<compile_context>
chip_gen: v5e
topology: v5e:2x2
jax: 0.10.0
libtpu: 0.0.40
codegen_flags: <defaults>
</compile_context>

<pallas_src>
import functools

import jax
import jax.numpy as jnp
from jax import lax
from jax.experimental import pallas as pl
from jax.experimental.pallas import tpu as pltpu

EPS = 1e-5
LANE = 128   # lane width
SUB = 16     # bf16 sublane tile


# ---------------------------------------------------------------------------
# Fused kernel: conv1+bn1+relu -> conv2(3x3)+bn2+relu -> conv3+bn3+residual+relu
# ---------------------------------------------------------------------------
def _fused_bottleneck_kernel(*refs, stride, H, W, Ho, Wo, has_downsample):
    if has_downsample:
        (x_ref, w1_ref, s1_ref, b1_ref, w2_ref, s2_ref, b2_ref,
         w3_ref, s3_ref, b3_ref, wd_ref, sd_ref, bd_ref,
         o_ref, pad_ref, acc_ref) = refs
    else:
        (x_ref, w1_ref, s1_ref, b1_ref, w2_ref, s2_ref, b2_ref,
         w3_ref, s3_ref, b3_ref,
         o_ref, pad_ref, acc_ref) = refs
        wd_ref = sd_ref = bd_ref = None

    wpad = x_ref.shape[1]          # padded width (multiple of 16)
    cin_p = x_ref.shape[-1]
    cmid_p = w1_ref.shape[-1]
    cout_p = o_ref.shape[-1]

    # ---- conv1 (1x1) + bn1 + relu, written into a zero-bordered VMEM image ----
    xi = x_ref[1:H + 1, :, :]                                    # (H, wpad, Cin_p) bf16
    y1 = jnp.dot(xi.reshape(H * wpad, cin_p), w1_ref[...],
                 preferred_element_type=jnp.float32)
    y1 = jnp.maximum(y1 * s1_ref[...] + b1_ref[...], 0.0)
    # mask the padded columns back to zero (conv2's zero padding must see zeros, not relu(bn shift))
    col = lax.broadcasted_iota(jnp.int32, (wpad, 1), 0)
    in_cols = jnp.logical_and(col >= 1, col <= W)                # (wpad, 1)
    y1 = jnp.where(in_cols, y1.reshape(H, wpad, cmid_p), 0.0)
    pad_ref[...] = jnp.zeros_like(pad_ref)                       # zero top/bottom halo rows
    pad_ref[1:H + 1, :, :] = y1.astype(pad_ref.dtype)

    # ---- conv2 (3x3, pad=1, stride) + bn2 + relu, f32 VMEM accumulator ----
    xfull = pad_ref[...] if stride != 1 else None
    for kh in range(3):
        for kw in range(3):
            if stride == 1:
                patch = pad_ref[kh:kh + Ho, kw:kw + Wo, :]
            else:
                # TODO(synk): strided tap extraction; stride != 1 path is untuned.
                patch = xfull[kh:kh + stride * Ho:stride, kw:kw + stride * Wo:stride, :]
            d = jnp.dot(patch.reshape(Ho * Wo, cmid_p), w2_ref[kh * 3 + kw],
                        preferred_element_type=jnp.float32)
            if kh == 0 and kw == 0:
                acc_ref[...] = d
            else:
                acc_ref[...] += d
    y2 = jnp.maximum(acc_ref[...] * s2_ref[...] + b2_ref[...], 0.0).astype(jnp.bfloat16)

    # ---- conv3 (1x1) + bn3 + residual / downsample + relu ----
    y3 = jnp.dot(y2, w3_ref[...], preferred_element_type=jnp.float32)
    y3 = y3 * s3_ref[...] + b3_ref[...]
    if stride == 1:
        xres = x_ref[1:H + 1, 1:W + 1, :]                        # (H, W, Cin_p)
    else:
        xres = x_ref[...][1:H + 1:stride, 1:W + 1:stride, :]
    if has_downsample:
        res = jnp.dot(xres.reshape(Ho * Wo, cin_p), wd_ref[...],
                      preferred_element_type=jnp.float32)
        res = res * sd_ref[...] + bd_ref[...]
    else:
        res = xres.reshape(Ho * Wo, cout_p).astype(jnp.float32)
    y3 = jnp.maximum(y3 + res, 0.0)
    o_ref[...] = y3.reshape(Ho, Wo, cout_p).astype(o_ref.dtype)


# ---------------------------------------------------------------------------
# Helpers
# ---------------------------------------------------------------------------
def _round_up(v, m):
    return (v + m - 1) // m * m


def fold_bn(gamma, beta, mean, var):
    scale = gamma / jnp.sqrt(var + EPS)
    shift = beta - mean * scale
    return scale.astype(jnp.float32), shift.astype(jnp.float32)


def _pad2d(a, rows, cols):
    return jnp.pad(a, ((0, rows - a.shape[0]), (0, cols - a.shape[1])))


def _pad_row(v, cols):
    return jnp.pad(v, (0, cols - v.shape[0])).reshape(1, cols).astype(jnp.float32)


# ---------------------------------------------------------------------------
# Wrapper (module.forward, non-deploy / eval-mode BN)
# ---------------------------------------------------------------------------
def bottleneck_forward_pallas(x_nchw, p, stride=1):
    # TODO(synk): training-mode BatchNorm (batch statistics) not implemented; running stats used.
    x = jnp.transpose(x_nchw, (0, 2, 3, 1)).astype(jnp.float32)  # NHWC
    N, H, W, Cin = x.shape
    planes = p["w1"].shape[0]
    out_c = 4 * planes
    has_ds = "wd" in p
    if not has_ds:
        assert stride == 1 and Cin == out_c, "identity residual requires stride==1 and inplanes==planes*4"

    Ho = (H + 2 - 3) // stride + 1
    Wo = (W + 2 - 3) // stride + 1

    cin_p = _round_up(Cin, LANE)
    cmid_p = _round_up(planes, LANE)
    cout_p = _round_up(out_c, LANE)
    wpad = _round_up(W + 2, SUB)

    # Input: spatial zero pad (1 top/bottom, 1 left, rest right to a sublane-tile multiple)
    # + channel pad to 128 lanes, cast to bf16 for the MXU.
    xp = jnp.pad(x, ((0, 0), (1, 1), (1, wpad - W - 1), (0, cin_p - Cin))).astype(jnp.bfloat16)

    w1 = _pad2d(p["w1"][:, :, 0, 0].T, cin_p, cmid_p).astype(jnp.bfloat16)
    s1, b1 = fold_bn(*p["bn1"])
    w2 = jnp.transpose(p["w2"], (2, 3, 1, 0)).reshape(9, planes, planes)
    w2 = jnp.pad(w2, ((0, 0), (0, cmid_p - planes), (0, cmid_p - planes))).astype(jnp.bfloat16)
    s2, b2 = fold_bn(*p["bn2"])
    w3 = _pad2d(p["w3"][:, :, 0, 0].T, cmid_p, cout_p).astype(jnp.bfloat16)
    s3, b3 = fold_bn(*p["bn3"])

    inputs = [xp, w1, _pad_row(s1, cmid_p), _pad_row(b1, cmid_p),
              w2, _pad_row(s2, cmid_p), _pad_row(b2, cmid_p),
              w3, _pad_row(s3, cout_p), _pad_row(b3, cout_p)]
    in_specs = [
        pl.BlockSpec((None, H + 2, wpad, cin_p), lambda n: (n, 0, 0, 0)),
        pl.BlockSpec((cin_p, cmid_p), lambda n: (0, 0)),
        pl.BlockSpec((1, cmid_p), lambda n: (0, 0)),
        pl.BlockSpec((1, cmid_p), lambda n: (0, 0)),
        pl.BlockSpec((9, cmid_p, cmid_p), lambda n: (0, 0, 0)),
        pl.BlockSpec((1, cmid_p), lambda n: (0, 0)),
        pl.BlockSpec((1, cmid_p), lambda n: (0, 0)),
        pl.BlockSpec((cmid_p, cout_p), lambda n: (0, 0)),
        pl.BlockSpec((1, cout_p), lambda n: (0, 0)),
        pl.BlockSpec((1, cout_p), lambda n: (0, 0)),
    ]
    if has_ds:
        wd = _pad2d(p["wd"][:, :, 0, 0].T, cin_p, cout_p).astype(jnp.bfloat16)
        sd, bd = fold_bn(*p["bnd"])
        inputs += [wd, _pad_row(sd, cout_p), _pad_row(bd, cout_p)]
        in_specs += [
            pl.BlockSpec((cin_p, cout_p), lambda n: (0, 0)),
            pl.BlockSpec((1, cout_p), lambda n: (0, 0)),
            pl.BlockSpec((1, cout_p), lambda n: (0, 0)),
        ]

    kernel = functools.partial(_fused_bottleneck_kernel, stride=stride, H=H, W=W,
                               Ho=Ho, Wo=Wo, has_downsample=has_ds)
    out = pl.pallas_call(
        kernel,
        out_shape=jax.ShapeDtypeStruct((N, Ho, Wo, cout_p), jnp.float32),
        grid=(N,),
        in_specs=in_specs,
        out_specs=pl.BlockSpec((None, Ho, Wo, cout_p), lambda n: (n, 0, 0, 0)),
        scratch_shapes=[
            pltpu.VMEM((H + 2, wpad, cmid_p), jnp.bfloat16),   # zero-bordered conv1 output image
            pltpu.VMEM((Ho * Wo, cmid_p), jnp.float32),        # conv2 f32 accumulator
        ],
        compiler_params=pltpu.CompilerParams(
            dimension_semantics=("parallel",),
            vmem_limit_bytes=48 * 1024 * 1024,
        ),
    )(*inputs)

    out = out[..., :out_c]
    return jnp.transpose(out, (0, 3, 1, 2))                      # back to NCHW


# ---------------------------------------------------------------------------
# Deterministic parameters
# ---------------------------------------------------------------------------
def make_params(key, inplanes, planes, stride):
    out_c = planes * 4
    ks = jax.random.split(key, 16)
    p = {
        "w1": jax.random.normal(ks[0], (planes, inplanes, 1, 1), jnp.float32) * 0.2,
        "bn1": (jax.random.uniform(ks[1], (planes,), minval=0.5, maxval=1.5),
                jax.random.normal(ks[2], (planes,)) * 0.1,
                jax.random.normal(ks[3], (planes,)) * 0.1,
                jax.random.uniform(ks[4], (planes,), minval=0.5, maxval=1.5)),
        "w2": jax.random.normal(ks[5], (planes, planes, 3, 3), jnp.float32) * 0.2,
        "bn2": (jax.random.uniform(ks[6], (planes,), minval=0.5, maxval=1.5),
                jax.random.normal(ks[7], (planes,)) * 0.1,
                jax.random.normal(ks[8], (planes,)) * 0.1,
                jax.random.uniform(ks[9], (planes,), minval=0.5, maxval=1.5)),
        "w3": jax.random.normal(ks[10], (out_c, planes, 1, 1), jnp.float32) * 0.2,
        "bn3": (jax.random.uniform(ks[11], (out_c,), minval=0.5, maxval=1.5),
                jax.random.normal(ks[12], (out_c,)) * 0.1,
                jax.random.normal(ks[13], (out_c,)) * 0.1,
                jax.random.uniform(ks[14], (out_c,), minval=0.5, maxval=1.5)),
    }
    if stride != 1 or inplanes != out_c:
        kd = jax.random.split(ks[15], 5)
        p["wd"] = jax.random.normal(kd[0], (out_c, inplanes, 1, 1), jnp.float32) * 0.2
        p["bnd"] = (jax.random.uniform(kd[1], (out_c,), minval=0.5, maxval=1.5),
                    jax.random.normal(kd[2], (out_c,)) * 0.1,
                    jax.random.normal(kd[3], (out_c,)) * 0.1,
                    jax.random.uniform(kd[4], (out_c,), minval=0.5, maxval=1.5))
    return p


# ---------------------------------------------------------------------------
# Pure-JAX reference with the same bf16 quantization points as the kernel
# ---------------------------------------------------------------------------
def bottleneck_forward_ref(x_nchw, p, stride=1):
    q = lambda t: t.astype(jnp.bfloat16).astype(jnp.float32)
    x = q(jnp.transpose(x_nchw, (0, 2, 3, 1)).astype(jnp.float32))

    def conv(x, w_oihw, s, pad):
        return lax.conv_general_dilated(
            x, q(jnp.transpose(w_oihw, (2, 3, 1, 0))), (s, s), [(pad, pad), (pad, pad)],
            dimension_numbers=("NHWC", "HWIO", "NHWC"), precision=lax.Precision.HIGHEST)

    def bn(x, params):
        g, b, m, v = params
        return g * (x - m) / jnp.sqrt(v + EPS) + b

    out = q(jax.nn.relu(bn(conv(x, p["w1"], 1, 0), p["bn1"])))
    out = q(jax.nn.relu(bn(conv(out, p["w2"], stride, 1), p["bn2"])))
    out = bn(conv(out, p["w3"], 1, 0), p["bn3"])
    residual = bn(conv(x, p["wd"], stride, 0), p["bnd"]) if "wd" in p else x
    out = jax.nn.relu(out + residual)
    return jnp.transpose(out, (0, 3, 1, 2))


if __name__ == "__main__":
    key = jax.random.PRNGKey(0)
    k_x, k_p, k_x2, k_p2 = jax.random.split(key, 4)

    # Config 1: downsample branch (inplanes != planes*4), stride=1.
    N, inplanes, planes, H, W, stride = 2, 4, 4, 16, 16, 1
    x = jax.random.normal(k_x, (N, inplanes, H, W), jnp.float32)
    params = make_params(k_p, inplanes, planes, stride)
    out = jax.block_until_ready(bottleneck_forward_pallas(x, params, stride))
    ref = jax.block_until_ready(bottleneck_forward_ref(x, params, stride))
    assert out.shape == (N, planes * 4, H, W), out.shape
    err1 = float(jnp.max(jnp.abs(out - ref)))
    assert jnp.allclose(out, ref, atol=2e-2, rtol=2e-2), err1

    # Config 2: identity-residual branch (inplanes == planes*4), stride=1.
    inplanes2 = 16
    x2 = jax.random.normal(k_x2, (N, inplanes2, H, W), jnp.float32)
    params2 = make_params(k_p2, inplanes2, planes, 1)
    out2 = jax.block_until_ready(bottleneck_forward_pallas(x2, params2, 1))
    ref2 = jax.block_until_ready(bottleneck_forward_ref(x2, params2, 1))
    assert out2.shape == (N, planes * 4, H, W), out2.shape
    err2 = float(jnp.max(jnp.abs(out2 - ref2)))
    assert jnp.allclose(out2, ref2, atol=2e-2, rtol=2e-2), err2

    print("KERNEL_OK")
</pallas_src>

<mosaic_0001>
module attributes {stable_mosaic.version = 11 : i64} {
  func.func @_fused_bottleneck_kernel(%arg0: i32, %arg1: memref<1x18x32x128xbf16, #tpu.memory_space<vmem>>, %arg2: memref<128x128xbf16, #tpu.memory_space<vmem>>, %arg3: memref<1x128xf32, #tpu.memory_space<vmem>>, %arg4: memref<1x128xf32, #tpu.memory_space<vmem>>, %arg5: memref<9x128x128xbf16, #tpu.memory_space<vmem>>, %arg6: memref<1x128xf32, #tpu.memory_space<vmem>>, %arg7: memref<1x128xf32, #tpu.memory_space<vmem>>, %arg8: memref<128x128xbf16, #tpu.memory_space<vmem>>, %arg9: memref<1x128xf32, #tpu.memory_space<vmem>>, %arg10: memref<1x128xf32, #tpu.memory_space<vmem>>, %arg11: memref<128x128xbf16, #tpu.memory_space<vmem>>, %arg12: memref<1x128xf32, #tpu.memory_space<vmem>>, %arg13: memref<1x128xf32, #tpu.memory_space<vmem>>, %arg14: memref<1x16x16x128xf32, #tpu.memory_space<vmem>>, %arg15: memref<18x32x128xbf16, #tpu.memory_space<vmem>>, %arg16: memref<256x128xf32, #tpu.memory_space<vmem>>) attributes {dimension_semantics = [#tpu.dimension_semantics<parallel>], iteration_bounds = array<i64: 2>, scalar_prefetch = 0 : i64, scratch_operands = 2 : i64, tpu.core_type = #tpu.core_type<tc>, window_params = [{transform_indices = @transform_0, window_bounds = array<i64: 1, 18, 32, 128>}, {pipeline_mode = #tpu.pipeline_mode<synchronous>, transform_indices = @transform_1, window_bounds = array<i64: 128, 128>}, {pipeline_mode = #tpu.pipeline_mode<synchronous>, transform_indices = @transform_2, window_bounds = array<i64: 1, 128>}, {pipeline_mode = #tpu.pipeline_mode<synchronous>, transform_indices = @transform_3, window_bounds = array<i64: 1, 128>}, {pipeline_mode = #tpu.pipeline_mode<synchronous>, transform_indices = @transform_4, window_bounds = array<i64: 9, 128, 128>}, {pipeline_mode = #tpu.pipeline_mode<synchronous>, transform_indices = @transform_5, window_bounds = array<i64: 1, 128>}, {pipeline_mode = #tpu.pipeline_mode<synchronous>, transform_indices = @transform_6, window_bounds = array<i64: 1, 128>}, {pipeline_mode = #tpu.pipeline_mode<synchronous>, transform_indices = @transform_7, window_bounds = array<i64: 128, 128>}, {pipeline_mode = #tpu.pipeline_mode<synchronous>, transform_indices = @transform_8, window_bounds = array<i64: 1, 128>}, {pipeline_mode = #tpu.pipeline_mode<synchronous>, transform_indices = @transform_9, window_bounds = array<i64: 1, 128>}, {pipeline_mode = #tpu.pipeline_mode<synchronous>, transform_indices = @transform_10, window_bounds = array<i64: 128, 128>}, {pipeline_mode = #tpu.pipeline_mode<synchronous>, transform_indices = @transform_11, window_bounds = array<i64: 1, 128>}, {pipeline_mode = #tpu.pipeline_mode<synchronous>, transform_indices = @transform_12, window_bounds = array<i64: 1, 128>}, {transform_indices = @transform_13, window_bounds = array<i64: 1, 16, 16, 128>}]} {
    %c0 = arith.constant 0 : index
    %c1 = arith.constant 1 : index
    %c0_0 = arith.constant 0 : index
    %c0_1 = arith.constant 0 : index
    %0 = vector.load %arg1[%c0, %c1, %c0_0, %c0_1] : memref<1x18x32x128xbf16, #tpu.memory_space<vmem>>, vector<1x16x32x128xbf16>
    %1 = vector.shape_cast %0 : vector<1x16x32x128xbf16> to vector<16x32x128xbf16>
    %2 = vector.shape_cast %1 : vector<16x32x128xbf16> to vector<512x128xbf16>
    %c0_2 = arith.constant 0 : index
    %c0_3 = arith.constant 0 : index
    %3 = vector.load %arg2[%c0_2, %c0_3] : memref<128x128xbf16, #tpu.memory_space<vmem>>, vector<128x128xbf16>
    %cst = arith.constant dense<0.000000e+00> : vector<512x128xf32>
    %4 = tpu.matmul %2, %3, %cst {dimension_numbers = #tpu.dot_dimension_numbers<[1], [0], [0], [1], [0, 0, 1, 1], [], []>} : vector<512x128xbf16>, vector<128x128xbf16>, vector<512x128xf32> -> vector<512x128xf32>
    %c0_4 = arith.constant 0 : index
    %c0_5 = arith.constant 0 : index
    %5 = vector.load %arg3[%c0_4, %c0_5] : memref<1x128xf32, #tpu.memory_space<vmem>>, vector<1x128xf32>
    %6 = vector.broadcast %5 : vector<1x128xf32> to vector<512x128xf32>
    %7 = arith.mulf %4, %6 : vector<512x128xf32>
    %c0_6 = arith.constant 0 : index
    %c0_7 = arith.constant 0 : index
    %8 = vector.load %arg4[%c0_6, %c0_7] : memref<1x128xf32, #tpu.memory_space<vmem>>, vector<1x128xf32>
    %9 = vector.broadcast %8 : vector<1x128xf32> to vector<512x128xf32>
    %10 = arith.addf %7, %9 : vector<512x128xf32>
    %cst_8 = arith.constant 0.000000e+00 : f32
    %11 = vector.broadcast %cst_8 : f32 to vector<512x128xf32>
    %12 = arith.maximumf %10, %11 : vector<512x128xf32>
    %13 = tpu.iota {dimensions = array<i32: 0>} : vector<32x1xi32>
    %c1_i32 = arith.constant 1 : i32
    %14 = vector.broadcast %c1_i32 : i32 to vector<32x1xi32>
    %15 = arith.cmpi sge, %13, %14 : vector<32x1xi32>
    %c16_i32 = arith.constant 16 : i32
    %16 = vector.broadcast %c16_i32 : i32 to vector<32x1xi32>
    %17 = arith.cmpi sle, %13, %16 : vector<32x1xi32>
    %18 = arith.andi %15, %17 : vector<32x1xi1>
    %19 = vector.shape_cast %12 : vector<512x128xf32> to vector<16x32x128xf32>
    %cst_9 = arith.constant 0.000000e+00 : f32
    %20 = vector.shape_cast %18 : vector<32x1xi1> to vector<1x32x1xi1>
    %21 = vector.broadcast %20 : vector<1x32x1xi1> to vector<16x32x128xi1>
    %22 = vector.broadcast %cst_9 : f32 to vector<16x32x128xf32>
    %23 = arith.select %21, %19, %22 : vector<16x32x128xi1>, vector<16x32x128xf32>
    %cst_10 = arith.constant 0.000000e+00 : bf16
    %24 = vector.broadcast %cst_10 : bf16 to vector<18x32x128xbf16>
    %c0_11 = arith.constant 0 : index
    %c0_12 = arith.constant 0 : index
    %c0_13 = arith.constant 0 : index
    %25 = vector.load %arg15[%c0_11, %c0_12, %c0_13] : memref<18x32x128xbf16, #tpu.memory_space<vmem>>, vector<18x32x128xbf16>
    tpu.vector_store %arg15[%c0_11, %c0_12, %c0_13], %24 {strides = array<i32>} : memref<18x32x128xbf16, #tpu.memory_space<vmem>>, vector<18x32x128xbf16>,
    %26 = arith.truncf %23 : vector<16x32x128xf32> to vector<16x32x128xbf16>
    %c1_14 = arith.constant 1 : index
    %c0_15 = arith.constant 0 : index
    %c0_16 = arith.constant 0 : index
    %27 = vector.load %arg15[%c1_14, %c0_15, %c0_16] : memref<18x32x128xbf16, #tpu.memory_space<vmem>>, vector<16x32x128xbf16>
    tpu.vector_store %arg15[%c1_14, %c0_15, %c0_16], %26 {strides = array<i32>} : memref<18x32x128xbf16, #tpu.memory_space<vmem>>, vector<16x32x128xbf16>,
    %c0_17 = arith.constant 0 : index
    %c0_18 = arith.constant 0 : index
    %c0_19 = arith.constant 0 : index
    %28 = vector.load %arg15[%c0_17, %c0_18, %c0_19] : memref<18x32x128xbf16, #tpu.memory_space<vmem>>, vector<16x16x128xbf16>
    %29 = vector.shape_cast %28 : vector<16x16x128xbf16> to vector<256x128xbf16>
    %c0_20 = arith.constant 0 : index
    %c0_21 = arith.constant 0 : index
    %c0_22 = arith.constant 0 : index
    %30 = vector.load %arg5[%c0_20, %c0_21, %c0_22] : memref<9x128x128xbf16, #tpu.memory_space<vmem>>, vector<1x128x128xbf16>
    %31 = vector.shape_cast %30 : vector<1x128x128xbf16> to vector<128x128xbf16>
    %cst_23 = arith.constant dense<0.000000e+00> : vector<256x128xf32>
    %32 = tpu.matmul %29, %31, %cst_23 {dimension_numbers = #tpu.dot_dimension_numbers<[1], [0], [0], [1], [0, 0, 1, 1], [], []>} : vector<256x128xbf16>, vector<128x128xbf16>, vector<256x128xf32> -> vector<256x128xf32>
    %c0_24 = arith.constant 0 : index
    %c0_25 = arith.constant 0 : index
    %33 = vector.load %arg16[%c0_24, %c0_25] : memref<256x128xf32, #tpu.memory_space<vmem>>, vector<256x128xf32>
    tpu.vector_store %arg16[%c0_24, %c0_25], %32 {strides = array<i32>} : memref<256x128xf32, #tpu.memory_space<vmem>>, vector<256x128xf32>,
    %c0_26 = arith.constant 0 : index
    %c1_27 = arith.constant 1 : index
    %c0_28 = arith.constant 0 : index
    %34 = vector.load %arg15[%c0_26, %c1_27, %c0_28] : memref<18x32x128xbf16, #tpu.memory_space<vmem>>, vector<16x16x128xbf16>
    %35 = vector.shape_cast %34 : vector<16x16x128xbf16> to vector<256x128xbf16>
    %c1_29 = arith.constant 1 : index
    %c0_30 = arith.constant 0 : index
    %c0_31 = arith.constant 0 : index
    %36 = vector.load %arg5[%c1_29, %c0_30, %c0_31] : memref<9x128x128xbf16, #tpu.memory_space<vmem>>, vector<1x128x128xbf16>
    %37 = vector.shape_cast %36 : vector<1x128x128xbf16> to vector<128x128xbf16>
    %cst_32 = arith.constant dense<0.000000e+00> : vector<256x128xf32>
    %38 = tpu.matmul %35, %37, %cst_32 {dimension_numbers = #tpu.dot_dimension_numbers<[1], [0], [0], [1], [0, 0, 1, 1], [], []>} : vector<256x128xbf16>, vector<128x128xbf16>, vector<256x128xf32> -> vector<256x128xf32>
    %c0_33 = arith.constant 0 : index
    %c0_34 = arith.constant 0 : index
    %39 = vector.load %arg16[%c0_33, %c0_34] : memref<256x128xf32, #tpu.memory_space<vmem>>, vector<256x128xf32>
    %40 = arith.addf %39, %38 : vector<256x128xf32>
    %c0_35 = arith.constant 0 : index
    %c0_36 = arith.constant 0 : index
    %41 = vector.load %arg16[%c0_35, %c0_36] : memref<256x128xf32, #tpu.memory_space<vmem>>, vector<256x128xf32>
    tpu.vector_store %arg16[%c0_35, %c0_36], %40 {strides = array<i32>} : memref<256x128xf32, #tpu.memory_space<vmem>>, vector<256x128xf32>,
    %c0_37 = arith.constant 0 : index
    %c2 = arith.constant 2 : index
    %c0_38 = arith.constant 0 : index
    %42 = vector.load %arg15[%c0_37, %c2, %c0_38] : memref<18x32x128xbf16, #tpu.memory_space<vmem>>, vector<16x16x128xbf16>
    %43 = vector.shape_cast %42 : vector<16x16x128xbf16> to vector<256x128xbf16>
    %c2_39 = arith.constant 2 : index
    %c0_40 = arith.constant 0 : index
    %c0_41 = arith.constant 0 : index
    %44 = vector.load %arg5[%c2_39, %c0_40, %c0_41] : memref<9x128x128xbf16, #tpu.memory_space<vmem>>, vector<1x128x128xbf16>
    %45 = vector.shape_cast %44 : vector<1x128x128xbf16> to vector<128x128xbf16>
    %cst_42 = arith.constant dense<0.000000e+00> : vector<256x128xf32>
    %46 = tpu.matmul %43, %45, %cst_42 {dimension_numbers = #tpu.dot_dimension_numbers<[1], [0], [0], [1], [0, 0, 1, 1], [], []>} : vector<256x128xbf16>, vector<128x128xbf16>, vector<256x128xf32> -> vector<256x128xf32>
    %c0_43 = arith.constant 0 : index
    %c0_44 = arith.constant 0 : index
    %47 = vector.load %arg16[%c0_43, %c0_44] : memref<256x128xf32, #tpu.memory_space<vmem>>, vector<256x128xf32>
    %48 = arith.addf %47, %46 : vector<256x128xf32>
    %c0_45 = arith.constant 0 : index
    %c0_46 = arith.constant 0 : index
    %49 = vector.load %arg16[%c0_45, %c0_46] : memref<256x128xf32, #tpu.memory_space<vmem>>, vector<256x128xf32>
    tpu.vector_store %arg16[%c0_45, %c0_46], %48 {strides = array<i32>} : memref<256x128xf32, #tpu.memory_space<vmem>>, vector<256x128xf32>,
    %c1_47 = arith.constant 1 : index
    %c0_48 = arith.constant 0 : index
    %c0_49 = arith.constant 0 : index
    %50 = vector.load %arg15[%c1_47, %c0_48, %c0_49] : memref<18x32x128xbf16, #tpu.memory_space<vmem>>, vector<16x16x128xbf16>
    %51 = vector.shape_cast %50 : vector<16x16x128xbf16> to vector<256x128xbf16>
    %c3 = arith.constant 3 : index
    %c0_50 = arith.constant 0 : index
    %c0_51 = arith.constant 0 : index
    %52 = vector.load %arg5[%c3, %c0_50, %c0_51] : memref<9x128x128xbf16, #tpu.memory_space<vmem>>, vector<1x128x128xbf16>
    %53 = vector.shape_cast %52 : vector<1x128x128xbf16> to vector<128x128xbf16>
    %cst_52 = arith.constant dense<0.000000e+00> : vector<256x128xf32>
    %54 = tpu.matmul %51, %53, %cst_52 {dimension_numbers = #tpu.dot_dimension_numbers<[1], [0], [0], [1], [0, 0, 1, 1], [], []>} : vector<256x128xbf16>, vector<128x128xbf16>, vector<256x128xf32> -> vector<256x128xf32>
    %c0_53 = arith.constant 0 : index
    %c0_54 = arith.constant 0 : index
    %55 = vector.load %arg16[%c0_53, %c0_54] : memref<256x128xf32, #tpu.memory_space<vmem>>, vector<256x128xf32>
    %56 = arith.addf %55, %54 : vector<256x128xf32>
    %c0_55 = arith.constant 0 : index
    %c0_56 = arith.constant 0 : index
    %57 = vector.load %arg16[%c0_55, %c0_56] : memref<256x128xf32, #tpu.memory_space<vmem>>, vector<256x128xf32>
    tpu.vector_store %arg16[%c0_55, %c0_56], %56 {strides = array<i32>} : memref<256x128xf32, #tpu.memory_space<vmem>>, vector<256x128xf32>,
    %c1_57 = arith.constant 1 : index
    %c1_58 = arith.constant 1 : index
    %c0_59 = arith.constant 0 : index
    %58 = vector.load %arg15[%c1_57, %c1_58, %c0_59] : memref<18x32x128xbf16, #tpu.memory_space<vmem>>, vector<16x16x128xbf16>
    %59 = vector.shape_cast %58 : vector<16x16x128xbf16> to vector<256x128xbf16>
    %c4 = arith.constant 4 : index
    %c0_60 = arith.constant 0 : index
    %c0_61 = arith.constant 0 : index
    %60 = vector.load %arg5[%c4, %c0_60, %c0_61] : memref<9x128x128xbf16, #tpu.memory_space<vmem>>, vector<1x128x128xbf16>
    %61 = vector.shape_cast %60 : vector<1x128x128xbf16> to vector<128x128xbf16>
    %cst_62 = arith.constant dense<0.000000e+00> : vector<256x128xf32>
    %62 = tpu.matmul %59, %61, %cst_62 {dimension_numbers = #tpu.dot_dimension_numbers<[1], [0], [0], [1], [0, 0, 1, 1], [], []>} : vector<256x128xbf16>, vector<128x128xbf16>, vector<256x128xf32> -> vector<256x128xf32>
    %c0_63 = arith.constant 0 : index
    %c0_64 = arith.constant 0 : index
    %63 = vector.load %arg16[%c0_63, %c0_64] : memref<256x128xf32, #tpu.memory_space<vmem>>, vector<256x128xf32>
    %64 = arith.addf %63, %62 : vector<256x128xf32>
    %c0_65 = arith.constant 0 : index
    %c0_66 = arith.constant 0 : index
    %65 = vector.load %arg16[%c0_65, %c0_66] : memref<256x128xf32, #tpu.memory_space<vmem>>, vector<256x128xf32>
    tpu.vector_store %arg16[%c0_65, %c0_66], %64 {strides = array<i32>} : memref<256x128xf32, #tpu.memory_space<vmem>>, vector<256x128xf32>,
    %c1_67 = arith.constant 1 : index
    %c2_68 = arith.constant 2 : index
    %c0_69 = arith.constant 0 : index
    %66 = vector.load %arg15[%c1_67, %c2_68, %c0_69] : memref<18x32x128xbf16, #tpu.memory_space<vmem>>, vector<16x16x128xbf16>
    %67 = vector.shape_cast %66 : vector<16x16x128xbf16> to vector<256x128xbf16>
    %c5 = arith.constant 5 : index
    %c0_70 = arith.constant 0 : index
    %c0_71 = arith.constant 0 : index
    %68 = vector.load %arg5[%c5, %c0_70, %c0_71] : memref<9x128x128xbf16, #tpu.memory_space<vmem>>, vector<1x128x128xbf16>
    %69 = vector.shape_cast %68 : vector<1x128x128xbf16> to vector<128x128xbf16>
    %cst_72 = arith.constant dense<0.000000e+00> : vector<256x128xf32>
    %70 = tpu.matmul %67, %69, %cst_72 {dimension_numbers = #tpu.dot_dimension_numbers<[1], [0], [0], [1], [0, 0, 1, 1], [], []>} : vector<256x128xbf16>, vector<128x128xbf16>, vector<256x128xf32> -> vector<256x128xf32>
    %c0_73 = arith.constant 0 : index
    %c0_74 = arith.constant 0 : index
    %71 = vector.load %arg16[%c0_73, %c0_74] : memref<256x128xf32, #tpu.memory_space<vmem>>, vector<256x128xf32>
    %72 = arith.addf %71, %70 : vector<256x128xf32>
    %c0_75 = arith.constant 0 : index
    %c0_76 = arith.constant 0 : index
    %73 = vector.load %arg16[%c0_75, %c0_76] : memref<256x128xf32, #tpu.memory_space<vmem>>, vector<256x128xf32>
    tpu.vector_store %arg16[%c0_75, %c0_76], %72 {strides = array<i32>} : memref<256x128xf32, #tpu.memory_space<vmem>>, vector<256x128xf32>,
    %c2_77 = arith.constant 2 : index
    %c0_78 = arith.constant 0 : index
    %c0_79 = arith.constant 0 : index
    %74 = vector.load %arg15[%c2_77, %c0_78, %c0_79] : memref<18x32x128xbf16, #tpu.memory_space<vmem>>, vector<16x16x128xbf16>
    %75 = vector.shape_cast %74 : vector<16x16x128xbf16> to vector<256x128xbf16>
    %c6 = arith.constant 6 : index
    %c0_80 = arith.constant 0 : index
    %c0_81 = arith.constant 0 : index
    %76 = vector.load %arg5[%c6, %c0_80, %c0_81] : memref<9x128x128xbf16, #tpu.memory_space<vmem>>, vector<1x128x128xbf16>
    %77 = vector.shape_cast %76 : vector<1x128x128xbf16> to vector<128x128xbf16>
    %cst_82 = arith.constant dense<0.000000e+00> : vector<256x128xf32>
    %78 = tpu.matmul %75, %77, %cst_82 {dimension_numbers = #tpu.dot_dimension_numbers<[1], [0], [0], [1], [0, 0, 1, 1], [], []>} : vector<256x128xbf16>, vector<128x128xbf16>, vector<256x128xf32> -> vector<256x128xf32>
    %c0_83 = arith.constant 0 : index
    %c0_84 = arith.constant 0 : index
    %79 = vector.load %arg16[%c0_83, %c0_84] : memref<256x128xf32, #tpu.memory_space<vmem>>, vector<256x128xf32>
    %80 = arith.addf %79, %78 : vector<256x128xf32>
    %c0_85 = arith.constant 0 : index
    %c0_86 = arith.constant 0 : index
    %81 = vector.load %arg16[%c0_85, %c0_86] : memref<256x128xf32, #tpu.memory_space<vmem>>, vector<256x128xf32>
    tpu.vector_store %arg16[%c0_85, %c0_86], %80 {strides = array<i32>} : memref<256x128xf32, #tpu.memory_space<vmem>>, vector<256x128xf32>,
    %c2_87 = arith.constant 2 : index
    %c1_88 = arith.constant 1 : index
    %c0_89 = arith.constant 0 : index
    %82 = vector.load %arg15[%c2_87, %c1_88, %c0_89] : memref<18x32x128xbf16, #tpu.memory_space<vmem>>, vector<16x16x128xbf16>
    %83 = vector.shape_cast %82 : vector<16x16x128xbf16> to vector<256x128xbf16>
    %c7 = arith.constant 7 : index
    %c0_90 = arith.constant 0 : index
    %c0_91 = arith.constant 0 : index
    %84 = vector.load %arg5[%c7, %c0_90, %c0_91] : memref<9x128x128xbf16, #tpu.memory_space<vmem>>, vector<1x128x128xbf16>
    %85 = vector.shape_cast %84 : vector<1x128x128xbf16> to vector<128x128xbf16>
    %cst_92 = arith.constant dense<0.000000e+00> : vector<256x128xf32>
    %86 = tpu.matmul %83, %85, %cst_92 {dimension_numbers = #tpu.dot_dimension_numbers<[1], [0], [0], [1], [0, 0, 1, 1], [], []>} : vector<256x128xbf16>, vector<128x128xbf16>, vector<256x128xf32> -> vector<256x128xf32>
    %c0_93 = arith.constant 0 : index
    %c0_94 = arith.constant 0 : index
    %87 = vector.load %arg16[%c0_93, %c0_94] : memref<256x128xf32, #tpu.memory_space<vmem>>, vector<256x128xf32>
    %88 = arith.addf %87, %86 : vector<256x128xf32>
    %c0_95 = arith.constant 0 : index
    %c0_96 = arith.constant 0 : index
    %89 = vector.load %arg16[%c0_95, %c0_96] : memref<256x128xf32, #tpu.memory_space<vmem>>, vector<256x128xf32>
    tpu.vector_store %arg16[%c0_95, %c0_96], %88 {strides = array<i32>} : memref<256x128xf32, #tpu.memory_space<vmem>>, vector<256x128xf32>,
    %c2_97 = arith.constant 2 : index
    %c2_98 = arith.constant 2 : index
    %c0_99 = arith.constant 0 : index
    %90 = vector.load %arg15[%c2_97, %c2_98, %c0_99] : memref<18x32x128xbf16, #tpu.memory_space<vmem>>, vector<16x16x128xbf16>
    %91 = vector.shape_cast %90 : vector<16x16x128xbf16> to vector<256x128xbf16>
    %c8 = arith.constant 8 : index
    %c0_100 = arith.constant 0 : index
    %c0_101 = arith.constant 0 : index
    %92 = vector.load %arg5[%c8, %c0_100, %c0_101] : memref<9x128x128xbf16, #tpu.memory_space<vmem>>, vector<1x128x128xbf16>
    %93 = vector.shape_cast %92 : vector<1x128x128xbf16> to vector<128x128xbf16>
    %cst_102 = arith.constant dense<0.000000e+00> : vector<256x128xf32>
    %94 = tpu.matmul %91, %93, %cst_102 {dimension_numbers = #tpu.dot_dimension_numbers<[1], [0], [0], [1], [0, 0, 1, 1], [], []>} : vector<256x128xbf16>, vector<128x128xbf16>, vector<256x128xf32> -> vector<256x128xf32>
    %c0_103 = arith.constant 0 : index
    %c0_104 = arith.constant 0 : index
    %95 = vector.load %arg16[%c0_103, %c0_104] : memref<256x128xf32, #tpu.memory_space<vmem>>, vector<256x128xf32>
    %96 = arith.addf %95, %94 : vector<256x128xf32>
    %c0_105 = arith.constant 0 : index
    %c0_106 = arith.constant 0 : index
    %97 = vector.load %arg16[%c0_105, %c0_106] : memref<256x128xf32, #tpu.memory_space<vmem>>, vector<256x128xf32>
    tpu.vector_store %arg16[%c0_105, %c0_106], %96 {strides = array<i32>} : memref<256x128xf32, #tpu.memory_space<vmem>>, vector<256x128xf32>,
    %c0_107 = arith.constant 0 : index
    %c0_108 = arith.constant 0 : index
    %98 = vector.load %arg16[%c0_107, %c0_108] : memref<256x128xf32, #tpu.memory_space<vmem>>, vector<256x128xf32>
    %c0_109 = arith.constant 0 : index
    %c0_110 = arith.constant 0 : index
    %99 = vector.load %arg6[%c0_109, %c0_110] : memref<1x128xf32, #tpu.memory_space<vmem>>, vector<1x128xf32>
    %100 = vector.broadcast %99 : vector<1x128xf32> to vector<256x128xf32>
    %101 = arith.mulf %98, %100 : vector<256x128xf32>
    %c0_111 = arith.constant 0 : index
    %c0_112 = arith.constant 0 : index
    %102 = vector.load %arg7[%c0_111, %c0_112] : memref<1x128xf32, #tpu.memory_space<vmem>>, vector<1x128xf32>
    %103 = vector.broadcast %102 : vector<1x128xf32> to vector<256x128xf32>
    %104 = arith.addf %101, %103 : vector<256x128xf32>
    %cst_113 = arith.constant 0.000000e+00 : f32
    %105 = vector.broadcast %cst_113 : f32 to vector<256x128xf32>
    %106 = arith.maximumf %104, %105 : vector<256x128xf32>
    %107 = arith.truncf %106 : vector<256x128xf32> to vector<256x128xbf16>
    %c0_114 = arith.constant 0 : index
    %c0_115 = arith.constant 0 : index
    %108 = vector.load %arg8[%c0_114, %c0_115] : memref<128x128xbf16, #tpu.memory_space<vmem>>, vector<128x128xbf16>
    %cst_116 = arith.constant dense<0.000000e+00> : vector<256x128xf32>
    %109 = tpu.matmul %107, %108, %cst_116 {dimension_numbers = #tpu.dot_dimension_numbers<[1], [0], [0], [1], [0, 0, 1, 1], [], []>} : vector<256x128xbf16>, vector<128x128xbf16>, vector<256x128xf32> -> vector<256x128xf32>
    %c0_117 = arith.constant 0 : index
    %c0_118 = arith.constant 0 : index
    %110 = vector.load %arg9[%c0_117, %c0_118] : memref<1x128xf32, #tpu.memory_space<vmem>>, vector<1x128xf32>
    %111 = vector.broadcast %110 : vector<1x128xf32> to vector<256x128xf32>
    %112 = arith.mulf %109, %111 : vector<256x128xf32>
    %c0_119 = arith.constant 0 : index
    %c0_120 = arith.constant 0 : index
    %113 = vector.load %arg10[%c0_119, %c0_120] : memref<1x128xf32, #tpu.memory_space<vmem>>, vector<1x128xf32>
    %114 = vector.broadcast %113 : vector<1x128xf32> to vector<256x128xf32>
    %115 = arith.addf %112, %114 : vector<256x128xf32>
    %c0_121 = arith.constant 0 : index
    %c1_122 = arith.constant 1 : index
    %c1_123 = arith.constant 1 : index
    %c0_124 = arith.constant 0 : index
    %116 = vector.load %arg1[%c0_121, %c1_122, %c1_123, %c0_124] : memref<1x18x32x128xbf16, #tpu.memory_space<vmem>>, vector<1x16x16x128xbf16>
    %117 = vector.shape_cast %116 : vector<1x16x16x128xbf16> to vector<16x16x128xbf16>
    %118 = vector.shape_cast %117 : vector<16x16x128xbf16> to vector<256x128xbf16>
    %c0_125 = arith.constant 0 : index
    %c0_126 = arith.constant 0 : index
    %119 = vector.load %arg11[%c0_125, %c0_126] : memref<128x128xbf16, #tpu.memory_space<vmem>>, vector<128x128xbf16>
    %cst_127 = arith.constant dense<0.000000e+00> : vector<256x128xf32>
    %120 = tpu.matmul %118, %119, %cst_127 {dimension_numbers = #tpu.dot_dimension_numbers<[1], [0], [0], [1], [0, 0, 1, 1], [], []>} : vector<256x128xbf16>, vector<128x128xbf16>, vector<256x128xf32> -> vector<256x128xf32>
    %c0_128 = arith.constant 0 : index
    %c0_129 = arith.constant 0 : index
    %121 = vector.load %arg12[%c0_128, %c0_129] : memref<1x128xf32, #tpu.memory_space<vmem>>, vector<1x128xf32>
    %122 = vector.broadcast %121 : vector<1x128xf32> to vector<256x128xf32>
    %123 = arith.mulf %120, %122 : vector<256x128xf32>
    %c0_130 = arith.constant 0 : index
    %c0_131 = arith.constant 0 : index
    %124 = vector.load %arg13[%c0_130, %c0_131] : memref<1x128xf32, #tpu.memory_space<vmem>>, vector<1x128xf32>
    %125 = vector.broadcast %124 : vector<1x128xf32> to vector<256x128xf32>
    %126 = arith.addf %123, %125 : vector<256x128xf32>
    %127 = arith.addf %115, %126 : vector<256x128xf32>
    %cst_132 = arith.constant 0.000000e+00 : f32
    %128 = vector.broadcast %cst_132 : f32 to vector<256x128xf32>
    %129 = arith.maximumf %127, %128 : vector<256x128xf32>
    %130 = vector.shape_cast %129 : vector<256x128xf32> to vector<16x16x128xf32>
    %c0_133 = arith.constant 0 : index
    %c0_134 = arith.constant 0 : index
    %c0_135 = arith.constant 0 : index
    %c0_136 = arith.constant 0 : index
    %131 = vector.load %arg14[%c0_133, %c0_134, %c0_135, %c0_136] : memref<1x16x16x128xf32, #tpu.memory_space<vmem>>, vector<1x16x16x128xf32>
    %132 = vector.shape_cast %131 : vector<1x16x16x128xf32> to vector<16x16x128xf32>
    %133 = vector.shape_cast %130 : vector<16x16x128xf32> to vector<1x16x16x128xf32>
    tpu.vector_store %arg14[%c0_133, %c0_134, %c0_135, %c0_136], %133 {strides = array<i32>} : memref<1x16x16x128xf32, #tpu.memory_space<vmem>>, vector<1x16x16x128xf32>,
    return
  }
  func.func @transform_0(%arg0: i32) -> (i32, i32, i32, i32) {
    %c0_i32 = arith.constant 0 : i32
    %c0_i32_0 = arith.constant 0 : i32
    %c0_i32_1 = arith.constant 0 : i32
    %c0_i32_2 = arith.constant 0 : i32
    return %arg0, %c0_i32, %c0_i32_0, %c0_i32_1 : i32, i32, i32, i32
  }
  func.func @transform_1(%arg0: i32) -> (i32, i32) {
    %c0_i32 = arith.constant 0 : i32
    %c0_i32_0 = arith.constant 0 : i32
    %c0_i32_1 = arith.constant 0 : i32
    return %c0_i32, %c0_i32_0 : i32, i32
  }
  func.func @transform_2(%arg0: i32) -> (i32, i32) {
    %c0_i32 = arith.constant 0 : i32
    %c0_i32_0 = arith.constant 0 : i32
    %c0_i32_1 = arith.constant 0 : i32
    return %c0_i32, %c0_i32_0 : i32, i32
  }
  func.func @transform_3(%arg0: i32) -> (i32, i32) {
    %c0_i32 = arith.constant 0 : i32
    %c0_i32_0 = arith.constant 0 : i32
    %c0_i32_1 = arith.constant 0 : i32
    return %c0_i32, %c0_i32_0 : i32, i32
  }
  func.func @transform_4(%arg0: i32) -> (i32, i32, i32) {
    %c0_i32 = arith.constant 0 : i32
    %c0_i32_0 = arith.constant 0 : i32
    %c0_i32_1 = arith.constant 0 : i32
    %c0_i32_2 = arith.constant 0 : i32
    return %c0_i32, %c0_i32_0, %c0_i32_1 : i32, i32, i32
  }
  func.func @transform_5(%arg0: i32) -> (i32, i32) {
    %c0_i32 = arith.constant 0 : i32
    %c0_i32_0 = arith.constant 0 : i32
    %c0_i32_1 = arith.constant 0 : i32
    return %c0_i32, %c0_i32_0 : i32, i32
  }
  func.func @transform_6(%arg0: i32) -> (i32, i32) {
    %c0_i32 = arith.constant 0 : i32
    %c0_i32_0 = arith.constant 0 : i32
    %c0_i32_1 = arith.constant 0 : i32
    return %c0_i32, %c0_i32_0 : i32, i32
  }
  func.func @transform_7(%arg0: i32) -> (i32, i32) {
    %c0_i32 = arith.constant 0 : i32
    %c0_i32_0 = arith.constant 0 : i32
    %c0_i32_1 = arith.constant 0 : i32
    return %c0_i32, %c0_i32_0 : i32, i32
  }
  func.func @transform_8(%arg0: i32) -> (i32, i32) {
    %c0_i32 = arith.constant 0 : i32
    %c0_i32_0 = arith.constant 0 : i32
    %c0_i32_1 = arith.constant 0 : i32
    return %c0_i32, %c0_i32_0 : i32, i32
  }
  func.func @transform_9(%arg0: i32) -> (i32, i32) {
    %c0_i32 = arith.constant 0 : i32
    %c0_i32_0 = arith.constant 0 : i32
    %c0_i32_1 = arith.constant 0 : i32
    return %c0_i32, %c0_i32_0 : i32, i32
  }
  func.func @transform_10(%arg0: i32) -> (i32, i32) {
    %c0_i32 = arith.constant 0 : i32
    %c0_i32_0 = arith.constant 0 : i32
    %c0_i32_1 = arith.constant 0 : i32
    return %c0_i32, %c0_i32_0 : i32, i32
  }
  func.func @transform_11(%arg0: i32) -> (i32, i32) {
    %c0_i32 = arith.constant 0 : i32
    %c0_i32_0 = arith.constant 0 : i32
    %c0_i32_1 = arith.constant 0 : i32
    return %c0_i32, %c0_i32_0 : i32, i32
  }
  func.func @transform_12(%arg0: i32) -> (i32, i32) {
    %c0_i32 = arith.constant 0 : i32
    %c0_i32_0 = arith.constant 0 : i32
    %c0_i32_1 = arith.constant 0 : i32
    return %c0_i32, %c0_i32_0 : i32, i32
  }
  func.func @transform_13(%arg0: i32) -> (i32, i32, i32, i32) {
    %c0_i32 = arith.constant 0 : i32
    %c0_i32_0 = arith.constant 0 : i32
    %c0_i32_1 = arith.constant 0 : i32
    %c0_i32_2 = arith.constant 0 : i32
    return %arg0, %c0_i32, %c0_i32_0, %c0_i32_1 : i32, i32, i32, i32
  }
}

</mosaic_0001>

<bundles_post_ra>
// kernel: tpu_custom_call.1
= control target key start
LH: loop header
LB: loop body
LE: loop exit
PB: predicated region body
PF: predicated region fallthrough
CT: control target
= control target key end

     0   :  { %s11349_s0 = inlined_call_operand.hbm [shape: bf16[2,18,32,128], index: 0, kind: input, shape index: {}]   ;;  %s11350_s1 = inlined_call_operand.hbm [shape: bf16[128,128], index: 1, kind: input, shape index: {}]   ;;  %s11351_s2 = inlined_call_operand.vmem [shape: f32[1,128], index: 2, kind: input, shape index: {}]   ;;  %s11352_s3 = inlined_call_operand.vmem [shape: f32[1,128], index: 3, kind: input, shape index: {}]   ;;  %s11353_s4 = inlined_call_operand.hbm [shape: bf16[9,128,128], index: 4, kind: input, shape index: {}]   ;;  %s11354_s5 = inlined_call_operand.vmem [shape: f32[1,128], index: 5, kind: input, shape index: {}]   ;;  %s11355_s6 = inlined_call_operand.vmem [shape: f32[1,128], index: 6, kind: input, shape index: {}]   ;;  %s11356_s7 = inlined_call_operand.hbm [shape: bf16[128,128], index: 7, kind: input, shape index: {}]   ;;  %s11357_s8 = inlined_call_operand.vmem [shape: f32[1,128], index: 8, kind: input, shape index: {}]   ;;  %s11358_s9 = inlined_call_operand.vmem [shape: f32[1,128], index: 9, kind: input, shape index: {}]   ;;  %s11359_s10 = inlined_call_operand.hbm [shape: bf16[128,128], index: 10, kind: input, shape index: {}]   ;;  %s11360_s11 = inlined_call_operand.vmem [shape: f32[1,128], index: 11, kind: input, shape index: {}]   ;;  %s11361_s12 = inlined_call_operand.vmem [shape: f32[1,128], index: 12, kind: input, shape index: {}]   ;;  %s11362_s13 = inlined_call_operand.hbm [shape: f32[2,16,16,128], index: 13, kind: output, shape index: {}]  }
   0x1   :  { %11369 = sst [smem:[#allocation71_spill]] %s11350_s1 }
   0x2   :  { %11370 = sst [smem:[#allocation72_spill]] %s11353_s4 }
   0x3   :  { %11371 = sst [smem:[#allocation73_spill]] %s11356_s7 }
   0x4   :  { %11372 = sst [smem:[#allocation74_spill]] %s11359_s10 }
   0x5   :  { %11373 = sst [smem:[#allocation75_spill]] %s11362_s13 }
   0x6   :  { %18 = vsyncpa [#allocation5], 0 }
   0x7   :  { %20 = vsyncpa [#allocation5 + $0x1], 0 }
   0x8   :  { %21 = vsyncpa [#allocation8], 0 }
   0x9   :  { %22 = vsyncpa [#allocation11], 0 }
   0xa   :  { %23 = vsyncpa [#allocation6], 0 }
   0xb   :  { %25 = vsyncpa [#allocation6 + $0x1], 0  ;;  %s9402_s25 = smov 0   ;;  %s9404_s26 = smov 0  }
   0xc   :  { %s9406_s27 = smov 0   ;;  %s9408_s28 = smov 0  }
   0xd LB: > { %11374 = sst [smem:[#allocation18_spill]] %s9308_s25  ;;  %s9423_s29 = sadd.s32 4294967295, %s9320_s28   ;;  %s9320_s28 = sphi %s9408_s28, %s11544_s28   ;;  %s9316_s27 = sphi %s9406_s27, %s11541_s27   ;;  %s9312_s26 = sphi %s9404_s26, %s11543_s26   ;;  %s9308_s25 = sphi %s9402_s25, %s11542_s25  }
   0xe   : > { %11375 = sst [smem:[#allocation19_spill]] %s9316_s27  ;;  %s7709_s30 = sadd.s32 4294967294, %s9320_s28  }
   0xf   : > { %p51_p0 = scmp.ne.s32.totalorder %s9312_s26, %s9308_s25  ;;  %p52_p1 = scmp.eq.s32.totalorder %s9423_s29, 0 }
  0x10   : > { %p327_p2 = scmp.eq.s32.totalorder %s9423_s29, 1  ;;  %p333_p3 = scmp.eq.s32.totalorder %s7709_s30, 1 }
  0x11   : > { %p9432_p4 = por %p52_p1, %p51_p0  ;;  %p7710_p5 = scmp.ge.s32.totalorder %s9320_s28, 1 }
  0x12   : > { %p9437_p6 = por %p333_p3, %p51_p0  ;;  %p340_p7 = scmp.lt.s32.totalorder %s9320_s28, 3 }
  0x13   : > { %s11379_s1 = sld [smem:[#allocation71_spill]]  ;;  %s9322_s20 = smov [#allocation7]  }
  0x14   : > { %s11377_s15 = scalar_select %p9437_p6, 1, 0 }
  0x15   : > { %p9445_p8 = pnand %p7710_p5, %p340_p7  ;;  %s353_s21 = sshll.u32 %s9322_s20, 4  ;;  %s354_s21 = int_to_ptr.vmem [resolvable:$true] %s353_s21 }
  0x16   : > { %11378 = sst [smem:[#allocation20_spill]] %s11377_s15  ;;  %s11366_s16 = smov 64  }
  0x17   : > { %p9007_p9 = pneg %p9445_p8  ;;  %s11382_s7 = sld [smem:[#allocation73_spill]] }
  0x18   : > { %s11367_s17 = smov 4   ;;  %s9325_s20 = smov [#allocation10]  }
  0x19   : > { %s351_s18 = sshll.u32 %s11379_s1, 4  ;;  %p9453_p10 = pnand %p9007_p9, %p52_p1  ;;  %s352_s18 = int_to_ptr.hbm [resolvable:$true] %s351_s18 }
  0x1a   : > { %s393_s1 = sshll.u32 %s9325_s20, 4  ;;  %s11383_s4 = sld [smem:[#allocation72_spill]]  ;;  %s394_s1 = int_to_ptr.vmem [resolvable:$true] %s393_s1 }
  0x1b   : > { %9010 = dma.hbm_to_vmem [thread:$0]  (!%p9453_p10), %s352_s18, 1024, %s354_s21, [#allocation8], %s11366_s16, %s11366_s16, %s11367_s17  }
  0x1c   : > { %s11384_s10 = sld [smem:[#allocation74_spill]]  ;;  %s9326_s24 = smov [#allocation9]  }
  0x1d   : > { %s391_s30 = sshll.u32 %s11382_s7, 4  ;;  %s373_s25 = sshll.u32 %s9326_s24, 4  ;;  %s392_s30 = int_to_ptr.hbm [resolvable:$true] %s391_s30  ;;  %s374_s25 = int_to_ptr.vmem [resolvable:$true] %s373_s25 }
  0x1e   : > { %9016 = dma.hbm_to_vmem [thread:$0]  (!%p9453_p10), %s392_s30, 1024, %s394_s1, [#allocation11], %s11366_s16, %s11366_s16, %s11367_s17  }
  0x1f   : > { %s9327_s15 = smov [#allocation12]   ;;  %s9488_s30 = sadd.s32 1, %s9320_s28  }
  0x20   : > { %s371_s13 = sshll.u32 %s11383_s4, 4  ;;  %s413_s1 = sshll.u32 %s9327_s15, 4  ;;  %s372_s13 = int_to_ptr.hbm [resolvable:$true] %s371_s13  ;;  %s414_s1 = int_to_ptr.vmem [resolvable:$true] %s413_s1 }
  0x21   : > { %9013 = dma.hbm_to_vmem [thread:$0]  (!%p9453_p10), %s372_s13, 9216, %s374_s25, [#allocation8], %s11366_s16, %s11366_s16, %s11367_s17  }
  0x22   : > { %s411_s23 = sshll.u32 %s11384_s10, 4  ;;  %s38_s20 = sadd.s32 1, %s9316_s27  ;;  %s412_s23 = int_to_ptr.hbm [resolvable:$true] %s411_s23 }
  0x23   : > { %9019 = dma.hbm_to_vmem [thread:$0]  (!%p9453_p10), %s412_s23, 1024, %s414_s1, [#allocation11], %s11366_s16, %s11366_s16, %s11367_s17  }
  0x24   : > { %s35_s18 = ssub.s32 %s9320_s28, %s9488_s30  ;;  %p45_p12 = scmp.ne.s32.totalorder %s9316_s27, %s9312_s26 }
  0x25   : > { %p36_p13 = scmp.eq.s32.totalorder %s35_s18, 0  ;;  %p46_p0 = scmp.eq.s32.totalorder %s9320_s28, 0 }
  0x26   : > { %p9498_p3 = por %p327_p2, %p45_p12  ;;  %p9032_p5 = scmp.lt.s32.totalorder %s9320_s28, 2 }
  0x27   : > { %s9504_s21 = scalar_select %p36_p13, %s9316_s27, %s38_s20  }
  0x28   : > { %p47_p7 = por %p46_p0, %p45_p12  ;;  %s433_s22 = sand.u32 1, %s9316_s27  }
  0x29   : > { %11386 = sst [smem:[#allocation21_spill]] %s9504_s21  ;;  %s8984_s24 = smul.u32 288, %s433_s22 }
  0x2a   : > { %s8985_s23 = smul.u32 288, %s9320_s28  ;;  %p9508_p9 = pnand %p9032_p5, %p47_p7 }
  0x2b   : > { %s437_s16 = scalar_lea.vmem [#allocation4], %s8984_s24  ;;  %s434_s20 = scalar_lea.sflag [#allocation5], %s433_s22 }
  0x2c   : > { %s442_s18 = scalar_lea.hbm %s11349_s0, %s8985_s23  ;;  %s445_s17 = sshll.u32 %s437_s16, 4  ;;  %s446_s17 = int_to_ptr.vmem [resolvable:$true] %s445_s17 }
  0x2d   : > { %s443_s4 = sshll.u32 %s442_s18, 4  ;;  %p9220_p10 = pneg %p9508_p9  ;;  %s444_s4 = int_to_ptr.hbm [resolvable:$true] %s443_s4 }
  0x2e   : > { %s9216_s7 = sshra.s32 %s444_s4, 4  ;;  %s9223_s15 = scalar_lea.hbm %s11349_s0, 576  ;;  %s9217_s7 = int_to_ptr.hbm [resolvable:$true] %s9216_s7 }
  0x2f   : > { %s9218_s10 = scalar_lea.hbm %s9217_s7, 288  ;;  %p9224_p0 = scmp.lt.s32.totalorder %s9217_s7, %s11349_s0 }
  0x30   : > { %p9219_p2 = scmp.ne.s32.totalorder %s9217_s7, %s9218_s10  ;;  %p9225_p5 = scmp.lt.s32.totalorder %s9223_s15, %s9218_s10 }
  0x32   : > { %p9221_p12 = pnand %p9220_p10, %p9219_p2  ;;  %p9226_p7 = por %p9225_p5, %p9224_p0 }
  0x34   : > { %p9222_p13 = pneg %p9221_p12 }
  0x36   : > { %p9227_p11 = pnand %p9226_p7, %p9222_p13 }
  0x38   : > { %9230 = shalt.err (!%p9227_p11)
}
  0x39   : > { %s11388_s16 = smov 4   ;;  %s11389_s22 = smov 64  }
  0x3a   : > { %9023 = dma.hbm_to_vmem [thread:$0]  (!%p9508_p9), %s444_s4, 4608, %s446_s17, %s434_s20, %s11389_s22, %s11389_s22, %s11388_s16  }
  0x3b   : > { %457 = sbr.rel (%p9445_p8) target bundleno = 1456 (0x5b0), region = 72 }
  0x40   : > { %s9531_s27 = sand.u32 1, %s9312_s26  }
  0x41   : > { %s8986_s7 = smul.u32 288, %s9531_s27  ;;  %s460_s10 = scalar_lea.sflag [#allocation5], %s9531_s27 }
  0x43   : > { %s9535_s21 = scalar_lea.vmem [#allocation4], %s8986_s7 }
  0x44   : > { %9291 = dma.done.wait (%p9432_p4), %s460_s10, 4608  }
  0x45   : > { %9293 = vsyncadd (%p9432_p4), %s460_s10, 4294962688 }
  0x46   : > { %9295 = dma.done.wait (%p52_p1), [#allocation8], 10240  }
  0x47   : > { %9297 = vsyncadd (%p52_p1), [#allocation8], 4294957056 }
  0x48   : > { %9299 = dma.done.wait (%p52_p1), [#allocation11], 2048  }
  0x49   : > { %9301 = vsyncadd (%p52_p1), [#allocation11], 4294965248  ;;  %v9328_v0 = vmov 0   ;;  %v8631_v1 = vld [vmem:[#allocation7 + $0x38] sm:$0xff]  ;;  %v8630_v2 = vld [vmem:[#allocation7 + $0x30] sm:$0xff]  ;;  %vm2666_vm0 = vcmask 1042432  }
  0x4a   : > { %1307 = vst [vmem:[#allocation2] sm:$0xf] %v9328_v0  ;;  %849 = vmatpush.bf16.msra.mxu0 %v8631_v1  ;;  %8960 = vmatpush.bf16.msra.mxu1 %v8631_v1  ;;  %v8629_v3 = vld [vmem:[#allocation7 + $0x28] sm:$0xff]  ;;  %v8628_v4 = vld [vmem:[#allocation7 + $0x20] sm:$0xff]  ;;  %v8627_v5 = vld [vmem:[#allocation7 + $0x18] sm:$0xff]  ;;  %vm2667_vm1 = vcmask 1046532  }
  0x4b   : > { %1308 = vst [vmem:[#allocation2 + $0x4] sm:$0xf] %v9328_v0  ;;  %8962 = vmatpush.bf16.msra.mxu3 %v8631_v1  ;;  %8961 = vmatpush.bf16.msra.mxu2 %v8631_v1  ;;  %v8626_v6 = vld [vmem:[#allocation7 + $0x10] sm:$0xff]  ;;  %v8625_v7 = vld [vmem:[#allocation7 + $0x8] sm:$0xff]  ;;  %v8624_v8 = vld [vmem:[#allocation7] sm:$0xff]  ;;  %s7722_s1 = sshll.u32 %s9531_s27, 8 }
  0x4c   : > { %1309 = vst [vmem:[#allocation2 + $0x8] sm:$0xf] %v9328_v0  ;;  %v8592_v9 = vld [vmem:[%s9535_s21 + $0x10] sm:$0xff]  ;;  %v8593_v10 = vld [vmem:[%s9535_s21 + $0x18] sm:$0xff]  ;;  %v8594_v11 = vld [vmem:[%s9535_s21 + $0x20] sm:$0xff]  ;;  %s11063_s23 = scalar_lea.vmem [#allocation13], %s7722_s1 }
  0x4d   : > { %1311 = vst [vmem:[#allocation2 + $0x10] sm:$0xf] %v9328_v0  ;;  %v8612_v12 = vld [vmem:[%s9535_s21 + $0xb0] sm:$0xff]  ;;  %v8595_v13 = vld [vmem:[%s9535_s21 + $0x28] sm:$0xff]  ;;  %v8613_v15 = vld [vmem:[%s9535_s21 + $0xb8] sm:$0xff]  ;;  %s8768_s17 = sshll.u32 %s9423_s29, 8 }
  0x4e   : > { %1312 = vst [vmem:[#allocation2 + $0x14] sm:$0xf] %v9328_v0  ;;  %850 = vmatpush.bf16.msra.mxu0 %v8630_v2  ;;  %8963 = vmatpush.bf16.msra.mxu1 %v8630_v2  ;;  %v8620_v14 = vld [vmem:[%s9535_s21 + $0xf0] sm:$0xff]  ;;  %v8621_v18 = vld [vmem:[%s9535_s21 + $0xf8] sm:$0xff]  ;;  %v8614_v19 = vld [vmem:[%s9535_s21 + $0xc0] sm:$0xff]  ;;  %s11536_s18 = sld [smem:[#allocation75_spill]] }
  0x4f   : > { %1313 = vst [vmem:[#allocation2 + $0x18] sm:$0xf] %v9328_v0  ;;  %8965 = vmatpush.bf16.msra.mxu3 %v8630_v2  ;;  %8964 = vmatpush.bf16.msra.mxu2 %v8630_v2  ;;  %v8616_v16 = vld [vmem:[%s9535_s21 + $0xd0] sm:$0xff]  ;;  %v8617_v20 = vld [vmem:[%s9535_s21 + $0xd8] sm:$0xff]  ;;  %v8653_v24 = vld [vmem:[#allocation9 + $0x28] sm:$0xff]  ;;  %s7595_s15 = sshll.u32 %s11063_s23, 4  ;;  %s7596_s15 = int_to_ptr.vmem [resolvable:$true] %s7595_s15 }
  0x50   : > { %1315 = vst [vmem:[#allocation2 + $0x20] sm:$0xf] %v9328_v0  ;;  %v8596_v17 = vld [vmem:[%s9535_s21 + $0x30] sm:$0xff]  ;;  %v8655_v21 = vld [vmem:[#allocation9 + $0x38] sm:$0xff]  ;;  %v8652_v25 = vld [vmem:[#allocation9 + $0x20] sm:$0xff]  ;;  %s7583_s29 = scalar_lea.sflag [#allocation6], %s9531_s27 }
  0x51   : > { %1316 = vst [vmem:[#allocation2 + $0x24] sm:$0xf] %v9328_v0  ;;  %v8654_v22 = vld [vmem:[#allocation9 + $0x30] sm:$0xff]  ;;  %v8597_v23 = vld [vmem:[%s9535_s21 + $0x38] sm:$0xff]  ;;  %v8622_v26 = vld [vmem:[%s9535_s21 + $0x100] sm:$0xff] }
  0x52   : > { %1317 = vst [vmem:[#allocation2 + $0x28] sm:$0xf] %v9328_v0  ;;  %851 = vmatpush.bf16.msra.mxu0 %v8629_v3  ;;  %8966 = vmatpush.bf16.msra.mxu1 %v8629_v3  ;;  %v8671_v27 = vld [vmem:[#allocation9 + $0xb8] sm:$0xff]  ;;  %v8615_v28 = vld [vmem:[%s9535_s21 + $0xc8] sm:$0xff]  ;;  %v8618_v29 = vld [vmem:[%s9535_s21 + $0xe0] sm:$0xff] }
  0x53   : > { %1319 = vst [vmem:[#allocation2 + $0x30] sm:$0xf] %v9328_v0  ;;  %8968 = vmatpush.bf16.msra.mxu3 %v8629_v3  ;;  %8967 = vmatpush.bf16.msra.mxu2 %v8629_v3  ;;  %v8663_v30 = vld [vmem:[#allocation9 + $0x78] sm:$0xff]  ;;  %v8670_v31 = vld [vmem:[#allocation9 + $0xb0] sm:$0xff]  ;;  %v8598_v35 = vld [vmem:[%s9535_s21 + $0x40] sm:$0xff] }
  0x54   : > { %1320 = vst [vmem:[#allocation2 + $0x34] sm:$0xf] %v9328_v0  ;;  %v8651_v32 = vld [vmem:[#allocation9 + $0x18] sm:$0xff]  ;;  %v8650_v33 = vld [vmem:[#allocation9 + $0x10] sm:$0xff]  ;;  %v8669_v36 = vld [vmem:[#allocation9 + $0xa8] sm:$0xff]  ;;  %s7594_s20 = scalar_lea.hbm %s11536_s18, %s8768_s17  ;;  %s9266_s10 = scalar_lea.hbm %s11536_s18, 512 }
  0x55   : > { %1321 = vst [vmem:[#allocation2 + $0x38] sm:$0xf] %v9328_v0  ;;  %v8662_v34 = vld [vmem:[#allocation9 + $0x70] sm:$0xff]  ;;  %v8649_v37 = vld [vmem:[#allocation9 + $0x8] sm:$0xff]  ;;  %v8668_v39 = vld [vmem:[#allocation9 + $0xa0] sm:$0xff]  ;;  %s7597_s1 = sshll.u32 %s7594_s20, 4  ;;  %s7598_s1 = int_to_ptr.hbm [resolvable:$true] %s7597_s1 }
  0x56   : > { %1323 = vst [vmem:[#allocation2 + $0x40] sm:$0xf] %v9328_v0  ;;  %852 = vmatpush.bf16.msra.mxu0 %v8628_v4  ;;  %8969 = vmatpush.bf16.msra.mxu1 %v8628_v4  ;;  %v8661_v38 = vld [vmem:[#allocation9 + $0x68] sm:$0xff]  ;;  %v8648_v40 = vld [vmem:[#allocation9] sm:$0xff]  ;;  %v8667_v43 = vld [vmem:[#allocation9 + $0x98] sm:$0xff] }
  0x57   : > { %1324 = vst [vmem:[#allocation2 + $0x44] sm:$0xf] %v9328_v0  ;;  %8971 = vmatpush.bf16.msra.mxu3 %v8628_v4  ;;  %8970 = vmatpush.bf16.msra.mxu2 %v8628_v4  ;;  %v8660_v41 = vld [vmem:[#allocation9 + $0x60] sm:$0xff]  ;;  %v8623_v42 = vld [vmem:[%s9535_s21 + $0x108] sm:$0xff]  ;;  %v8659_v46 = vld [vmem:[#allocation9 + $0x58] sm:$0xff] }
  0x58   : > { %1325 = vst [vmem:[#allocation2 + $0x48] sm:$0xf] %v9328_v0  ;;  %v8632_v44 = vld [vmem:[#allocation2] sm:$0xff]  ;;  %v8619_v45 = vld [vmem:[%s9535_s21 + $0xe8] sm:$0xff]  ;;  %v8666_v47 = vld [vmem:[#allocation9 + $0x90] sm:$0xff] }
  0x59   : > { %1327 = vst [vmem:[#allocation2 + $0x50] sm:$0xf] %v9328_v0  ;;  %v1821_v48 = vld [vmem:[#allocation2] sm:$0xf]  ;;  %v1822_v49 = vld [vmem:[#allocation2 + $0x4] sm:$0xf]  ;;  %vm9623_vm2 = vmor %vm2666_vm0, %vm2667_vm1 }
  0x5a   : > { %1328 = vst [vmem:[#allocation2 + $0x54] sm:$0xf] %v9328_v0  ;;  %853 = vmatpush.bf16.msra.mxu0 %v8627_v5  ;;  %8972 = vmatpush.bf16.msra.mxu1 %v8627_v5  ;;  %v8658_v50 = vld [vmem:[#allocation9 + $0x50] sm:$0xff]  ;;  %v1873_v51 = vshrl.u32 %v1821_v48, 16  ;;  %v1876_v52 = vshll.u32 %v1821_v48, 16  ;;  %v1882_v53 = vshll.u32 %v1822_v49, 16 }
  0x5b   : > { %1329 = vst [vmem:[#allocation2 + $0x58] sm:$0xf] %v9328_v0  ;;  %8974 = vmatpush.bf16.msra.mxu3 %v8627_v5  ;;  %8973 = vmatpush.bf16.msra.mxu2 %v8627_v5  ;;  %v1886_v54 = vshrl.u32 %v1822_v49, 16  ;;  %v8599_v55 = vld [vmem:[%s9535_s21 + $0x48] sm:$0xff]  ;;  %v2571_v56 = vld [vmem:[#allocation2 + $0x4] sm:$0xf] }
  0x5c   : > { %1331 = vst [vmem:[#allocation2 + $0x60] sm:$0xf] %v9328_v0  ;;  %v8665_v57 = vld [vmem:[#allocation9 + $0x88] sm:$0xff]  ;;  %v2671_v58 = vrot.slane %v2571_v56, 5  ;;  %v1875_v59 = vrot.slane %v1873_v51, 4  ;;  %v1878_v60 = vrot.slane %v1876_v52, 5 }
  0x5d   : > { %1332 = vst [vmem:[#allocation2 + $0x64] sm:$0xf] %v9328_v0  ;;  %v1884_v61 = vrot.slane %v1882_v53, 5  ;;  %v2570_v62 = vld [vmem:[#allocation2] sm:$0xe]  ;;  %v8657_v1 = vld [vmem:[#allocation9 + $0x48] sm:$0xff] }
  0x5e   : > { %1333 = vst [vmem:[#allocation2 + $0x68] sm:$0xf] %v9328_v0  ;;  %854 = vmatpush.bf16.msra.mxu0 %v8626_v6  ;;  %8975 = vmatpush.bf16.msra.mxu1 %v8626_v6  ;;  %v2572_v63 = vld [vmem:[#allocation2 + $0x8] sm:$0x1]  ;;  %v8075_v2 = vrot.slane %v2570_v62, 9  ;;  %v2673_v3 = vrot.slane %v2671_v58, 4 }
  0x5f   : > { %1335 = vst [vmem:[#allocation2 + $0x70] sm:$0xf] %v9328_v0  ;;  %8977 = vmatpush.bf16.msra.mxu3 %v8626_v6  ;;  %8976 = vmatpush.bf16.msra.mxu2 %v8626_v6  ;;  %v2674_v5 = vrot.slane %v2572_v63, 5  ;;  %v1823_v6 = vld [vmem:[#allocation2 + $0x8] sm:$0x1] }
  0x60   : > { %1336 = vst [vmem:[#allocation2 + $0x74] sm:$0xf] %v9328_v0  ;;  %vm1869_vm3 = vsmask.f32 3328  ;;  %vm1870_vm4 = vsmask.f32 7440 }
  0x61   : > { %1337 = vst [vmem:[#allocation2 + $0x78] sm:$0xf] %v9328_v0  ;;  %vm9631_vm5 = vmor %vm1869_vm3, %vm1870_vm4 }
  0x62   : > { %855 = vmatpush.bf16.msra.mxu0 %v8625_v7  ;;  %8978 = vmatpush.bf16.msra.mxu1 %v8625_v7  ;;  %1339 = vst [vmem:[#allocation2 + $0x80] sm:$0xf] %v9328_v0 }
  0x63   : > { %8980 = vmatpush.bf16.msra.mxu3 %v8625_v7  ;;  %8979 = vmatpush.bf16.msra.mxu2 %v8625_v7  ;;  %1340 = vst [vmem:[#allocation2 + $0x84] sm:$0xf] %v9328_v0  ;;  %v1879_v7 = vor.u32 %v1878_v60, %v1875_v59 }
  0x64   : > { %1341 = vst [vmem:[#allocation2 + $0x88] sm:$0xf] %v9328_v0 }
  0x65   : > { %1343 = vst [vmem:[#allocation2 + $0x90] sm:$0xf] %v9328_v0 }
  0x66   : > { %856 = vmatpush.bf16.msra.mxu0 %v8624_v8  ;;  %8981 = vmatpush.bf16.msra.mxu1 %v8624_v8  ;;  %1344 = vst [vmem:[#allocation2 + $0x94] sm:$0xf] %v9328_v0 }
  0x67   : > { %8983 = vmatpush.bf16.msra.mxu3 %v8624_v8  ;;  %8982 = vmatpush.bf16.msra.mxu2 %v8624_v8  ;;  %1345 = vst [vmem:[#allocation2 + $0x98] sm:$0xf] %v9328_v0 }
  0x68   : > { %1347 = vst [vmem:[#allocation2 + $0xa0] sm:$0xf] %v9328_v0 }
  0x69   : > { %857 = vmatmul.bf16.vlgmr.msra.gmra.mxu0 %v8592_v9  ;;  %1348 = vst [vmem:[#allocation2 + $0xa4] sm:$0xf] %v9328_v0  ;;  %957 = vmatmul.bf16.vlgmr.msra.gmra.mxu1 %v8612_v12  ;;  %v8664_v9 = vld [vmem:[#allocation9 + $0x80] sm:$0xff] }
  0x6a   : > { %1349 = vst [vmem:[#allocation2 + $0xa8] sm:$0xf] %v9328_v0  ;;  %997 = vmatmul.bf16.vlgmr.msra.gmra.mxu3 %v8620_v14  ;;  %977 = vmatmul.bf16.vlgmr.msra.gmra.mxu2 %v8616_v16  ;;  %v1880_v14 = vrot.slane %v1879_v7, 4 }
  0x6b   : > { %1351 = vst [vmem:[#allocation2 + $0xb0] sm:$0xf] %v9328_v0  ;;  %1700 = vmatpush.bf16.msrb.mxu1 %v8655_v21  ;;  %2910 = vmatpush.bf16.msrb.mxu3 %v8671_v27  ;;  %v8600_v27 = vld [vmem:[%s9535_s21 + $0x50] sm:$0xff] }
  0x6c   : > { %1352 = vst [vmem:[#allocation2 + $0xb4] sm:$0xf] %v9328_v0  ;;  %2385 = vmatpush.bf16.msrb.mxu2 %v8663_v30  ;;  %v9649_v30 = vld [vmem:[%s11352_s3] ss:$0 sm:$0xff] }
  0x6d   : > { %1353 = vst [vmem:[#allocation2 + $0xb8] sm:$0xf] %v9328_v0 }
  0x6e   : > { %1355 = vst [vmem:[#allocation2 + $0xc0] sm:$0xf] %v9328_v0 }
  0x6f   : > { %1356 = vst [vmem:[#allocation2 + $0xc4] sm:$0xf] %v9328_v0  ;;  %1701 = vmatpush.bf16.msrb.mxu1 %v8654_v22  ;;  %2911 = vmatpush.bf16.msrb.mxu3 %v8670_v31  ;;  %v1218_v31 = vlaneseq }
  0x70   : > { %1357 = vst [vmem:[#allocation2 + $0xc8] sm:$0xf] %v9328_v0  ;;  %2386 = vmatpush.bf16.msrb.mxu2 %v8662_v34 }
  0x71   : > { %1359 = vst [vmem:[#allocation2 + $0xd0] sm:$0xf] %v9328_v0 }
  0x72   : > { %1360 = vst [vmem:[#allocation2 + $0xd4] sm:$0xf] %v9328_v0 }
  0x73   : > { %1361 = vst [vmem:[#allocation2 + $0xd8] sm:$0xf] %v9328_v0  ;;  %1702 = vmatpush.bf16.msrb.mxu1 %v8653_v24  ;;  %2912 = vmatpush.bf16.msrb.mxu3 %v8669_v36 }
  0x74   : > { %1363 = vst [vmem:[#allocation2 + $0xe0] sm:$0xf] %v9328_v0  ;;  %2387 = vmatpush.bf16.msrb.mxu2 %v8661_v38 }
  0x75   : > { %1364 = vst [vmem:[#allocation2 + $0xe4] sm:$0xf] %v9328_v0 }
  0x76   : > { %1365 = vst [vmem:[#allocation2 + $0xe8] sm:$0xf] %v9328_v0 }
  0x77   : > { %1367 = vst [vmem:[#allocation2 + $0xf0] sm:$0xf] %v9328_v0  ;;  %1703 = vmatpush.bf16.msrb.mxu1 %v8652_v25  ;;  %2913 = vmatpush.bf16.msrb.mxu3 %v8668_v39  ;;  %v9642_v25 = vld [vmem:[%s11351_s2] ss:$0 sm:$0xff] }
  0x78   : > { %1368 = vst [vmem:[#allocation2 + $0xf4] sm:$0xf] %v9328_v0  ;;  %2388 = vmatpush.bf16.msrb.mxu2 %v8660_v41  ;;  %v8601_v41 = vld [vmem:[%s9535_s21 + $0x58] sm:$0xff] }
  0x79   : > { %862 = vmatmul.bf16.gmra.mxu0 %v8593_v10  ;;  %1369 = vst [vmem:[#allocation2 + $0xf8] sm:$0xf] %v9328_v0  ;;  %962 = vmatmul.bf16.gmra.mxu1 %v8613_v15  ;;  %v2672_v10 = vsel %vm9623_vm2, %v8075_v2, %v2671_v58  ;;  %v8656_v15 = vld [vmem:[#allocation9 + $0x40] sm:$0xff] }
  0x7a   : > { %1371 = vst [vmem:[#allocation2 + $0x100] sm:$0xf] %v9328_v0  ;;  %1002 = vmatmul.bf16.gmra.mxu3 %v8621_v18  ;;  %982 = vmatmul.bf16.gmra.mxu2 %v8617_v20  ;;  %v2798_v12 = vunpack.c.l.b16 %v2672_v10 }
  0x7b   : > { %1372 = vst [vmem:[#allocation2 + $0x104] sm:$0xf] %v9328_v0  ;;  %1704 = vmatpush.bf16.msrb.mxu1 %v8651_v32  ;;  %2914 = vmatpush.bf16.msrb.mxu3 %v8667_v43 }
  0x7c   : > { %1373 = vst [vmem:[#allocation2 + $0x108] sm:$0xf] %v9328_v0  ;;  %2389 = vmatpush.bf16.msrb.mxu2 %v8659_v46  ;;  %v9329_v46 = vmov 0.0|0.0  }
  0x7d   : > { %1375 = vst [vmem:[#allocation2 + $0x110] sm:$0xf] %v9328_v0 }
  0x7e   : > { %1376 = vst [vmem:[#allocation2 + $0x114] sm:$0xf] %v9328_v0 }
  0x7f   : > { %1377 = vst [vmem:[#allocation2 + $0x118] sm:$0xf] %v9328_v0  ;;  %1705 = vmatpush.bf16.msrb.mxu1 %v8650_v33  ;;  %2915 = vmatpush.bf16.msrb.mxu3 %v8666_v47  ;;  %v1888_v0 = vrot.slane %v1886_v54, 4  ;;  %v9652_v33 = vshrl.u32 %v1218_v31, 7  ;;  %v9666_v47 = vunpack.c.l.bf16 %v9329_v46 }
  0x80   : > { %2390 = vmatpush.bf16.msrb.mxu2 %v8658_v50 }
  0x81   : > { %v1889_v8 = vor.u32 %v1888_v0, %v1884_v61  ;;  %vm1223_vm6 = vcmp.ge.s32.totalorder %v9652_v33, 1  ;;  %v9661_v43 = vadd.s32 16, %v9652_v33 }
  0x83   : > { %1706 = vmatpush.bf16.msrb.mxu1 %v8649_v37  ;;  %2916 = vmatpush.bf16.msrb.mxu3 %v8665_v57  ;;  %v1890_v18 = vrot.slane %v1889_v8, 4  ;;  %vm1229_vm7 = vcmp.le.s32.totalorder %v9661_v43, 16 }
  0x84   : > { %2391 = vmatpush.bf16.msrb.mxu2 %v8657_v1 }
  0x87   : > { %1707 = vmatpush.bf16.msrb.mxu1 %v8648_v40  ;;  %2917 = vmatpush.bf16.msrb.mxu3 %v8664_v9 }
  0x88   : > { %2392 = vmatpush.bf16.msrb.mxu2 %v8656_v15 }
  0x89   : > { %867 = vmatmul.bf16.gmra.mxu0 %v8594_v11  ;;  %967 = vmatmul.bf16.gmra.mxu1 %v8614_v19  ;;  %v2675_v11 = vsel %vm9623_vm2, %v2673_v3, %v2674_v5  ;;  %v1892_v19 = vshll.u32 %v1823_v6, 16  ;;  %v8602_v5 = vld [vmem:[%s9535_s21 + $0x60] sm:$0xff] }
  0x8a   : > { %1007 = vmatmul.bf16.gmra.mxu3 %v8622_v26  ;;  %987 = vmatmul.bf16.gmra.mxu2 %v8618_v29  ;;  %v2799_v16 = vunpack.c.l.b16 %v2675_v11 }
  0x8b   : > { %v1894_v21 = vrot.slane %v1892_v19, 5 }
  0x8c   : > { %v2830_v20 = vpack.c.b16 %v2799_v16, %v2798_v12 }
  0x99   : > { %872 = vmatmul.bf16.gmra.mxu0 %v8595_v13  ;;  %972 = vmatmul.bf16.gmra.mxu1 %v8615_v28 }
  0x9a   : > { %1012 = vmatmul.bf16.gmra.mxu3 %v8623_v42  ;;  %992 = vmatmul.bf16.gmra.mxu2 %v8619_v45 }
  0xa9   : > { %877 = vmatmul.bf16.gmra.mxu0 %v8596_v17  ;;  %1708 = vmatmul.bf16.vlgmr.msrb.gmra.mxu1 %v8632_v44  ;;  %v1885_v17 = vsel %vm9631_vm5, %v1880_v14, %v1884_v61 }
  0xaa   : > { %2918 = vmatmul.bf16.vlgmr.msrb.gmra.mxu3 %v2830_v20  ;;  %v2273_v22 = vunpack.c.l.b16 %v1885_v17 }
  0xb9   : > { %882 = vmatmul.bf16.gmra.mxu0 %v8597_v23  ;;  %v1895_v23 = vsel %vm9631_vm5, %v1890_v18, %v1894_v21 }
  0xba   : > { %v2274_v24 = vunpack.c.l.b16 %v1895_v23 }
  0xbc   : > { %v2305_v26 = vpack.c.b16 %v2274_v24, %v2273_v22 }
  0xbe   : > { %2393 = vmatmul.bf16.vlgmr.msrb.gmra.mxu2 %v2305_v26 }
  0xc9   : > { %887 = vmatmul.bf16.gmra.mxu0 %v8598_v35 }
  0xd9   : > { %892 = vmatmul.bf16.gmra.mxu0 %v8599_v55 }
  0xe6   : > { %v858_v28 = vpop.f32.mrf.mxu0 }
  0xe7   : > { %v1022_v29 = vmul.f32 %v9642_v25, %v858_v28 }
  0xe9   : > { %897 = vmatmul.bf16.gmra.mxu0 %v8600_v27  ;;  %v1090_v32 = vadd.f32 %v9649_v30, %v1022_v29 }
  0xeb   : > { %v1154_v36 = vmax.f32 %v1090_v32, 0.0 }
  0xed   : > { %v1243_v39 = vsel %vm1223_vm6, %v1154_v36, 0.0 }
  0xee   : > { %v860_v34 = vpop.f32.mrf.mxu0 }
  0xef   : > { %v1023_v35 = vmul.f32 %v9642_v25, %v860_v34  ;;  %v958_v34 = vpop.f32.mrf.mxu1 }
  0xf1   : > { %v1091_v37 = vadd.f32 %v9649_v30, %v1023_v35 }
  0xf3   : > { %v1155_v38 = vmax.f32 %v1091_v37, 0.0 }
  0xf5   : > { %v8772_v40 = vpack.c.bf16 %v1155_v38, %v1243_v39 }
  0xf6   : > { %v863_v42 = vpop.f32.mrf.mxu0 }
  0xf7   : > { %8773 = vst [vmem:[#allocation2 + $0x10] sm:$0xff] %v8772_v40   ;;  %v1024_v44 = vmul.f32 %v9642_v25, %v863_v42  ;;  %v8603_v40 = vld [vmem:[%s9535_s21 + $0x68] sm:$0xff] }
  0xf9   : > { %v1092_v45 = vadd.f32 %v9649_v30, %v1024_v44  ;;  %902 = vmatmul.bf16.gmra.mxu0 %v8601_v41  ;;  %v1062_v44 = vmul.f32 %v9642_v25, %v958_v34 }
  0xfb   : > { %v1156_v48 = vmax.f32 %v1092_v45, 0.0  ;;  %v960_v45 = vpop.f32.mrf.mxu1 }
  0xfd   : > { %v1245_v49 = vsel %vm1229_vm7, %v1156_v48, 0.0  ;;  %v1130_v48 = vadd.f32 %v9649_v30, %v1062_v44 }
  0xfe   : > { %v8777_v50 = vpack.c.bf16 %v9666_v47, %v1245_v49  ;;  %v865_v51 = vpop.f32.mrf.mxu0  ;;  %v8633_v52 = vld [vmem:[#allocation2 + $0x10] sm:$0xff] }
  0xff   : > { %v2573_v53 = vld [vmem:[#allocation2 + $0x10] sm:$0xe]  ;;  %v2574_v54 = vld [vmem:[#allocation2 + $0x14] sm:$0xf]  ;;  %1713 = vmatmul.bf16.gmra.mxu1 %v8633_v52 }
 0x100   : > { %v1824_v55 = vld [vmem:[#allocation2 + $0x10] sm:$0xf]  ;;  %v1825_v56 = vld [vmem:[#allocation2 + $0x14] sm:$0xf]  ;;  %8929 = vst [vmem:[#allocation2 + $0x18] sm:$0xff] %v8777_v50   ;;  %v8076_v0 = vrot.slane %v2573_v53, 9 }
 0x101   : > { %v1897_v57 = vshrl.u32 %v1824_v55, 16  ;;  %v1900_v58 = vshll.u32 %v1824_v55, 16  ;;  %v1906_v59 = vshll.u32 %v1825_v56, 16  ;;  %v1910_v60 = vshrl.u32 %v1825_v56, 16 }
 0x102   : > { %v2678_v1 = vrot.slane %v2574_v54, 5  ;;  %v1194_v54 = vmax.f32 %v1130_v48, 0.0 }
 0x103   : > { %v1899_v61 = vrot.slane %v1897_v57, 4  ;;  %v1902_v62 = vrot.slane %v1900_v58, 5  ;;  %v1908_v63 = vrot.slane %v1906_v59, 5  ;;  %v1912_v2 = vrot.slane %v1910_v60, 4  ;;  %v963_v59 = vpop.f32.mrf.mxu1 }
 0x104   : > { %v2679_v10 = vsel %vm9623_vm2, %v8076_v0, %v2678_v1  ;;  %v2680_v14 = vrot.slane %v2678_v1, 4  ;;  %v1063_v1 = vmul.f32 %v9642_v25, %v960_v45 }
 0x105   : > { %v1903_v3 = vor.u32 %v1902_v62, %v1899_v61  ;;  %v1913_v8 = vor.u32 %v1912_v2, %v1908_v63  ;;  %v2800_v21 = vunpack.c.l.b16 %v2679_v10  ;;  %v1064_v2 = vmul.f32 %v9642_v25, %v963_v59 }
 0x106   : > { %v868_v6 = vpop.f32.mrf.mxu0  ;;  %v1131_v10 = vadd.f32 %v9649_v30, %v1063_v1 }
 0x107   : > { %v1904_v7 = vrot.slane %v1903_v3, 4  ;;  %v2575_v9 = vld [vmem:[#allocation2 + $0x18] sm:$0x1]  ;;  %v1026_v12 = vmul.f32 %v9642_v25, %v868_v6  ;;  %v1914_v19 = vrot.slane %v1913_v8, 4  ;;  %v998_v8 = vpop.f32.mrf.mxu3 }
 0x108   : > { %v1826_v11 = vld [vmem:[#allocation2 + $0x18] sm:$0x1]  ;;  %v2681_v15 = vrot.slane %v2575_v9, 5 }
 0x109   : > { %v1916_v16 = vshll.u32 %v1826_v11, 16  ;;  %907 = vmatmul.bf16.gmra.mxu0 %v8602_v5  ;;  %v1909_v18 = vsel %vm9631_vm5, %v1904_v7, %v1908_v63  ;;  %v1094_v23 = vadd.f32 %v9649_v30, %v1026_v12  ;;  %v1132_v11 = vadd.f32 %v9649_v30, %v1064_v2 }
 0x10a   : > { %v2682_v17 = vsel %vm9623_vm2, %v2680_v14, %v2681_v15  ;;  %v2275_v27 = vunpack.c.l.b16 %v1909_v18  ;;  %v1078_v12 = vmul.f32 %v9642_v25, %v998_v8  ;;  %v978_v14 = vpop.f32.mrf.mxu2  ;;  %v1283_v15 = vsel %vm1223_vm6, %v1194_v54, 0.0 }
 0x10b   : > { %v1918_v20 = vrot.slane %v1916_v16, 5  ;;  %v2801_v22 = vunpack.c.l.b16 %v2682_v17  ;;  %v1158_v35 = vmax.f32 %v1094_v23, 0.0  ;;  %v8604_v17 = vld [vmem:[%s9535_s21 + $0x70] sm:$0xff]  ;;  %v1195_v18 = vmax.f32 %v1131_v10, 0.0  ;;  %v965_v34 = vpop.f32.mrf.mxu1 }
 0x10d   : > { %v1919_v24 = vsel %vm9631_vm5, %v1914_v19, %v1918_v20  ;;  %v2831_v26 = vpack.c.b16 %v2801_v22, %v2800_v21  ;;  %v1247_v38 = vsel %vm1223_vm6, %v1158_v35, 0.0  ;;  %v1196_v19 = vmax.f32 %v1132_v11, 0.0 }
 0x10e   : > { %v2276_v28 = vunpack.c.l.b16 %v1919_v24  ;;  %v870_v29 = vpop.f32.mrf.mxu0  ;;  %v1070_v20 = vmul.f32 %v9642_v25, %v978_v14 }
 0x10f   : > { %v1027_v31 = vmul.f32 %v9642_v25, %v870_v29  ;;  %2923 = vmatmul.bf16.gmra.mxu3 %v2831_v26  ;;  %v8872_v29 = vpack.c.bf16 %v1195_v18, %v1283_v15  ;;  %v8605_v15 = vld [vmem:[%s9535_s21 + $0x78] sm:$0xff] }
 0x110   : > { %v2306_v32 = vpack.c.b16 %v2276_v28, %v2275_v27 }
 0x111   : > { %v1095_v36 = vadd.f32 %v9649_v30, %v1027_v31  ;;  %v1285_v31 = vsel %vm1229_vm7, %v1196_v19, 0.0  ;;  %8948 = vst [vmem:[#allocation2 + $0xb0] sm:$0xff] %v8872_v29  }
 0x112   : > { %2398 = vmatmul.bf16.gmra.mxu2 %v2306_v32  ;;  %v1146_v32 = vadd.f32 %v9649_v30, %v1078_v12 }
 0x113   : > { %v1159_v37 = vmax.f32 %v1095_v36, 0.0 }
 0x115   : > { %v8782_v39 = vpack.c.bf16 %v1159_v37, %v1247_v38  ;;  %v8877_v38 = vpack.c.bf16 %v9666_v47, %v1285_v31 }
 0x116   : > { %v873_v41 = vpop.f32.mrf.mxu0 }
 0x117   : > { %8930 = vst [vmem:[#allocation2 + $0x20] sm:$0xff] %v8782_v39   ;;  %v1028_v42 = vmul.f32 %v9642_v25, %v873_v41 }
 0x118   : > { %8949 = vst [vmem:[#allocation2 + $0xb8] sm:$0xff] %v8877_v38   ;;  %v1854_v43 = vld [vmem:[#allocation2 + $0xb0] sm:$0xf] }
 0x119   : > { %v1096_v46 = vadd.f32 %v9649_v30, %v1028_v42  ;;  %912 = vmatmul.bf16.gmra.mxu0 %v8603_v40  ;;  %v1138_v40 = vadd.f32 %v9649_v30, %v1070_v20 }
 0x11b   : > { %v1160_v49 = vmax.f32 %v1096_v46, 0.0 }
 0x11d   : > { %v1249_v50 = vsel %vm1229_vm7, %v1160_v49, 0.0 }
 0x11e   : > { %v8787_v51 = vpack.c.bf16 %v9666_v47, %v1249_v50  ;;  %v875_v52 = vpop.f32.mrf.mxu0  ;;  %v8634_v53 = vld [vmem:[#allocation2 + $0x20] sm:$0xff] }
 0x11f   : > { %v2576_v55 = vld [vmem:[#allocation2 + $0x20] sm:$0xe]  ;;  %v2577_v56 = vld [vmem:[#allocation2 + $0x24] sm:$0xf]  ;;  %1718 = vmatmul.bf16.gmra.mxu1 %v8634_v53  ;;  %v1000_v52 = vpop.f32.mrf.mxu3 }
 0x120   : > { %v1827_v57 = vld [vmem:[#allocation2 + $0x20] sm:$0xf]  ;;  %v1828_v58 = vld [vmem:[#allocation2 + $0x24] sm:$0xf]  ;;  %8931 = vst [vmem:[#allocation2 + $0x28] sm:$0xff] %v8787_v51   ;;  %v8077_v0 = vrot.slane %v2576_v55, 9 }
 0x121   : > { %v1921_v60 = vshrl.u32 %v1827_v57, 16  ;;  %v1924_v61 = vshll.u32 %v1827_v57, 16  ;;  %v1930_v62 = vshll.u32 %v1828_v58, 16  ;;  %v1934_v63 = vshrl.u32 %v1828_v58, 16  ;;  %v980_v57 = vpop.f32.mrf.mxu2 }
 0x122   : > { %v2685_v3 = vrot.slane %v2577_v56, 5  ;;  %v1210_v51 = vmax.f32 %v1146_v32, 0.0  ;;  %v1202_v55 = vmax.f32 %v1138_v40, 0.0  ;;  %v1079_v56 = vmul.f32 %v9642_v25, %v1000_v52 }
 0x123   : > { %v1923_v5 = vrot.slane %v1921_v60, 4  ;;  %v1926_v6 = vrot.slane %v1924_v61, 5  ;;  %v1932_v7 = vrot.slane %v1930_v62, 5  ;;  %v1936_v9 = vrot.slane %v1934_v63, 4  ;;  %v968_v63 = vpop.f32.mrf.mxu1 }
 0x124   : > { %v2686_v22 = vsel %vm9623_vm2, %v8077_v0, %v2685_v3  ;;  %v2687_v27 = vrot.slane %v2685_v3, 4  ;;  %v1071_v59 = vmul.f32 %v9642_v25, %v980_v57  ;;  %v1147_v62 = vadd.f32 %v9649_v30, %v1079_v56 }
 0x125   : > { %v1927_v16 = vor.u32 %v1926_v6, %v1923_v5  ;;  %v1937_v24 = vor.u32 %v1936_v9, %v1932_v7  ;;  %v2802_v45 = vunpack.c.l.b16 %v2686_v22  ;;  %v1299_v1 = vsel %vm1223_vm6, %v1210_v51, 0.0 }
 0x126   : > { %v878_v21 = vpop.f32.mrf.mxu0  ;;  %v1139_v2 = vadd.f32 %v9649_v30, %v1071_v59  ;;  %v1291_v5 = vsel %vm1223_vm6, %v1202_v55, 0.0  ;;  %v1211_v6 = vmax.f32 %v1147_v62, 0.0  ;;  %v1066_v19 = vmul.f32 %v9642_v25, %v968_v63 }
 0x127   : > { %v1928_v23 = vrot.slane %v1927_v16, 4  ;;  %v2578_v26 = vld [vmem:[#allocation2 + $0x28] sm:$0x1]  ;;  %v1030_v35 = vmul.f32 %v9642_v25, %v878_v21  ;;  %v1938_v42 = vrot.slane %v1937_v24, 4  ;;  %v1003_v12 = vpop.f32.mrf.mxu3 }
 0x128   : > { %v1829_v28 = vld [vmem:[#allocation2 + $0x28] sm:$0x1]  ;;  %v2688_v36 = vrot.slane %v2578_v26, 5  ;;  %v8912_v9 = vpack.c.bf16 %v1211_v6, %v1299_v1  ;;  %v1080_v20 = vmul.f32 %v9642_v25, %v1003_v12 }
 0x129   : > { %v1940_v37 = vshll.u32 %v1829_v28, 16  ;;  %917 = vmatmul.bf16.gmra.mxu0 %v8604_v17  ;;  %v1933_v39 = vsel %vm9631_vm5, %v1928_v23, %v1932_v7  ;;  %v1098_v48 = vadd.f32 %v9649_v30, %v1030_v35  ;;  %v1203_v7 = vmax.f32 %v1139_v2, 0.0  ;;  %v983_v17 = vpop.f32.mrf.mxu2 }
 0x12a   : > { %v2689_v41 = vsel %vm9623_vm2, %v2687_v27, %v2688_v36  ;;  %v2277_v50 = vunpack.c.l.b16 %v1933_v39  ;;  %8956 = vst [vmem:[#allocation2 + $0xf0] sm:$0xff] %v8912_v9   ;;  %v1072_v21 = vmul.f32 %v9642_v25, %v983_v17  ;;  %v1148_v24 = vadd.f32 %v9649_v30, %v1080_v20 }
 0x12b   : > { %v1942_v44 = vrot.slane %v1940_v37, 5  ;;  %v2803_v46 = vunpack.c.l.b16 %v2689_v41  ;;  %v1162_v0 = vmax.f32 %v1098_v48, 0.0  ;;  %v8892_v11 = vpack.c.bf16 %v1203_v7, %v1291_v5  ;;  %v970_v22 = vpop.f32.mrf.mxu1  ;;  %v8606_v5 = vld [vmem:[%s9535_s21 + $0x80] sm:$0xff] }
 0x12c   : > { %v1140_v26 = vadd.f32 %v9649_v30, %v1072_v21  ;;  %v1134_v27 = vadd.f32 %v9649_v30, %v1066_v19  ;;  %v1212_v29 = vmax.f32 %v1148_v24, 0.0  ;;  %v1067_v55 = vmul.f32 %v9642_v25, %v970_v22 }
 0x12d   : > { %v1943_v49 = vsel %vm9631_vm5, %v1938_v42, %v1942_v44  ;;  %v2832_v53 = vpack.c.b16 %v2803_v46, %v2802_v45  ;;  %v1251_v10 = vsel %vm1223_vm6, %v1162_v0, 0.0  ;;  %8952 = vst [vmem:[#allocation2 + $0xd0] sm:$0xff] %v8892_v11  }
 0x12e   : > { %v2278_v54 = vunpack.c.l.b16 %v1943_v49  ;;  %v880_v58 = vpop.f32.mrf.mxu0  ;;  %v1204_v31 = vmax.f32 %v1140_v26, 0.0  ;;  %v1301_v35 = vsel %vm1229_vm7, %v1212_v29, 0.0  ;;  %v1198_v40 = vmax.f32 %v1134_v27, 0.0 }
 0x12f   : > { %v1031_v60 = vmul.f32 %v9642_v25, %v880_v58  ;;  %2928 = vmatmul.bf16.gmra.mxu3 %v2832_v53  ;;  %v1005_v32 = vpop.f32.mrf.mxu3  ;;  %v8917_v42 = vpack.c.bf16 %v9666_v47, %v1301_v35  ;;  %v1135_v63 = vadd.f32 %v9649_v30, %v1067_v55 }
 0x130   : > { %v2307_v61 = vpack.c.b16 %v2278_v54, %v2277_v50  ;;  %v1293_v36 = vsel %vm1229_vm7, %v1204_v31, 0.0  ;;  %v1287_v1 = vsel %vm1223_vm6, %v1198_v40, 0.0 }
 0x131   : > { %v1099_v3 = vadd.f32 %v9649_v30, %v1031_v60  ;;  %v8897_v44 = vpack.c.bf16 %v9666_v47, %v1293_v36  ;;  %v985_v45 = vpop.f32.mrf.mxu2  ;;  %8957 = vst [vmem:[#allocation2 + $0xf8] sm:$0xff] %v8917_v42   ;;  %v1199_v6 = vmax.f32 %v1135_v63, 0.0 }
 0x132   : > { %2403 = vmatmul.bf16.gmra.mxu2 %v2307_v61 }
 0x133   : > { %v1163_v8 = vmax.f32 %v1099_v3, 0.0  ;;  %v973_v50 = vpop.f32.mrf.mxu1  ;;  %8953 = vst [vmem:[#allocation2 + $0xd8] sm:$0xff] %v8897_v44  }
 0x134   : > { %v1068_v56 = vmul.f32 %v9642_v25, %v973_v50 }
 0x135   : > { %v8792_v14 = vpack.c.bf16 %v1163_v8, %v1251_v10 }
 0x136   : > { %v883_v16 = vpop.f32.mrf.mxu0  ;;  %v1136_v0 = vadd.f32 %v9649_v30, %v1068_v56 }
 0x137   : > { %8932 = vst [vmem:[#allocation2 + $0x30] sm:$0xff] %v8792_v14   ;;  %v1032_v18 = vmul.f32 %v9642_v25, %v883_v16  ;;  %v1008_v3 = vpop.f32.mrf.mxu3 }
 0x138   : > { %v1200_v7 = vmax.f32 %v1136_v0, 0.0  ;;  %v1082_v8 = vmul.f32 %v9642_v25, %v1008_v3 }
 0x139   : > { %v1100_v23 = vadd.f32 %v9649_v30, %v1032_v18  ;;  %922 = vmatmul.bf16.gmra.mxu0 %v8605_v15  ;;  %v988_v12 = vpop.f32.mrf.mxu2  ;;  %v8882_v18 = vpack.c.bf16 %v1199_v6, %v1287_v1 }
 0x13a   : > { %v1289_v19 = vsel %vm1229_vm7, %v1200_v7, 0.0  ;;  %v1150_v26 = vadd.f32 %v9649_v30, %v1082_v8  ;;  %v1074_v27 = vmul.f32 %v9642_v25, %v988_v12 }
 0x13b   : > { %v1164_v28 = vmax.f32 %v1100_v23, 0.0  ;;  %v975_v20 = vpop.f32.mrf.mxu1  ;;  %v8887_v24 = vpack.c.bf16 %v9666_v47, %v1289_v19  ;;  %8950 = vst [vmem:[#allocation2 + $0xc0] sm:$0xff] %v8882_v18  }
 0x13c   : > { %v1142_v36 = vadd.f32 %v9649_v30, %v1074_v27  ;;  %v1214_v44 = vmax.f32 %v1150_v26, 0.0 }
 0x13d   : > { %v1253_v34 = vsel %vm1229_vm7, %v1164_v28, 0.0  ;;  %8951 = vst [vmem:[#allocation2 + $0xc8] sm:$0xff] %v8887_v24  }
 0x13e   : > { %v8797_v37 = vpack.c.bf16 %v9666_v47, %v1253_v34  ;;  %v885_v38 = vpop.f32.mrf.mxu0  ;;  %v8635_v39 = vld [vmem:[#allocation2 + $0x30] sm:$0xff]  ;;  %v1303_v56 = vsel %vm1223_vm6, %v1214_v44, 0.0 }
 0x13f   : > { %v2579_v41 = vld [vmem:[#allocation2 + $0x30] sm:$0xe]  ;;  %v2580_v46 = vld [vmem:[#allocation2 + $0x34] sm:$0xf]  ;;  %1723 = vmatmul.bf16.gmra.mxu1 %v8635_v39  ;;  %v1010_v39 = vpop.f32.mrf.mxu3 }
 0x140   : > { %v1830_v48 = vld [vmem:[#allocation2 + $0x30] sm:$0xf]  ;;  %v1831_v49 = vld [vmem:[#allocation2 + $0x34] sm:$0xf]  ;;  %8933 = vst [vmem:[#allocation2 + $0x38] sm:$0xff] %v8797_v37   ;;  %v8078_v57 = vrot.slane %v2579_v41, 9 }
 0x141   : > { %v1945_v51 = vshrl.u32 %v1830_v48, 16  ;;  %v1948_v52 = vshll.u32 %v1830_v48, 16  ;;  %v1954_v53 = vshll.u32 %v1831_v49, 16  ;;  %v1958_v54 = vshrl.u32 %v1831_v49, 16  ;;  %v990_v49 = vpop.f32.mrf.mxu2 }
 0x142   : > { %v2692_v61 = vrot.slane %v2580_v46, 5  ;;  %v1206_v46 = vmax.f32 %v1142_v36, 0.0  ;;  %v1083_v48 = vmul.f32 %v9642_v25, %v1010_v39 }
 0x143   : > { %v1947_v58 = vrot.slane %v1945_v51, 4  ;;  %v1950_v59 = vrot.slane %v1948_v52, 5  ;;  %v1956_v60 = vrot.slane %v1954_v53, 5  ;;  %v1960_v62 = vrot.slane %v1958_v54, 4 }
 0x144   : > { %v2693_v15 = vsel %vm9623_vm2, %v8078_v57, %v2692_v61  ;;  %v2694_v16 = vrot.slane %v2692_v61, 4  ;;  %v1075_v52 = vmul.f32 %v9642_v25, %v990_v49  ;;  %v1151_v54 = vadd.f32 %v9649_v30, %v1083_v48 }
 0x145   : > { %v1951_v2 = vor.u32 %v1950_v59, %v1947_v58  ;;  %v1961_v11 = vor.u32 %v1960_v62, %v1956_v60  ;;  %v2804_v34 = vunpack.c.l.b16 %v2693_v15  ;;  %v1295_v58 = vsel %vm1223_vm6, %v1206_v46, 0.0  ;;  %v8608_v46 = vld [vmem:[%s9535_s21 + $0x90] sm:$0xff] }
 0x146   : > { %v888_v9 = vpop.f32.mrf.mxu0  ;;  %v1143_v57 = vadd.f32 %v9649_v30, %v1075_v52  ;;  %v1215_v59 = vmax.f32 %v1151_v54, 0.0 }
 0x147   : > { %v1952_v10 = vrot.slane %v1951_v2, 4  ;;  %v2581_v14 = vld [vmem:[#allocation2 + $0x38] sm:$0x1]  ;;  %v1034_v21 = vmul.f32 %v9642_v25, %v888_v9  ;;  %v1962_v31 = vrot.slane %v1961_v11, 4  ;;  %v1013_v0 = vpop.f32.mrf.mxu3  ;;  %v8607_v2 = vld [vmem:[%s9535_s21 + $0x88] sm:$0xff] }
 0x148   : > { %v1832_v17 = vld [vmem:[#allocation2 + $0x38] sm:$0x1]  ;;  %v2695_v22 = vrot.slane %v2581_v14, 5  ;;  %v1207_v61 = vmax.f32 %v1143_v57, 0.0  ;;  %v8922_v63 = vpack.c.bf16 %v1215_v59, %v1303_v56  ;;  %v1084_v8 = vmul.f32 %v9642_v25, %v1013_v0 }
 0x149   : > { %v1964_v23 = vshll.u32 %v1832_v17, 16  ;;  %927 = vmatmul.bf16.gmra.mxu0 %v8606_v5  ;;  %v1957_v29 = vsel %vm9631_vm5, %v1952_v10, %v1956_v60  ;;  %v1102_v37 = vadd.f32 %v9649_v30, %v1034_v21  ;;  %v993_v6 = vpop.f32.mrf.mxu2 }
 0x14a   : > { %v2696_v28 = vsel %vm9623_vm2, %v2694_v16, %v2695_v22  ;;  %v2279_v41 = vunpack.c.l.b16 %v1957_v29  ;;  %v8902_v3 = vpack.c.bf16 %v1207_v61, %v1295_v58  ;;  %8958 = vst [vmem:[#allocation2 + $0x100] sm:$0xff] %v8922_v63   ;;  %v1076_v9 = vmul.f32 %v9642_v25, %v993_v6  ;;  %v1709_v58 = vpop.f32.mrf.mxu1 }
 0x14b   : > { %v1966_v32 = vrot.slane %v1964_v23, 5  ;;  %v2805_v35 = vunpack.c.l.b16 %v2696_v28  ;;  %v1166_v53 = vmax.f32 %v1102_v37, 0.0  ;;  %v1152_v11 = vadd.f32 %v9649_v30, %v1084_v8 }
 0x14c   : > { %8954 = vst [vmem:[#allocation2 + $0xe0] sm:$0xff] %v8902_v3   ;;  %v1144_v12 = vadd.f32 %v9649_v30, %v1076_v9 }
 0x14d   : > { %v1967_v38 = vsel %vm9631_vm5, %v1962_v31, %v1966_v32  ;;  %v2833_v40 = vpack.c.b16 %v2805_v35, %v2804_v34  ;;  %v1255_v62 = vsel %vm1223_vm6, %v1166_v53, 0.0  ;;  %v1216_v15 = vmax.f32 %v1152_v11, 0.0  ;;  %v8734_v11 = vld [vmem:[#allocation9 + $0x1b0] sm:$0xff] }
 0x14e   : > { %v2280_v42 = vunpack.c.l.b16 %v1967_v38  ;;  %v890_v45 = vpop.f32.mrf.mxu0  ;;  %v1208_v16 = vmax.f32 %v1144_v12, 0.0 }
 0x14f   : > { %v1035_v50 = vmul.f32 %v9642_v25, %v890_v45  ;;  %2933 = vmatmul.bf16.gmra.mxu3 %v2833_v40  ;;  %v1015_v17 = vpop.f32.mrf.mxu3  ;;  %v1305_v19 = vsel %vm1229_vm7, %v1216_v15, 0.0 }
 0x150   : > { %v2308_v51 = vpack.c.b16 %v2280_v42, %v2279_v41  ;;  %v1297_v20 = vsel %vm1229_vm7, %v1208_v16, 0.0  ;;  %v8927_v26 = vpack.c.bf16 %v9666_v47, %v1305_v19  ;;  %v8733_v17 = vld [vmem:[#allocation9 + $0x1a8] sm:$0xff] }
 0x151   : > { %v1103_v55 = vadd.f32 %v9649_v30, %v1035_v50  ;;  %v8907_v27 = vpack.c.bf16 %v9666_v47, %v1297_v20  ;;  %v995_v28 = vpop.f32.mrf.mxu2 }
 0x152   : > { %2408 = vmatmul.bf16.gmra.mxu2 %v2308_v51  ;;  %8959 = vst [vmem:[#allocation2 + $0x108] sm:$0xff] %v8927_v26   ;;  %v8703_v26 = vld [vmem:[#allocation9 + $0x138] sm:$0xff] }
 0x153   : > { %v1167_v60 = vmax.f32 %v1103_v55, 0.0  ;;  %8955 = vst [vmem:[#allocation2 + $0xe8] sm:$0xff] %v8907_v27   ;;  %v8695_v27 = vld [vmem:[#allocation9 + $0xf8] sm:$0xff]  ;;  %4034 = vmatpush.bf16.msra.mxu2 %v8703_v26 }
 0x154   : > { %3288 = vmatpush.bf16.msra.mxu1 %v8695_v27 }
 0x155   : > { %v8802_v1 = vpack.c.bf16 %v1167_v60, %v1255_v62 }
 0x156   : > { %v893_v5 = vpop.f32.mrf.mxu0 }
 0x157   : > { %8934 = vst [vmem:[#allocation2 + $0x40] sm:$0xff] %v8802_v1   ;;  %v1036_v7 = vmul.f32 %v9642_v25, %v893_v5  ;;  %v8735_v1 = vld [vmem:[#allocation9 + $0x1b8] sm:$0xff]  ;;  %v9840_v26 = vpop.f32.mrf.mxu3 }
 0x158   : > { %4935 = vmatpush.bf16.msrb.mxu0 %v8735_v1 }
 0x159   : > { %v1104_v10 = vadd.f32 %v9649_v30, %v1036_v7  ;;  %932 = vmatmul.bf16.gmra.mxu0 %v8607_v2  ;;  %v2394_v60 = vpop.f32.mrf.mxu2 }
 0x15a   : > { %v9808_v0 = vadd.f32 %v2394_v60, %v1709_v58  ;;  %v8728_v60 = vld [vmem:[#allocation9 + $0x180] sm:$0xff] }
 0x15b   : > { %v1168_v14 = vmax.f32 %v1104_v10, 0.0 }
 0x15c   : > { %4936 = vmatpush.bf16.msrb.mxu0 %v8734_v11 }
 0x15d   : > { %v1257_v18 = vsel %vm1229_vm7, %v1168_v14, 0.0 }
 0x15e   : > { %v8807_v21 = vpack.c.bf16 %v9666_v47, %v1257_v18  ;;  %v895_v22 = vpop.f32.mrf.mxu0  ;;  %v8636_v23 = vld [vmem:[#allocation2 + $0x40] sm:$0xff] }
 0x15f   : > { %v2582_v24 = vld [vmem:[#allocation2 + $0x40] sm:$0xe]  ;;  %v2583_v29 = vld [vmem:[#allocation2 + $0x44] sm:$0xf]  ;;  %1728 = vmatmul.bf16.gmra.mxu1 %v8636_v23 }
 0x160   : > { %v1833_v31 = vld [vmem:[#allocation2 + $0x40] sm:$0xf]  ;;  %v1834_v32 = vld [vmem:[#allocation2 + $0x44] sm:$0xf]  ;;  %8935 = vst [vmem:[#allocation2 + $0x48] sm:$0xff] %v8807_v21   ;;  %v8079_v41 = vrot.slane %v2582_v24, 9  ;;  %4937 = vmatpush.bf16.msrb.mxu0 %v8733_v17 }
 0x161   : > { %v1969_v34 = vshrl.u32 %v1833_v31, 16  ;;  %v1972_v35 = vshll.u32 %v1833_v31, 16  ;;  %v1978_v36 = vshll.u32 %v1834_v32, 16  ;;  %v1982_v37 = vshrl.u32 %v1834_v32, 16  ;;  %v8609_v21 = vld [vmem:[%s9535_s21 + $0x98] sm:$0xff]  ;;  %v8732_v23 = vld [vmem:[#allocation9 + $0x1a0] sm:$0xff] }
 0x162   : > { %v2699_v42 = vrot.slane %v2583_v29, 5  ;;  %v8731_v29 = vld [vmem:[#allocation9 + $0x198] sm:$0xff] }
 0x163   : > { %v1971_v38 = vrot.slane %v1969_v34, 4  ;;  %v1974_v39 = vrot.slane %v1972_v35, 5  ;;  %v1980_v40 = vrot.slane %v1978_v36, 5  ;;  %v1984_v44 = vrot.slane %v1982_v37, 4 }
 0x164   : > { %v2700_v52 = vsel %vm9623_vm2, %v8079_v41, %v2699_v42  ;;  %v2701_v55 = vrot.slane %v2699_v42, 4  ;;  %4938 = vmatpush.bf16.msrb.mxu0 %v8732_v23 }
 0x165   : > { %v1975_v45 = vor.u32 %v1974_v39, %v1971_v38  ;;  %v1985_v48 = vor.u32 %v1984_v44, %v1980_v40  ;;  %v2806_v2 = vunpack.c.l.b16 %v2700_v52 }
 0x166   : > { %v898_v49 = vpop.f32.mrf.mxu0 }
 0x167   : > { %v1976_v50 = vrot.slane %v1975_v45, 4  ;;  %v2584_v51 = vld [vmem:[#allocation2 + $0x48] sm:$0x1]  ;;  %v1038_v54 = vmul.f32 %v9642_v25, %v898_v49  ;;  %v1986_v59 = vrot.slane %v1985_v48, 4 }
 0x168   : > { %v1835_v53 = vld [vmem:[#allocation2 + $0x48] sm:$0x1]  ;;  %v2702_v56 = vrot.slane %v2584_v51, 5  ;;  %4939 = vmatpush.bf16.msrb.mxu0 %v8731_v29 }
 0x169   : > { %v1988_v57 = vshll.u32 %v1835_v53, 16  ;;  %937 = vmatmul.bf16.gmra.mxu0 %v8608_v46  ;;  %v1981_v62 = vsel %vm9631_vm5, %v1976_v50, %v1980_v40  ;;  %v1106_v5 = vadd.f32 %v9649_v30, %v1038_v54  ;;  %v8730_v46 = vld [vmem:[#allocation9 + $0x190] sm:$0xff]  ;;  %v8729_v51 = vld [vmem:[#allocation9 + $0x188] sm:$0xff] }
 0x16a   : > { %v2703_v61 = vsel %vm9623_vm2, %v2701_v55, %v2702_v56  ;;  %v2281_v8 = vunpack.c.l.b16 %v1981_v62  ;;  %v8610_v56 = vld [vmem:[%s9535_s21 + $0xa0] sm:$0xff] }
 0x16b   : > { %v1990_v63 = vrot.slane %v1988_v57, 5  ;;  %v2807_v3 = vunpack.c.l.b16 %v2703_v61  ;;  %v1170_v15 = vmax.f32 %v1106_v5, 0.0 }
 0x16c   : > { %4940 = vmatpush.bf16.msrb.mxu0 %v8730_v46 }
 0x16d   : > { %v1991_v6 = vsel %vm9631_vm5, %v1986_v59, %v1990_v63  ;;  %v2834_v7 = vpack.c.b16 %v2807_v3, %v2806_v2  ;;  %v1259_v19 = vsel %vm1223_vm6, %v1170_v15, 0.0 }
 0x16e   : > { %v2282_v9 = vunpack.c.l.b16 %v1991_v6  ;;  %v900_v10 = vpop.f32.mrf.mxu0  ;;  %v9827_v6 = vpop.f32.mrf.mxu1 }
 0x16f   : > { %v1039_v12 = vmul.f32 %v9642_v25, %v900_v10  ;;  %2938 = vmatmul.bf16.gmra.mxu3 %v2834_v7  ;;  %v9829_v7 = vpop.f32.mrf.mxu2 }
 0x170   : > { %v2309_v14 = vpack.c.b16 %v2282_v9, %v2281_v8  ;;  %4941 = vmatpush.bf16.msrb.mxu0 %v8729_v51 }
 0x171   : > { %v1107_v16 = vadd.f32 %v9649_v30, %v1039_v12 }
 0x172   : > { %2413 = vmatmul.bf16.gmra.mxu2 %v2309_v14 }
 0x173   : > { %v1171_v18 = vmax.f32 %v1107_v16, 0.0 }
 0x174   : > { %4942 = vmatpush.bf16.msrb.mxu0 %v8728_v60 }
 0x175   : > { %v8812_v20 = vpack.c.bf16 %v1171_v18, %v1259_v19 }
 0x176   : > { %v903_v22 = vpop.f32.mrf.mxu0 }
 0x177   : > { %8936 = vst [vmem:[#allocation2 + $0x50] sm:$0xff] %v8812_v20   ;;  %v1040_v24 = vmul.f32 %v9642_v25, %v903_v22 }
 0x179   : > { %v1108_v28 = vadd.f32 %v9649_v30, %v1040_v24  ;;  %942 = vmatmul.bf16.gmra.mxu0 %v8609_v21 }
 0x17b   : > { %v1172_v31 = vmax.f32 %v1108_v28, 0.0 }
 0x17c   : > { %v1714_v28 = vpop.f32.mrf.mxu1 }
 0x17d   : > { %v1261_v32 = vsel %vm1229_vm7, %v1172_v31, 0.0 }
 0x17e   : > { %v8817_v34 = vpack.c.bf16 %v9666_v47, %v1261_v32  ;;  %v905_v35 = vpop.f32.mrf.mxu0  ;;  %v8637_v36 = vld [vmem:[#allocation2 + $0x50] sm:$0xff] }
 0x17f   : > { %v2585_v37 = vld [vmem:[#allocation2 + $0x50] sm:$0xe]  ;;  %v2586_v38 = vld [vmem:[#allocation2 + $0x54] sm:$0xf]  ;;  %1733 = vmatmul.bf16.gmra.mxu1 %v8637_v36  ;;  %v8611_v35 = vld [vmem:[%s9535_s21 + $0xa8] sm:$0xff] }
 0x180   : > { %v1836_v39 = vld [vmem:[#allocation2 + $0x50] sm:$0xf]  ;;  %v1837_v40 = vld [vmem:[#allocation2 + $0x54] sm:$0xf]  ;;  %8937 = vst [vmem:[#allocation2 + $0x58] sm:$0xff] %v8817_v34   ;;  %v8080_v52 = vrot.slane %v2585_v37, 9 }
 0x181   : > { %v1993_v41 = vshrl.u32 %v1836_v39, 16  ;;  %v1996_v42 = vshll.u32 %v1836_v39, 16  ;;  %v2002_v44 = vshll.u32 %v1837_v40, 16  ;;  %v2006_v45 = vshrl.u32 %v1837_v40, 16  ;;  %v8694_v39 = vld [vmem:[#allocation9 + $0xf0] sm:$0xff] }
 0x182   : > { %v2706_v53 = vrot.slane %v2586_v38, 5  ;;  %v8702_v38 = vld [vmem:[#allocation9 + $0x130] sm:$0xff]  ;;  %3289 = vmatpush.bf16.msra.mxu1 %v8694_v39 }
 0x183   : > { %v1995_v48 = vrot.slane %v1993_v41, 4  ;;  %v1998_v49 = vrot.slane %v1996_v42, 5  ;;  %v2004_v50 = vrot.slane %v2002_v44, 5  ;;  %v2008_v54 = vrot.slane %v2006_v45, 4  ;;  %4035 = vmatpush.bf16.msra.mxu2 %v8702_v38  ;;  %v9847_v42 = vpop.f32.mrf.mxu3 }
 0x184   : > { %v2707_v62 = vsel %vm9623_vm2, %v8080_v52, %v2706_v53  ;;  %v2708_v2 = vrot.slane %v2706_v53, 4 }
 0x185   : > { %v1999_v55 = vor.u32 %v1998_v49, %v1995_v48  ;;  %v2009_v59 = vor.u32 %v2008_v54, %v2004_v50  ;;  %v2808_v12 = vunpack.c.l.b16 %v2707_v62 }
 0x186   : > { %v908_v57 = vpop.f32.mrf.mxu0 }
 0x187   : > { %v2000_v58 = vrot.slane %v1999_v55, 4  ;;  %v2587_v61 = vld [vmem:[#allocation2 + $0x58] sm:$0x1]  ;;  %v1042_v1 = vmul.f32 %v9642_v25, %v908_v57  ;;  %v2010_v10 = vrot.slane %v2009_v59, 4 }
 0x188   : > { %v1838_v63 = vld [vmem:[#allocation2 + $0x58] sm:$0x1]  ;;  %v2709_v3 = vrot.slane %v2587_v61, 5 }
 0x189   : > { %v2012_v5 = vshll.u32 %v1838_v63, 16  ;;  %947 = vmatmul.bf16.gmra.mxu0 %v8610_v56  ;;  %v2005_v9 = vsel %vm9631_vm5, %v2000_v58, %v2004_v50  ;;  %v1110_v15 = vadd.f32 %v9649_v30, %v1042_v1 }
 0x18a   : > { %v2710_v8 = vsel %vm9623_vm2, %v2708_v2, %v2709_v3  ;;  %v2283_v18 = vunpack.c.l.b16 %v2005_v9  ;;  %v8712_v3 = vld [vmem:[#allocation2 + $0x20] sm:$0xff] }
 0x18b   : > { %v2014_v11 = vrot.slane %v2012_v5, 5  ;;  %v2809_v14 = vunpack.c.l.b16 %v2710_v8  ;;  %v1174_v23 = vmax.f32 %v1110_v15, 0.0 }
 0x18d   : > { %v2015_v16 = vsel %vm9631_vm5, %v2010_v10, %v2014_v11  ;;  %v2835_v17 = vpack.c.b16 %v2809_v14, %v2808_v12  ;;  %v1263_v29 = vsel %vm1223_vm6, %v1174_v23, 0.0  ;;  %v9859_v11 = vld [vmem:[%s11351_s2] ss:$0 sm:$0xff]  ;;  %v9866_v23 = vpop.f32.mrf.mxu1 }
 0x18e   : > { %v2284_v19 = vunpack.c.l.b16 %v2015_v16  ;;  %v910_v20 = vpop.f32.mrf.mxu0 }
 0x18f   : > { %v1043_v21 = vmul.f32 %v9642_v25, %v910_v20  ;;  %2943 = vmatmul.bf16.gmra.mxu3 %v2835_v17 }
 0x190   : > { %v2310_v22 = vpack.c.b16 %v2284_v19, %v2283_v18 }
 0x191   : > { %v1111_v24 = vadd.f32 %v9649_v30, %v1043_v21 }
 0x192   : > { %2418 = vmatmul.bf16.gmra.mxu2 %v2310_v22  ;;  %v2924_v62 = vpop.f32.mrf.mxu3 }
 0x193   : > { %v1175_v27 = vmax.f32 %v1111_v24, 0.0 }
 0x195   : > { %v2399_v31 = vpop.f32.mrf.mxu2  ;;  %v8822_v32 = vpack.c.bf16 %v1175_v27, %v1263_v29  ;;  %v9873_v27 = vld [vmem:[%s11352_s3] ss:$0 sm:$0xff] }
 0x196   : > { %v2508_v34 = vadd.f32 %v2399_v31, %v1714_v28  ;;  %v913_v36 = vpop.f32.mrf.mxu0 }
 0x197   : > { %8938 = vst [vmem:[#allocation2 + $0x60] sm:$0xff] %v8822_v32   ;;  %v1044_v37 = vmul.f32 %v9642_v25, %v913_v36 }
 0x198   : > { %v9854_v10 = vadd.f32 %v2924_v62, %v2508_v34 }
 0x199   : > { %v1112_v40 = vadd.f32 %v9649_v30, %v1044_v37  ;;  %952 = vmatmul.bf16.gmra.mxu0 %v8611_v35 }
 0x19b   : > { %v1176_v41 = vmax.f32 %v1112_v40, 0.0 }
 0x19d   : > { %v1265_v44 = vsel %vm1229_vm7, %v1176_v41, 0.0  ;;  %v9868_v24 = vpop.f32.mrf.mxu2  ;;  %v1719_v41 = vpop.f32.mrf.mxu1 }
 0x19e   : > { %v8827_v45 = vpack.c.bf16 %v9666_v47, %v1265_v44  ;;  %v915_v46 = vpop.f32.mrf.mxu0  ;;  %v8638_v48 = vld [vmem:[#allocation2 + $0x60] sm:$0xff] }
 0x19f   : > { %v2588_v49 = vld [vmem:[#allocation2 + $0x60] sm:$0xe]  ;;  %v2589_v50 = vld [vmem:[#allocation2 + $0x64] sm:$0xf]  ;;  %1738 = vmatmul.bf16.gmra.mxu1 %v8638_v48 }
 0x1a0   : > { %v1839_v25 = vld [vmem:[#allocation2 + $0x60] sm:$0xf]  ;;  %v1840_v51 = vld [vmem:[#allocation2 + $0x64] sm:$0xf]  ;;  %8939 = vst [vmem:[#allocation2 + $0x68] sm:$0xff] %v8827_v45   ;;  %v8081_v58 = vrot.slane %v2588_v49, 9 }
 0x1a1   : > { %v2017_v30 = vshrl.u32 %v1839_v25, 16  ;;  %v2020_v52 = vshll.u32 %v1839_v25, 16  ;;  %v2026_v53 = vshll.u32 %v1840_v51, 16  ;;  %v2030_v54 = vshrl.u32 %v1840_v51, 16  ;;  %v8713_v25 = vld [vmem:[#allocation2 + $0x30] sm:$0xff]  ;;  %v8701_v51 = vld [vmem:[#allocation9 + $0x128] sm:$0xff] }
 0x1a2   : > { %v2713_v59 = vrot.slane %v2589_v50, 5  ;;  %4036 = vmatpush.bf16.msra.mxu2 %v8701_v51 }
 0x1a3   : > { %v2019_v55 = vrot.slane %v2017_v30, 4  ;;  %v2022_v56 = vrot.slane %v2020_v52, 5  ;;  %v2028_v57 = vrot.slane %v2026_v53, 5  ;;  %v2032_v60 = vrot.slane %v2030_v54, 4  ;;  %v8693_v30 = vld [vmem:[#allocation9 + $0xe8] sm:$0xff] }
 0x1a4   : > { %v2714_v8 = vsel %vm9623_vm2, %v8081_v58, %v2713_v59  ;;  %v2715_v14 = vrot.slane %v2713_v59, 4  ;;  %3290 = vmatpush.bf16.msra.mxu1 %v8693_v30 }
 0x1a5   : > { %v2023_v61 = vor.u32 %v2022_v56, %v2019_v55  ;;  %v2033_v2 = vor.u32 %v2032_v60, %v2028_v57  ;;  %v2810_v21 = vunpack.c.l.b16 %v2714_v8 }
 0x1a6   : > { %v918_v63 = vpop.f32.mrf.mxu0 }
 0x1a7   : > { %v2024_v1 = vrot.slane %v2023_v61, 4  ;;  %v2590_v5 = vld [vmem:[#allocation2 + $0x68] sm:$0x1]  ;;  %v1046_v12 = vmul.f32 %v9859_v11, %v918_v63  ;;  %v2034_v19 = vrot.slane %v2033_v2, 4 }
 0x1a8   : > { %v1841_v9 = vld [vmem:[#allocation2 + $0x68] sm:$0x1]  ;;  %v2716_v15 = vrot.slane %v2590_v5, 5 }
 0x1a9   : > { %v2036_v16 = vshll.u32 %v1841_v9, 16  ;;  %4943 = vmatmul.bf16.vlgmr.msrb.gmra.mxu0 %v8712_v3  ;;  %v2029_v18 = vsel %vm9631_vm5, %v2024_v1, %v2028_v57  ;;  %v1114_v28 = vadd.f32 %v9873_v27, %v1046_v12 }
 0x1aa   : > { %v2717_v17 = vsel %vm9623_vm2, %v2715_v14, %v2716_v15  ;;  %v2285_v32 = vunpack.c.l.b16 %v2029_v18 }
 0x1ab   : > { %v2038_v20 = vrot.slane %v2036_v16, 5  ;;  %v2811_v22 = vunpack.c.l.b16 %v2717_v17  ;;  %v1178_v38 = vmax.f32 %v1114_v28, 0.0 }
 0x1ad   : > { %v2039_v29 = vsel %vm9631_vm5, %v2034_v19, %v2038_v20  ;;  %v2836_v31 = vpack.c.b16 %v2811_v22, %v2810_v21  ;;  %v1267_v44 = vsel %vm1223_vm6, %v1178_v38, 0.0  ;;  %v8714_v19 = vld [vmem:[#allocation2 + $0x40] sm:$0xff] }
 0x1ae   : > { %v2286_v34 = vunpack.c.l.b16 %v2039_v29  ;;  %v920_v35 = vpop.f32.mrf.mxu0 }
 0x1af   : > { %v1047_v36 = vmul.f32 %v9859_v11, %v920_v35  ;;  %2948 = vmatmul.bf16.gmra.mxu3 %v2836_v31 }
 0x1b0   : > { %v2311_v37 = vpack.c.b16 %v2286_v34, %v2285_v32 }
 0x1b1   : > { %v1115_v39 = vadd.f32 %v9873_v27, %v1047_v36 }
 0x1b2   : > { %2423 = vmatmul.bf16.gmra.mxu2 %v2311_v37 }
 0x1b3   : > { %v1179_v40 = vmax.f32 %v1115_v39, 0.0 }
 0x1b5   : > { %v2404_v45 = vpop.f32.mrf.mxu2  ;;  %v8832_v46 = vpack.c.bf16 %v1179_v40, %v1267_v44  ;;  %v9896_v40 = vpop.f32.mrf.mxu1 }
 0x1b6   : > { %v9882_v48 = vadd.f32 %v2404_v45, %v1719_v41  ;;  %v923_v49 = vpop.f32.mrf.mxu0 }
 0x1b7   : > { %8940 = vst [vmem:[#allocation2 + $0x70] sm:$0xff] %v8832_v46   ;;  %v1048_v50 = vmul.f32 %v9859_v11, %v923_v49 }
 0x1b9   : > { %v1116_v52 = vadd.f32 %v9873_v27, %v1048_v50  ;;  %4948 = vmatmul.bf16.gmra.mxu0 %v8713_v25 }
 0x1bb   : > { %v1180_v53 = vmax.f32 %v1116_v52, 0.0 }
 0x1bd   : > { %v1269_v54 = vsel %vm1229_vm7, %v1180_v53, 0.0  ;;  %v9898_v41 = vpop.f32.mrf.mxu2 }
 0x1be   : > { %v8837_v55 = vpack.c.bf16 %v9666_v47, %v1269_v54  ;;  %v925_v56 = vpop.f32.mrf.mxu0  ;;  %v8639_v57 = vld [vmem:[#allocation2 + $0x70] sm:$0xff]  ;;  %v9905_v54 = vpop.f32.mrf.mxu3 }
 0x1bf   : > { %v2591_v58 = vld [vmem:[#allocation2 + $0x70] sm:$0xe]  ;;  %v2592_v59 = vld [vmem:[#allocation2 + $0x74] sm:$0xf]  ;;  %1743 = vmatmul.bf16.gmra.mxu1 %v8639_v57  ;;  %v1724_v56 = vpop.f32.mrf.mxu1 }
 0x1c0   : > { %v1842_v60 = vld [vmem:[#allocation2 + $0x70] sm:$0xf]  ;;  %v1843_v61 = vld [vmem:[#allocation2 + $0x74] sm:$0xf]  ;;  %8941 = vst [vmem:[#allocation2 + $0x78] sm:$0xff] %v8837_v55   ;;  %v8082_v9 = vrot.slane %v2591_v58, 9 }
 0x1c1   : > { %v2041_v62 = vshrl.u32 %v1842_v60, 16  ;;  %v2044_v63 = vshll.u32 %v1842_v60, 16  ;;  %v2050_v1 = vshll.u32 %v1843_v61, 16  ;;  %v2054_v2 = vshrl.u32 %v1843_v61, 16 }
 0x1c2   : > { %v2720_v12 = vrot.slane %v2592_v59, 5 }
 0x1c3   : > { %v2043_v3 = vrot.slane %v2041_v62, 4  ;;  %v2046_v5 = vrot.slane %v2044_v63, 5  ;;  %v2052_v8 = vrot.slane %v2050_v1, 5  ;;  %v2056_v14 = vrot.slane %v2054_v2, 4  ;;  %v8715_v63 = vld [vmem:[#allocation2 + $0x50] sm:$0xff]  ;;  %v8700_v1 = vld [vmem:[#allocation9 + $0x120] sm:$0xff] }
 0x1c4   : > { %v2721_v21 = vsel %vm9623_vm2, %v8082_v9, %v2720_v12  ;;  %v2722_v29 = vrot.slane %v2720_v12, 4  ;;  %v8692_v2 = vld [vmem:[#allocation9 + $0xe0] sm:$0xff]  ;;  %4037 = vmatpush.bf16.msra.mxu2 %v8700_v1 }
 0x1c5   : > { %v2047_v15 = vor.u32 %v2046_v5, %v2043_v3  ;;  %v2057_v18 = vor.u32 %v2056_v14, %v2052_v8  ;;  %v2812_v38 = vunpack.c.l.b16 %v2721_v21  ;;  %3291 = vmatpush.bf16.msra.mxu1 %v8692_v2 }
 0x1c6   : > { %v928_v16 = vpop.f32.mrf.mxu0  ;;  %v2929_v5 = vpop.f32.mrf.mxu3 }
 0x1c7   : > { %v2048_v17 = vrot.slane %v2047_v15, 4  ;;  %v2593_v20 = vld [vmem:[#allocation2 + $0x78] sm:$0x1]  ;;  %v1050_v28 = vmul.f32 %v9859_v11, %v928_v16  ;;  %v2058_v36 = vrot.slane %v2057_v18, 4  ;;  %v9914_v9 = vadd.f32 %v2929_v5, %v9882_v48 }
 0x1c8   : > { %v1844_v22 = vld [vmem:[#allocation2 + $0x78] sm:$0x1]  ;;  %v2723_v31 = vrot.slane %v2593_v20, 5 }
 0x1c9   : > { %v2060_v32 = vshll.u32 %v1844_v22, 16  ;;  %4953 = vmatmul.bf16.gmra.mxu0 %v8714_v19  ;;  %v2053_v35 = vsel %vm9631_vm5, %v2048_v17, %v2052_v8  ;;  %v1118_v44 = vadd.f32 %v9873_v27, %v1050_v28 }
 0x1ca   : > { %v2724_v34 = vsel %vm9623_vm2, %v2722_v29, %v2723_v31  ;;  %v2287_v49 = vunpack.c.l.b16 %v2053_v35 }
 0x1cb   : > { %v2062_v37 = vrot.slane %v2060_v32, 5  ;;  %v2813_v39 = vunpack.c.l.b16 %v2724_v34  ;;  %v1182_v52 = vmax.f32 %v1118_v44, 0.0 }
 0x1cd   : > { %v2063_v45 = vsel %vm9631_vm5, %v2058_v36, %v2062_v37  ;;  %v2837_v46 = vpack.c.b16 %v2813_v39, %v2812_v38  ;;  %v1271_v57 = vsel %vm1223_vm6, %v1182_v52, 0.0 }
 0x1ce   : > { %v2288_v50 = vunpack.c.l.b16 %v2063_v45  ;;  %v930_v25 = vpop.f32.mrf.mxu0  ;;  %v8716_v45 = vld [vmem:[#allocation2 + $0x60] sm:$0xff] }
 0x1cf   : > { %v1051_v51 = vmul.f32 %v9859_v11, %v930_v25  ;;  %2953 = vmatmul.bf16.gmra.mxu3 %v2837_v46 }
 0x1d0   : > { %v2312_v30 = vpack.c.b16 %v2288_v50, %v2287_v49 }
 0x1d1   : > { %v1119_v53 = vadd.f32 %v9873_v27, %v1051_v51 }
 0x1d2   : > { %2428 = vmatmul.bf16.gmra.mxu2 %v2312_v30 }
 0x1d3   : > { %v1183_v55 = vmax.f32 %v1119_v53, 0.0 }
 0x1d5   : > { %v2409_v58 = vpop.f32.mrf.mxu2  ;;  %v8842_v59 = vpack.c.bf16 %v1183_v55, %v1271_v57 }
 0x1d6   : > { %v9909_v60 = vadd.f32 %v2409_v58, %v1724_v56  ;;  %v933_v61 = vpop.f32.mrf.mxu0 }
 0x1d7   : > { %8942 = vst [vmem:[#allocation2 + $0x80] sm:$0xff] %v8842_v59   ;;  %v1052_v62 = vmul.f32 %v9859_v11, %v933_v61  ;;  %v9926_v61 = vpop.f32.mrf.mxu1 }
 0x1d9   : > { %v1120_v3 = vadd.f32 %v9873_v27, %v1052_v62  ;;  %4958 = vmatmul.bf16.gmra.mxu0 %v8715_v63 }
 0x1db   : > { %v1184_v8 = vmax.f32 %v1120_v3, 0.0 }
 0x1dd   : > { %v1273_v12 = vsel %vm1229_vm7, %v1184_v8, 0.0  ;;  %v9928_v62 = vpop.f32.mrf.mxu2 }
 0x1de   : > { %v8847_v14 = vpack.c.bf16 %v9666_v47, %v1273_v12  ;;  %v935_v15 = vpop.f32.mrf.mxu0  ;;  %v8640_v16 = vld [vmem:[#allocation2 + $0x80] sm:$0xff] }
 0x1df   : > { %v2594_v17 = vld [vmem:[#allocation2 + $0x80] sm:$0xe]  ;;  %v2595_v18 = vld [vmem:[#allocation2 + $0x84] sm:$0xf]  ;;  %1748 = vmatmul.bf16.gmra.mxu1 %v8640_v16 }
 0x1e0   : > { %v1845_v19 = vld [vmem:[#allocation2 + $0x80] sm:$0xf]  ;;  %v1846_v20 = vld [vmem:[#allocation2 + $0x84] sm:$0xf]  ;;  %8943 = vst [vmem:[#allocation2 + $0x88] sm:$0xff] %v8847_v14   ;;  %v8083_v34 = vrot.slane %v2594_v17, 9  ;;  %v9935_v17 = vpop.f32.mrf.mxu3 }
 0x1e1   : > { %v2065_v21 = vshrl.u32 %v1845_v19, 16  ;;  %v2068_v22 = vshll.u32 %v1845_v19, 16  ;;  %v2074_v28 = vshll.u32 %v1846_v20, 16  ;;  %v2078_v29 = vshrl.u32 %v1846_v20, 16  ;;  %v1729_v19 = vpop.f32.mrf.mxu1 }
 0x1e2   : > { %v2727_v35 = vrot.slane %v2595_v18, 5 }
 0x1e3   : > { %v2067_v31 = vrot.slane %v2065_v21, 4  ;;  %v2070_v48 = vrot.slane %v2068_v22, 5  ;;  %v2076_v32 = vrot.slane %v2074_v28, 5  ;;  %v2080_v36 = vrot.slane %v2078_v29, 4 }
 0x1e4   : > { %v2728_v49 = vsel %vm9623_vm2, %v8083_v34, %v2727_v35  ;;  %v2729_v51 = vrot.slane %v2727_v35, 4  ;;  %v8691_v34 = vld [vmem:[#allocation9 + $0xd8] sm:$0xff] }
 0x1e5   : > { %v2071_v37 = vor.u32 %v2070_v48, %v2067_v31  ;;  %v2081_v44 = vor.u32 %v2080_v36, %v2076_v32  ;;  %v2814_v58 = vunpack.c.l.b16 %v2728_v49  ;;  %v8717_v48 = vld [vmem:[#allocation2 + $0x70] sm:$0xff]  ;;  %3292 = vmatpush.bf16.msra.mxu1 %v8691_v34 }
 0x1e6   : > { %v938_v38 = vpop.f32.mrf.mxu0 }
 0x1e7   : > { %v2072_v39 = vrot.slane %v2071_v37, 4  ;;  %v2596_v46 = vld [vmem:[#allocation2 + $0x88] sm:$0x1]  ;;  %v1054_v25 = vmul.f32 %v9859_v11, %v938_v38  ;;  %v2082_v56 = vrot.slane %v2081_v44, 4 }
 0x1e8   : > { %v1847_v50 = vld [vmem:[#allocation2 + $0x88] sm:$0x1]  ;;  %v2730_v30 = vrot.slane %v2596_v46, 5  ;;  %v2934_v36 = vpop.f32.mrf.mxu3 }
 0x1e9   : > { %v2084_v52 = vshll.u32 %v1847_v50, 16  ;;  %4963 = vmatmul.bf16.gmra.mxu0 %v8716_v45  ;;  %v2077_v55 = vsel %vm9631_vm5, %v2072_v39, %v2076_v32  ;;  %v1122_v63 = vadd.f32 %v9873_v27, %v1054_v25  ;;  %v8699_v32 = vld [vmem:[#allocation9 + $0x118] sm:$0xff] }
 0x1ea   : > { %v2731_v53 = vsel %vm9623_vm2, %v2729_v51, %v2730_v30  ;;  %v2289_v3 = vunpack.c.l.b16 %v2077_v55  ;;  %4038 = vmatpush.bf16.msra.mxu2 %v8699_v32  ;;  %v9947_v51 = vadd.f32 %v2934_v36, %v9909_v60  ;;  %v8711_v60 = vld [vmem:[#allocation9 + $0x178] sm:$0xff]  ;;  %v9958_v36 = vpop.f32.mrf.mxu1 }
 0x1eb   : > { %v2086_v57 = vrot.slane %v2084_v52, 5  ;;  %v2815_v59 = vunpack.c.l.b16 %v2731_v53  ;;  %v1186_v15 = vmax.f32 %v1122_v63, 0.0  ;;  %4556 = vmatpush.bf16.msra.mxu3 %v8711_v60 }
 0x1ed   : > { %v2087_v1 = vsel %vm9631_vm5, %v2082_v56, %v2086_v57  ;;  %v2838_v2 = vpack.c.b16 %v2815_v59, %v2814_v58  ;;  %v1275_v20 = vsel %vm1223_vm6, %v1186_v15, 0.0 }
 0x1ee   : > { %v2290_v5 = vunpack.c.l.b16 %v2087_v1  ;;  %v940_v8 = vpop.f32.mrf.mxu0 }
 0x1ef   : > { %v1055_v12 = vmul.f32 %v9859_v11, %v940_v8  ;;  %2958 = vmatmul.bf16.gmra.mxu3 %v2838_v2 }
 0x1f0   : > { %v2313_v14 = vpack.c.b16 %v2290_v5, %v2289_v3  ;;  %v9949_v3 = vpop.f32.mrf.mxu3 }
 0x1f1   : > { %v1123_v16 = vadd.f32 %v9873_v27, %v1055_v12 }
 0x1f2   : > { %2433 = vmatmul.bf16.gmra.mxu2 %v2313_v14  ;;  %v8718_v14 = vld [vmem:[#allocation2 + $0x80] sm:$0xff] }
 0x1f3   : > { %v1187_v18 = vmax.f32 %v1123_v16, 0.0 }
 0x1f5   : > { %v2414_v21 = vpop.f32.mrf.mxu2  ;;  %v8852_v22 = vpack.c.bf16 %v1187_v18, %v1275_v20 }
 0x1f6   : > { %v9939_v28 = vadd.f32 %v2414_v21, %v1729_v19  ;;  %v943_v29 = vpop.f32.mrf.mxu0 }
 0x1f7   : > { %8944 = vst [vmem:[#allocation2 + $0x90] sm:$0xff] %v8852_v22   ;;  %v1056_v31 = vmul.f32 %v9859_v11, %v943_v29 }
 0x1f9   : > { %v1124_v35 = vadd.f32 %v9873_v27, %v1056_v31  ;;  %4968 = vmatmul.bf16.gmra.mxu0 %v8717_v48 }
 0x1fb   : > { %v1188_v37 = vmax.f32 %v1124_v35, 0.0 }
 0x1fd   : > { %v1277_v38 = vsel %vm1229_vm7, %v1188_v37, 0.0  ;;  %v9960_v37 = vpop.f32.mrf.mxu2 }
 0x1fe   : > { %v8857_v39 = vpack.c.bf16 %v9666_v47, %v1277_v38  ;;  %v945_v44 = vpop.f32.mrf.mxu0  ;;  %v8641_v45 = vld [vmem:[#allocation2 + $0x90] sm:$0xff] }
 0x1ff   : > { %v2597_v46 = vld [vmem:[#allocation2 + $0x90] sm:$0xe]  ;;  %v2598_v49 = vld [vmem:[#allocation2 + $0x94] sm:$0xf]  ;;  %1753 = vmatmul.bf16.gmra.mxu1 %v8641_v45  ;;  %v2939_v44 = vpop.f32.mrf.mxu3 }
 0x200   : > { %v1848_v50 = vld [vmem:[#allocation2 + $0x90] sm:$0xf]  ;;  %v1849_v25 = vld [vmem:[#allocation2 + $0x94] sm:$0xf]  ;;  %8945 = vst [vmem:[#allocation2 + $0x98] sm:$0xff] %v8857_v39   ;;  %v8084_v59 = vrot.slane %v2597_v46, 9 }
 0x201   : > { %v2089_v30 = vshrl.u32 %v1848_v50, 16  ;;  %v2092_v52 = vshll.u32 %v1848_v50, 16  ;;  %v2098_v53 = vshll.u32 %v1849_v25, 16  ;;  %v2102_v55 = vshrl.u32 %v1849_v25, 16 }
 0x202   : > { %v2734_v63 = vrot.slane %v2598_v49, 5  ;;  %v9966_v25 = vadd.f32 %v2939_v44, %v9939_v28  ;;  %v8690_v28 = vld [vmem:[#allocation9 + $0xd0] sm:$0xff] }
 0x203   : > { %v2091_v56 = vrot.slane %v2089_v30, 4  ;;  %v2094_v57 = vrot.slane %v2092_v52, 5  ;;  %v2100_v58 = vrot.slane %v2098_v53, 5  ;;  %v2104_v1 = vrot.slane %v2102_v55, 4  ;;  %3293 = vmatpush.bf16.msra.mxu1 %v8690_v28 }
 0x204   : > { %v2735_v16 = vsel %vm9623_vm2, %v8084_v59, %v2734_v63  ;;  %v2736_v20 = vrot.slane %v2734_v63, 4 }
 0x205   : > { %v2095_v2 = vor.u32 %v2094_v57, %v2091_v56  ;;  %v2105_v12 = vor.u32 %v2104_v1, %v2100_v58  ;;  %v2816_v34 = vunpack.c.l.b16 %v2735_v16  ;;  %v8698_v56 = vld [vmem:[#allocation9 + $0x110] sm:$0xff] }
 0x206   : > { %v948_v5 = vpop.f32.mrf.mxu0  ;;  %4039 = vmatpush.bf16.msra.mxu2 %v8698_v56 }
 0x207   : > { %v2096_v8 = vrot.slane %v2095_v2, 4  ;;  %v2599_v15 = vld [vmem:[#allocation2 + $0x98] sm:$0x1]  ;;  %v1058_v19 = vmul.f32 %v9859_v11, %v948_v5  ;;  %v2106_v48 = vrot.slane %v2105_v12, 4  ;;  %v8719_v12 = vld [vmem:[#allocation2 + $0x90] sm:$0xff] }
 0x208   : > { %v1850_v18 = vld [vmem:[#allocation2 + $0x98] sm:$0x1]  ;;  %v2737_v21 = vrot.slane %v2599_v15, 5 }
 0x209   : > { %v2108_v22 = vshll.u32 %v1850_v18, 16  ;;  %4973 = vmatmul.bf16.gmra.mxu0 %v8718_v14  ;;  %v2101_v31 = vsel %vm9631_vm5, %v2096_v8, %v2100_v58  ;;  %v1126_v38 = vadd.f32 %v9873_v27, %v1058_v19  ;;  %v1734_v58 = vpop.f32.mrf.mxu1 }
 0x20a   : > { %v2738_v29 = vsel %vm9623_vm2, %v2736_v20, %v2737_v21  ;;  %v2291_v46 = vunpack.c.l.b16 %v2101_v31  ;;  %v9977_v20 = vpop.f32.mrf.mxu3 }
 0x20b   : > { %v2110_v32 = vrot.slane %v2108_v22, 5  ;;  %v2817_v35 = vunpack.c.l.b16 %v2738_v29  ;;  %v1190_v53 = vmax.f32 %v1126_v38, 0.0 }
 0x20d   : > { %v2111_v39 = vsel %vm9631_vm5, %v2106_v48, %v2110_v32  ;;  %v2839_v45 = vpack.c.b16 %v2817_v35, %v2816_v34  ;;  %v1279_v59 = vsel %vm1223_vm6, %v1190_v53, 0.0  ;;  %v8710_v53 = vld [vmem:[#allocation9 + $0x170] sm:$0xff] }
 0x20e   : > { %v2292_v49 = vunpack.c.l.b16 %v2111_v39  ;;  %v950_v50 = vpop.f32.mrf.mxu0  ;;  %4557 = vmatpush.bf16.msra.mxu3 %v8710_v53 }
 0x20f   : > { %v1059_v30 = vmul.f32 %v9859_v11, %v950_v50  ;;  %2963 = vmatmul.bf16.gmra.mxu3 %v2839_v45 }
 0x210   : > { %v2314_v52 = vpack.c.b16 %v2292_v49, %v2291_v46  ;;  %v2137_v46 = vshrl.u32 %v1854_v43, 16  ;;  %v2140_v49 = vshll.u32 %v1854_v43, 16  ;;  %v8643_v43 = vld [vmem:[#allocation2 + $0xb0] sm:$0xff] }
 0x211   : > { %v1127_v55 = vadd.f32 %v9873_v27, %v1059_v30 }
 0x212   : > { %2438 = vmatmul.bf16.gmra.mxu2 %v2314_v52 }
 0x213   : > { %v1191_v57 = vmax.f32 %v1127_v55, 0.0 }
 0x215   : > { %v2419_v63 = vpop.f32.mrf.mxu2  ;;  %v8862_v1 = vpack.c.bf16 %v1191_v57, %v1279_v59  ;;  %v2944_v59 = vpop.f32.mrf.mxu3 }
 0x216   : > { %v2516_v2 = vadd.f32 %v2419_v63, %v1734_v58  ;;  %v953_v5 = vpop.f32.mrf.mxu0 }
 0x217   : > { %8946 = vst [vmem:[#allocation2 + $0xa0] sm:$0xff] %v8862_v1   ;;  %v1060_v8 = vmul.f32 %v9859_v11, %v953_v5 }
 0x219   : > { %v1128_v60 = vadd.f32 %v9873_v27, %v1060_v8  ;;  %4978 = vmatmul.bf16.gmra.mxu0 %v8719_v12  ;;  %v2139_v8 = vrot.slane %v2137_v46, 4  ;;  %v2142_v12 = vrot.slane %v2140_v49, 5  ;;  %v8697_v49 = vld [vmem:[#allocation9 + $0x108] sm:$0xff] }
 0x21a   : > { %4040 = vmatpush.bf16.msra.mxu2 %v8697_v49 }
 0x21b   : > { %v1192_v14 = vmax.f32 %v1128_v60, 0.0  ;;  %v9981_v60 = vadd.f32 %v2944_v59, %v2516_v2 }
 0x21d   : > { %v1281_v15 = vsel %vm1229_vm7, %v1192_v14, 0.0 }
 0x21e   : > { %v8867_v33 = vpack.c.bf16 %v9666_v47, %v1281_v15  ;;  %v955_v16 = vpop.f32.mrf.mxu0  ;;  %v8642_v18 = vld [vmem:[#allocation2 + $0xa0] sm:$0xff]  ;;  %v1855_v47 = vld [vmem:[#allocation2 + $0xb4] sm:$0xf] }
 0x21f   : > { %v1851_v19 = vld [vmem:[#allocation2 + $0xa0] sm:$0xf]  ;;  %1758 = vmatmul.bf16.gmra.mxu1 %v8642_v18  ;;  %v1852_v21 = vld [vmem:[#allocation2 + $0xa4] sm:$0xf]  ;;  %v2146_v52 = vshll.u32 %v1855_v47, 16  ;;  %v2150_v58 = vshrl.u32 %v1855_v47, 16 }
 0x220   : > { %8947 = vst [vmem:[#allocation2 + $0xa8] sm:$0xff] %v8867_v33   ;;  %v2113_v11 = vshrl.u32 %v1851_v19, 16  ;;  %v2116_v22 = vshll.u32 %v1851_v19, 16  ;;  %v2600_v29 = vld [vmem:[#allocation2 + $0xa0] sm:$0xe]  ;;  %v2122_v27 = vshll.u32 %v1852_v21, 16 }
 0x221   : > { %v2601_v31 = vld [vmem:[#allocation2 + $0xa4] sm:$0xf]  ;;  %v2126_v48 = vshrl.u32 %v1852_v21, 16  ;;  %v8085_v39 = vrot.slane %v2600_v29, 9  ;;  %v2604_v21 = vld [vmem:[#allocation2 + $0xb4] sm:$0xf]  ;;  %v9987_v29 = vpop.f32.mrf.mxu1 }
 0x222   : > { %v2115_v32 = vrot.slane %v2113_v11, 4  ;;  %v2118_v34 = vrot.slane %v2116_v22, 5  ;;  %v2124_v35 = vrot.slane %v2122_v27, 5  ;;  %v2741_v44 = vrot.slane %v2601_v31, 5  ;;  %v8720_v55 = vld [vmem:[#allocation2 + $0xa0] sm:$0xff]  ;;  %v9989_v31 = vpop.f32.mrf.mxu2 }
 0x223   : > { %v2128_v38 = vrot.slane %v2126_v48, 4  ;;  %v2148_v11 = vrot.slane %v2146_v52, 5  ;;  %v2152_v22 = vrot.slane %v2150_v58, 4  ;;  %11394 = vst [vmem:[#allocation22_spill] sm:$0xff] %v9989_v31  ;;  %v1856_v27 = vld [vmem:[#allocation2 + $0xb8] sm:$0x1] }
 0x224   : > { %v2119_v45 = vor.u32 %v2118_v34, %v2115_v32  ;;  %v2742_v63 = vsel %vm9623_vm2, %v8085_v39, %v2741_v44  ;;  %v2743_v1 = vrot.slane %v2741_v44, 4  ;;  %v2603_v47 = vld [vmem:[#allocation2 + $0xb0] sm:$0xe]  ;;  %v2605_v39 = vld [vmem:[#allocation2 + $0xb8] sm:$0x1]  ;;  %v2143_v44 = vor.u32 %v2142_v12, %v2139_v8 }
 0x225   : > { %v2129_v30 = vor.u32 %v2128_v38, %v2124_v35  ;;  %v2818_v18 = vunpack.c.l.b16 %v2742_v63  ;;  %v2156_v46 = vshll.u32 %v1856_v27, 16  ;;  %v2751_v52 = vrot.slane %v2605_v39, 5  ;;  %v1857_v63 = vld [vmem:[#allocation2 + $0xc0] sm:$0xf]  ;;  %v8721_v12 = vld [vmem:[#allocation2 + $0xb0] sm:$0xff] }
 0x226   : > { %v2120_v50 = vrot.slane %v2119_v45, 4  ;;  %v2153_v45 = vor.u32 %v2152_v22, %v2148_v11  ;;  %v2144_v53 = vrot.slane %v2143_v44, 4 }
 0x227   : > { %v2602_v56 = vld [vmem:[#allocation2 + $0xa8] sm:$0x1]  ;;  %v2130_v33 = vrot.slane %v2129_v30, 4 }
 0x228   : > { %v1853_v57 = vld [vmem:[#allocation2 + $0xa8] sm:$0x1]  ;;  %v2744_v28 = vrot.slane %v2602_v56, 5  ;;  %v2125_v15 = vsel %vm9631_vm5, %v2120_v50, %v2124_v35  ;;  %v2748_v35 = vrot.slane %v2604_v21, 5  ;;  %v8086_v50 = vrot.slane %v2603_v47, 9  ;;  %v8644_v47 = vld [vmem:[#allocation2 + $0xc0] sm:$0xff] }
 0x229   : > { %v2132_v5 = vshll.u32 %v1853_v57, 16  ;;  %4983 = vmatmul.bf16.gmra.mxu0 %v8720_v55  ;;  %v2293_v32 = vunpack.c.l.b16 %v2125_v15  ;;  %v2154_v55 = vrot.slane %v2153_v45, 4  ;;  %v2158_v56 = vrot.slane %v2156_v46, 5  ;;  %v1739_v57 = vpop.f32.mrf.mxu1  ;;  %v2606_v45 = vld [vmem:[#allocation2 + $0xc0] sm:$0xe] }
 0x22a   : > { %v2745_v14 = vsel %vm9623_vm2, %v2743_v1, %v2744_v28  ;;  %v2750_v30 = vrot.slane %v2748_v35, 4  ;;  %v1858_v1 = vld [vmem:[#allocation2 + $0xc4] sm:$0xf]  ;;  %v8689_v28 = vld [vmem:[#allocation9 + $0xc8] sm:$0xff] }
 0x22b   : > { %v2134_v16 = vrot.slane %v2132_v5, 5  ;;  %v2819_v19 = vunpack.c.l.b16 %v2745_v14  ;;  %v2749_v5 = vsel %vm9623_vm2, %v8086_v50, %v2748_v35  ;;  %v2149_v14 = vsel %vm9631_vm5, %v2144_v53, %v2148_v11  ;;  %3294 = vmatpush.bf16.msra.mxu1 %v8689_v28  ;;  %v1859_v11 = vld [vmem:[#allocation2 + $0xc8] sm:$0x1] }
 0x22c   : > { %v2752_v8 = vsel %vm9623_vm2, %v2750_v30, %v2751_v52  ;;  %v2159_v15 = vsel %vm9631_vm5, %v2154_v55, %v2158_v56  ;;  %v2820_v21 = vunpack.c.l.b16 %v2749_v5  ;;  %v2608_v46 = vld [vmem:[#allocation2 + $0xc8] sm:$0x1]  ;;  %v2180_v30 = vshll.u32 %v1859_v11, 16  ;;  %v1860_v56 = vld [vmem:[#allocation2 + $0xd0] sm:$0xf] }
 0x22d   : > { %v2135_v2 = vsel %vm9631_vm5, %v2130_v33, %v2134_v16  ;;  %v2840_v48 = vpack.c.b16 %v2819_v19, %v2818_v18  ;;  %v2161_v33 = vshrl.u32 %v1857_v63, 16  ;;  %v2164_v16 = vshll.u32 %v1857_v63, 16  ;;  %v1862_v11 = vld [vmem:[#allocation2 + $0xd8] sm:$0x1] }
 0x22e   : > { %v2294_v34 = vunpack.c.l.b16 %v2135_v2  ;;  %v2170_v18 = vshll.u32 %v1858_v1, 16  ;;  %v2174_v19 = vshrl.u32 %v1858_v1, 16  ;;  %v2821_v22 = vunpack.c.l.b16 %v2752_v8 }
 0x22f   : > { %2968 = vmatmul.bf16.gmra.mxu3 %v2840_v48  ;;  %1763 = vmatmul.bf16.gmra.mxu1 %v8643_v43  ;;  %v2295_v2 = vunpack.c.l.b16 %v2149_v14  ;;  %v2296_v27 = vunpack.c.l.b16 %v2159_v15  ;;  %v2607_v48 = vld [vmem:[#allocation2 + $0xc4] sm:$0xf]  ;;  %v8087_v52 = vrot.slane %v2606_v45, 9  ;;  %v2758_v55 = vrot.slane %v2608_v46, 5  ;;  %v2609_v45 = vld [vmem:[#allocation2 + $0xd0] sm:$0xe] }
 0x230   : > { %v2315_v38 = vpack.c.b16 %v2294_v34, %v2293_v32  ;;  %v2163_v32 = vrot.slane %v2161_v33, 4  ;;  %v2166_v34 = vrot.slane %v2164_v16, 5  ;;  %v2172_v43 = vrot.slane %v2170_v18, 5  ;;  %v8709_v33 = vld [vmem:[#allocation9 + $0x168] sm:$0xff]  ;;  %v8722_v16 = vld [vmem:[#allocation2 + $0xc0] sm:$0xff] }
 0x231   : > { %v2176_v35 = vrot.slane %v2174_v19, 4  ;;  %v2755_v39 = vrot.slane %v2607_v48, 5  ;;  %v2316_v44 = vpack.c.b16 %v2296_v27, %v2295_v2  ;;  %v2182_v1 = vrot.slane %v2180_v30, 5  ;;  %4558 = vmatpush.bf16.msra.mxu3 %v8709_v33  ;;  %v2611_v46 = vld [vmem:[#allocation2 + $0xd8] sm:$0x1]  ;;  %v8688_v33 = vld [vmem:[#allocation9 + $0xc0] sm:$0xff] }
 0x232   : > { %2443 = vmatmul.bf16.gmra.mxu2 %v2315_v38  ;;  %v2841_v38 = vpack.c.b16 %v2821_v22, %v2820_v21  ;;  %v2167_v49 = vor.u32 %v2166_v34, %v2163_v32  ;;  %v2185_v28 = vshrl.u32 %v1860_v56, 16  ;;  %v2188_v5 = vshll.u32 %v1860_v56, 16  ;;  %3295 = vmatpush.bf16.msra.mxu1 %v8688_v33 }
 0x233   : > { %v2177_v50 = vor.u32 %v2176_v35, %v2172_v43  ;;  %v2757_v53 = vrot.slane %v2755_v39, 4  ;;  %v2756_v8 = vsel %vm9623_vm2, %v8087_v52, %v2755_v39  ;;  %v2204_v52 = vshll.u32 %v1862_v11, 16 }
 0x234   : > { %v2822_v21 = vunpack.c.l.b16 %v2756_v8  ;;  %v2187_v2 = vrot.slane %v2185_v28, 4  ;;  %v2190_v27 = vrot.slane %v2188_v5, 5  ;;  %v2765_v56 = vrot.slane %v2611_v46, 5 }
 0x235   : > { %v2424_v58 = vpop.f32.mrf.mxu2  ;;  %v2178_v63 = vrot.slane %v2177_v50, 4  ;;  %v2206_v28 = vrot.slane %v2204_v52, 5 }
 0x236   : > { %v9993_v59 = vadd.f32 %v2424_v58, %v1739_v57  ;;  %v1861_v57 = vld [vmem:[#allocation2 + $0xd4] sm:$0xf]  ;;  %v2168_v58 = vrot.slane %v2167_v49, 4  ;;  %v2191_v50 = vor.u32 %v2190_v27, %v2187_v2 }
 0x237   : > { %v2194_v14 = vshll.u32 %v1861_v57, 16  ;;  %v2198_v15 = vshrl.u32 %v1861_v57, 16  ;;  %v2183_v19 = vsel %vm9631_vm5, %v2178_v63, %v2182_v1  ;;  %v8696_v57 = vld [vmem:[#allocation9 + $0x100] sm:$0xff]  ;;  %v8723_v2 = vld [vmem:[#allocation2 + $0xd0] sm:$0xff] }
 0x238   : > { %v2173_v18 = vsel %vm9631_vm5, %v2168_v58, %v2172_v43  ;;  %v2298_v35 = vunpack.c.l.b16 %v2183_v19  ;;  %v2192_v63 = vrot.slane %v2191_v50, 4  ;;  %4041 = vmatpush.bf16.msra.mxu2 %v8696_v57 }
 0x239   : > { %4988 = vmatmul.bf16.gmra.mxu0 %v8721_v12  ;;  %v2759_v12 = vsel %vm9623_vm2, %v2757_v53, %v2758_v55  ;;  %v2196_v48 = vrot.slane %v2194_v14, 5  ;;  %v2200_v32 = vrot.slane %v2198_v15, 4  ;;  %v2297_v34 = vunpack.c.l.b16 %v2173_v18  ;;  %v1864_v14 = vld [vmem:[#allocation2 + $0xe4] sm:$0xf] }
 0x23a   : > { %v2823_v22 = vunpack.c.l.b16 %v2759_v12  ;;  %v8088_v55 = vrot.slane %v2609_v45, 9  ;;  %v1863_v12 = vld [vmem:[#allocation2 + $0xe0] sm:$0xf]  ;;  %v2613_v45 = vld [vmem:[#allocation2 + $0xe4] sm:$0xf] }
 0x23b   : > { %v2201_v30 = vor.u32 %v2200_v32, %v2196_v48  ;;  %v2317_v53 = vpack.c.b16 %v2298_v35, %v2297_v34  ;;  %v2197_v19 = vsel %vm9631_vm5, %v2192_v63, %v2196_v48  ;;  %v2209_v27 = vshrl.u32 %v1863_v12, 16  ;;  %v2614_v63 = vld [vmem:[#allocation2 + $0xe8] sm:$0x1] }
 0x23c   : > { %v2842_v43 = vpack.c.b16 %v2823_v22, %v2822_v21  ;;  %v10025_v22 = vpop.f32.mrf.mxu0  ;;  %v2212_v32 = vshll.u32 %v1863_v12, 16  ;;  %v2218_v34 = vshll.u32 %v1864_v14, 16  ;;  %v2222_v35 = vshrl.u32 %v1864_v14, 16  ;;  %v8707_v12 = vld [vmem:[#allocation9 + $0x158] sm:$0xff] }
 0x23d   : > { %v10013_v39 = vpop.f32.mrf.mxu2  ;;  %v2202_v1 = vrot.slane %v2201_v30, 4  ;;  %11397 = vst [vmem:[#allocation25_spill] sm:$0xff] %v10025_v22  ;;  %v2211_v46 = vrot.slane %v2209_v27, 4  ;;  %v1865_v30 = vld [vmem:[#allocation2 + $0xe8] sm:$0x1]  ;;  %v8706_v27 = vld [vmem:[#allocation9 + $0x150] sm:$0xff] }
 0x23e   : > { %11396 = vst [vmem:[#allocation24_spill] sm:$0xff] %v10013_v39  ;;  %v2220_v48 = vrot.slane %v2218_v34, 5  ;;  %v2224_v50 = vrot.slane %v2222_v35, 4  ;;  %v1867_v34 = vld [vmem:[#allocation2 + $0xf4] sm:$0xf] }
 0x23f   : > { %2973 = vmatmul.bf16.gmra.mxu3 %v2841_v38  ;;  %1768 = vmatmul.bf16.gmra.mxu1 %v8644_v47  ;;  %v2610_v38 = vld [vmem:[#allocation2 + $0xd4] sm:$0xf]  ;;  %v10011_v47 = vpop.f32.mrf.mxu1  ;;  %v2207_v21 = vsel %vm9631_vm5, %v2202_v1, %v2206_v28 }
 0x240   : > { %11395 = vst [vmem:[#allocation23_spill] sm:$0xff] %v10011_v47  ;;  %v2762_v49 = vrot.slane %v2610_v38, 5  ;;  %v2225_v28 = vor.u32 %v2224_v50, %v2220_v48  ;;  %v2242_v50 = vshll.u32 %v1867_v34, 16 }
 0x242   : > { %2448 = vmatmul.bf16.gmra.mxu2 %v2316_v44  ;;  %v8645_v44 = vld [vmem:[#allocation2 + $0xd0] sm:$0xff]  ;;  %v2764_v58 = vrot.slane %v2762_v49, 4 }
 0x244   : > { %v2766_v18 = vsel %vm9623_vm2, %v2764_v58, %v2765_v56  ;;  %v2769_v56 = vrot.slane %v2613_v45, 5  ;;  %v2612_v58 = vld [vmem:[#allocation2 + $0xe0] sm:$0xe]  ;;  %v10029_v14 = vpop.f32.mrf.mxu0 }
 0x245   : > { %v2825_v11 = vunpack.c.l.b16 %v2766_v18  ;;  %11399 = vst [vmem:[#allocation27_spill] sm:$0xff] %v10029_v14  ;;  %v8089_v33 = vrot.slane %v2612_v58, 9  ;;  %v2772_v18 = vrot.slane %v2614_v63, 5  ;;  %v2616_v63 = vld [vmem:[#allocation2 + $0xf4] sm:$0xf] }
 0x246   : > { %v8750_v14 = vld [vmem:[#allocation9 + $0x230] sm:$0xff] }
 0x247   : > { %v1744_v5 = vpop.f32.mrf.mxu1  ;;  %v2770_v35 = vsel %vm9623_vm2, %v8089_v33, %v2769_v56  ;;  %v2244_v33 = vrot.slane %v2242_v50, 5 }
 0x249   : > { %4993 = vmatmul.bf16.gmra.mxu0 %v8722_v16  ;;  %v2763_v16 = vsel %vm9623_vm2, %v8088_v55, %v2762_v49  ;;  %v2214_v49 = vrot.slane %v2212_v32, 5  ;;  %v8646_v55 = vld [vmem:[#allocation2 + $0xe0] sm:$0xff]  ;;  %v1866_v32 = vld [vmem:[#allocation2 + $0xf0] sm:$0xf] }
 0x24a   : > { %v2824_v38 = vunpack.c.l.b16 %v2763_v16  ;;  %v2771_v16 = vrot.slane %v2769_v56, 4 }
 0x24b   : > { %v2215_v1 = vor.u32 %v2214_v49, %v2211_v46  ;;  %v2233_v46 = vshrl.u32 %v1866_v32, 16  ;;  %v2236_v49 = vshll.u32 %v1866_v32, 16  ;;  %v2615_v32 = vld [vmem:[#allocation2 + $0xf0] sm:$0xe] }
 0x24c   : > { %v2843_v52 = vpack.c.b16 %v2825_v11, %v2824_v38  ;;  %v2773_v38 = vsel %vm9623_vm2, %v2771_v16, %v2772_v18  ;;  %v8724_v11 = vld [vmem:[#allocation2 + $0xe0] sm:$0xff] }
 0x24d   : > { %v8704_v18 = vld [vmem:[#allocation9 + $0x140] sm:$0xff] }
 0x24f   : > { %2978 = vmatmul.bf16.gmra.mxu3 %v2842_v43  ;;  %1773 = vmatmul.bf16.gmra.mxu1 %v8645_v44  ;;  %v2299_v43 = vunpack.c.l.b16 %v2197_v19  ;;  %v2300_v44 = vunpack.c.l.b16 %v2207_v21  ;;  %v2216_v19 = vrot.slane %v2215_v1, 4  ;;  %v2226_v21 = vrot.slane %v2225_v28, 4  ;;  %v10044_v1 = vpop.f32.mrf.mxu1 }
 0x250   : > { %11401 = vst [vmem:[#allocation29_spill] sm:$0xff] %v10044_v1  ;;  %v8674_v1 = vld [vmem:[#allocation2 + $0x30] sm:$0xff] }
 0x251   : > { %v2318_v57 = vpack.c.b16 %v2300_v44, %v2299_v43  ;;  %v2221_v43 = vsel %vm9631_vm5, %v2216_v19, %v2220_v48 }
 0x252   : > { %2453 = vmatmul.bf16.gmra.mxu2 %v2317_v53  ;;  %v8708_v53 = vld [vmem:[#allocation9 + $0x160] sm:$0xff]  ;;  %v2301_v58 = vunpack.c.l.b16 %v2221_v43  ;;  %v8751_v43 = vld [vmem:[#allocation9 + $0x238] sm:$0xff] }
 0x253   : > { %4559 = vmatpush.bf16.msra.mxu3 %v8708_v53  ;;  %v2826_v53 = vunpack.c.l.b16 %v2770_v35  ;;  %6203 = vmatpush.bf16.msrb.mxu2 %v8751_v43 }
 0x255   : > { %v2429_v8 = vpop.f32.mrf.mxu2 }
 0x256   : > { %v10015_v15 = vadd.f32 %v2429_v8, %v1744_v5  ;;  %v2228_v5 = vshll.u32 %v1865_v30, 16  ;;  %v10027_v8 = vpop.f32.mrf.mxu3  ;;  %v2246_v30 = vshrl.u32 %v1867_v34, 16  ;;  %v2617_v34 = vld [vmem:[#allocation2 + $0xf8] sm:$0x1] }
 0x257   : > { %11398 = vst [vmem:[#allocation26_spill] sm:$0xff] %v10027_v8  ;;  %4560 = vmatpush.bf16.msra.mxu3 %v8707_v12  ;;  %v2238_v12 = vrot.slane %v2236_v49, 5  ;;  %6204 = vmatpush.bf16.msrb.mxu2 %v8750_v14 }
 0x258   : > { %v2248_v16 = vrot.slane %v2246_v30, 4 }
 0x259   : > { %4998 = vmatmul.bf16.gmra.mxu0 %v8723_v2  ;;  %v2230_v2 = vrot.slane %v2228_v5, 5  ;;  %v2235_v5 = vrot.slane %v2233_v46, 4  ;;  %v2779_v46 = vrot.slane %v2617_v34, 5 }
 0x25b   : > { %v2231_v44 = vsel %vm9631_vm5, %v2226_v21, %v2230_v2  ;;  %4561 = vmatpush.bf16.msra.mxu3 %v8706_v27  ;;  %v1868_v21 = vld [vmem:[#allocation2 + $0xf8] sm:$0x1]  ;;  %v8647_v2 = vld [vmem:[#allocation2 + $0xf0] sm:$0xff]  ;;  %v2239_v35 = vor.u32 %v2238_v12, %v2235_v5 }
 0x25c   : > { %v2302_v48 = vunpack.c.l.b16 %v2231_v44  ;;  %v8090_v44 = vrot.slane %v2615_v32, 9  ;;  %v1749_v50 = vpop.f32.mrf.mxu1 }
 0x25d   : > { %v10046_v28 = vpop.f32.mrf.mxu2 }
 0x25e   : > { %v2949_v45 = vpop.f32.mrf.mxu3  ;;  %11402 = vst [vmem:[#allocation30_spill] sm:$0xff] %v10046_v28  ;;  %v2319_v27 = vpack.c.b16 %v2302_v48, %v2301_v58 }
 0x25f   : > { %2983 = vmatmul.bf16.gmra.mxu3 %v2843_v52  ;;  %1778 = vmatmul.bf16.gmra.mxu1 %v8646_v55  ;;  %v8705_v52 = vld [vmem:[#allocation9 + $0x148] sm:$0xff]  ;;  %v2827_v55 = vunpack.c.l.b16 %v2773_v38  ;;  %v10040_v56 = vadd.f32 %v2949_v45, %v9993_v59  ;;  %v2776_v59 = vrot.slane %v2616_v63, 5  ;;  %v2249_v38 = vor.u32 %v2248_v16, %v2244_v33  ;;  %v8743_v63 = vld [vmem:[#allocation9 + $0x1f8] sm:$0xff]  ;;  %v3473_v16 = vld [vmem:[#allocation2 + $0x10] sm:$0xf] }
 0x260   : > { %4562 = vmatpush.bf16.msra.mxu3 %v8705_v52  ;;  %v2240_v52 = vrot.slane %v2239_v35, 4  ;;  %5681 = vmatpush.bf16.msrb.mxu1 %v8743_v63  ;;  %v3522_v34 = vshrl.u32 %v3473_v16, 16  ;;  %v3525_v35 = vshll.u32 %v3473_v16, 16  ;;  %v4219_v16 = vld [vmem:[#allocation2 + $0x10] sm:$0xe] }
 0x261   : > { %v2844_v19 = vpack.c.b16 %v2827_v55, %v2826_v53  ;;  %v2778_v45 = vrot.slane %v2776_v59, 4  ;;  %v2250_v53 = vrot.slane %v2249_v38, 4  ;;  %v2777_v5 = vsel %vm9623_vm2, %v8090_v44, %v2776_v59 }
 0x262   : > { %2458 = vmatmul.bf16.gmra.mxu2 %v2318_v57  ;;  %v10042_v57 = vpop.f32.mrf.mxu0  ;;  %v3527_v63 = vrot.slane %v3525_v35, 5 }
 0x263   : > { %11400 = vst [vmem:[#allocation28_spill] sm:$0xff] %v10042_v57  ;;  %v2780_v12 = vsel %vm9623_vm2, %v2778_v45, %v2779_v46  ;;  %v4220_v46 = vld [vmem:[#allocation2 + $0x14] sm:$0xf] }
 0x264   : > { %4563 = vmatpush.bf16.msra.mxu3 %v8704_v18  ;;  %v8725_v18 = vld [vmem:[#allocation2 + $0xf0] sm:$0xff]  ;;  %v2829_v32 = vunpack.c.l.b16 %v2780_v12 }
 0x266   : > { %v10048_v49 = vpop.f32.mrf.mxu3 }
 0x267   : > { %11403 = vst [vmem:[#allocation31_spill] sm:$0xff] %v10048_v49 }
 0x269   : > { %5003 = vmatmul.bf16.gmra.mxu0 %v8724_v11  ;;  %v2252_v11 = vshll.u32 %v1868_v21, 16  ;;  %v2245_v21 = vsel %vm9631_vm5, %v2240_v52, %v2244_v33 }
 0x26a   : > { %v10050_v58 = vpop.f32.mrf.mxu0 }
 0x26b   : > { %v2254_v55 = vrot.slane %v2252_v11, 5  ;;  %11404 = vst [vmem:[#allocation32_spill] sm:$0xff] %v10050_v58  ;;  %v2303_v11 = vunpack.c.l.b16 %v2245_v21  ;;  %v8672_v58 = vld [vmem:[#allocation2 + $0x10] sm:$0xff] }
 0x26e   : > { %v2954_v44 = vpop.f32.mrf.mxu3 }
 0x26f   : > { %2988 = vmatmul.bf16.gmra.mxu3 %v2844_v19  ;;  %1783 = vmatmul.bf16.gmra.mxu1 %v8647_v2  ;;  %v3474_v19 = vld [vmem:[#allocation2 + $0x14] sm:$0xf]  ;;  %v2255_v2 = vsel %vm9631_vm5, %v2250_v53, %v2254_v55  ;;  %v4221_v55 = vld [vmem:[#allocation2 + $0x18] sm:$0x1] }
 0x270   : > { %v3531_v38 = vshll.u32 %v3474_v19, 16  ;;  %v3535_v59 = vshrl.u32 %v3474_v19, 16  ;;  %v2304_v43 = vunpack.c.l.b16 %v2255_v2  ;;  %v4320_v19 = vrot.slane %v4221_v55, 5  ;;  %v10064_v2 = vpop.f32.mrf.mxu1 }
 0x271   : > { %11406 = vst [vmem:[#allocation34_spill] sm:$0xff] %v10064_v2 }
 0x272   : > { %2463 = vmatmul.bf16.gmra.mxu2 %v2319_v27  ;;  %v2828_v27 = vunpack.c.l.b16 %v2777_v5  ;;  %v3533_v33 = vrot.slane %v3531_v38, 5  ;;  %v3537_v52 = vrot.slane %v3535_v59, 4  ;;  %v10062_v57 = vpop.f32.mrf.mxu0  ;;  %v2320_v53 = vpack.c.b16 %v2304_v43, %v2303_v11  ;;  %v8726_v38 = vld [vmem:[#allocation2 + $0x100] sm:$0xff] }
 0x273   : > { %11405 = vst [vmem:[#allocation33_spill] sm:$0xff] %v10062_v57  ;;  %v4317_v5 = vrot.slane %v4220_v46, 5  ;;  %v3476_v43 = vld [vmem:[#allocation2 + $0x20] sm:$0xf]  ;;  %v4224_v57 = vld [vmem:[#allocation2 + $0x28] sm:$0x1] }
 0x274   : > { %v2845_v45 = vpack.c.b16 %v2829_v32, %v2828_v27  ;;  %v3538_v21 = vor.u32 %v3537_v52, %v3533_v33  ;;  %v8251_v27 = vrot.slane %v4219_v16, 9  ;;  %v3546_v55 = vshrl.u32 %v3476_v43, 16 }
 0x275   : > { %v2434_v30 = vpop.f32.mrf.mxu2  ;;  %v4319_v32 = vrot.slane %v4317_v5, 4 }
 0x276   : > { %v10052_v48 = vadd.f32 %v2434_v30, %v1749_v50  ;;  %v3475_v50 = vld [vmem:[#allocation2 + $0x18] sm:$0x1]  ;;  %v3524_v30 = vrot.slane %v3522_v34, 4  ;;  %v10066_v59 = vpop.f32.mrf.mxu3  ;;  %v4318_v46 = vsel %vm9623_vm2, %v8251_v27, %v4317_v5 }
 0x277   : > { %v3541_v12 = vshll.u32 %v3475_v50, 16  ;;  %11407 = vst [vmem:[#allocation35_spill] sm:$0xff] %v10066_v59  ;;  %v4321_v11 = vsel %vm9623_vm2, %v4319_v32, %v4320_v19 }
 0x279   : > { %5008 = vmatmul.bf16.gmra.mxu0 %v8725_v18  ;;  %v3528_v18 = vor.u32 %v3527_v63, %v3524_v30  ;;  %v3543_v34 = vrot.slane %v3541_v12, 5  ;;  %v4445_v63 = vunpack.c.l.b16 %v4321_v11  ;;  %v3549_v12 = vshll.u32 %v3476_v43, 16  ;;  %v3478_v11 = vld [vmem:[#allocation2 + $0x28] sm:$0x1] }
 0x27a   : > { %v10074_v30 = vpop.f32.mrf.mxu0 }
 0x27b   : > { %v3529_v35 = vrot.slane %v3528_v18, 4  ;;  %11408 = vst [vmem:[#allocation36_spill] sm:$0xff] %v10074_v30 }
 0x27c   : > { %v1754_v19 = vpop.f32.mrf.mxu1 }
 0x27d   : > { %v3534_v52 = vsel %vm9631_vm5, %v3529_v35, %v3533_v33  ;;  %v10081_v27 = vpop.f32.mrf.mxu2  ;;  %v8673_v33 = vld [vmem:[#allocation2 + $0x20] sm:$0xff]  ;;  %v3548_v35 = vrot.slane %v3546_v55, 4 }
 0x27e   : > { %11410 = vst [vmem:[#allocation38_spill] sm:$0xff] %v10081_v27  ;;  %v10083_v30 = vpop.f32.mrf.mxu3 }
 0x27f   : > { %2993 = vmatmul.bf16.gmra.mxu3 %v2845_v45  ;;  %3296 = vmatmul.bf16.vlgmr.msra.gmra.mxu1 %v8672_v58  ;;  %v3539_v58 = vrot.slane %v3538_v21, 4  ;;  %v3477_v45 = vld [vmem:[#allocation2 + $0x24] sm:$0xf]  ;;  %v4444_v21 = vunpack.c.l.b16 %v4318_v46  ;;  %v3565_v46 = vshll.u32 %v3478_v11, 16  ;;  %v3480_v11 = vld [vmem:[#allocation2 + $0x34] sm:$0xf] }
 0x280   : > { %v3555_v16 = vshll.u32 %v3477_v45, 16  ;;  %v3559_v18 = vshrl.u32 %v3477_v45, 16 }
 0x281   : > { %v3544_v50 = vsel %vm9631_vm5, %v3539_v58, %v3543_v34  ;;  %v4476_v32 = vpack.c.b16 %v4445_v63, %v4444_v21  ;;  %v3922_v34 = vunpack.c.l.b16 %v3534_v52  ;;  %v4223_v58 = vld [vmem:[#allocation2 + $0x24] sm:$0xf]  ;;  %v4327_v63 = vrot.slane %v4224_v57, 5 }
 0x282   : > { %2468 = vmatmul.bf16.gmra.mxu2 %v2320_v53  ;;  %v10079_v53 = vadd.f32 %v2954_v44, %v10015_v15  ;;  %v3923_v5 = vunpack.c.l.b16 %v3544_v50  ;;  %v3557_v15 = vrot.slane %v3555_v16, 5  ;;  %v3561_v44 = vrot.slane %v3559_v18, 4  ;;  %v4222_v50 = vld [vmem:[#allocation2 + $0x20] sm:$0xe]  ;;  %v8742_v18 = vld [vmem:[#allocation9 + $0x1f0] sm:$0xff] }
 0x283   : > { %v4324_v45 = vrot.slane %v4223_v58, 5  ;;  %v8252_v59 = vrot.slane %v4222_v50, 9  ;;  %v3567_v55 = vrot.slane %v3565_v46, 5  ;;  %v3479_v58 = vld [vmem:[#allocation2 + $0x30] sm:$0xf]  ;;  %5682 = vmatpush.bf16.msrb.mxu1 %v8742_v18 }
 0x284   : > { %11409 = vst [vmem:[#allocation37_spill] sm:$0xff] %v10079_v53  ;;  %v3954_v43 = vpack.c.b16 %v3923_v5, %v3922_v34  ;;  %v3562_v21 = vor.u32 %v3561_v44, %v3557_v15  ;;  %v3583_v44 = vshrl.u32 %v3480_v11, 16  ;;  %v3481_v18 = vld [vmem:[#allocation2 + $0x38] sm:$0x1] }
 0x285   : > { %v4326_v28 = vrot.slane %v4324_v45, 4  ;;  %v4325_v14 = vsel %vm9623_vm2, %v8252_v59, %v4324_v45 }
 0x286   : > { %v3563_v34 = vrot.slane %v3562_v21, 4  ;;  %v10091_v57 = vpop.f32.mrf.mxu3  ;;  %v4226_v21 = vld [vmem:[#allocation2 + $0x34] sm:$0xf] }
 0x287   : > { %v4328_v5 = vsel %vm9623_vm2, %v4326_v28, %v4327_v63  ;;  %11411 = vst [vmem:[#allocation39_spill] sm:$0xff] %v10091_v57  ;;  %v3579_v28 = vshll.u32 %v3480_v11, 16  ;;  %v4225_v11 = vld [vmem:[#allocation2 + $0x30] sm:$0xe] }
 0x289   : > { %5013 = vmatmul.bf16.gmra.mxu0 %v8726_v38  ;;  %v3551_v38 = vrot.slane %v3549_v12, 5  ;;  %v10085_v12 = vpop.f32.mrf.mxu1 }
 0x28b   : > { %v3552_v52 = vor.u32 %v3551_v38, %v3548_v35  ;;  %v4447_v35 = vunpack.c.l.b16 %v4328_v5  ;;  %v3585_v5 = vrot.slane %v3583_v44, 4 }
 0x28f   : > { %4564 = vmatmul.bf16.vlgmr.msra.gmra.mxu3 %v4476_v32  ;;  %3301 = vmatmul.bf16.gmra.mxu1 %v8673_v33  ;;  %v3553_v32 = vrot.slane %v3552_v52, 4  ;;  %v3568_v33 = vsel %vm9631_vm5, %v3563_v34, %v3567_v55  ;;  %v3581_v55 = vrot.slane %v3579_v28, 5 }
 0x290   : > { %v3925_v46 = vunpack.c.l.b16 %v3568_v33 }
 0x291   : > { %v3558_v38 = vsel %vm9631_vm5, %v3553_v32, %v3557_v15  ;;  %v4331_v15 = vrot.slane %v4226_v21, 5  ;;  %v3589_v32 = vshll.u32 %v3481_v18, 16 }
 0x292   : > { %4042 = vmatmul.bf16.vlgmr.msra.gmra.mxu2 %v3954_v43  ;;  %v4446_v43 = vunpack.c.l.b16 %v4325_v14  ;;  %v3924_v52 = vunpack.c.l.b16 %v3558_v38  ;;  %v10101_v57 = vpop.f32.mrf.mxu3  ;;  %v8253_v38 = vrot.slane %v4225_v11, 9 }
 0x294   : > { %v4477_v63 = vpack.c.b16 %v4447_v35, %v4446_v43  ;;  %v3955_v34 = vpack.c.b16 %v3925_v46, %v3924_v52  ;;  %v3586_v35 = vor.u32 %v3585_v5, %v3581_v55  ;;  %v4333_v43 = vrot.slane %v4331_v15, 4  ;;  %v3483_v52 = vld [vmem:[#allocation2 + $0x44] sm:$0xf] }
 0x295   : > { %v2439_v22 = vpop.f32.mrf.mxu2  ;;  %v3607_v11 = vshrl.u32 %v3483_v52, 16 }
 0x296   : > { %v10087_v16 = vadd.f32 %v2439_v22, %v1754_v19  ;;  %v3570_v22 = vshrl.u32 %v3479_v58, 16  ;;  %v3573_v19 = vshll.u32 %v3479_v58, 16  ;;  %v4227_v58 = vld [vmem:[#allocation2 + $0x38] sm:$0x1]  ;;  %v3587_v46 = vrot.slane %v3586_v35, 4 }
 0x297   : > { %v4334_v33 = vrot.slane %v4227_v58, 5  ;;  %v4229_v35 = vld [vmem:[#allocation2 + $0x44] sm:$0xf]  ;;  %v3609_v27 = vrot.slane %v3607_v11, 4 }
 0x298   : > { %v3572_v59 = vrot.slane %v3570_v22, 4  ;;  %v3575_v45 = vrot.slane %v3573_v19, 5  ;;  %v3591_v22 = vrot.slane %v3589_v32, 5  ;;  %v3603_v32 = vshll.u32 %v3483_v52, 16  ;;  %v4228_v52 = vld [vmem:[#allocation2 + $0x40] sm:$0xe] }
 0x299   : > { %v4335_v44 = vsel %vm9623_vm2, %v4333_v43, %v4334_v33  ;;  %v4338_v2 = vrot.slane %v4229_v35, 5  ;;  %v8741_v35 = vld [vmem:[#allocation9 + $0x1e8] sm:$0xff] }
 0x29a   : > { %v3576_v14 = vor.u32 %v3575_v45, %v3572_v59  ;;  %v3592_v21 = vsel %vm9631_vm5, %v3587_v46, %v3591_v22  ;;  %v4449_v18 = vunpack.c.l.b16 %v4335_v44  ;;  %v10115_v45 = vadd.f32 %v10083_v30, %v10052_v48  ;;  %v10117_v5 = vpop.f32.mrf.mxu3  ;;  %v8675_v22 = vld [vmem:[#allocation2 + $0x40] sm:$0xff]  ;;  %v4230_v44 = vld [vmem:[#allocation2 + $0x48] sm:$0x1]  ;;  %5683 = vmatpush.bf16.msrb.mxu1 %v8741_v35 }
 0x29b   : > { %v3927_v33 = vunpack.c.l.b16 %v3592_v21  ;;  %v3605_v46 = vrot.slane %v3603_v32, 5  ;;  %v4341_v21 = vrot.slane %v4230_v44, 5  ;;  %v4340_v39 = vrot.slane %v4338_v2, 4 }
 0x29c   : > { %v10099_v50 = vpop.f32.mrf.mxu1  ;;  %v3577_v28 = vrot.slane %v3576_v14, 4  ;;  %11412 = vst [vmem:[#allocation40_spill] sm:$0xff] %v10115_v45  ;;  %v8749_v45 = vld [vmem:[#allocation9 + $0x228] sm:$0xff] }
 0x29d   : > { %6205 = vmatpush.bf16.msrb.mxu2 %v8749_v45 }
 0x29e   : > { %v3582_v59 = vsel %vm9631_vm5, %v3577_v28, %v3581_v55  ;;  %v3484_v28 = vld [vmem:[#allocation2 + $0x48] sm:$0x1] }
 0x29f   : > { %4569 = vmatmul.bf16.gmra.mxu3 %v4477_v63  ;;  %3306 = vmatmul.bf16.gmra.mxu1 %v8674_v1  ;;  %v3482_v63 = vld [vmem:[#allocation2 + $0x40] sm:$0xf]  ;;  %v4332_v1 = vsel %vm9623_vm2, %v8253_v38, %v4331_v15  ;;  %v10119_v15 = vpop.f32.mrf.mxu2  ;;  %v3926_v55 = vunpack.c.l.b16 %v3582_v59  ;;  %v8254_v59 = vrot.slane %v4228_v52, 9 }
 0x2a0   : > { %v3597_v58 = vshll.u32 %v3482_v63, 16  ;;  %v4448_v14 = vunpack.c.l.b16 %v4332_v1  ;;  %v3613_v1 = vshll.u32 %v3484_v28, 16  ;;  %v3486_v28 = vld [vmem:[#allocation2 + $0x54] sm:$0xf] }
 0x2a1   : > { %v3627_v52 = vshll.u32 %v3486_v28, 16 }
 0x2a2   : > { %4047 = vmatmul.bf16.gmra.mxu2 %v3955_v34  ;;  %v3594_v34 = vshrl.u32 %v3482_v63, 16  ;;  %v4478_v43 = vpack.c.b16 %v4449_v18, %v4448_v14  ;;  %v3599_v30 = vrot.slane %v3597_v58, 5  ;;  %v3956_v63 = vpack.c.b16 %v3927_v33, %v3926_v55  ;;  %v3485_v55 = vld [vmem:[#allocation2 + $0x50] sm:$0xf] }
 0x2a3   : > { %v3610_v14 = vor.u32 %v3609_v27, %v3605_v46  ;;  %v3615_v58 = vrot.slane %v3613_v1, 5  ;;  %v4342_v33 = vsel %vm9623_vm2, %v4340_v39, %v4341_v21  ;;  %v4339_v27 = vsel %vm9623_vm2, %v8254_v59, %v4338_v2  ;;  %v4232_v2 = vld [vmem:[#allocation2 + $0x54] sm:$0xf] }
 0x2a4   : > { %v10103_v19 = vpop.f32.mrf.mxu1  ;;  %v3596_v48 = vrot.slane %v3594_v34, 4  ;;  %v4451_v45 = vunpack.c.l.b16 %v4342_v33  ;;  %v3631_v1 = vshrl.u32 %v3486_v28, 16  ;;  %v3487_v33 = vld [vmem:[#allocation2 + $0x58] sm:$0x1]  ;;  %v3629_v47 = vrot.slane %v3627_v52, 5 }
 0x2a5   : > { %v4231_v28 = vld [vmem:[#allocation2 + $0x50] sm:$0xe] }
 0x2a6   : > { %v3600_v18 = vor.u32 %v3599_v30, %v3596_v48  ;;  %v3621_v48 = vshll.u32 %v3485_v55, 16  ;;  %v3633_v53 = vrot.slane %v3631_v1, 4 }
 0x2ac   : > { %v10121_v38 = vpop.f32.mrf.mxu1 }
 0x2af   : > { %4574 = vmatmul.bf16.gmra.mxu3 %v4478_v43  ;;  %3311 = vmatmul.bf16.gmra.mxu1 %v8675_v22  ;;  %v3601_v43 = vrot.slane %v3600_v18, 4  ;;  %v3611_v22 = vrot.slane %v3610_v14, 4 }
 0x2b1   : > { %v3616_v44 = vsel %vm9631_vm5, %v3611_v22, %v3615_v58  ;;  %v3606_v39 = vsel %vm9631_vm5, %v3601_v43, %v3605_v46  ;;  %v3623_v22 = vrot.slane %v3621_v48, 5  ;;  %v4345_v43 = vrot.slane %v4232_v2, 5  ;;  %v3488_v2 = vld [vmem:[#allocation2 + $0x60] sm:$0xf] }
 0x2b2   : > { %4052 = vmatmul.bf16.gmra.mxu2 %v3956_v63  ;;  %v10123_v49 = vpop.f32.mrf.mxu3  ;;  %v4450_v63 = vunpack.c.l.b16 %v4339_v27  ;;  %v3929_v21 = vunpack.c.l.b16 %v3616_v44  ;;  %v3928_v58 = vunpack.c.l.b16 %v3606_v39  ;;  %v4233_v27 = vld [vmem:[#allocation2 + $0x58] sm:$0x1]  ;;  %v8255_v39 = vrot.slane %v4231_v28, 9 }
 0x2b3   : > { %v4348_v44 = vrot.slane %v4233_v27, 5  ;;  %v4347_v8 = vrot.slane %v4345_v43, 4 }
 0x2b4   : > { %v10128_v11 = vpop.f32.mrf.mxu1  ;;  %v4479_v14 = vpack.c.b16 %v4451_v45, %v4450_v63  ;;  %v3957_v46 = vpack.c.b16 %v3929_v21, %v3928_v58  ;;  %v3637_v45 = vshll.u32 %v3487_v33, 16  ;;  %v4346_v58 = vsel %vm9623_vm2, %v8255_v39, %v4345_v43  ;;  %v3489_v33 = vld [vmem:[#allocation2 + $0x64] sm:$0xf] }
 0x2b5   : > { %v2444_v34 = vpop.f32.mrf.mxu2  ;;  %v4349_v1 = vsel %vm9623_vm2, %v4347_v8, %v4348_v44  ;;  %v3651_v8 = vshll.u32 %v3489_v33, 16  ;;  %v3655_v28 = vshrl.u32 %v3489_v33, 16  ;;  %v2525_v39 = vadd.f32 %v10119_v15, %v10085_v12  ;;  %v4236_v33 = vld [vmem:[#allocation2 + $0x68] sm:$0x1]  ;;  %v4234_v12 = vld [vmem:[#allocation2 + $0x60] sm:$0xe] }
 0x2b6   : > { %v10126_v32 = vadd.f32 %v2444_v34, %v10099_v50  ;;  %v3618_v50 = vshrl.u32 %v3485_v55, 16  ;;  %v8676_v55 = vld [vmem:[#allocation2 + $0x50] sm:$0xff]  ;;  %v3639_v48 = vrot.slane %v3637_v45, 5  ;;  %v10164_v45 = vadd.f32 %v10101_v57, %v10087_v16 }
 0x2b7   : > { %v3657_v16 = vrot.slane %v3655_v28, 4  ;;  %v8256_v28 = vrot.slane %v4234_v12, 9 }
 0x2b8   : > { %v3620_v35 = vrot.slane %v3618_v50, 4  ;;  %11413 = vst [vmem:[#allocation41_spill] sm:$0xff] %v10164_v45 }
 0x2ba   : > { %v10136_v30 = vpop.f32.mrf.mxu3 }
 0x2bc   : > { %v10143_v34 = vpop.f32.mrf.mxu1 }
 0x2bd   : > { %v2446_v18 = vpop.f32.mrf.mxu2 }
 0x2be   : > { %v10141_v59 = vadd.f32 %v2446_v18, %v10103_v19  ;;  %v3624_v19 = vor.u32 %v3623_v22, %v3620_v35  ;;  %v3634_v18 = vor.u32 %v3633_v53, %v3629_v47  ;;  %v4453_v53 = vunpack.c.l.b16 %v4349_v1  ;;  %v3490_v1 = vld [vmem:[#allocation2 + $0x68] sm:$0x1] }
 0x2bf   : > { %4579 = vmatmul.bf16.gmra.mxu3 %v4479_v14  ;;  %3316 = vmatmul.bf16.gmra.mxu1 %v8676_v55  ;;  %v3642_v22 = vshrl.u32 %v3488_v2, 16  ;;  %v3645_v55 = vshll.u32 %v3488_v2, 16  ;;  %v8677_v2 = vld [vmem:[#allocation2 + $0x60] sm:$0xff] }
 0x2c0   : > { %v3625_v21 = vrot.slane %v3624_v19, 4  ;;  %v3635_v14 = vrot.slane %v3634_v18, 4 }
 0x2c2   : > { %4057 = vmatmul.bf16.gmra.mxu2 %v3957_v46  ;;  %v10145_v63 = vpop.f32.mrf.mxu3  ;;  %v3640_v35 = vsel %vm9631_vm5, %v3635_v14, %v3639_v48  ;;  %v4452_v46 = vunpack.c.l.b16 %v4346_v58  ;;  %v4235_v48 = vld [vmem:[#allocation2 + $0x64] sm:$0xf]  ;;  %v3647_v14 = vrot.slane %v3645_v55, 5  ;;  %v3653_v58 = vrot.slane %v3651_v8, 5 }
 0x2c3   : > { %v3931_v43 = vunpack.c.l.b16 %v3640_v35  ;;  %v3661_v35 = vshll.u32 %v3490_v1, 16  ;;  %v8740_v1 = vld [vmem:[#allocation9 + $0x1e0] sm:$0xff] }
 0x2c4   : > { %v10150_v52 = vpop.f32.mrf.mxu1  ;;  %v4480_v19 = vpack.c.b16 %v4453_v53, %v4452_v46  ;;  %v4352_v53 = vrot.slane %v4235_v48, 5  ;;  %v3658_v55 = vor.u32 %v3657_v16, %v3653_v58  ;;  %5684 = vmatpush.bf16.msrb.mxu1 %v8740_v1 }
 0x2c5   : > { %v2449_v50 = vpop.f32.mrf.mxu2 }
 0x2c6   : > { %v10148_v31 = vadd.f32 %v2449_v50, %v10121_v38  ;;  %v3630_v38 = vsel %vm9631_vm5, %v3625_v21, %v3629_v47  ;;  %v3644_v21 = vrot.slane %v3642_v22, 4  ;;  %v4355_v22 = vrot.slane %v4236_v33, 5 }
 0x2c7   : > { %v3930_v18 = vunpack.c.l.b16 %v3630_v38  ;;  %v10174_v38 = vadd.f32 %v10117_v5, %v2525_v39  ;;  %v3659_v39 = vrot.slane %v3658_v55, 4 }
 0x2c8   : > { %v3648_v15 = vor.u32 %v3647_v14, %v3644_v21  ;;  %v3491_v21 = vld [vmem:[#allocation2 + $0x70] sm:$0xf]  ;;  %v3492_v14 = vld [vmem:[#allocation2 + $0x74] sm:$0xf] }
 0x2c9   : > { %v3958_v57 = vpack.c.b16 %v3931_v43, %v3930_v18  ;;  %11414 = vst [vmem:[#allocation42_spill] sm:$0xff] %v10174_v38  ;;  %v3663_v43 = vrot.slane %v3661_v35, 5  ;;  %v3666_v33 = vshrl.u32 %v3491_v21, 16  ;;  %v3669_v35 = vshll.u32 %v3491_v21, 16 }
 0x2ca   : > { %v10160_v27 = vpop.f32.mrf.mxu3  ;;  %v3649_v48 = vrot.slane %v3648_v15, 4  ;;  %v3675_v15 = vshll.u32 %v3492_v14, 16 }
 0x2cb   : > { %v3664_v16 = vsel %vm9631_vm5, %v3659_v39, %v3663_v43  ;;  %v4238_v43 = vld [vmem:[#allocation2 + $0x74] sm:$0xf]  ;;  %v3668_v39 = vrot.slane %v3666_v33, 4 }
 0x2cc   : > { %v10171_v50 = vpop.f32.mrf.mxu1  ;;  %v3933_v55 = vunpack.c.l.b16 %v3664_v16  ;;  %v3677_v21 = vrot.slane %v3675_v15, 5 }
 0x2cd   : > { %v2451_v44 = vpop.f32.mrf.mxu2 }
 0x2ce   : > { %v10169_v47 = vadd.f32 %v2451_v44, %v10128_v11  ;;  %v8748_v11 = vld [vmem:[#allocation9 + $0x220] sm:$0xff]  ;;  %v4354_v44 = vrot.slane %v4352_v53, 4 }
 0x2cf   : > { %4584 = vmatmul.bf16.gmra.mxu3 %v4480_v19  ;;  %3321 = vmatmul.bf16.gmra.mxu1 %v8677_v2  ;;  %v4353_v2 = vsel %vm9623_vm2, %v8256_v28, %v4352_v53 }
 0x2d0   : > { %6206 = vmatpush.bf16.msrb.mxu2 %v8748_v11  ;;  %v4356_v5 = vsel %vm9623_vm2, %v4354_v44, %v4355_v22  ;;  %v3679_v11 = vshrl.u32 %v3492_v14, 16  ;;  %v4454_v22 = vunpack.c.l.b16 %v4353_v2  ;;  %v4239_v14 = vld [vmem:[#allocation2 + $0x78] sm:$0x1]  ;;  %v4359_v2 = vrot.slane %v4238_v43, 5  ;;  %v3495_v43 = vld [vmem:[#allocation2 + $0x84] sm:$0xf] }
 0x2d2   : > { %4062 = vmatmul.bf16.gmra.mxu2 %v3958_v57  ;;  %v10176_v46 = vpop.f32.mrf.mxu3  ;;  %v4455_v57 = vunpack.c.l.b16 %v4356_v5  ;;  %v3493_v5 = vld [vmem:[#allocation2 + $0x78] sm:$0x1]  ;;  %v3681_v38 = vrot.slane %v3679_v11, 4  ;;  %v4361_v33 = vrot.slane %v4359_v2, 4 }
 0x2d3   : > { %v3685_v16 = vshll.u32 %v3493_v5, 16 }
 0x2d4   : > { %v10181_v18 = vpop.f32.mrf.mxu1  ;;  %v4481_v28 = vpack.c.b16 %v4455_v57, %v4454_v22  ;;  %v3682_v57 = vor.u32 %v3681_v38, %v3677_v21 }
 0x2d5   : > { %v2454_v8 = vpop.f32.mrf.mxu2 }
 0x2d6   : > { %v10179_v19 = vadd.f32 %v2454_v8, %v10143_v34  ;;  %v3654_v34 = vsel %vm9631_vm5, %v3649_v48, %v3653_v58  ;;  %v3671_v58 = vrot.slane %v3669_v35, 5  ;;  %v8678_v48 = vld [vmem:[#allocation2 + $0x70] sm:$0xff]  ;;  %v3687_v35 = vrot.slane %v3685_v16, 5 }
 0x2d7   : > { %v3932_v44 = vunpack.c.l.b16 %v3654_v34  ;;  %v4237_v34 = vld [vmem:[#allocation2 + $0x70] sm:$0xe]  ;;  %v3699_v16 = vshll.u32 %v3495_v43, 16 }
 0x2d8   : > { %v8257_v45 = vrot.slane %v4237_v34, 9  ;;  %v3703_v34 = vshrl.u32 %v3495_v43, 16  ;;  %v4242_v43 = vld [vmem:[#allocation2 + $0x88] sm:$0x1] }
 0x2da   : > { %v10191_v12 = vpop.f32.mrf.mxu3  ;;  %v4360_v5 = vsel %vm9623_vm2, %v8257_v45, %v4359_v2 }
 0x2db   : > { %11415 = vst [vmem:[#allocation43_spill] sm:$0xff] %v10191_v12  ;;  %v3959_v12 = vpack.c.b16 %v3933_v55, %v3932_v44 }
 0x2dc   : > { %v10196_v53 = vpop.f32.mrf.mxu1 }
 0x2dd   : > { %v2456_v8 = vpop.f32.mrf.mxu2 }
 0x2de   : > { %v10194_v1 = vadd.f32 %v2456_v8, %v10150_v52  ;;  %v3672_v52 = vor.u32 %v3671_v58, %v3668_v39  ;;  %v10215_v58 = vadd.f32 %v10123_v49, %v10126_v32  ;;  %v8679_v49 = vld [vmem:[#allocation2 + $0x80] sm:$0xff] }
 0x2df   : > { %4589 = vmatmul.bf16.gmra.mxu3 %v4481_v28  ;;  %3326 = vmatmul.bf16.gmra.mxu1 %v8678_v48  ;;  %v3494_v28 = vld [vmem:[#allocation2 + $0x80] sm:$0xf] }
 0x2e0   : > { %11416 = vst [vmem:[#allocation44_spill] sm:$0xff] %v10194_v1  ;;  %v4362_v1 = vrot.slane %v4239_v14, 5  ;;  %v3673_v55 = vrot.slane %v3672_v52, 4  ;;  %v3693_v14 = vshll.u32 %v3494_v28, 16  ;;  %v4456_v52 = vunpack.c.l.b16 %v4360_v5 }
 0x2e2   : > { %4067 = vmatmul.bf16.gmra.mxu2 %v3959_v12  ;;  %v10198_v8 = vpop.f32.mrf.mxu3  ;;  %v4363_v44 = vsel %vm9623_vm2, %v4361_v33, %v4362_v1  ;;  %v3683_v12 = vrot.slane %v3682_v57, 4  ;;  %v3690_v1 = vshrl.u32 %v3494_v28, 16 }
 0x2e3   : > { %v4457_v39 = vunpack.c.l.b16 %v4363_v44  ;;  %v3695_v44 = vrot.slane %v3693_v14, 5 }
 0x2e4   : > { %v10203_v11 = vpop.f32.mrf.mxu1  ;;  %v3688_v38 = vsel %vm9631_vm5, %v3683_v12, %v3687_v35  ;;  %v4241_v35 = vld [vmem:[#allocation2 + $0x84] sm:$0xf]  ;;  %v3692_v32 = vrot.slane %v3690_v1, 4  ;;  %v3701_v12 = vrot.slane %v3699_v16, 5 }
 0x2e5   : > { %v2459_v22 = vpop.f32.mrf.mxu2  ;;  %v3935_v57 = vunpack.c.l.b16 %v3688_v38  ;;  %v4482_v33 = vpack.c.b16 %v4457_v39, %v4456_v52  ;;  %v4366_v5 = vrot.slane %v4241_v35, 5  ;;  %v10226_v39 = vadd.f32 %v10136_v30, %v10141_v59 }
 0x2e6   : > { %v10201_v15 = vadd.f32 %v2459_v22, %v10171_v50  ;;  %v3678_v50 = vsel %vm9631_vm5, %v3673_v55, %v3677_v21  ;;  %v3496_v55 = vld [vmem:[#allocation2 + $0x88] sm:$0x1]  ;;  %v4369_v52 = vrot.slane %v4242_v43, 5  ;;  %v3696_v1 = vor.u32 %v3695_v44, %v3692_v32  ;;  %v8739_v43 = vld [vmem:[#allocation9 + $0x1d8] sm:$0xff] }
 0x2e7   : > { %v3934_v21 = vunpack.c.l.b16 %v3678_v50  ;;  %v3709_v38 = vshll.u32 %v3496_v55, 16  ;;  %5685 = vmatpush.bf16.msrb.mxu1 %v8739_v43  ;;  %v3499_v43 = vld [vmem:[#allocation2 + $0x98] sm:$0x1] }
 0x2e8   : > { %v3697_v30 = vrot.slane %v3696_v1, 4 }
 0x2e9   : > { %v3960_v28 = vpack.c.b16 %v3935_v57, %v3934_v21  ;;  %v4368_v57 = vrot.slane %v4366_v5, 4 }
 0x2ea   : > { %v10217_v48 = vpop.f32.mrf.mxu3 }
 0x2eb   : > { %11417 = vst [vmem:[#allocation45_spill] sm:$0xff] %v10217_v48  ;;  %v3705_v48 = vrot.slane %v3703_v34, 4  ;;  %v4370_v55 = vsel %vm9623_vm2, %v4368_v57, %v4369_v52  ;;  %v3031_v57 = vadd.f32 %v9840_v26, %v9808_v0  ;;  %v3733_v26 = vshll.u32 %v3499_v43, 16  ;;  %v8759_v43 = vld [vmem:[#allocation10 + $0x38] sm:$0xff] }
 0x2ec   : > { %v10222_v22 = vpop.f32.mrf.mxu1  ;;  %v4459_v44 = vunpack.c.l.b16 %v4370_v55  ;;  %6604 = vmatpush.bf16.msrb.mxu3 %v8759_v43  ;;  %v8681_v43 = vld [vmem:[#allocation2 + $0xa0] sm:$0xff] }
 0x2ed   : > { %v2461_v45 = vpop.f32.mrf.mxu2  ;;  %v3706_v14 = vor.u32 %v3705_v48, %v3701_v12 }
 0x2ee   : > { %v10220_v2 = vadd.f32 %v2461_v45, %v10181_v18  ;;  %v4240_v18 = vld [vmem:[#allocation2 + $0x80] sm:$0xe]  ;;  %v8747_v45 = vld [vmem:[#allocation9 + $0x218] sm:$0xff] }
 0x2ef   : > { %4594 = vmatmul.bf16.gmra.mxu3 %v4482_v33  ;;  %3331 = vmatmul.bf16.gmra.mxu1 %v8679_v49  ;;  %v8258_v34 = vrot.slane %v4240_v18, 9  ;;  %v3711_v33 = vrot.slane %v3709_v38, 5  ;;  %v3707_v59 = vrot.slane %v3706_v14, 4  ;;  %v3497_v49 = vld [vmem:[#allocation2 + $0x90] sm:$0xf] }
 0x2f0   : > { %6207 = vmatpush.bf16.msrb.mxu2 %v8747_v45  ;;  %v3714_v38 = vshrl.u32 %v3497_v49, 16  ;;  %v3702_v45 = vsel %vm9631_vm5, %v3697_v30, %v3701_v12  ;;  %v3717_v52 = vshll.u32 %v3497_v49, 16  ;;  %v8680_v12 = vld [vmem:[#allocation2 + $0x90] sm:$0xff] }
 0x2f1   : > { %v4367_v48 = vsel %vm9623_vm2, %v8258_v34, %v4366_v5  ;;  %v3712_v32 = vsel %vm9631_vm5, %v3707_v59, %v3711_v33  ;;  %v4244_v59 = vld [vmem:[#allocation2 + $0x94] sm:$0xf] }
 0x2f2   : > { %4072 = vmatmul.bf16.gmra.mxu2 %v3960_v28  ;;  %v10228_v50 = vpop.f32.mrf.mxu3  ;;  %v3498_v28 = vld [vmem:[#allocation2 + $0x94] sm:$0xf]  ;;  %v3937_v5 = vunpack.c.l.b16 %v3712_v32  ;;  %v3719_v30 = vrot.slane %v3717_v52, 5  ;;  %v4245_v32 = vld [vmem:[#allocation2 + $0x98] sm:$0x1]  ;;  %v4373_v0 = vrot.slane %v4244_v59, 5 }
 0x2f3   : > { %11418 = vst [vmem:[#allocation46_spill] sm:$0xff] %v10228_v50  ;;  %v3723_v1 = vshll.u32 %v3498_v28, 16  ;;  %v3727_v14 = vshrl.u32 %v3498_v28, 16  ;;  %v3501_v59 = vld [vmem:[#allocation2 + $0xa4] sm:$0xf] }
 0x2f4   : > { %v10233_v35 = vpop.f32.mrf.mxu1 }
 0x2f5   : > { %v2464_v16 = vpop.f32.mrf.mxu2  ;;  %v3725_v49 = vrot.slane %v3723_v1, 5  ;;  %v3729_v28 = vrot.slane %v3727_v14, 4  ;;  %v4375_v14 = vrot.slane %v4373_v0, 4 }
 0x2f6   : > { %v10231_v21 = vadd.f32 %v2464_v16, %v10196_v53  ;;  %v10243_v53 = vadd.f32 %v10145_v63, %v10148_v31  ;;  %v4458_v16 = vunpack.c.l.b16 %v4367_v48  ;;  %v3936_v63 = vunpack.c.l.b16 %v3702_v45 }
 0x2f8   : > { %v4483_v31 = vpack.c.b16 %v4459_v44, %v4458_v16  ;;  %v3961_v48 = vpack.c.b16 %v3937_v5, %v3936_v63  ;;  %v10258_v44 = vadd.f32 %v10160_v27, %v10169_v47  ;;  %v3500_v47 = vld [vmem:[#allocation2 + $0xa0] sm:$0xf] }
 0x2fa   : > { %v10245_v18 = vpop.f32.mrf.mxu3 }
 0x2fb   : > { %11419 = vst [vmem:[#allocation47_spill] sm:$0xff] %v10245_v18  ;;  %v3716_v18 = vrot.slane %v3714_v38, 4  ;;  %v4376_v38 = vrot.slane %v4245_v32, 5 }
 0x2fc   : > { %v3297_v55 = vpop.f32.mrf.mxu1 }
 0x2fd   : > { %v2466_v34 = vpop.f32.mrf.mxu2  ;;  %v10254_v50 = vadd.f32 %v3297_v55, %v3031_v57  ;;  %v3720_v16 = vor.u32 %v3719_v30, %v3716_v18  ;;  %v3735_v57 = vrot.slane %v3733_v26, 5  ;;  %v3741_v26 = vshll.u32 %v3500_v47, 16 }
 0x2fe   : > { %v10252_v33 = vadd.f32 %v2466_v34, %v10203_v11  ;;  %v4243_v11 = vld [vmem:[#allocation2 + $0x90] sm:$0xe]  ;;  %v3730_v34 = vor.u32 %v3729_v28, %v3725_v49  ;;  %v3738_v28 = vshrl.u32 %v3500_v47, 16 }
 0x2ff   : > { %4599 = vmatmul.bf16.gmra.mxu3 %v4483_v31  ;;  %3336 = vmatmul.bf16.gmra.mxu1 %v8680_v12  ;;  %v8259_v1 = vrot.slane %v4243_v11, 9  ;;  %v4377_v31 = vsel %vm9623_vm2, %v4375_v14, %v4376_v38  ;;  %v3721_v63 = vrot.slane %v3720_v16, 4  ;;  %v3747_v11 = vshll.u32 %v3501_v59, 16 }
 0x300   : > { %v3731_v27 = vrot.slane %v3730_v34, 4  ;;  %v4461_v30 = vunpack.c.l.b16 %v4377_v31  ;;  %v3751_v38 = vshrl.u32 %v3501_v59, 16  ;;  %v4247_v31 = vld [vmem:[#allocation2 + $0xa4] sm:$0xf] }
 0x301   : > { %v4374_v18 = vsel %vm9623_vm2, %v8259_v1, %v4373_v0  ;;  %v3726_v32 = vsel %vm9631_vm5, %v3721_v63, %v3725_v49  ;;  %v3743_v49 = vrot.slane %v3741_v26, 5  ;;  %v3749_v63 = vrot.slane %v3747_v11, 5 }
 0x302   : > { %4077 = vmatmul.bf16.gmra.mxu2 %v3961_v48  ;;  %v10260_v45 = vpop.f32.mrf.mxu3  ;;  %v3736_v12 = vsel %vm9631_vm5, %v3731_v27, %v3735_v57  ;;  %v4460_v16 = vunpack.c.l.b16 %v4374_v18  ;;  %v3938_v57 = vunpack.c.l.b16 %v3726_v32  ;;  %v3753_v47 = vrot.slane %v3751_v38, 4  ;;  %v4248_v18 = vld [vmem:[#allocation2 + $0xa8] sm:$0x1]  ;;  %v8746_v32 = vld [vmem:[#allocation9 + $0x210] sm:$0xff] }
 0x303   : > { %v3939_v0 = vunpack.c.l.b16 %v3736_v12  ;;  %v8767_v12 = vld [vmem:[#allocation12 + $0x38] sm:$0xff]  ;;  %6208 = vmatpush.bf16.msrb.mxu2 %v8746_v32  ;;  %v2507_v26 = vadd.f32 %v9829_v7, %v9827_v6  ;;  %v8738_v6 = vld [vmem:[#allocation9 + $0x1d0] sm:$0xff] }
 0x304   : > { %v10265_v55 = vpop.f32.mrf.mxu1  ;;  %v4484_v14 = vpack.c.b16 %v4461_v30, %v4460_v16  ;;  %v4246_v30 = vld [vmem:[#allocation2 + $0xa0] sm:$0xe]  ;;  %7325 = vmatpush.bf16.msra.mxu0 %v8767_v12  ;;  %5686 = vmatpush.bf16.msrb.mxu1 %v8738_v6 }
 0x305   : > { %v2469_v52 = vpop.f32.mrf.mxu2  ;;  %v3962_v59 = vpack.c.b16 %v3939_v0, %v3938_v57  ;;  %v8260_v38 = vrot.slane %v4246_v30, 9 }
 0x306   : > { %v10263_v5 = vadd.f32 %v2469_v52, %v10222_v22  ;;  %v10275_v22 = vadd.f32 %v10176_v46, %v10179_v19  ;;  %v3502_v46 = vld [vmem:[#allocation2 + $0xa8] sm:$0x1]  ;;  %v3740_v19 = vrot.slane %v3738_v28, 4  ;;  %v4383_v28 = vrot.slane %v4248_v18, 5 }
 0x30a   : > { %v10277_v48 = vpop.f32.mrf.mxu3 }
 0x30b   : > { %11420 = vst [vmem:[#allocation48_spill] sm:$0xff] %v10277_v48  ;;  %v3744_v48 = vor.u32 %v3743_v49, %v3740_v19 }
 0x30c   : > { %v3302_v1 = vpop.f32.mrf.mxu1 }
 0x30d   : > { %v2471_v34 = vpop.f32.mrf.mxu2  ;;  %v10285_v27 = vadd.f32 %v3302_v1, %v9854_v10  ;;  %v3754_v10 = vor.u32 %v3753_v47, %v3749_v63  ;;  %v3503_v1 = vld [vmem:[#allocation2 + $0xb0] sm:$0xf]  ;;  %v3745_v49 = vrot.slane %v3744_v48, 4 }
 0x30e   : > { %v10282_v52 = vadd.f32 %v2471_v34, %v10233_v35  ;;  %v4380_v35 = vrot.slane %v4247_v31, 5  ;;  %v3757_v34 = vshll.u32 %v3502_v46, 16  ;;  %v3762_v46 = vshrl.u32 %v3503_v1, 16 }
 0x30f   : > { %4604 = vmatmul.bf16.gmra.mxu3 %v4484_v14  ;;  %3341 = vmatmul.bf16.gmra.mxu1 %v8681_v43  ;;  %v3765_v43 = vshll.u32 %v3503_v1, 16  ;;  %v3755_v47 = vrot.slane %v3754_v10, 4  ;;  %v10301_v1 = vpop.f32.mrf.mxu0  ;;  %v3750_v48 = vsel %vm9631_vm5, %v3745_v49, %v3749_v63  ;;  %v4249_v63 = vld [vmem:[#allocation2 + $0xb0] sm:$0xe]  ;;  %v4251_v49 = vld [vmem:[#allocation2 + $0xb8] sm:$0x1] }
 0x310   : > { %11421 = vst [vmem:[#allocation49_spill] sm:$0xff] %v10282_v52  ;;  %v3504_v52 = vld [vmem:[#allocation2 + $0xb4] sm:$0xf]  ;;  %v4382_v0 = vrot.slane %v4380_v35, 4  ;;  %v3759_v14 = vrot.slane %v3757_v34, 5  ;;  %v4381_v7 = vsel %vm9623_vm2, %v8260_v38, %v4380_v35  ;;  %v3032_v34 = vadd.f32 %v9847_v42, %v2507_v26 }
 0x311   : > { %v3775_v18 = vshrl.u32 %v3504_v52, 16  ;;  %v3764_v32 = vrot.slane %v3762_v46, 4  ;;  %11423 = vst [vmem:[#allocation51_spill] sm:$0xff] %v10301_v1  ;;  %v4462_v38 = vunpack.c.l.b16 %v4381_v7  ;;  %v8682_v1 = vld [vmem:[#allocation2 + $0xb0] sm:$0xff]  ;;  %v8261_v7 = vrot.slane %v4249_v63, 9 }
 0x312   : > { %4082 = vmatmul.bf16.gmra.mxu2 %v3962_v59  ;;  %v4565_v16 = vpop.f32.mrf.mxu3  ;;  %v3771_v59 = vshll.u32 %v3504_v52, 16  ;;  %v4384_v19 = vsel %vm9623_vm2, %v4382_v0, %v4383_v28  ;;  %v4250_v52 = vld [vmem:[#allocation2 + $0xb4] sm:$0xf]  ;;  %v3410_v35 = vadd.f32 %v10265_v55, %v3032_v34 }
 0x313   : > { %v4463_v30 = vunpack.c.l.b16 %v4384_v19  ;;  %v3940_v19 = vunpack.c.l.b16 %v3750_v48 }
 0x314   : > { %v10290_v31 = vpop.f32.mrf.mxu1  ;;  %v3773_v10 = vrot.slane %v3771_v59, 5 }
 0x315   : > { %v4043_v11 = vpop.f32.mrf.mxu2  ;;  %v4485_v46 = vpack.c.b16 %v4463_v30, %v4462_v38 }
 0x316   : > { %v4155_v57 = vadd.f32 %v4043_v11, %v10254_v50  ;;  %v3760_v50 = vsel %vm9631_vm5, %v3755_v47, %v3759_v14  ;;  %v3777_v11 = vrot.slane %v3775_v18, 4  ;;  %v3505_v14 = vld [vmem:[#allocation2 + $0xb8] sm:$0x1]  ;;  %v4387_v47 = vrot.slane %v4250_v52, 5 }
 0x317   : > { %v3941_v0 = vunpack.c.l.b16 %v3760_v50  ;;  %v3781_v18 = vshll.u32 %v3505_v14, 16  ;;  %v4390_v50 = vrot.slane %v4251_v49, 5  ;;  %v10311_v38 = vpop.f32.mrf.mxu0 }
 0x318   : > { %v10294_v12 = vadd.f32 %v4565_v16, %v4155_v57  ;;  %v3767_v16 = vrot.slane %v3765_v43, 5  ;;  %v3778_v59 = vor.u32 %v3777_v11, %v3773_v10  ;;  %v4389_v30 = vrot.slane %v4387_v47, 4 }
 0x319   : > { %v3963_v55 = vpack.c.b16 %v3941_v0, %v3940_v19  ;;  %v8758_v19 = vld [vmem:[#allocation10 + $0x30] sm:$0xff] }
 0x31a   : > { %11422 = vst [vmem:[#allocation50_spill] sm:$0xff] %v10294_v12  ;;  %v4567_v28 = vpop.f32.mrf.mxu3  ;;  %v3768_v43 = vor.u32 %v3767_v16, %v3764_v32  ;;  %v3779_v52 = vrot.slane %v3778_v59, 4  ;;  %v3507_v32 = vld [vmem:[#allocation2 + $0xc4] sm:$0xf]  ;;  %v4391_v0 = vsel %vm9623_vm2, %v4389_v30, %v4390_v50  ;;  %6605 = vmatpush.bf16.msrb.mxu3 %v8758_v19 }
 0x31c   : > { %v3307_v26 = vpop.f32.mrf.mxu1  ;;  %v3769_v48 = vrot.slane %v3768_v43, 4 }
 0x31d   : > { %v4045_v57 = vpop.f32.mrf.mxu2  ;;  %v10307_v6 = vadd.f32 %v3307_v26, %v9914_v9  ;;  %v3783_v9 = vrot.slane %v3781_v18, 5 }
 0x31e   : > { %v4156_v42 = vadd.f32 %v4045_v57, %v3410_v35  ;;  %v3506_v35 = vld [vmem:[#allocation2 + $0xc0] sm:$0xf]  ;;  %v3774_v14 = vsel %vm9631_vm5, %v3769_v48, %v3773_v10 }
 0x31f   : > { %4609 = vmatmul.bf16.gmra.mxu3 %v4485_v46  ;;  %3346 = vmatmul.bf16.gmra.mxu1 %v8682_v1  ;;  %v4388_v1 = vsel %vm9623_vm2, %v8261_v7, %v4387_v47  ;;  %v3786_v26 = vshrl.u32 %v3506_v35, 16  ;;  %v4465_v47 = vunpack.c.l.b16 %v4391_v0  ;;  %v3942_v59 = vunpack.c.l.b16 %v3774_v14  ;;  %v4253_v7 = vld [vmem:[#allocation2 + $0xc4] sm:$0xf]  ;;  %v4254_v14 = vld [vmem:[#allocation2 + $0xc8] sm:$0x1] }
 0x320   : > { %v10309_v12 = vadd.f32 %v4567_v28, %v4156_v42  ;;  %v2509_v28 = vadd.f32 %v9868_v24, %v9866_v23  ;;  %v3784_v42 = vsel %vm9631_vm5, %v3779_v52, %v3783_v9  ;;  %v3789_v23 = vshll.u32 %v3506_v35, 16  ;;  %v3508_v52 = vld [vmem:[#allocation2 + $0xc8] sm:$0x1] }
 0x321   : > { %v3795_v24 = vshll.u32 %v3507_v32, 16  ;;  %v4464_v49 = vunpack.c.l.b16 %v4388_v1  ;;  %v3943_v18 = vunpack.c.l.b16 %v3784_v42  ;;  %v4394_v1 = vrot.slane %v4253_v7, 5 }
 0x322   : > { %4087 = vmatmul.bf16.gmra.mxu2 %v3963_v55  ;;  %v4570_v34 = vpop.f32.mrf.mxu3  ;;  %v3034_v63 = vadd.f32 %v9905_v54, %v2509_v28  ;;  %v3788_v55 = vrot.slane %v3786_v26, 4  ;;  %v3791_v50 = vrot.slane %v3789_v23, 5  ;;  %v8683_v28 = vld [vmem:[#allocation2 + $0xc0] sm:$0xff]  ;;  %v3805_v23 = vshll.u32 %v3508_v52, 16 }
 0x323   : > { %v3797_v30 = vrot.slane %v3795_v24, 5  ;;  %v8766_v24 = vld [vmem:[#allocation12 + $0x30] sm:$0xff] }
 0x324   : > { %v10316_v11 = vpop.f32.mrf.mxu1  ;;  %v3412_v10 = vadd.f32 %v10290_v31, %v3034_v63  ;;  %v4252_v31 = vld [vmem:[#allocation2 + $0xc0] sm:$0xe]  ;;  %v3792_v42 = vor.u32 %v3791_v50, %v3788_v55  ;;  %7326 = vmatpush.bf16.msra.mxu0 %v8766_v24  ;;  %v3509_v50 = vld [vmem:[#allocation2 + $0xd0] sm:$0xf] }
 0x325   : > { %v4048_v57 = vpop.f32.mrf.mxu2  ;;  %v8262_v63 = vrot.slane %v4252_v31, 9 }
 0x326   : > { %v4157_v16 = vadd.f32 %v4048_v57, %v10285_v27  ;;  %v3799_v27 = vshrl.u32 %v3507_v32, 16  ;;  %v4486_v57 = vpack.c.b16 %v4465_v47, %v4464_v49  ;;  %v10330_v32 = vpop.f32.mrf.mxu0  ;;  %v4397_v49 = vrot.slane %v4254_v14, 5 }
 0x327   : > { %v3793_v47 = vrot.slane %v3792_v42, 4 }
 0x328   : > { %v10326_v46 = vadd.f32 %v4570_v34, %v4157_v16  ;;  %v3801_v34 = vrot.slane %v3799_v27, 4  ;;  %v3964_v16 = vpack.c.b16 %v3943_v18, %v3942_v59  ;;  %v8745_v27 = vld [vmem:[#allocation9 + $0x208] sm:$0xff]  ;;  %v3807_v18 = vrot.slane %v3805_v23, 5  ;;  %v4256_v23 = vld [vmem:[#allocation2 + $0xd4] sm:$0xf] }
 0x329   : > { %6209 = vmatpush.bf16.msrb.mxu2 %v8745_v27 }
 0x32a   : > { %v4572_v43 = vpop.f32.mrf.mxu3  ;;  %v3802_v26 = vor.u32 %v3801_v34, %v3797_v30  ;;  %v3510_v34 = vld [vmem:[#allocation2 + $0xd4] sm:$0xf] }
 0x32b   : > { %v3823_v31 = vshrl.u32 %v3510_v34, 16 }
 0x32c   : > { %v3312_v35 = vpop.f32.mrf.mxu1  ;;  %v3803_v59 = vrot.slane %v3802_v26, 4 }
 0x32d   : > { %v4050_v48 = vpop.f32.mrf.mxu2  ;;  %v10333_v54 = vadd.f32 %v3312_v35, %v9947_v51  ;;  %v4396_v51 = vrot.slane %v4394_v1, 4  ;;  %v3798_v35 = vsel %vm9631_vm5, %v3793_v47, %v3797_v30  ;;  %v3825_v47 = vrot.slane %v3823_v31, 4 }
 0x32e   : > { %v4158_v9 = vadd.f32 %v4050_v48, %v3412_v10  ;;  %v2511_v10 = vadd.f32 %v9898_v41, %v9896_v40  ;;  %v4395_v48 = vsel %vm9623_vm2, %v8262_v63, %v4394_v1  ;;  %v3808_v40 = vsel %vm9631_vm5, %v3803_v59, %v3807_v18  ;;  %v8737_v41 = vld [vmem:[#allocation9 + $0x1c8] sm:$0xff] }
 0x32f   : > { %4614 = vmatmul.bf16.gmra.mxu3 %v4486_v57  ;;  %3351 = vmatmul.bf16.gmra.mxu1 %v8683_v28  ;;  %v4398_v52 = vsel %vm9623_vm2, %v4396_v51, %v4397_v49  ;;  %v3810_v57 = vshrl.u32 %v3509_v50, 16  ;;  %v3813_v28 = vshll.u32 %v3509_v50, 16  ;;  %v4466_v14 = vunpack.c.l.b16 %v4395_v48  ;;  %v3511_v50 = vld [vmem:[#allocation2 + $0xd8] sm:$0x1] }
 0x330   : > { %v10335_v0 = vadd.f32 %v4572_v43, %v4158_v9  ;;  %v3036_v1 = vadd.f32 %v9935_v17, %v2511_v10  ;;  %v4467_v42 = vunpack.c.l.b16 %v4398_v52  ;;  %5687 = vmatpush.bf16.msrb.mxu1 %v8737_v41  ;;  %v3944_v30 = vunpack.c.l.b16 %v3798_v35  ;;  %v8684_v10 = vld [vmem:[#allocation2 + $0xd0] sm:$0xff]  ;;  %v4257_v48 = vld [vmem:[#allocation2 + $0xd8] sm:$0x1] }
 0x331   : > { %v3945_v27 = vunpack.c.l.b16 %v3808_v40  ;;  %v3812_v63 = vrot.slane %v3810_v57, 4  ;;  %v3815_v51 = vrot.slane %v3813_v28, 5  ;;  %v3829_v41 = vshll.u32 %v3511_v50, 16 }
 0x332   : > { %4092 = vmatmul.bf16.gmra.mxu2 %v3964_v16  ;;  %v4575_v19 = vpop.f32.mrf.mxu3  ;;  %v3819_v16 = vshll.u32 %v3510_v34, 16  ;;  %v3414_v24 = vadd.f32 %v10316_v11, %v3036_v1  ;;  %v4255_v34 = vld [vmem:[#allocation2 + $0xd0] sm:$0xe] }
 0x333   : > { %v3965_v11 = vpack.c.b16 %v3945_v27, %v3944_v30  ;;  %v3816_v35 = vor.u32 %v3815_v51, %v3812_v63  ;;  %v8263_v57 = vrot.slane %v4255_v34, 9  ;;  %v2513_v30 = vadd.f32 %v9928_v62, %v9926_v61 }
 0x334   : > { %v10340_v7 = vpop.f32.mrf.mxu1  ;;  %v3821_v49 = vrot.slane %v3819_v16, 5  ;;  %v4404_v16 = vrot.slane %v4257_v48, 5 }
 0x335   : > { %v4053_v43 = vpop.f32.mrf.mxu2 }
 0x336   : > { %v4159_v55 = vadd.f32 %v4053_v43, %v10307_v6  ;;  %v10352_v6 = vpop.f32.mrf.mxu0  ;;  %v4487_v43 = vpack.c.b16 %v4467_v42, %v4466_v14  ;;  %v3826_v40 = vor.u32 %v3825_v47, %v3821_v49  ;;  %v3513_v14 = vld [vmem:[#allocation2 + $0xe4] sm:$0xf] }
 0x338   : > { %v10346_v9 = vadd.f32 %v4575_v19, %v4159_v55  ;;  %v4401_v55 = vrot.slane %v4256_v23, 5  ;;  %v3817_v23 = vrot.slane %v3816_v35, 4 }
 0x33a   : > { %v4577_v26 = vpop.f32.mrf.mxu3  ;;  %v4403_v28 = vrot.slane %v4401_v55, 4  ;;  %v4402_v63 = vsel %vm9623_vm2, %v8263_v57, %v4401_v55  ;;  %v3822_v61 = vsel %vm9631_vm5, %v3817_v23, %v3821_v49 }
 0x33b   : > { %v4468_v34 = vunpack.c.l.b16 %v4402_v63 }
 0x33c   : > { %v3317_v18 = vpop.f32.mrf.mxu1  ;;  %v4405_v51 = vsel %vm9623_vm2, %v4403_v28, %v4404_v16  ;;  %v3946_v16 = vunpack.c.l.b16 %v3822_v61 }
 0x33d   : > { %v4055_v19 = vpop.f32.mrf.mxu2  ;;  %v10357_v17 = vadd.f32 %v3317_v18, %v9966_v25  ;;  %v3512_v25 = vld [vmem:[#allocation2 + $0xe0] sm:$0xf]  ;;  %v3843_v18 = vshll.u32 %v3513_v14, 16  ;;  %v4469_v55 = vunpack.c.l.b16 %v4405_v51 }
 0x33e   : > { %v4160_v59 = vadd.f32 %v4055_v19, %v3414_v24  ;;  %v10361_v31 = vpop.f32.mrf.mxu0  ;;  %v3827_v24 = vrot.slane %v3826_v40, 4  ;;  %v3834_v47 = vshrl.u32 %v3512_v25, 16 }
 0x33f   : > { %4619 = vmatmul.bf16.gmra.mxu3 %v4487_v43  ;;  %3356 = vmatmul.bf16.gmra.mxu1 %v8684_v10  ;;  %v3847_v43 = vshrl.u32 %v3513_v14, 16  ;;  %v8757_v10 = vld [vmem:[#allocation10 + $0x28] sm:$0xff] }
 0x340   : > { %v10359_v52 = vadd.f32 %v4577_v26, %v4160_v59  ;;  %v3831_v26 = vrot.slane %v3829_v41, 5  ;;  %v3837_v59 = vshll.u32 %v3512_v25, 16  ;;  %6606 = vmatpush.bf16.msrb.mxu3 %v8757_v10  ;;  %v3836_v35 = vrot.slane %v3834_v47, 4  ;;  %v3514_v25 = vld [vmem:[#allocation2 + $0xe8] sm:$0x1] }
 0x341   : > { %v3845_v41 = vrot.slane %v3843_v18, 5  ;;  %v3849_v57 = vrot.slane %v3847_v43, 4  ;;  %v3853_v47 = vshll.u32 %v3514_v25, 16  ;;  %v4260_v18 = vld [vmem:[#allocation2 + $0xe8] sm:$0x1] }
 0x342   : > { %4097 = vmatmul.bf16.gmra.mxu2 %v3965_v11  ;;  %v4580_v1 = vpop.f32.mrf.mxu3  ;;  %v3832_v62 = vsel %vm9631_vm5, %v3827_v24, %v3831_v26  ;;  %v4259_v11 = vld [vmem:[#allocation2 + $0xe4] sm:$0xf]  ;;  %v3839_v40 = vrot.slane %v3837_v59, 5  ;;  %v8765_v43 = vld [vmem:[#allocation12 + $0x28] sm:$0xff] }
 0x343   : > { %v4408_v24 = vrot.slane %v4259_v11, 5  ;;  %v3850_v51 = vor.u32 %v3849_v57, %v3845_v41  ;;  %7327 = vmatpush.bf16.msra.mxu0 %v8765_v43  ;;  %v3855_v11 = vrot.slane %v3853_v47, 5  ;;  %v2515_v57 = vadd.f32 %v9960_v37, %v9958_v36 }
 0x344   : > { %v10366_v19 = vpop.f32.mrf.mxu1  ;;  %v3840_v63 = vor.u32 %v3839_v40, %v3836_v35  ;;  %v3515_v35 = vld [vmem:[#allocation2 + $0xf0] sm:$0xf] }
 0x345   : > { %v4058_v42 = vpop.f32.mrf.mxu2  ;;  %v4410_v61 = vrot.slane %v4408_v24, 4  ;;  %v3861_v37 = vshll.u32 %v3515_v35, 16 }
 0x346   : > { %v4161_v27 = vadd.f32 %v4058_v42, %v10333_v54  ;;  %v3038_v54 = vadd.f32 %v9949_v3, %v2513_v30  ;;  %v10380_v49 = vpop.f32.mrf.mxu0  ;;  %v4488_v3 = vpack.c.b16 %v4469_v55, %v4468_v34  ;;  %v8685_v30 = vld [vmem:[#allocation2 + $0xe0] sm:$0xff]  ;;  %v3841_v34 = vrot.slane %v3840_v63, 4 }
 0x347   : > { %11424 = vst [vmem:[#allocation52_spill] sm:$0xff] %v10380_v49  ;;  %v3851_v55 = vrot.slane %v3850_v51, 4 }
 0x348   : > { %v10372_v50 = vadd.f32 %v4580_v1, %v4161_v27  ;;  %v3416_v28 = vadd.f32 %v10340_v7, %v3038_v54  ;;  %v3947_v1 = vunpack.c.l.b16 %v3832_v62  ;;  %v4258_v27 = vld [vmem:[#allocation2 + $0xe0] sm:$0xe] }
 0x349   : > { %v8264_v10 = vrot.slane %v4258_v27, 9  ;;  %v8744_v62 = vld [vmem:[#allocation9 + $0x200] sm:$0xff] }
 0x34a   : > { %v4582_v48 = vpop.f32.mrf.mxu3  ;;  %v3966_v7 = vpack.c.b16 %v3947_v1, %v3946_v16  ;;  %6210 = vmatpush.bf16.msrb.mxu2 %v8744_v62  ;;  %v8736_v27 = vld [vmem:[#allocation9 + $0x1c0] sm:$0xff] }
 0x34b   : > { %v4409_v1 = vsel %vm9623_vm2, %v8264_v10, %v4408_v24  ;;  %v3040_v24 = vadd.f32 %v9977_v20, %v2515_v57  ;;  %5688 = vmatpush.bf16.msrb.mxu1 %v8736_v27  ;;  %v4262_v10 = vld [vmem:[#allocation2 + $0xf4] sm:$0xf] }
 0x34c   : > { %v3322_v23 = vpop.f32.mrf.mxu1  ;;  %v4470_v63 = vunpack.c.l.b16 %v4409_v1  ;;  %v4263_v1 = vld [vmem:[#allocation2 + $0xf8] sm:$0x1] }
 0x34d   : > { %v4060_v14 = vpop.f32.mrf.mxu2  ;;  %v10383_v26 = vadd.f32 %v3322_v23, %v9981_v60  ;;  %v4411_v60 = vrot.slane %v4260_v18, 5  ;;  %v3856_v23 = vsel %vm9631_vm5, %v3851_v55, %v3855_v11  ;;  %v3418_v43 = vadd.f32 %v10366_v19, %v3040_v24 }
 0x34e   : > { %v4162_v42 = vadd.f32 %v4060_v14, %v3416_v28  ;;  %v10394_v25 = vpop.f32.mrf.mxu0  ;;  %v3949_v18 = vunpack.c.l.b16 %v3856_v23 }
 0x34f   : > { %4624 = vmatmul.bf16.gmra.mxu3 %v4488_v3  ;;  %3361 = vmatmul.bf16.gmra.mxu1 %v8685_v30  ;;  %11425 = vst [vmem:[#allocation53_spill] sm:$0xff] %v10394_v25  ;;  %v4412_v14 = vsel %vm9623_vm2, %v4410_v61, %v4411_v60  ;;  %v3858_v3 = vshrl.u32 %v3515_v35, 16  ;;  %v3863_v61 = vrot.slane %v3861_v37, 5 }
 0x350   : > { %v10385_v59 = vadd.f32 %v4582_v48, %v4162_v42  ;;  %v3516_v48 = vld [vmem:[#allocation2 + $0xf4] sm:$0xf]  ;;  %v3846_v42 = vsel %vm9631_vm5, %v3841_v34, %v3845_v41  ;;  %v4471_v51 = vunpack.c.l.b16 %v4412_v14  ;;  %v3517_v34 = vld [vmem:[#allocation2 + $0xf8] sm:$0x1] }
 0x351   : > { %v3871_v30 = vshrl.u32 %v3516_v48, 16  ;;  %v3860_v41 = vrot.slane %v3858_v3, 4 }
 0x352   : > { %4102 = vmatmul.bf16.gmra.mxu2 %v3966_v7  ;;  %v4585_v54 = vpop.f32.mrf.mxu3  ;;  %v3948_v7 = vunpack.c.l.b16 %v3846_v42  ;;  %v4489_v20 = vpack.c.b16 %v4471_v51, %v4470_v63  ;;  %v3877_v42 = vshll.u32 %v3517_v34, 16  ;;  %v5120_v63 = vld [vmem:[#allocation2 + $0x20] sm:$0xf] }
 0x353   : > { %v3864_v19 = vor.u32 %v3863_v61, %v3860_v41  ;;  %v3518_v61 = vld [vmem:[#allocation2 + $0x100] sm:$0xf] }
 0x354   : > { %v10390_v16 = vpop.f32.mrf.mxu1  ;;  %v3967_v57 = vpack.c.b16 %v3949_v18, %v3948_v7  ;;  %v3879_v24 = vrot.slane %v3877_v42, 5  ;;  %v11427_v7 = vld [vmem:[#allocation22_spill] sm:$0xff] }
 0x355   : > { %v4063_v40 = vpop.f32.mrf.mxu2  ;;  %v3865_v27 = vrot.slane %v3864_v19, 4  ;;  %v2517_v18 = vadd.f32 %v11427_v7, %v9987_v29  ;;  %v3885_v19 = vshll.u32 %v3518_v61, 16 }
 0x356   : > { %v4163_v28 = vadd.f32 %v4063_v40, %v10357_v17  ;;  %v3867_v17 = vshll.u32 %v3516_v48, 16  ;;  %v8686_v40 = vld [vmem:[#allocation2 + $0xf0] sm:$0xff]  ;;  %v4415_v48 = vrot.slane %v4262_v10, 5  ;;  %v10413_v23 = vpop.f32.mrf.mxu0 }
 0x357   : > { %11426 = vst [vmem:[#allocation54_spill] sm:$0xff] %v10413_v23  ;;  %v3887_v25 = vrot.slane %v3885_v19, 5  ;;  %v4266_v19 = vld [vmem:[#allocation2 + $0x108] sm:$0x1] }
 0x358   : > { %v10402_v36 = vadd.f32 %v4585_v54, %v4163_v28  ;;  %v3869_v62 = vrot.slane %v3867_v17, 5  ;;  %v3873_v54 = vrot.slane %v3871_v30, 4  ;;  %v4261_v28 = vld [vmem:[#allocation2 + $0xf0] sm:$0xe]  ;;  %v4417_v17 = vrot.slane %v4415_v48, 4 }
 0x359   : > { %v8265_v37 = vrot.slane %v4261_v28, 9  ;;  %v4418_v30 = vrot.slane %v4263_v1, 5  ;;  %v8756_v28 = vld [vmem:[#allocation10 + $0x20] sm:$0xff]  ;;  %v3882_v1 = vshrl.u32 %v3518_v61, 16 }
 0x35a   : > { %v10405_v47 = vpop.f32.mrf.mxu3  ;;  %v3874_v14 = vor.u32 %v3873_v54, %v3869_v62  ;;  %v3519_v54 = vld [vmem:[#allocation2 + $0x104] sm:$0xf]  ;;  %6607 = vmatpush.bf16.msrb.mxu3 %v8756_v28 }
 0x35b   : > { %v4419_v34 = vsel %vm9623_vm2, %v4417_v17, %v4418_v30  ;;  %v3895_v42 = vshrl.u32 %v3519_v54, 16 }
 0x35c   : > { %v3327_v11 = vpop.f32.mrf.mxu1  ;;  %v4473_v17 = vunpack.c.l.b16 %v4419_v34  ;;  %v5122_v34 = vld [vmem:[#allocation2 + $0x28] sm:$0x1] }
 0x35d   : > { %v4065_v60 = vpop.f32.mrf.mxu2  ;;  %v10411_v35 = vadd.f32 %v3327_v11, %v10040_v56  ;;  %v3875_v56 = vrot.slane %v3874_v14, 4  ;;  %v5169_v11 = vshrl.u32 %v5120_v63, 16  ;;  %v3891_v14 = vshll.u32 %v3519_v54, 16 }
 0x35e   : > { %v10408_v55 = vadd.f32 %v4065_v60, %v3418_v43  ;;  %v5121_v43 = vld [vmem:[#allocation2 + $0x24] sm:$0xf]  ;;  %v4416_v60 = vsel %vm9623_vm2, %v8265_v37, %v4415_v48  ;;  %v3884_v54 = vrot.slane %v3882_v1, 4  ;;  %v4264_v1 = vld [vmem:[#allocation2 + $0x100] sm:$0xe] }
 0x35f   : > { %4629 = vmatmul.bf16.gmra.mxu3 %v4489_v20  ;;  %3366 = vmatmul.bf16.gmra.mxu1 %v8686_v40  ;;  %v5172_v20 = vshll.u32 %v5120_v63, 16  ;;  %v3880_v29 = vsel %vm9631_vm5, %v3875_v56, %v3879_v24  ;;  %v11428_v48 = vld [vmem:[#allocation26_spill] sm:$0xff]  ;;  %v5182_v30 = vshrl.u32 %v5121_v43, 16 }
 0x360   : > { %v3042_v37 = vadd.f32 %v11428_v48, %v2517_v18  ;;  %v3951_v7 = vunpack.c.l.b16 %v3880_v29  ;;  %v3893_v18 = vrot.slane %v3891_v14, 5 }
 0x361   : > { %v5174_v61 = vrot.slane %v5172_v20, 5  ;;  %v5184_v49 = vrot.slane %v5182_v30, 4 }
 0x362   : > { %4107 = vmatmul.bf16.gmra.mxu2 %v3967_v57  ;;  %v4590_v3 = vpop.f32.mrf.mxu3  ;;  %v3870_v57 = vsel %vm9631_vm5, %v3865_v27, %v3869_v62  ;;  %v5171_v62 = vrot.slane %v5169_v11, 4  ;;  %v8727_v27 = vld [vmem:[#allocation2 + $0x110] sm:$0xff]  ;;  %v3420_v56 = vadd.f32 %v10390_v16, %v3042_v37  ;;  %v8764_v37 = vld [vmem:[#allocation12 + $0x20] sm:$0xff] }
 0x363   : > { %v3950_v24 = vunpack.c.l.b16 %v3870_v57  ;;  %5018 = vmatmul.bf16.gmra.mxu0 %v8727_v27  ;;  %v8687_v57 = vld [vmem:[#allocation2 + $0x100] sm:$0xff] }
 0x364   : > { %v10418_v10 = vpop.f32.mrf.mxu1  ;;  %v5175_v14 = vor.u32 %v5174_v61, %v5171_v62  ;;  %7328 = vmatpush.bf16.msra.mxu0 %v8764_v37 }
 0x365   : > { %v4068_v51 = vpop.f32.mrf.mxu2  ;;  %v3968_v20 = vpack.c.b16 %v3951_v7, %v3950_v24 }
 0x366   : > { %v4165_v41 = vadd.f32 %v4068_v51, %v10383_v26  ;;  %v5178_v26 = vshll.u32 %v5121_v43, 16  ;;  %v4472_v51 = vunpack.c.l.b16 %v4416_v60  ;;  %v3897_v60 = vrot.slane %v3895_v42, 4 }
 0x367   : > { %v5188_v42 = vshll.u32 %v5122_v34, 16  ;;  %v5123_v34 = vld [vmem:[#allocation2 + $0x30] sm:$0xf] }
 0x368   : > { %v10424_v40 = vadd.f32 %v4590_v3, %v4165_v41  ;;  %v10431_v3 = vpop.f32.mrf.mxu0  ;;  %v4265_v41 = vld [vmem:[#allocation2 + $0x104] sm:$0xf]  ;;  %v4490_v48 = vpack.c.b16 %v4473_v17, %v4472_v51  ;;  %v5180_v11 = vrot.slane %v5178_v26, 5  ;;  %v3898_v27 = vor.u32 %v3897_v60, %v3893_v18 }
 0x369   : > { %11429 = vst [vmem:[#allocation22_spill] sm:$0xff] %v10431_v3  ;;  %v3520_v3 = vld [vmem:[#allocation2 + $0x108] sm:$0x1]  ;;  %v4422_v29 = vrot.slane %v4265_v41, 5  ;;  %v8266_v17 = vrot.slane %v4264_v1, 9  ;;  %v5190_v41 = vrot.slane %v5188_v42, 5 }
 0x36a   : > { %v10433_v63 = vpop.f32.mrf.mxu3  ;;  %v5185_v51 = vor.u32 %v5184_v49, %v5180_v11  ;;  %v3899_v62 = vrot.slane %v3898_v27, 4 }
 0x36b   : > { %11430 = vst [vmem:[#allocation26_spill] sm:$0xff] %v10433_v63  ;;  %v11431_v63 = vld [vmem:[#allocation37_spill] sm:$0xff]  ;;  %v4424_v30 = vrot.slane %v4422_v29, 4  ;;  %v4423_v1 = vsel %vm9623_vm2, %v8266_v17, %v4422_v29 }
 0x36c   : > { %v3332_v28 = vpop.f32.mrf.mxu1  ;;  %v5186_v60 = vrot.slane %v5185_v51, 4  ;;  %v11435_v51 = vld [vmem:[#allocation31_spill] sm:$0xff] }
 0x36d   : > { %v4070_v23 = vpop.f32.mrf.mxu2  ;;  %v10439_v16 = vadd.f32 %v3332_v28, %v11431_v63  ;;  %v4425_v63 = vrot.slane %v4266_v19, 5  ;;  %v5176_v28 = vrot.slane %v5175_v14, 4 }
 0x36e   : > { %v10436_v43 = vadd.f32 %v4070_v23, %v3420_v56  ;;  %v3888_v23 = vor.u32 %v3887_v25, %v3884_v54  ;;  %v3901_v56 = vshll.u32 %v3520_v3, 16  ;;  %v11434_v25 = vld [vmem:[#allocation24_spill] sm:$0xff]  ;;  %v5191_v37 = vsel %vm9631_vm5, %v5186_v60, %v5190_v41 }
 0x36f   : > { %4634 = vmatmul.bf16.gmra.mxu3 %v4490_v48  ;;  %3371 = vmatmul.bf16.gmra.mxu1 %v8687_v57  ;;  %v11433_v57 = vld [vmem:[#allocation23_spill] sm:$0xff]  ;;  %v4426_v19 = vsel %vm9623_vm2, %v4424_v30, %v4425_v63  ;;  %v5181_v42 = vsel %vm9631_vm5, %v5176_v28, %v5180_v11  ;;  %v4474_v30 = vunpack.c.l.b16 %v4423_v1  ;;  %v5570_v11 = vunpack.c.l.b16 %v5191_v37 }
 0x370   : > { %v10441_v48 = vpop.f32.mrf.mxu0  ;;  %v3889_v7 = vrot.slane %v3888_v23, 4  ;;  %v3903_v61 = vrot.slane %v3901_v56, 5  ;;  %v2519_v54 = vadd.f32 %v11434_v25, %v11433_v57  ;;  %v5193_v23 = vshrl.u32 %v5123_v34, 16 }
 0x371   : > { %11432 = vst [vmem:[#allocation37_spill] sm:$0xff] %v10441_v48  ;;  %v5196_v56 = vshll.u32 %v5123_v34, 16 }
 0x372   : > { %4112 = vmatmul.bf16.gmra.mxu2 %v3968_v20  ;;  %v4595_v26 = vpop.f32.mrf.mxu3  ;;  %v5124_v20 = vld [vmem:[#allocation2 + $0x34] sm:$0xf]  ;;  %v3904_v27 = vsel %vm9631_vm5, %v3899_v62, %v3903_v61  ;;  %v3044_v17 = vadd.f32 %v11435_v51, %v2519_v54 }
 0x373   : > { %v5202_v29 = vshll.u32 %v5124_v20, 16  ;;  %v5206_v63 = vshrl.u32 %v5124_v20, 16  ;;  %v3953_v57 = vunpack.c.l.b16 %v3904_v27  ;;  %v5198_v60 = vrot.slane %v5196_v56, 5  ;;  %v11437_v20 = vld [vmem:[#allocation40_spill] sm:$0xff]  ;;  %v5867_v27 = vld [vmem:[#allocation2 + $0x24] sm:$0xf] }
 0x374   : > { %v10446_v49 = vpop.f32.mrf.mxu1  ;;  %v3422_v28 = vadd.f32 %v10418_v10, %v3044_v17  ;;  %v11439_v17 = vld [vmem:[#allocation38_spill] sm:$0xff] }
 0x375   : > { %v4073_v24 = vpop.f32.mrf.mxu2  ;;  %v5204_v54 = vrot.slane %v5202_v29, 5  ;;  %v5208_v1 = vrot.slane %v5206_v63, 4  ;;  %v5868_v29 = vld [vmem:[#allocation2 + $0x28] sm:$0x1]  ;;  %v5964_v63 = vrot.slane %v5867_v27, 5 }
 0x376   : > { %v4167_v3 = vadd.f32 %v4073_v24, %v10411_v35  ;;  %v3894_v35 = vsel %vm9631_vm5, %v3889_v7, %v3893_v18  ;;  %v5125_v18 = vld [vmem:[#allocation2 + $0x38] sm:$0x1]  ;;  %v5195_v7 = vrot.slane %v5193_v23, 4 }
 0x377   : > { %v3952_v41 = vunpack.c.l.b16 %v3894_v35  ;;  %v5212_v35 = vshll.u32 %v5125_v18, 16  ;;  %v11442_v18 = vld [vmem:[#allocation30_spill] sm:$0xff] }
 0x378   : > { %v10452_v14 = vadd.f32 %v4595_v26, %v4167_v3  ;;  %v4475_v26 = vunpack.c.l.b16 %v4426_v19  ;;  %v5569_v3 = vunpack.c.l.b16 %v5181_v42  ;;  %v10468_v19 = vpop.f32.mrf.mxu0  ;;  %v11438_v42 = vld [vmem:[#allocation34_spill] sm:$0xff]  ;;  %v5199_v56 = vor.u32 %v5198_v60, %v5195_v7 }
 0x379   : > { %11436 = vst [vmem:[#allocation23_spill] sm:$0xff] %v10468_v19  ;;  %v3969_v10 = vpack.c.b16 %v3953_v57, %v3952_v41  ;;  %v2523_v23 = vadd.f32 %v11439_v17, %v11438_v42  ;;  %v5967_v41 = vrot.slane %v5868_v29, 5  ;;  %v11441_v57 = vld [vmem:[#allocation29_spill] sm:$0xff]  ;;  %v5126_v60 = vld [vmem:[#allocation2 + $0x40] sm:$0xf]  ;;  %v11444_v29 = vld [vmem:[#allocation35_spill] sm:$0xff] }
 0x37a   : > { %v10463_v24 = vpop.f32.mrf.mxu3  ;;  %v4491_v34 = vpack.c.b16 %v4475_v26, %v4474_v30  ;;  %v5601_v37 = vpack.c.b16 %v5570_v11, %v5569_v3  ;;  %v5866_v30 = vld [vmem:[#allocation2 + $0x20] sm:$0xe]  ;;  %v5200_v11 = vrot.slane %v5199_v56, 4  ;;  %v5127_v17 = vld [vmem:[#allocation2 + $0x44] sm:$0xf] }
 0x37b   : > { %v8427_v3 = vrot.slane %v5866_v30, 9 }
 0x37c   : > { %v3337_v61 = vpop.f32.mrf.mxu1  ;;  %v5205_v30 = vsel %vm9631_vm5, %v5200_v11, %v5204_v54 }
 0x37d   : > { %v4075_v25 = vpop.f32.mrf.mxu2  ;;  %v10471_v51 = vadd.f32 %v3337_v61, %v11437_v20  ;;  %v11440_v61 = vld [vmem:[#allocation39_spill] sm:$0xff]  ;;  %v5571_v11 = vunpack.c.l.b16 %v5205_v30 }
 0x37e   : > { %v10466_v62 = vadd.f32 %v4075_v25, %v3422_v28  ;;  %v5209_v28 = vor.u32 %v5208_v1, %v5204_v54  ;;  %v5214_v25 = vrot.slane %v5212_v35, 5  ;;  %v3048_v20 = vadd.f32 %v11440_v61, %v2523_v23  ;;  %v8755_v23 = vld [vmem:[#allocation10 + $0x18] sm:$0xff] }
 0x37f   : > { %4639 = vmatmul.bf16.gmra.mxu3 %v4491_v34  ;;  %5689 = vmatmul.bf16.vlgmr.msrb.gmra.mxu1 %v5601_v37  ;;  %v2521_v34 = vadd.f32 %v11442_v18, %v11441_v57  ;;  %v5230_v57 = vshrl.u32 %v5127_v17, 16 }
 0x380   : > { %v5210_v7 = vrot.slane %v5209_v28, 4  ;;  %v10485_v56 = vpop.f32.mrf.mxu0  ;;  %v5217_v28 = vshrl.u32 %v5126_v60, 16  ;;  %6608 = vmatpush.bf16.msrb.mxu3 %v8755_v23 }
 0x381   : > { %11443 = vst [vmem:[#allocation24_spill] sm:$0xff] %v10485_v56  ;;  %v3046_v61 = vadd.f32 %v11444_v29, %v2521_v34  ;;  %v11446_v29 = vld [vmem:[#allocation41_spill] sm:$0xff] }
 0x382   : > { %4117 = vmatmul.bf16.gmra.mxu2 %v3969_v10  ;;  %v4600_v26 = vpop.f32.mrf.mxu3  ;;  %v5966_v10 = vrot.slane %v5964_v63, 4  ;;  %v5215_v35 = vsel %vm9631_vm5, %v5210_v7, %v5214_v25 }
 0x383   : > { %v5572_v18 = vunpack.c.l.b16 %v5215_v35 }
 0x384   : > { %v3339_v37 = vpop.f32.mrf.mxu1 }
 0x385   : > { %v4078_v19 = vpop.f32.mrf.mxu2  ;;  %v10479_v1 = vadd.f32 %v3339_v37, %v3048_v20  ;;  %v5226_v20 = vshll.u32 %v5127_v17, 16  ;;  %v5602_v23 = vpack.c.b16 %v5572_v18, %v5571_v11 }
 0x386   : > { %v4169_v42 = vadd.f32 %v4078_v19, %v10439_v16  ;;  %v5965_v16 = vsel %vm9623_vm2, %v8427_v3, %v5964_v63  ;;  %v5968_v19 = vsel %vm9623_vm2, %v5966_v10, %v5967_v41  ;;  %v5128_v63 = vld [vmem:[#allocation2 + $0x48] sm:$0x1]  ;;  %v5219_v3 = vrot.slane %v5217_v28, 4  ;;  %v5871_v28 = vld [vmem:[#allocation2 + $0x38] sm:$0x1] }
 0x387   : > { %v6092_v37 = vunpack.c.l.b16 %v5968_v19  ;;  %v6091_v7 = vunpack.c.l.b16 %v5965_v16  ;;  %v5228_v34 = vrot.slane %v5226_v20, 5  ;;  %v5236_v35 = vshll.u32 %v5128_v63, 16  ;;  %v5869_v19 = vld [vmem:[#allocation2 + $0x30] sm:$0xe] }
 0x388   : > { %v10481_v27 = vadd.f32 %v4600_v26, %v4169_v42  ;;  %v5220_v26 = vshll.u32 %v5126_v60, 16  ;;  %v3424_v42 = vadd.f32 %v10446_v49, %v3046_v61  ;;  %v5232_v60 = vrot.slane %v5230_v57, 4  ;;  %v8763_v49 = vld [vmem:[#allocation12 + $0x18] sm:$0xff]  ;;  %v10502_v61 = vpop.f32.mrf.mxu0  ;;  %v5129_v63 = vld [vmem:[#allocation2 + $0x50] sm:$0xf] }
 0x389   : > { %v6123_v48 = vpack.c.b16 %v6092_v37, %v6091_v7  ;;  %7329 = vmatpush.bf16.msra.mxu0 %v8763_v49  ;;  %11447 = vst [vmem:[#allocation40_spill] sm:$0xff] %v10502_v61  ;;  %v5238_v57 = vrot.slane %v5236_v35, 5  ;;  %v5241_v35 = vshrl.u32 %v5129_v63, 16  ;;  %v5873_v61 = vld [vmem:[#allocation2 + $0x44] sm:$0xf] }
 0x38a   : > { %v10494_v25 = vpop.f32.mrf.mxu3  ;;  %v5222_v10 = vrot.slane %v5220_v26, 5  ;;  %v5233_v16 = vor.u32 %v5232_v60, %v5228_v34  ;;  %v5130_v60 = vld [vmem:[#allocation2 + $0x54] sm:$0xf] }
 0x38b   : > { %11445 = vst [vmem:[#allocation31_spill] sm:$0xff] %v10494_v25  ;;  %v5870_v25 = vld [vmem:[#allocation2 + $0x34] sm:$0xf] }
 0x38c   : > { %v3342_v41 = vpop.f32.mrf.mxu1  ;;  %v5223_v30 = vor.u32 %v5222_v10, %v5219_v3  ;;  %v5971_v20 = vrot.slane %v5870_v25, 5  ;;  %v5234_v7 = vrot.slane %v5233_v16, 4  ;;  %v5250_v16 = vshll.u32 %v5130_v60, 16 }
 0x38d   : > { %v4080_v54 = vpop.f32.mrf.mxu2  ;;  %v10500_v17 = vadd.f32 %v3342_v41, %v11446_v29  ;;  %v5974_v41 = vrot.slane %v5871_v28, 5 }
 0x38e   : > { %v10497_v56 = vadd.f32 %v4080_v54, %v3424_v42  ;;  %v8428_v54 = vrot.slane %v5869_v19, 9  ;;  %v5224_v11 = vrot.slane %v5223_v30, 4  ;;  %v5973_v10 = vrot.slane %v5971_v20, 4 }
 0x38f   : > { %5694 = vmatmul.bf16.gmra.mxu1 %v5602_v23  ;;  %v5239_v25 = vsel %vm9631_vm5, %v5234_v7, %v5238_v57  ;;  %v5244_v30 = vshll.u32 %v5129_v63, 16  ;;  %v5254_v19 = vshrl.u32 %v5130_v60, 16 }
 0x390   : > { %v5972_v23 = vsel %vm9623_vm2, %v8428_v54, %v5971_v20  ;;  %v5229_v49 = vsel %vm9631_vm5, %v5224_v11, %v5228_v34  ;;  %v5131_v20 = vld [vmem:[#allocation2 + $0x58] sm:$0x1]  ;;  %v5243_v54 = vrot.slane %v5241_v35, 4  ;;  %v5252_v34 = vrot.slane %v5250_v16, 5  ;;  %v5874_v35 = vld [vmem:[#allocation2 + $0x48] sm:$0x1] }
 0x391   : > { %v6093_v7 = vunpack.c.l.b16 %v5972_v23  ;;  %v5256_v11 = vrot.slane %v5254_v19, 4  ;;  %v5981_v16 = vrot.slane %v5874_v35, 5 }
 0x392   : > { %6211 = vmatmul.bf16.vlgmr.msrb.gmra.mxu2 %v6123_v48  ;;  %v4605_v26 = vpop.f32.mrf.mxu3  ;;  %v11448_v48 = vld [vmem:[#allocation42_spill] sm:$0xff] }
 0x393   : > { %v5257_v23 = vor.u32 %v5256_v11, %v5252_v34 }
 0x394   : > { %v3344_v37 = vpop.f32.mrf.mxu1 }
 0x395   : > { %v4083_v42 = vpop.f32.mrf.mxu2  ;;  %v10506_v3 = vadd.f32 %v3344_v37, %v11448_v48  ;;  %v5573_v37 = vunpack.c.l.b16 %v5229_v49 }
 0x396   : > { %v4171_v18 = vadd.f32 %v4083_v42, %v10471_v51  ;;  %v5975_v51 = vsel %vm9623_vm2, %v5973_v10, %v5974_v41  ;;  %v5246_v10 = vrot.slane %v5244_v30, 5 }
 0x397   : > { %v6094_v42 = vunpack.c.l.b16 %v5975_v51  ;;  %v5260_v51 = vshll.u32 %v5131_v20, 16 }
 0x398   : > { %v10508_v29 = vadd.f32 %v4605_v26, %v4171_v18  ;;  %v5574_v26 = vunpack.c.l.b16 %v5239_v25  ;;  %v10520_v18 = vpop.f32.mrf.mxu0  ;;  %v5247_v49 = vor.u32 %v5246_v10, %v5243_v54  ;;  %v5133_v54 = vld [vmem:[#allocation2 + $0x64] sm:$0xf] }
 0x399   : > { %11450 = vst [vmem:[#allocation38_spill] sm:$0xff] %v10520_v18  ;;  %v6124_v25 = vpack.c.b16 %v6094_v42, %v6093_v7  ;;  %v5872_v18 = vld [vmem:[#allocation2 + $0x40] sm:$0xe] }
 0x39a   : > { %v10518_v28 = vpop.f32.mrf.mxu3  ;;  %v5603_v60 = vpack.c.b16 %v5574_v26, %v5573_v37  ;;  %v8429_v30 = vrot.slane %v5872_v18, 9  ;;  %v5258_v26 = vrot.slane %v5257_v23, 4  ;;  %v5132_v42 = vld [vmem:[#allocation2 + $0x60] sm:$0xf]  ;;  %v8754_v18 = vld [vmem:[#allocation10 + $0x10] sm:$0xff] }
 0x39b   : > { %11449 = vst [vmem:[#allocation34_spill] sm:$0xff] %v10518_v28  ;;  %v5265_v11 = vshrl.u32 %v5132_v42, 16  ;;  %6609 = vmatpush.bf16.msrb.mxu3 %v8754_v18 }
 0x39c   : > { %v3347_v48 = vpop.f32.mrf.mxu1 }
 0x39d   : > { %v4085_v57 = vpop.f32.mrf.mxu2  ;;  %v10526_v63 = vadd.f32 %v3347_v48, %v10215_v58  ;;  %v5248_v48 = vrot.slane %v5247_v49, 4 }
 0x39e   : > { %v10523_v41 = vadd.f32 %v4085_v57, %v10479_v1  ;;  %v5978_v1 = vrot.slane %v5873_v61, 5  ;;  %v5262_v57 = vrot.slane %v5260_v51, 5  ;;  %v5278_v51 = vshrl.u32 %v5133_v54, 16 }
 0x39f   : > { %5699 = vmatmul.bf16.gmra.mxu1 %v5603_v60  ;;  %v5253_v60 = vsel %vm9631_vm5, %v5248_v48, %v5252_v34 }
 0x3a0   : > { %11451 = vst [vmem:[#allocation39_spill] sm:$0xff] %v10523_v41  ;;  %v10529_v37 = vpop.f32.mrf.mxu0  ;;  %v5980_v20 = vrot.slane %v5978_v1, 4  ;;  %v5263_v61 = vsel %vm9631_vm5, %v5258_v26, %v5262_v57  ;;  %v5575_v57 = vunpack.c.l.b16 %v5253_v60  ;;  %v5280_v34 = vrot.slane %v5278_v51, 4  ;;  %v5877_v60 = vld [vmem:[#allocation2 + $0x58] sm:$0x1] }
 0x3a1   : > { %11452 = vst [vmem:[#allocation29_spill] sm:$0xff] %v10529_v37  ;;  %v5576_v49 = vunpack.c.l.b16 %v5263_v61  ;;  %v5876_v61 = vld [vmem:[#allocation2 + $0x54] sm:$0xf] }
 0x3a2   : > { %6216 = vmatmul.bf16.gmra.mxu2 %v6124_v25  ;;  %v4610_v28 = vpop.f32.mrf.mxu3  ;;  %v5274_v25 = vshll.u32 %v5133_v54, 16 }
 0x3a4   : > { %v3349_v58 = vpop.f32.mrf.mxu1 }
 0x3a5   : > { %v4088_v41 = vpop.f32.mrf.mxu2  ;;  %v10532_v7 = vadd.f32 %v3349_v58, %v10226_v39  ;;  %v5268_v39 = vshll.u32 %v5132_v42, 16  ;;  %v5134_v58 = vld [vmem:[#allocation2 + $0x68] sm:$0x1]  ;;  %v5604_v42 = vpack.c.b16 %v5576_v49, %v5575_v57 }
 0x3a6   : > { %v4173_v19 = vadd.f32 %v4088_v41, %v10500_v17  ;;  %v5979_v17 = vsel %vm9623_vm2, %v8429_v30, %v5978_v1  ;;  %v5982_v41 = vsel %vm9623_vm2, %v5980_v20, %v5981_v16  ;;  %v5267_v1 = vrot.slane %v5265_v11, 4 }
 0x3a7   : > { %v6096_v23 = vunpack.c.l.b16 %v5982_v41  ;;  %v5270_v26 = vrot.slane %v5268_v39, 5  ;;  %v5276_v20 = vrot.slane %v5274_v25, 5  ;;  %v5284_v18 = vshll.u32 %v5134_v58, 16  ;;  %v8762_v41 = vld [vmem:[#allocation12 + $0x10] sm:$0xff] }
 0x3a8   : > { %v10534_v10 = vadd.f32 %v4610_v28, %v4173_v19  ;;  %v6095_v19 = vunpack.c.l.b16 %v5979_v17  ;;  %v10552_v37 = vpop.f32.mrf.mxu0  ;;  %7330 = vmatpush.bf16.msra.mxu0 %v8762_v41  ;;  %v5985_v25 = vrot.slane %v5876_v61, 5  ;;  %v5135_v58 = vld [vmem:[#allocation2 + $0x70] sm:$0xf] }
 0x3a9   : > { %11454 = vst [vmem:[#allocation35_spill] sm:$0xff] %v10552_v37  ;;  %v5271_v17 = vor.u32 %v5270_v26, %v5267_v1  ;;  %v5281_v11 = vor.u32 %v5280_v34, %v5276_v20  ;;  %v5286_v51 = vrot.slane %v5284_v18, 5  ;;  %v5136_v26 = vld [vmem:[#allocation2 + $0x74] sm:$0xf]  ;;  %v5289_v61 = vshrl.u32 %v5135_v58, 16 }
 0x3aa   : > { %v10544_v28 = vpop.f32.mrf.mxu3  ;;  %v6125_v54 = vpack.c.b16 %v6096_v23, %v6095_v19  ;;  %v5987_v1 = vrot.slane %v5985_v25, 4 }
 0x3ab   : > { %11453 = vst [vmem:[#allocation30_spill] sm:$0xff] %v10544_v28  ;;  %v5272_v57 = vrot.slane %v5271_v17, 4  ;;  %v5282_v19 = vrot.slane %v5281_v11, 4  ;;  %v5292_v17 = vshll.u32 %v5135_v58, 16  ;;  %v5302_v11 = vshrl.u32 %v5136_v26, 16 }
 0x3ac   : > { %v3352_v16 = vpop.f32.mrf.mxu1 }
 0x3ad   : > { %v4090_v35 = vpop.f32.mrf.mxu2  ;;  %v10550_v48 = vadd.f32 %v3352_v16, %v10243_v53  ;;  %v5988_v16 = vrot.slane %v5877_v60, 5  ;;  %v5277_v41 = vsel %vm9631_vm5, %v5272_v57, %v5276_v20  ;;  %v5304_v57 = vrot.slane %v5302_v11, 4  ;;  %v11461_v11 = vld [vmem:[#allocation43_spill] sm:$0xff] }
 0x3ae   : > { %v10547_v30 = vadd.f32 %v4090_v35, %v10506_v3  ;;  %v5875_v3 = vld [vmem:[#allocation2 + $0x50] sm:$0xe] }
 0x3af   : > { %5704 = vmatmul.bf16.gmra.mxu1 %v5604_v42  ;;  %v8430_v53 = vrot.slane %v5875_v3, 9 }
 0x3b0   : > { %v10568_v3 = vpop.f32.mrf.mxu0 }
 0x3b1   : > { %v5986_v18 = vsel %vm9623_vm2, %v8430_v53, %v5985_v25  ;;  %11456 = vst [vmem:[#allocation42_spill] sm:$0xff] %v10568_v3  ;;  %v5137_v25 = vld [vmem:[#allocation2 + $0x78] sm:$0x1]  ;;  %v5291_v53 = vrot.slane %v5289_v61, 4  ;;  %v5880_v61 = vld [vmem:[#allocation2 + $0x68] sm:$0x1] }
 0x3b2   : > { %6221 = vmatmul.bf16.gmra.mxu2 %v6125_v54  ;;  %v4615_v39 = vpop.f32.mrf.mxu3  ;;  %v5287_v54 = vsel %vm9631_vm5, %v5282_v19, %v5286_v51  ;;  %v5308_v37 = vshll.u32 %v5137_v25, 16  ;;  %v5138_v25 = vld [vmem:[#allocation2 + $0x80] sm:$0xf] }
 0x3b4   : > { %v3354_v23 = vpop.f32.mrf.mxu1 }
 0x3b5   : > { %v4093_v35 = vpop.f32.mrf.mxu2  ;;  %v10556_v42 = vadd.f32 %v3354_v23, %v10258_v44  ;;  %v5298_v44 = vshll.u32 %v5136_v26, 16  ;;  %v6097_v23 = vunpack.c.l.b16 %v5986_v18 }
 0x3b6   : > { %v4175_v49 = vadd.f32 %v4093_v35, %v10526_v63  ;;  %v5989_v63 = vsel %vm9623_vm2, %v5987_v1, %v5988_v16  ;;  %v5294_v1 = vrot.slane %v5292_v17, 5 }
 0x3b7   : > { %v6098_v35 = vunpack.c.l.b16 %v5989_v63  ;;  %v5300_v20 = vrot.slane %v5298_v44, 5  ;;  %v11460_v44 = vld [vmem:[#allocation44_spill] sm:$0xff] }
 0x3b8   : > { %v10558_v34 = vadd.f32 %v4615_v39, %v4175_v49  ;;  %v5578_v39 = vunpack.c.l.b16 %v5287_v54  ;;  %v5577_v49 = vunpack.c.l.b16 %v5277_v41  ;;  %v5879_v54 = vld [vmem:[#allocation2 + $0x64] sm:$0xf]  ;;  %v5295_v63 = vor.u32 %v5294_v1, %v5291_v53  ;;  %v5878_v41 = vld [vmem:[#allocation2 + $0x60] sm:$0xe] }
 0x3b9   : > { %v6126_v3 = vpack.c.b16 %v6098_v35, %v6097_v23  ;;  %v5305_v18 = vor.u32 %v5304_v57, %v5300_v20  ;;  %v5139_v57 = vld [vmem:[#allocation2 + $0x84] sm:$0xf] }
 0x3ba   : > { %11455 = vst [vmem:[#allocation41_spill] sm:$0xff] %v10558_v34  ;;  %v10570_v60 = vpop.f32.mrf.mxu3  ;;  %v5605_v26 = vpack.c.b16 %v5578_v39, %v5577_v49  ;;  %v5995_v39 = vrot.slane %v5880_v61, 5  ;;  %v5296_v23 = vrot.slane %v5295_v63, 4  ;;  %v5313_v61 = vshrl.u32 %v5138_v25, 16 }
 0x3bb   : > { %11457 = vst [vmem:[#allocation55_spill] sm:$0xff] %v10570_v60 }
 0x3bc   : > { %v3357_v19 = vpop.f32.mrf.mxu1  ;;  %v5301_v63 = vsel %vm9631_vm5, %v5296_v23, %v5300_v20 }
 0x3bd   : > { %v4095_v51 = vpop.f32.mrf.mxu2  ;;  %v10576_v58 = vadd.f32 %v3357_v19, %v10275_v22  ;;  %v3056_v22 = vadd.f32 %v11461_v11, %v11460_v44  ;;  %v8431_v19 = vrot.slane %v5878_v41, 9  ;;  %v5326_v44 = vshrl.u32 %v5139_v57, 16 }
 0x3be   : > { %v10573_v16 = vadd.f32 %v4095_v51, %v10532_v7  ;;  %v5992_v7 = vrot.slane %v5879_v54, 5  ;;  %v5310_v51 = vrot.slane %v5308_v37, 5  ;;  %v8753_v54 = vld [vmem:[#allocation10 + $0x8] sm:$0xff] }
 0x3bf   : > { %5709 = vmatmul.bf16.gmra.mxu1 %v5605_v26  ;;  %6610 = vmatpush.bf16.msrb.mxu3 %v8753_v54 }
 0x3c0   : > { %11458 = vst [vmem:[#allocation56_spill] sm:$0xff] %v10573_v16  ;;  %v10578_v16 = vpop.f32.mrf.mxu0  ;;  %v5994_v1 = vrot.slane %v5992_v7, 4  ;;  %v5993_v41 = vsel %vm9623_vm2, %v8431_v19, %v5992_v7  ;;  %v5579_v7 = vunpack.c.l.b16 %v5301_v63 }
 0x3c1   : > { %11459 = vst [vmem:[#allocation57_spill] sm:$0xff] %v10578_v16  ;;  %v6099_v19 = vunpack.c.l.b16 %v5993_v41 }
 0x3c2   : > { %6226 = vmatmul.bf16.gmra.mxu2 %v6126_v3  ;;  %v4620_v60 = vpop.f32.mrf.mxu3  ;;  %v5306_v3 = vrot.slane %v5305_v18, 4  ;;  %v5316_v18 = vshll.u32 %v5138_v25, 16 }
 0x3c4   : > { %v3359_v49 = vpop.f32.mrf.mxu1  ;;  %v5311_v37 = vsel %vm9631_vm5, %v5306_v3, %v5310_v51  ;;  %v5318_v23 = vrot.slane %v5316_v18, 5 }
 0x3c5   : > { %v4098_v17 = vpop.f32.mrf.mxu2  ;;  %v10583_v53 = vadd.f32 %v3359_v49, %v3056_v22  ;;  %v5580_v11 = vunpack.c.l.b16 %v5311_v37  ;;  %v5140_v49 = vld [vmem:[#allocation2 + $0x88] sm:$0x1] }
 0x3c6   : > { %v4177_v35 = vadd.f32 %v4098_v17, %v10550_v48  ;;  %v5996_v48 = vsel %vm9623_vm2, %v5994_v1, %v5995_v39  ;;  %v5322_v17 = vshll.u32 %v5139_v57, 16  ;;  %v5315_v39 = vrot.slane %v5313_v61, 4  ;;  %v5881_v61 = vld [vmem:[#allocation2 + $0x70] sm:$0xe] }
 0x3c7   : > { %v6100_v22 = vunpack.c.l.b16 %v5996_v48  ;;  %v5328_v1 = vrot.slane %v5326_v44, 4  ;;  %v5606_v37 = vpack.c.b16 %v5580_v11, %v5579_v7  ;;  %v5332_v16 = vshll.u32 %v5140_v49, 16 }
 0x3c8   : > { %v10585_v26 = vadd.f32 %v4620_v60, %v4177_v35  ;;  %v3057_v35 = vadd.f32 %v10198_v8, %v10201_v15  ;;  %v5324_v25 = vrot.slane %v5322_v17, 5  ;;  %v10602_v57 = vpop.f32.mrf.mxu0  ;;  %v8761_v8 = vld [vmem:[#allocation12 + $0x8] sm:$0xff]  ;;  %v5319_v15 = vor.u32 %v5318_v23, %v5315_v39 }
 0x3c9   : > { %11465 = vst [vmem:[#allocation59_spill] sm:$0xff] %v10602_v57  ;;  %v6127_v48 = vpack.c.b16 %v6100_v22, %v6099_v19  ;;  %7331 = vmatpush.bf16.msra.mxu0 %v8761_v8  ;;  %v5334_v17 = vrot.slane %v5332_v16, 5 }
 0x3ca   : > { %11462 = vst [vmem:[#allocation44_spill] sm:$0xff] %v10585_v26  ;;  %v10595_v60 = vpop.f32.mrf.mxu3  ;;  %v5329_v41 = vor.u32 %v5328_v1, %v5324_v25  ;;  %v5320_v19 = vrot.slane %v5319_v15, 4  ;;  %v5142_v1 = vld [vmem:[#allocation2 + $0x94] sm:$0xf] }
 0x3cb   : > { %11463 = vst [vmem:[#allocation43_spill] sm:$0xff] %v10595_v60  ;;  %v5882_v60 = vld [vmem:[#allocation2 + $0x74] sm:$0xf] }
 0x3cc   : > { %v3362_v20 = vpop.f32.mrf.mxu1  ;;  %v5999_v18 = vrot.slane %v5882_v60, 5  ;;  %v5330_v49 = vrot.slane %v5329_v41, 4  ;;  %v5325_v15 = vsel %vm9631_vm5, %v5320_v19, %v5324_v25  ;;  %v5154_v26 = vld [vmem:[#allocation2 + $0xd4] sm:$0xf] }
 0x3cd   : > { %v4100_v51 = vpop.f32.mrf.mxu2  ;;  %v10604_v54 = vadd.f32 %v3362_v20, %v3057_v35  ;;  %v8432_v20 = vrot.slane %v5881_v61, 9  ;;  %v5346_v61 = vshll.u32 %v5142_v1, 16 }
 0x3ce   : > { %v10600_v3 = vadd.f32 %v4100_v51, %v10556_v42  ;;  %v5883_v42 = vld [vmem:[#allocation2 + $0x78] sm:$0x1]  ;;  %v6001_v23 = vrot.slane %v5999_v18, 4  ;;  %v5335_v16 = vsel %vm9631_vm5, %v5330_v49, %v5334_v17 }
 0x3cf   : > { %5714 = vmatmul.bf16.gmra.mxu1 %v5606_v37  ;;  %v11466_v51 = vld [vmem:[#allocation45_spill] sm:$0xff]  ;;  %v6002_v11 = vrot.slane %v5883_v42, 5  ;;  %v5141_v37 = vld [vmem:[#allocation2 + $0x90] sm:$0xf]  ;;  %v5350_v42 = vshrl.u32 %v5142_v1, 16  ;;  %v5348_v19 = vrot.slane %v5346_v61, 5 }
 0x3d0   : > { %11464 = vst [vmem:[#allocation58_spill] sm:$0xff] %v10600_v3  ;;  %v3058_v35 = vadd.f32 %v11466_v51, %v10220_v2  ;;  %v10615_v60 = vpop.f32.mrf.mxu0  ;;  %v6000_v2 = vsel %vm9623_vm2, %v8432_v20, %v5999_v18  ;;  %v5337_v8 = vshrl.u32 %v5141_v37, 16  ;;  %v5340_v41 = vshll.u32 %v5141_v37, 16  ;;  %v5143_v20 = vld [vmem:[#allocation2 + $0x98] sm:$0x1]  ;;  %v11473_v61 = vld [vmem:[#allocation47_spill] sm:$0xff] }
 0x3d1   : > { %11468 = vst [vmem:[#allocation60_spill] sm:$0xff] %v10615_v60  ;;  %v6101_v18 = vunpack.c.l.b16 %v6000_v2  ;;  %v5352_v37 = vrot.slane %v5350_v42, 4  ;;  %v5884_v2 = vld [vmem:[#allocation2 + $0x80] sm:$0xe]  ;;  %v3060_v42 = vadd.f32 %v11473_v61, %v10252_v33 }
 0x3d2   : > { %6231 = vmatmul.bf16.gmra.mxu2 %v6127_v48  ;;  %v4625_v63 = vpop.f32.mrf.mxu3  ;;  %v5339_v49 = vrot.slane %v5337_v8, 4  ;;  %v5342_v25 = vrot.slane %v5340_v41, 5 }
 0x3d4   : > { %v3364_v7 = vpop.f32.mrf.mxu1 }
 0x3d5   : > { %v4103_v44 = vpop.f32.mrf.mxu2  ;;  %v10609_v39 = vadd.f32 %v3364_v7, %v3058_v35  ;;  %v11470_v35 = vld [vmem:[#allocation46_spill] sm:$0xff]  ;;  %v5581_v7 = vunpack.c.l.b16 %v5325_v15  ;;  %v5353_v15 = vor.u32 %v5352_v37, %v5348_v19 }
 0x3d6   : > { %v4179_v22 = vadd.f32 %v4103_v44, %v10576_v58  ;;  %v6003_v58 = vsel %vm9623_vm2, %v6001_v23, %v6002_v11  ;;  %v5582_v44 = vunpack.c.l.b16 %v5335_v16  ;;  %v8752_v37 = vld [vmem:[#allocation10] sm:$0xff] }
 0x3d7   : > { %v6102_v51 = vunpack.c.l.b16 %v6003_v58  ;;  %v5356_v58 = vshll.u32 %v5143_v20, 16  ;;  %v5144_v20 = vld [vmem:[#allocation2 + $0xa0] sm:$0xf]  ;;  %6611 = vmatpush.bf16.msrb.mxu3 %v8752_v37 }
 0x3d8   : > { %v10611_v48 = vadd.f32 %v4625_v63, %v4179_v22  ;;  %v3059_v22 = vadd.f32 %v11470_v35, %v10231_v21  ;;  %v5607_v60 = vpack.c.b16 %v5582_v44, %v5581_v7  ;;  %v5343_v21 = vor.u32 %v5342_v25, %v5339_v49  ;;  %v5886_v35 = vld [vmem:[#allocation2 + $0x88] sm:$0x1]  ;;  %v10632_v8 = vpop.f32.mrf.mxu0  ;;  %v5145_v25 = vld [vmem:[#allocation2 + $0xa4] sm:$0xf] }
 0x3d9   : > { %v6128_v16 = vpack.c.b16 %v6102_v51, %v6101_v18  ;;  %11472 = vst [vmem:[#allocation62_spill] sm:$0xff] %v10632_v8  ;;  %v6009_v44 = vrot.slane %v5886_v35, 5  ;;  %v5354_v18 = vrot.slane %v5353_v15, 4  ;;  %v5364_v15 = vshll.u32 %v5144_v20, 16 }
 0x3da   : > { %11467 = vst [vmem:[#allocation45_spill] sm:$0xff] %v10611_v48  ;;  %v10623_v63 = vpop.f32.mrf.mxu3  ;;  %v5374_v35 = vshrl.u32 %v5145_v25, 16 }
 0x3db   : > { %11469 = vst [vmem:[#allocation61_spill] sm:$0xff] %v10623_v63  ;;  %v5885_v63 = vld [vmem:[#allocation2 + $0x84] sm:$0xf] }
 0x3dc   : > { %v3367_v23 = vpop.f32.mrf.mxu1 }
 0x3dd   : > { %v4105_v17 = vpop.f32.mrf.mxu2  ;;  %v10630_v1 = vadd.f32 %v3367_v23, %v3059_v22  ;;  %v8433_v22 = vrot.slane %v5884_v2, 9  ;;  %v5370_v2 = vshll.u32 %v5145_v25, 16  ;;  %v8760_v25 = vld [vmem:[#allocation12] sm:$0xff] }
 0x3de   : > { %v10628_v11 = vadd.f32 %v4105_v17, %v10583_v53  ;;  %v6006_v17 = vrot.slane %v5885_v63, 5  ;;  %7332 = vmatpush.bf16.msra.mxu0 %v8760_v25 }
 0x3df   : > { %5719 = vmatmul.bf16.gmra.mxu1 %v5607_v60  ;;  %v5344_v60 = vrot.slane %v5343_v21, 4 }
 0x3e0   : > { %11471 = vst [vmem:[#allocation46_spill] sm:$0xff] %v10628_v11  ;;  %v5358_v11 = vrot.slane %v5356_v58, 5  ;;  %v6008_v23 = vrot.slane %v6006_v17, 4  ;;  %v6007_v33 = vsel %vm9623_vm2, %v8433_v22, %v6006_v17  ;;  %v5361_v58 = vshrl.u32 %v5144_v20, 16 }
 0x3e1   : > { %v5349_v21 = vsel %vm9631_vm5, %v5344_v60, %v5348_v19  ;;  %v3061_v17 = vadd.f32 %v10260_v45, %v10263_v5  ;;  %v5366_v60 = vrot.slane %v5364_v15, 5  ;;  %v5372_v20 = vrot.slane %v5370_v2, 5  ;;  %v5147_v45 = vld [vmem:[#allocation2 + $0xb0] sm:$0xf] }
 0x3e2   : > { %6236 = vmatmul.bf16.gmra.mxu2 %v6128_v16  ;;  %v4630_v53 = vpop.f32.mrf.mxu3  ;;  %v5359_v63 = vsel %vm9631_vm5, %v5354_v18, %v5358_v11  ;;  %v5583_v22 = vunpack.c.l.b16 %v5349_v21  ;;  %v5887_v2 = vld [vmem:[#allocation2 + $0x90] sm:$0xe] }
 0x3e4   : > { %v3369_v7 = vpop.f32.mrf.mxu1 }
 0x3e5   : > { %v4108_v41 = vpop.f32.mrf.mxu2  ;;  %v10637_v49 = vadd.f32 %v3369_v7, %v3060_v42  ;;  %v10651_v42 = vpop.f32.mrf.mxu0  ;;  %v5363_v7 = vrot.slane %v5361_v58, 4  ;;  %v5889_v58 = vld [vmem:[#allocation2 + $0x98] sm:$0x1] }
 0x3e6   : > { %v4181_v51 = vadd.f32 %v4108_v41, %v10604_v54  ;;  %v6010_v54 = vsel %vm9623_vm2, %v6008_v23, %v6009_v44  ;;  %11476 = vst [vmem:[#allocation64_spill] sm:$0xff] %v10651_v42  ;;  %v6103_v44 = vunpack.c.l.b16 %v6007_v33  ;;  %v5376_v23 = vrot.slane %v5374_v35, 4 }
 0x3e7   : > { %v6104_v61 = vunpack.c.l.b16 %v6010_v54  ;;  %v5367_v5 = vor.u32 %v5366_v60, %v5363_v7  ;;  %v5385_v35 = vshrl.u32 %v5147_v45, 16 }
 0x3e8   : > { %v10639_v16 = vadd.f32 %v4630_v53, %v4181_v51  ;;  %v5584_v53 = vunpack.c.l.b16 %v5359_v63  ;;  %v5146_v51 = vld [vmem:[#allocation2 + $0xa8] sm:$0x1]  ;;  %v5377_v33 = vor.u32 %v5376_v23, %v5372_v20 }
 0x3e9   : > { %v6129_v54 = vpack.c.b16 %v6104_v61, %v6103_v44  ;;  %v5380_v42 = vshll.u32 %v5146_v51, 16  ;;  %v11480_v61 = vld [vmem:[#allocation48_spill] sm:$0xff]  ;;  %v6016_v44 = vrot.slane %v5889_v58, 5  ;;  %v5388_v51 = vshll.u32 %v5147_v45, 16 }
 0x3ea   : > { %11474 = vst [vmem:[#allocation47_spill] sm:$0xff] %v10639_v16  ;;  %v10649_v41 = vpop.f32.mrf.mxu3  ;;  %v5608_v63 = vpack.c.b16 %v5584_v53, %v5583_v22  ;;  %v11479_v53 = vld [vmem:[#allocation49_spill] sm:$0xff]  ;;  %v5368_v60 = vrot.slane %v5367_v5, 4  ;;  %v5378_v23 = vrot.slane %v5377_v33, 4  ;;  %v5387_v45 = vrot.slane %v5385_v35, 4 }
 0x3eb   : > { %11475 = vst [vmem:[#allocation63_spill] sm:$0xff] %v10649_v41  ;;  %v5888_v41 = vld [vmem:[#allocation2 + $0x94] sm:$0xf]  ;;  %v5382_v15 = vrot.slane %v5380_v42, 5  ;;  %v3062_v22 = vadd.f32 %v11480_v61, %v11479_v53  ;;  %v5390_v53 = vrot.slane %v5388_v51, 5 }
 0x3ec   : > { %v3372_v19 = vpop.f32.mrf.mxu1 }
 0x3ed   : > { %v4110_v11 = vpop.f32.mrf.mxu2  ;;  %v10658_v37 = vadd.f32 %v3372_v19, %v3061_v17 }
 0x3ee   : > { %v10656_v18 = vadd.f32 %v4110_v11, %v10609_v39  ;;  %v5148_v39 = vld [vmem:[#allocation2 + $0xb4] sm:$0xf]  ;;  %v6013_v11 = vrot.slane %v5888_v41, 5  ;;  %v8434_v41 = vrot.slane %v5887_v2, 9 }
 0x3ef   : > { %5724 = vmatmul.bf16.gmra.mxu1 %v5608_v63  ;;  %v5394_v19 = vshll.u32 %v5148_v39, 16  ;;  %v5398_v63 = vshrl.u32 %v5148_v39, 16 }
 0x3f0   : > { %11477 = vst [vmem:[#allocation65_spill] sm:$0xff] %v10656_v18  ;;  %v10660_v18 = vpop.f32.mrf.mxu0  ;;  %v6015_v42 = vrot.slane %v6013_v11, 4  ;;  %v6014_v2 = vsel %vm9623_vm2, %v8434_v41, %v6013_v11  ;;  %v5891_v11 = vld [vmem:[#allocation2 + $0xa4] sm:$0xf] }
 0x3f1   : > { %11478 = vst [vmem:[#allocation66_spill] sm:$0xff] %v10660_v18  ;;  %v5383_v18 = vsel %vm9631_vm5, %v5378_v23, %v5382_v15  ;;  %v5396_v5 = vrot.slane %v5394_v19, 5  ;;  %v5400_v33 = vrot.slane %v5398_v63, 4  ;;  %v6105_v51 = vunpack.c.l.b16 %v6014_v2 }
 0x3f2   : > { %6241 = vmatmul.bf16.gmra.mxu2 %v6129_v54  ;;  %v4635_v21 = vpop.f32.mrf.mxu3  ;;  %v6017_v58 = vsel %vm9623_vm2, %v6015_v42, %v6016_v44  ;;  %v5586_v39 = vunpack.c.l.b16 %v5383_v18  ;;  %v5892_v42 = vld [vmem:[#allocation2 + $0xa8] sm:$0x1] }
 0x3f3   : > { %v6023_v2 = vrot.slane %v5892_v42, 5 }
 0x3f4   : > { %v3374_v7 = vpop.f32.mrf.mxu1 }
 0x3f5   : > { %v4113_v17 = vpop.f32.mrf.mxu2  ;;  %v10665_v54 = vadd.f32 %v3374_v7, %v3062_v22 }
 0x3f6   : > { %v4183_v25 = vadd.f32 %v4113_v17, %v10630_v1  ;;  %v5373_v1 = vsel %vm9631_vm5, %v5368_v60, %v5372_v20  ;;  %v5149_v17 = vld [vmem:[#allocation2 + $0xb8] sm:$0x1]  ;;  %v5401_v20 = vor.u32 %v5400_v33, %v5396_v5 }
 0x3f7   : > { %v5585_v15 = vunpack.c.l.b16 %v5373_v1  ;;  %v5404_v19 = vshll.u32 %v5149_v17, 16 }
 0x3f8   : > { %v10667_v8 = vadd.f32 %v4635_v21, %v4183_v25  ;;  %v6106_v21 = vunpack.c.l.b16 %v6017_v58  ;;  %v5391_v25 = vor.u32 %v5390_v53, %v5387_v45  ;;  %v10684_v7 = vpop.f32.mrf.mxu0  ;;  %v5402_v63 = vrot.slane %v5401_v20, 4  ;;  %v5150_v45 = vld [vmem:[#allocation2 + $0xc0] sm:$0xf]  ;;  %v5151_v53 = vld [vmem:[#allocation2 + $0xc4] sm:$0xf] }
 0x3f9   : > { %11484 = vst [vmem:[#allocation68_spill] sm:$0xff] %v10684_v7  ;;  %v5609_v18 = vpack.c.b16 %v5586_v39, %v5585_v15  ;;  %v5406_v41 = vrot.slane %v5404_v19, 5  ;;  %v6020_v58 = vrot.slane %v5891_v11, 5  ;;  %v5412_v15 = vshll.u32 %v5150_v45, 16 }
 0x3fa   : > { %11481 = vst [vmem:[#allocation49_spill] sm:$0xff] %v10667_v8  ;;  %v10677_v61 = vpop.f32.mrf.mxu3  ;;  %v6130_v60 = vpack.c.b16 %v6106_v21, %v6105_v51  ;;  %v5392_v23 = vrot.slane %v5391_v25, 4  ;;  %v10693_v25 = vld [vmem:[#allocation2 + $0xb4] sm:$0xf]  ;;  %v8509_v8 = vld [vmem:[%s9535_s21 + $0x18] sm:$0x1] }
 0x3fb   : > { %11482 = vst [vmem:[#allocation48_spill] sm:$0xff] %v10677_v61  ;;  %v5407_v21 = vsel %vm9631_vm5, %v5402_v63, %v5406_v41  ;;  %v5414_v7 = vrot.slane %v5412_v15, 5  ;;  %v5893_v15 = vld [vmem:[#allocation2 + $0xb0] sm:$0xe] }
 0x3fc   : > { %v10682_v35 = vpop.f32.mrf.mxu1  ;;  %v5397_v33 = vsel %vm9631_vm5, %v5392_v23, %v5396_v5  ;;  %v5422_v5 = vshrl.u32 %v5151_v53, 16  ;;  %v6027_v23 = vrot.slane %v10693_v25, 5  ;;  %v5588_v42 = vunpack.c.l.b16 %v5407_v21 }
 0x3fd   : > { %v4115_v22 = vpop.f32.mrf.mxu2  ;;  %v5587_v41 = vunpack.c.l.b16 %v5397_v33 }
 0x3fe   : > { %v10680_v44 = vadd.f32 %v4115_v22, %v10637_v49  ;;  %v5890_v49 = vld [vmem:[#allocation2 + $0xa0] sm:$0xe]  ;;  %v5409_v22 = vshrl.u32 %v5150_v45, 16 }
 0x3ff   : > { %5729 = vmatmul.bf16.gmra.mxu1 %v5609_v18  ;;  %v8435_v19 = vrot.slane %v5890_v49, 9  ;;  %v6022_v18 = vrot.slane %v6020_v58, 4 }
 0x400   : > { %11483 = vst [vmem:[#allocation67_spill] sm:$0xff] %v10680_v44  ;;  %v5019_v20 = vpop.f32.mrf.mxu0  ;;  %v5411_v45 = vrot.slane %v5409_v22, 4 }
 0x401   : > { %v6021_v49 = vsel %vm9623_vm2, %v8435_v19, %v6020_v58  ;;  %v5610_v58 = vpack.c.b16 %v5588_v42, %v5587_v41  ;;  %v6833_v19 = vshll.u32 %v8509_v8, 16 }
 0x402   : > { %6246 = vmatmul.bf16.gmra.mxu2 %v6130_v60  ;;  %v4640_v51 = vpop.f32.mrf.mxu3  ;;  %v5418_v60 = vshll.u32 %v5151_v53, 16  ;;  %v5424_v53 = vrot.slane %v5422_v5, 4  ;;  %v6107_v22 = vunpack.c.l.b16 %v6021_v49  ;;  %v5415_v3 = vor.u32 %v5414_v7, %v5411_v45  ;;  %v11488_v7 = vld [vmem:[#allocation25_spill] sm:$0xff] }
 0x403   : > { %v6835_v49 = vrot.slane %v6833_v19, 5 }
 0x404   : > { %v10689_v39 = vpop.f32.mrf.mxu1  ;;  %v10702_v61 = vrot.slane %v5418_v60, 5  ;;  %v5153_v60 = vld [vmem:[#allocation2 + $0xd0] sm:$0xf] }
 0x405   : > { %v4118_v1 = vpop.f32.mrf.mxu2  ;;  %v5433_v41 = vshrl.u32 %v5153_v60, 16 }
 0x406   : > { %v4185_v17 = vadd.f32 %v4118_v1, %v10658_v37  ;;  %v6024_v37 = vsel %vm9623_vm2, %v6022_v18, %v6023_v2  ;;  %v5152_v1 = vld [vmem:[#allocation2 + $0xc8] sm:$0x1] }
 0x407   : > { %v6108_v44 = vunpack.c.l.b16 %v6024_v37  ;;  %v5428_v5 = vshll.u32 %v5152_v1, 16  ;;  %v5895_v37 = vld [vmem:[#allocation2 + $0xb8] sm:$0x1]  ;;  %v5436_v1 = vshll.u32 %v5153_v60, 16 }
 0x408   : > { %v4707_v11 = vadd.f32 %v4640_v51, %v4185_v17  ;;  %v8507_v17 = vld [vmem:[%s9535_s21 + $0x10] sm:$0xf]  ;;  %v8508_v51 = vld [vmem:[%s9535_s21 + $0x14] sm:$0xf]  ;;  %v6030_v42 = vrot.slane %v5895_v37, 5 }
 0x409   : > { %v6814_v18 = vshrl.u32 %v8507_v17, 16  ;;  %v6817_v25 = vshll.u32 %v8507_v17, 16  ;;  %v6131_v48 = vpack.c.b16 %v6108_v44, %v6107_v22  ;;  %v5425_v17 = vor.u32 %v5424_v53, %v10702_v61  ;;  %v11487_v44 = vld [vmem:[#allocation50_spill] sm:$0xff] }
 0x40a   : > { %v10698_v63 = vadd.f32 %v5019_v20, %v4707_v11  ;;  %v6823_v20 = vshll.u32 %v8508_v51, 16  ;;  %v6827_v11 = vshrl.u32 %v8508_v51, 16  ;;  %v5430_v34 = vrot.slane %v5428_v5, 5 }
 0x40b   : > { %v6819_v16 = vrot.slane %v6817_v25, 5  ;;  %v5442_v25 = vshll.u32 %v5154_v26, 16  ;;  %v5056_v45 = vadd.f32 %v11488_v7, %v11487_v44  ;;  %v5416_v53 = vrot.slane %v5415_v3, 4 }
 0x40c   : > { %11485 = vst [vmem:[#allocation69_spill] sm:$0xff] %v10698_v63  ;;  %v10710_v21 = vpop.f32.mrf.mxu1  ;;  %v6816_v63 = vrot.slane %v6814_v18, 4  ;;  %v6825_v57 = vrot.slane %v6823_v20, 5  ;;  %v6829_v51 = vrot.slane %v6827_v11, 4  ;;  %v5446_v20 = vshrl.u32 %v5154_v26, 16 }
 0x40d   : > { %v4120_v2 = vpop.f32.mrf.mxu2  ;;  %v5426_v11 = vrot.slane %v5425_v17, 4  ;;  %v5802_v19 = vadd.f32 %v10682_v35, %v5056_v45  ;;  %v5438_v3 = vrot.slane %v5436_v1, 5  ;;  %v10726_v17 = vrot.slane %v5442_v25, 5 }
 0x40e   : > { %v10708_v33 = vadd.f32 %v4120_v2, %v10665_v54  ;;  %v8436_v54 = vrot.slane %v5893_v15, 9  ;;  %v6029_v2 = vrot.slane %v6027_v23, 4  ;;  %v6830_v8 = vor.u32 %v6829_v51, %v6825_v57 }
 0x40f   : > { %5734 = vmatmul.bf16.gmra.mxu1 %v5610_v58  ;;  %v5155_v58 = vld [vmem:[#allocation2 + $0xd8] sm:$0x1]  ;;  %v5421_v35 = vsel %vm9631_vm5, %v5416_v53, %v10702_v61  ;;  %v10750_v53 = vld [vmem:[%s11355_s6] ss:$0 sm:$0xff] }
 0x410   : > { %11486 = vst [vmem:[#allocation70_spill] sm:$0xff] %v10708_v33  ;;  %v6820_v33 = vor.u32 %v6819_v16, %v6816_v63  ;;  %v6831_v22 = vrot.slane %v6830_v8, 4  ;;  %v6028_v16 = vsel %vm9623_vm2, %v8436_v54, %v6027_v23  ;;  %v5435_v63 = vrot.slane %v5433_v41, 4  ;;  %v11489_v8 = vld [vmem:[#allocation27_spill] sm:$0xff] }
 0x411   : > { %v6031_v5 = vsel %vm9623_vm2, %v6029_v2, %v6030_v42  ;;  %v5452_v23 = vshll.u32 %v5155_v58, 16  ;;  %v5431_v54 = vsel %vm9631_vm5, %v5426_v11, %v5430_v34  ;;  %v5448_v41 = vrot.slane %v5446_v20, 4  ;;  %v10738_v2 = vld [vmem:[#allocation2 + $0xc4] sm:$0xf]  ;;  %v8510_v11 = vld [vmem:[%s9535_s21 + $0x20] sm:$0xf] }
 0x412   : > { %6251 = vmatmul.bf16.gmra.mxu2 %v6131_v48  ;;  %v6821_v18 = vrot.slane %v6820_v33, 4  ;;  %v6836_v26 = vsel %vm9631_vm5, %v6831_v22, %v6835_v49  ;;  %v5057_v49 = vadd.f32 %v11489_v8, %v10309_v12  ;;  %v6109_v1 = vunpack.c.l.b16 %v6028_v16  ;;  %v8511_v22 = vld [vmem:[%s9535_s21 + $0x24] sm:$0xf] }
 0x413   : > { %v7214_v37 = vunpack.c.l.b16 %v6836_v26  ;;  %v5439_v25 = vor.u32 %v5438_v3, %v5435_v63  ;;  %v5589_v44 = vunpack.c.l.b16 %v5421_v35  ;;  %v5590_v7 = vunpack.c.l.b16 %v5431_v54 }
 0x414   : > { %v6826_v48 = vsel %vm9631_vm5, %v6821_v18, %v6825_v57  ;;  %v10720_v33 = vpop.f32.mrf.mxu1  ;;  %v10731_v57 = vld [vmem:[%s11354_s5] ss:$0 sm:$0xff]  ;;  %v6110_v18 = vunpack.c.l.b16 %v6031_v5  ;;  %v10742_v61 = vrot.slane %v5452_v23, 5  ;;  %v6034_v34 = vrot.slane %v10738_v2, 5  ;;  %v5896_v5 = vld [vmem:[#allocation2 + $0xc0] sm:$0xe] }
 0x415   : > { %v6212_v15 = vpop.f32.mrf.mxu2  ;;  %v7213_v60 = vunpack.c.l.b16 %v6826_v48  ;;  %v5803_v20 = vadd.f32 %v10689_v39, %v5057_v49  ;;  %v5449_v12 = vor.u32 %v5448_v41, %v10726_v17  ;;  %v6838_v16 = vshrl.u32 %v8510_v11, 16  ;;  %v5156_v2 = vld [vmem:[#allocation2 + $0xe0] sm:$0xf] }
 0x416   : > { %v6324_v51 = vadd.f32 %v6212_v15, %v5802_v19  ;;  %v8512_v15 = vld [vmem:[%s9535_s21 + $0x28] sm:$0x1]  ;;  %v6841_v48 = vshll.u32 %v8510_v11, 16  ;;  %v6847_v63 = vshll.u32 %v8511_v22, 16  ;;  %v6851_v19 = vshrl.u32 %v8511_v22, 16 }
 0x417   : > { %v7245_v42 = vpack.c.b16 %v7214_v37, %v7213_v60  ;;  %v6132_v39 = vpack.c.b16 %v6110_v18, %v6109_v1  ;;  %v5440_v3 = vrot.slane %v5439_v25, 4  ;;  %v5898_v37 = vld [vmem:[#allocation2 + $0xc8] sm:$0x1]  ;;  %v6857_v23 = vshll.u32 %v8512_v15, 16  ;;  %v5157_v22 = vld [vmem:[#allocation2 + $0xe4] sm:$0xf] }
 0x418   : > { %v6424_v45 = vmul.f32 %v10731_v57, %v6324_v51  ;;  %v5611_v51 = vpack.c.b16 %v5590_v7, %v5589_v44  ;;  %v6840_v35 = vrot.slane %v6838_v16, 4  ;;  %v6843_v54 = vrot.slane %v6841_v48, 5 }
 0x419   : > { %7333 = vmatmul.bf16.vlgmr.msra.gmra.mxu0 %v7245_v42  ;;  %v6849_v41 = vrot.slane %v6847_v63, 5  ;;  %v5450_v49 = vrot.slane %v5449_v12, 4  ;;  %v6853_v11 = vrot.slane %v6851_v19, 4  ;;  %v6037_v1 = vrot.slane %v5898_v37, 5 }
 0x41a   : > { %v6460_v42 = vadd.f32 %v10750_v53, %v6424_v45  ;;  %v6844_v18 = vor.u32 %v6843_v54, %v6840_v35  ;;  %v6859_v7 = vrot.slane %v6857_v23, 5  ;;  %v5457_v15 = vshrl.u32 %v5156_v2, 16 }
 0x41b   : > { %v6854_v44 = vor.u32 %v6853_v11, %v6849_v41  ;;  %v5460_v48 = vshll.u32 %v5156_v2, 16  ;;  %v5466_v63 = vshll.u32 %v5157_v22, 16  ;;  %v5470_v45 = vshrl.u32 %v5157_v22, 16 }
 0x41c   : > { %v10756_v60 = vpop.f32.mrf.mxu1  ;;  %v6845_v16 = vrot.slane %v6844_v18, 4  ;;  %v6492_v19 = vmax.f32 %v6460_v42, 0.0  ;;  %v5445_v37 = vsel %vm9631_vm5, %v5440_v3, %v10726_v17 }
 0x41d   : > { %v6214_v58 = vpop.f32.mrf.mxu2  ;;  %v5462_v11 = vrot.slane %v5460_v48, 5  ;;  %v10784_v22 = vrot.slane %v5466_v63, 5  ;;  %v5472_v18 = vrot.slane %v5470_v45, 4  ;;  %v10790_v63 = vld [vmem:[#allocation2 + $0xd8] sm:$0x1] }
 0x41e   : > { %v6325_v26 = vadd.f32 %v6214_v58, %v5803_v20  ;;  %v8437_v20 = vrot.slane %v5896_v5, 9  ;;  %v6036_v58 = vrot.slane %v6034_v34, 4  ;;  %v6850_v23 = vsel %vm9631_vm5, %v6845_v16, %v6849_v41  ;;  %v10782_v41 = vld [vmem:[#allocation2 + $0xd4] sm:$0xf] }
 0x41f   : > { %5739 = vmatmul.bf16.gmra.mxu1 %v5611_v51  ;;  %v6855_v51 = vrot.slane %v6854_v44, 4  ;;  %v7215_v42 = vunpack.c.l.b16 %v6850_v23  ;;  %v6041_v44 = vrot.slane %v10782_v41, 5 }
 0x420   : > { %v6425_v8 = vmul.f32 %v10731_v57, %v6325_v26  ;;  %v11490_v26 = vld [vmem:[#allocation28_spill] sm:$0xff]  ;;  %v6038_v17 = vsel %vm9623_vm2, %v6036_v58, %v6037_v1  ;;  %v5591_v58 = vunpack.c.l.b16 %v5445_v37  ;;  %v8515_v37 = vld [vmem:[%s9535_s21 + $0x38] sm:$0x1] }
 0x421   : > { %v5058_v12 = vadd.f32 %v11490_v26, %v10326_v46  ;;  %v6860_v46 = vsel %vm9631_vm5, %v6855_v51, %v6859_v7  ;;  %v6112_v16 = vunpack.c.l.b16 %v6038_v17  ;;  %v8514_v51 = vld [vmem:[%s9535_s21 + $0x34] sm:$0xf]  ;;  %v6044_v17 = vrot.slane %v10790_v63, 5 }
 0x422   : > { %v6461_v25 = vadd.f32 %v10750_v53, %v6425_v8  ;;  %6256 = vmatmul.bf16.gmra.mxu2 %v6132_v39  ;;  %v5455_v39 = vsel %vm9631_vm5, %v5450_v49, %v10742_v61  ;;  %v6035_v8 = vsel %vm9623_vm2, %v8437_v20, %v6034_v34  ;;  %v7216_v3 = vunpack.c.l.b16 %v6860_v46  ;;  %v10780_v49 = vld [vmem:[#allocation2 + $0xd0] sm:$0xe] }
 0x423   : > { %v5804_v35 = vadd.f32 %v10710_v21, %v5058_v12  ;;  %v5459_v61 = vrot.slane %v5457_v15, 4  ;;  %v11491_v34 = vld [vmem:[#allocation32_spill] sm:$0xff]  ;;  %v8438_v1 = vrot.slane %v10780_v49, 9  ;;  %v5592_v7 = vunpack.c.l.b16 %v5455_v39 }
 0x424   : > { %v6493_v28 = vmax.f32 %v6461_v25, 0.0  ;;  %v10772_v2 = vpop.f32.mrf.mxu1  ;;  %v7246_v25 = vpack.c.b16 %v7216_v3, %v7215_v42  ;;  %v5059_v20 = vadd.f32 %v11491_v34, %v10335_v0  ;;  %v6111_v15 = vunpack.c.l.b16 %v6035_v8  ;;  %v5160_v34 = vld [vmem:[#allocation2 + $0xf4] sm:$0xf] }
 0x425   : > { %v6217_v5 = vpop.f32.mrf.mxu2  ;;  %v5463_v12 = vor.u32 %v5462_v11, %v5459_v61  ;;  %v5473_v0 = vor.u32 %v5472_v18, %v10784_v22  ;;  %v6871_v39 = vshll.u32 %v8514_v51, 16  ;;  %v6043_v8 = vrot.slane %v6041_v44, 4 }
 0x426   : > { %v6524_v54 = vpack.c.bf16 %v6493_v28, %v6492_v19  ;;  %v6326_v21 = vadd.f32 %v6217_v5, %v5804_v35  ;;  %v5158_v28 = vld [vmem:[#allocation2 + $0xe8] sm:$0x1]  ;;  %v5805_v45 = vadd.f32 %v10720_v33, %v5059_v20  ;;  %v8513_v19 = vld [vmem:[%s9535_s21 + $0x30] sm:$0xf]  ;;  %v6881_v33 = vshll.u32 %v8515_v37, 16 }
 0x427   : > { %v5476_v48 = vshll.u32 %v5158_v28, 16  ;;  %v6862_v23 = vshrl.u32 %v8513_v19, 16  ;;  %v6865_v35 = vshll.u32 %v8513_v19, 16  ;;  %v5612_v3 = vpack.c.b16 %v5592_v7, %v5591_v58 }
 0x428   : > { %6612 = vmatmul.bf16.vlgmr.msrb.gmra.mxu3 %v6524_v54  ;;  %v6426_v26 = vmul.f32 %v10731_v57, %v6326_v21  ;;  %v6875_v54 = vshrl.u32 %v8514_v51, 16  ;;  %v6873_v41 = vrot.slane %v6871_v39, 5  ;;  %v5159_v21 = vld [vmem:[#allocation2 + $0xf0] sm:$0xf]  ;;  %v6133_v18 = vpack.c.b16 %v6112_v16, %v6111_v15  ;;  %v11492_v39 = vld [vmem:[#allocation33_spill] sm:$0xff] }
 0x429   : > { %7338 = vmatmul.bf16.gmra.mxu0 %v7246_v25  ;;  %v6864_v49 = vrot.slane %v6862_v23, 4  ;;  %v6867_v61 = vrot.slane %v6865_v35, 5  ;;  %v5464_v20 = vrot.slane %v5463_v12, 4  ;;  %v5478_v19 = vrot.slane %v5476_v48, 5 }
 0x42a   : > { %v6462_v28 = vadd.f32 %v10750_v53, %v6426_v26  ;;  %v6877_v25 = vrot.slane %v6875_v54, 4  ;;  %v6883_v7 = vrot.slane %v6881_v33, 5  ;;  %v5484_v23 = vshll.u32 %v5159_v21, 16 }
 0x42b   : > { %v6868_v51 = vor.u32 %v6867_v61, %v6864_v49  ;;  %v5490_v35 = vshll.u32 %v5160_v34, 16  ;;  %v5494_v26 = vshrl.u32 %v5160_v34, 16  ;;  %v5060_v15 = vadd.f32 %v11492_v39, %v10346_v9  ;;  %v5902_v34 = vld [vmem:[#allocation2 + $0xe0] sm:$0xe] }
 0x42c   : > { %v10798_v42 = vpop.f32.mrf.mxu1  ;;  %v6878_v58 = vor.u32 %v6877_v25, %v6873_v41  ;;  %v6494_v16 = vmax.f32 %v6462_v28, 0.0  ;;  %v5469_v48 = vsel %vm9631_vm5, %v5464_v20, %v10784_v22  ;;  %v5903_v25 = vld [vmem:[#allocation2 + $0xe4] sm:$0xf]  ;;  %v5904_v20 = vld [vmem:[#allocation2 + $0xe8] sm:$0x1] }
 0x42d   : > { %v6219_v5 = vpop.f32.mrf.mxu2  ;;  %v6869_v37 = vrot.slane %v6868_v51, 4 }
 0x42e   : > { %v6327_v46 = vadd.f32 %v6219_v5, %v5805_v45  ;;  %v5474_v45 = vrot.slane %v5473_v0, 4  ;;  %v5481_v5 = vshrl.u32 %v5159_v21, 16  ;;  %v6042_v0 = vsel %vm9623_vm2, %v8438_v1, %v6041_v44 }
 0x42f   : > { %5744 = vmatmul.bf16.gmra.mxu1 %v5612_v3  ;;  %v6874_v33 = vsel %vm9631_vm5, %v6869_v37, %v6873_v41  ;;  %v5806_v3 = vadd.f32 %v10756_v60, %v5060_v15  ;;  %v6045_v44 = vsel %vm9623_vm2, %v6043_v8, %v6044_v17  ;;  %v10822_v60 = vrot.slane %v5490_v35, 5 }
 0x430   : > { %v6427_v11 = vmul.f32 %v10731_v57, %v6327_v46  ;;  %v6879_v46 = vrot.slane %v6878_v58, 4  ;;  %v7217_v21 = vunpack.c.l.b16 %v6874_v33  ;;  %v5479_v28 = vsel %vm9631_vm5, %v5474_v45, %v5478_v19  ;;  %v5161_v58 = vld [vmem:[#allocation2 + $0xf8] sm:$0x1]  ;;  %v11493_v45 = vld [vmem:[#allocation36_spill] sm:$0xff] }
 0x431   : > { %v5483_v22 = vrot.slane %v5481_v5, 4  ;;  %v5496_v41 = vrot.slane %v5494_v26, 4  ;;  %v6113_v51 = vunpack.c.l.b16 %v6042_v0  ;;  %v5061_v19 = vadd.f32 %v11493_v45, %v10359_v52  ;;  %v8518_v52 = vld [vmem:[%s9535_s21 + $0x48] sm:$0x1] }
 0x432   : > { %v6463_v63 = vadd.f32 %v10750_v53, %v6427_v11  ;;  %6261 = vmatmul.bf16.gmra.mxu2 %v6133_v18  ;;  %v6884_v9 = vsel %vm9631_vm5, %v6879_v46, %v6883_v7  ;;  %v5486_v18 = vrot.slane %v5484_v23, 5  ;;  %v5593_v7 = vunpack.c.l.b16 %v5469_v48  ;;  %v8517_v46 = vld [vmem:[%s9535_s21 + $0x44] sm:$0xf] }
 0x433   : > { %v7218_v11 = vunpack.c.l.b16 %v6884_v9  ;;  %v5594_v5 = vunpack.c.l.b16 %v5479_v28  ;;  %v6048_v37 = vrot.slane %v5903_v25, 5  ;;  %v6114_v23 = vunpack.c.l.b16 %v6045_v44 }
 0x434   : > { %v6495_v54 = vmax.f32 %v6463_v63, 0.0  ;;  %v10814_v49 = vpop.f32.mrf.mxu1  ;;  %v5487_v8 = vor.u32 %v5486_v18, %v5483_v22  ;;  %v8439_v17 = vrot.slane %v5902_v34, 9  ;;  %v6051_v35 = vrot.slane %v5904_v20, 5  ;;  %v5162_v20 = vld [vmem:[#allocation2 + $0x100] sm:$0xf] }
 0x435   : > { %v6222_v12 = vpop.f32.mrf.mxu2  ;;  %v7247_v63 = vpack.c.b16 %v7218_v11, %v7217_v21  ;;  %v5807_v26 = vadd.f32 %v10772_v2, %v5061_v19  ;;  %v5497_v15 = vor.u32 %v5496_v41, %v10822_v60  ;;  %v6895_v33 = vshll.u32 %v8517_v46, 16 }
 0x436   : > { %v6525_v61 = vpack.c.bf16 %v6495_v54, %v6494_v16  ;;  %v6328_v1 = vadd.f32 %v6222_v12, %v5806_v3  ;;  %v5500_v16 = vshll.u32 %v5161_v58, 16  ;;  %v8516_v54 = vld [vmem:[%s9535_s21 + $0x40] sm:$0xf]  ;;  %v6899_v3 = vshrl.u32 %v8517_v46, 16 }
 0x437   : > { %v6886_v0 = vshrl.u32 %v8516_v54, 16  ;;  %v6889_v48 = vshll.u32 %v8516_v54, 16  ;;  %v5613_v21 = vpack.c.b16 %v5594_v5, %v5593_v7  ;;  %v6050_v28 = vrot.slane %v6048_v37, 4 }
 0x438   : > { %6617 = vmatmul.bf16.gmra.mxu3 %v6525_v61  ;;  %v6428_v39 = vmul.f32 %v10731_v57, %v6328_v1  ;;  %v6905_v11 = vshll.u32 %v8518_v52, 16  ;;  %v5488_v2 = vrot.slane %v5487_v8, 4  ;;  %v6897_v25 = vrot.slane %v6895_v33, 5 }
 0x439   : > { %7343 = vmatmul.bf16.gmra.mxu0 %v7247_v63  ;;  %v6888_v22 = vrot.slane %v6886_v0, 4  ;;  %v6891_v18 = vrot.slane %v6889_v48, 5  ;;  %v6134_v41 = vpack.c.b16 %v6114_v23, %v6113_v51  ;;  %v6901_v34 = vrot.slane %v6899_v3, 4  ;;  %v11494_v51 = vld [vmem:[#allocation51_spill] sm:$0xff] }
 0x43a   : > { %v6464_v1 = vadd.f32 %v10750_v53, %v6428_v39  ;;  %v5498_v63 = vrot.slane %v5497_v15, 4  ;;  %v5502_v58 = vrot.slane %v5500_v16, 5  ;;  %v6049_v45 = vsel %vm9623_vm2, %v8439_v17, %v6048_v37  ;;  %v5163_v39 = vld [vmem:[#allocation2 + $0x104] sm:$0xf] }
 0x43b   : > { %v6892_v19 = vor.u32 %v6891_v18, %v6888_v22  ;;  %v6052_v5 = vsel %vm9623_vm2, %v6050_v28, %v6051_v35  ;;  %v6902_v8 = vor.u32 %v6901_v34, %v6897_v25  ;;  %v5062_v23 = vadd.f32 %v11494_v51, %v10372_v50  ;;  %v5905_v34 = vld [vmem:[#allocation2 + $0xf0] sm:$0xe] }
 0x43c   : > { %v10832_v9 = vpop.f32.mrf.mxu1  ;;  %v5493_v15 = vsel %vm9631_vm5, %v5488_v2, %v10822_v60  ;;  %v5505_v54 = vshrl.u32 %v5162_v20, 16  ;;  %v6496_v37 = vmax.f32 %v6464_v1, 0.0  ;;  %v5503_v35 = vsel %vm9631_vm5, %v5498_v63, %v5502_v58 }
 0x43d   : > { %v6224_v12 = vpop.f32.mrf.mxu2  ;;  %v6893_v16 = vrot.slane %v6892_v19, 4  ;;  %v6903_v46 = vrot.slane %v6902_v8, 4  ;;  %v5808_v52 = vadd.f32 %v10798_v42, %v5062_v23  ;;  %v5514_v50 = vshll.u32 %v5163_v39, 16 }
 0x43e   : > { %v6329_v61 = vadd.f32 %v6224_v12, %v5807_v26  ;;  %v6907_v26 = vrot.slane %v6905_v11, 5  ;;  %v5508_v12 = vshll.u32 %v5162_v20, 16  ;;  %v6115_v11 = vunpack.c.l.b16 %v6049_v45 }
 0x43f   : > { %5749 = vmatmul.bf16.gmra.mxu1 %v5613_v21  ;;  %v6898_v48 = vsel %vm9631_vm5, %v6893_v16, %v6897_v25  ;;  %v5518_v21 = vshrl.u32 %v5163_v39, 16  ;;  %v6116_v2 = vunpack.c.l.b16 %v6052_v5  ;;  %v5595_v22 = vunpack.c.l.b16 %v5493_v15  ;;  %v5907_v5 = vld [vmem:[#allocation2 + $0xf8] sm:$0x1]  ;;  %v8519_v15 = vld [vmem:[%s9535_s21 + $0x50] sm:$0xf] }
 0x440   : > { %v6429_v44 = vmul.f32 %v10731_v57, %v6329_v61  ;;  %v6908_v60 = vsel %vm9631_vm5, %v6903_v46, %v6907_v26  ;;  %v7219_v61 = vunpack.c.l.b16 %v6898_v48  ;;  %v5596_v18 = vunpack.c.l.b16 %v5503_v35  ;;  %v8520_v16 = vld [vmem:[%s9535_s21 + $0x54] sm:$0xf] }
 0x441   : > { %v7220_v42 = vunpack.c.l.b16 %v6908_v60  ;;  %v5507_v1 = vrot.slane %v5505_v54, 4  ;;  %v5063_v20 = vadd.f32 %v10311_v38, %v10385_v59  ;;  %v10857_v63 = vrot.slane %v5514_v50, 5  ;;  %v8521_v38 = vld [vmem:[%s9535_s21 + $0x58] sm:$0x1] }
 0x442   : > { %v6465_v7 = vadd.f32 %v10750_v53, %v6429_v44  ;;  %6266 = vmatmul.bf16.gmra.mxu2 %v6134_v41  ;;  %v5510_v44 = vrot.slane %v5508_v12, 5  ;;  %v5906_v41 = vld [vmem:[#allocation2 + $0xf4] sm:$0xf]  ;;  %v5520_v58 = vrot.slane %v5518_v21, 4  ;;  %v6135_v19 = vpack.c.b16 %v6116_v2, %v6115_v11 }
 0x443   : > { %v7248_v25 = vpack.c.b16 %v7220_v42, %v7219_v61  ;;  %v6055_v8 = vrot.slane %v5906_v41, 5  ;;  %v5809_v26 = vadd.f32 %v10814_v49, %v5063_v20  ;;  %v5614_v39 = vpack.c.b16 %v5596_v18, %v5595_v22 }
 0x444   : > { %v6497_v17 = vmax.f32 %v6465_v7, 0.0  ;;  %v10851_v33 = vpop.f32.mrf.mxu1  ;;  %v5164_v7 = vld [vmem:[#allocation2 + $0x108] sm:$0x1]  ;;  %v5511_v51 = vor.u32 %v5510_v44, %v5507_v1  ;;  %v8440_v23 = vrot.slane %v5905_v34, 9  ;;  %v6910_v59 = vshrl.u32 %v8519_v15, 16 }
 0x445   : > { %v6227_v0 = vpop.f32.mrf.mxu2  ;;  %v6923_v46 = vshrl.u32 %v8520_v16, 16  ;;  %v5524_v35 = vshll.u32 %v5164_v7, 16  ;;  %v6929_v48 = vshll.u32 %v8521_v38, 16  ;;  %v6057_v21 = vrot.slane %v6055_v8, 4 }
 0x446   : > { %v6526_v3 = vpack.c.bf16 %v6497_v17, %v6496_v37  ;;  %v6330_v28 = vadd.f32 %v6227_v0, %v5808_v52  ;;  %v6913_v37 = vshll.u32 %v8519_v15, 16  ;;  %v6919_v17 = vshll.u32 %v8520_v16, 16 }
 0x447   : > { %v5521_v0 = vor.u32 %v5520_v58, %v10857_v63  ;;  %v6912_v50 = vrot.slane %v6910_v59, 4  ;;  %v6925_v11 = vrot.slane %v6923_v46, 4  ;;  %v5512_v2 = vrot.slane %v5511_v51, 4 }
 0x448   : > { %6622 = vmatmul.bf16.gmra.mxu3 %v6526_v3  ;;  %v6430_v45 = vmul.f32 %v10731_v57, %v6330_v28  ;;  %v6915_v3 = vrot.slane %v6913_v37, 5  ;;  %v6921_v60 = vrot.slane %v6919_v17, 5  ;;  %v6058_v28 = vrot.slane %v5907_v5, 5 }
 0x449   : > { %7348 = vmatmul.bf16.gmra.mxu0 %v7248_v25  ;;  %v6056_v42 = vsel %vm9623_vm2, %v8440_v23, %v6055_v8  ;;  %v5522_v1 = vrot.slane %v5521_v0, 4  ;;  %v6931_v41 = vrot.slane %v6929_v48, 5  ;;  %v5064_v25 = vadd.f32 %v10330_v32, %v10402_v36 }
 0x44a   : > { %v6466_v49 = vadd.f32 %v10750_v53, %v6430_v45  ;;  %v6916_v22 = vor.u32 %v6915_v3, %v6912_v50  ;;  %v6926_v44 = vor.u32 %v6925_v11, %v6921_v60  ;;  %v5526_v20 = vrot.slane %v5524_v35, 5  ;;  %v5167_v35 = vld [vmem:[#allocation2 + $0x118] sm:$0x1] }
 0x44b   : > { %v4686_v45 = vadd.f32 %v10405_v47, %v10408_v55  ;;  %v6059_v5 = vsel %vm9623_vm2, %v6057_v21, %v6058_v28  ;;  %v6117_v38 = vunpack.c.l.b16 %v6056_v42  ;;  %v5548_v42 = vshll.u32 %v5167_v35, 16 }
 0x44c   : > { %v10864_v52 = vpop.f32.mrf.mxu1  ;;  %v6498_v34 = vmax.f32 %v6466_v49, 0.0  ;;  %v6917_v58 = vrot.slane %v6916_v22, 4  ;;  %v6927_v8 = vrot.slane %v6926_v44, 4  ;;  %v6118_v59 = vunpack.c.l.b16 %v6059_v5  ;;  %v8522_v22 = vld [vmem:[%s9535_s21 + $0x60] sm:$0xf] }
 0x44d   : > { %v6229_v54 = vpop.f32.mrf.mxu2  ;;  %v5527_v46 = vsel %vm9631_vm5, %v5522_v1, %v5526_v20  ;;  %v5065_v50 = vadd.f32 %v10352_v6, %v4686_v45  ;;  %v6937_v6 = vshll.u32 %v8522_v22, 16 }
 0x44e   : > { %v6331_v12 = vadd.f32 %v6229_v54, %v5809_v26  ;;  %v5165_v26 = vld [vmem:[#allocation2 + $0x110] sm:$0xf]  ;;  %v6922_v23 = vsel %vm9631_vm5, %v6917_v58, %v6921_v60  ;;  %v6932_v47 = vsel %vm9631_vm5, %v6927_v8, %v6931_v41  ;;  %v5598_v21 = vunpack.c.l.b16 %v5527_v46  ;;  %v8524_v41 = vld [vmem:[%s9535_s21 + $0x68] sm:$0x1] }
 0x44f   : > { %5754 = vmatmul.bf16.gmra.mxu1 %v5614_v39  ;;  %v5166_v39 = vld [vmem:[#allocation2 + $0x114] sm:$0xf]  ;;  %v5529_v32 = vshrl.u32 %v5165_v26, 16  ;;  %v5532_v36 = vshll.u32 %v5165_v26, 16  ;;  %v7221_v55 = vunpack.c.l.b16 %v6922_v23  ;;  %v7222_v37 = vunpack.c.l.b16 %v6932_v47  ;;  %v5908_v23 = vld [vmem:[#allocation2 + $0x100] sm:$0xe] }
 0x450   : > { %v6431_v61 = vmul.f32 %v10731_v57, %v6331_v12  ;;  %v5538_v54 = vshll.u32 %v5166_v39, 16  ;;  %v5542_v12 = vshrl.u32 %v5166_v39, 16  ;;  %v5811_v28 = vadd.f32 %v10851_v33, %v5065_v50 }
 0x451   : > { %v7249_v0 = vpack.c.b16 %v7222_v37, %v7221_v55  ;;  %v5531_v48 = vrot.slane %v5529_v32, 4  ;;  %v5534_v49 = vrot.slane %v5532_v36, 5  ;;  %v6939_v26 = vrot.slane %v6937_v6, 5  ;;  %v5910_v32 = vld [vmem:[#allocation2 + $0x108] sm:$0x1] }
 0x452   : > { %v6467_v18 = vadd.f32 %v10750_v53, %v6431_v61  ;;  %6271 = vmatmul.bf16.gmra.mxu2 %v6135_v19  ;;  %v5810_v19 = vadd.f32 %v10832_v9, %v5064_v25  ;;  %v5517_v9 = vsel %vm9631_vm5, %v5512_v2, %v10857_v63  ;;  %v10891_v3 = vrot.slane %v5538_v54, 5  ;;  %v5909_v63 = vld [vmem:[#allocation2 + $0x104] sm:$0xf] }
 0x453   : > { %v5544_v60 = vrot.slane %v5542_v12, 4  ;;  %v5597_v61 = vunpack.c.l.b16 %v5517_v9  ;;  %v6136_v2 = vpack.c.b16 %v6118_v59, %v6117_v38  ;;  %v5535_v44 = vor.u32 %v5534_v49, %v5531_v48 }
 0x454   : > { %v6499_v7 = vmax.f32 %v6467_v18, 0.0  ;;  %v10881_v15 = vpop.f32.mrf.mxu1  ;;  %v8523_v18 = vld [vmem:[%s9535_s21 + $0x64] sm:$0xf]  ;;  %v6934_v25 = vshrl.u32 %v8522_v22, 16  ;;  %v5550_v55 = vrot.slane %v5548_v42, 5  ;;  %v5066_v9 = vadd.f32 %v10361_v31, %v10424_v40 }
 0x455   : > { %v6232_v51 = vpop.f32.mrf.mxu2  ;;  %v5545_v45 = vor.u32 %v5544_v60, %v10891_v3  ;;  %v6947_v5 = vshrl.u32 %v8523_v18, 16  ;;  %v5615_v33 = vpack.c.b16 %v5598_v21, %v5597_v61  ;;  %v5536_v47 = vrot.slane %v5535_v44, 4  ;;  %v11495_v60 = vld [vmem:[#allocation26_spill] sm:$0xff] }
 0x456   : > { %v6527_v16 = vpack.c.bf16 %v6499_v7, %v6498_v34  ;;  %v6332_v17 = vadd.f32 %v6232_v51, %v5810_v19  ;;  %v6943_v34 = vshll.u32 %v8523_v18, 16  ;;  %v6062_v7 = vrot.slane %v5909_v63, 5 }
 0x457   : > { %v6936_v8 = vrot.slane %v6934_v25, 4  ;;  %v6949_v36 = vrot.slane %v6947_v5, 4  ;;  %v5546_v59 = vrot.slane %v5545_v45, 4  ;;  %v8441_v46 = vrot.slane %v5908_v23, 9  ;;  %v11496_v25 = vld [vmem:[#allocation52_spill] sm:$0xff] }
 0x458   : > { %6627 = vmatmul.bf16.gmra.mxu3 %v6527_v16  ;;  %v6432_v11 = vmul.f32 %v10731_v57, %v6332_v17  ;;  %v6945_v39 = vrot.slane %v6943_v34, 5  ;;  %v6953_v16 = vshll.u32 %v8524_v41, 16  ;;  %v6065_v12 = vrot.slane %v5910_v32, 5 }
 0x459   : > { %7353 = vmatmul.bf16.gmra.mxu0 %v7249_v0  ;;  %v6940_v54 = vor.u32 %v6939_v26, %v6936_v8  ;;  %v6064_v49 = vrot.slane %v6062_v7, 4  ;;  %v4688_v61 = vadd.f32 %v11495_v60, %v10436_v43  ;;  %v5812_v21 = vadd.f32 %v10864_v52, %v5066_v9  ;;  %v8525_v8 = vld [vmem:[%s9535_s21 + $0x70] sm:$0xf]  ;;  %v8526_v26 = vld [vmem:[%s9535_s21 + $0x74] sm:$0xf] }
 0x45a   : > { %v6468_v19 = vadd.f32 %v10750_v53, %v6432_v11  ;;  %v6950_v37 = vor.u32 %v6949_v36, %v6945_v39  ;;  %v6955_v17 = vrot.slane %v6953_v16, 5  ;;  %v6961_v23 = vshll.u32 %v8525_v8, 16 }
 0x45b   : > { %v6941_v0 = vrot.slane %v6940_v54, 4  ;;  %v6066_v44 = vsel %vm9623_vm2, %v6064_v49, %v6065_v12  ;;  %v5067_v6 = vadd.f32 %v11496_v25, %v4688_v61  ;;  %v6967_v32 = vshll.u32 %v8526_v26, 16  ;;  %v5913_v12 = vld [vmem:[#allocation2 + $0x118] sm:$0x1] }
 0x45c   : > { %v10898_v58 = vpop.f32.mrf.mxu1  ;;  %v6500_v35 = vmax.f32 %v6468_v19, 0.0  ;;  %v6951_v50 = vrot.slane %v6950_v37, 4  ;;  %v6120_v5 = vunpack.c.l.b16 %v6066_v44  ;;  %v8527_v19 = vld [vmem:[%s9535_s21 + $0x78] sm:$0x1] }
 0x45d   : > { %v6234_v1 = vpop.f32.mrf.mxu2  ;;  %v6946_v31 = vsel %vm9631_vm5, %v6941_v0, %v6945_v39  ;;  %v5813_v34 = vadd.f32 %v10881_v15, %v5067_v6 }
 0x45e   : > { %v6333_v20 = vadd.f32 %v6234_v1, %v5811_v28  ;;  %v5541_v28 = vsel %vm9631_vm5, %v5536_v47, %v10891_v3  ;;  %v6956_v42 = vsel %vm9631_vm5, %v6951_v50, %v6955_v17  ;;  %v7223_v43 = vunpack.c.l.b16 %v6946_v31 }
 0x45f   : > { %5759 = vmatmul.bf16.gmra.mxu1 %v5615_v33  ;;  %v7224_v52 = vunpack.c.l.b16 %v6956_v42  ;;  %v6063_v3 = vsel %vm9623_vm2, %v8441_v46, %v6062_v7  ;;  %v5599_v18 = vunpack.c.l.b16 %v5541_v28  ;;  %v5912_v33 = vld [vmem:[#allocation2 + $0x114] sm:$0xf]  ;;  %v6971_v47 = vshrl.u32 %v8526_v26, 16  ;;  %v5911_v46 = vld [vmem:[#allocation2 + $0x110] sm:$0xe]  ;;  %v11497_v28 = vld [vmem:[#allocation53_spill] sm:$0xff] }
 0x460   : > { %v6433_v51 = vmul.f32 %v10731_v57, %v6333_v20  ;;  %v6119_v45 = vunpack.c.l.b16 %v6063_v3  ;;  %v6069_v54 = vrot.slane %v5912_v33, 5  ;;  %v8442_v60 = vrot.slane %v5911_v46, 9  ;;  %v8529_v26 = vld [vmem:[%s9535_s21 + $0x84] sm:$0xf] }
 0x461   : > { %v7250_v41 = vpack.c.b16 %v7224_v52, %v7223_v43  ;;  %v6973_v0 = vrot.slane %v6971_v47, 4  ;;  %v5068_v31 = vadd.f32 %v11497_v28, %v10452_v14  ;;  %v4690_v43 = vadd.f32 %v10463_v24, %v10466_v62 }
 0x462   : > { %v6469_v38 = vadd.f32 %v10750_v53, %v6433_v51  ;;  %6276 = vmatmul.bf16.gmra.mxu2 %v6136_v2  ;;  %v5551_v2 = vsel %vm9631_vm5, %v5546_v59, %v5550_v55  ;;  %v6958_v51 = vshrl.u32 %v8525_v8, 16  ;;  %v6977_v55 = vshll.u32 %v8527_v19, 16  ;;  %v8528_v8 = vld [vmem:[%s9535_s21 + $0x80] sm:$0xf] }
 0x463   : > { %v5600_v1 = vunpack.c.l.b16 %v5551_v2  ;;  %v6969_v59 = vrot.slane %v6967_v32, 5  ;;  %v6137_v9 = vpack.c.b16 %v6120_v5, %v6119_v45  ;;  %v6071_v61 = vrot.slane %v6069_v54, 4 }
 0x464   : > { %v6501_v48 = vmax.f32 %v6469_v38, 0.0  ;;  %v10914_v40 = vpop.f32.mrf.mxu1  ;;  %v6960_v15 = vrot.slane %v6958_v51, 4  ;;  %v6963_v38 = vrot.slane %v6961_v23, 5  ;;  %v6979_v50 = vrot.slane %v6977_v55, 5 }
 0x465   : > { %v6237_v63 = vpop.f32.mrf.mxu2  ;;  %v5616_v39 = vpack.c.b16 %v5600_v1, %v5599_v18  ;;  %v6974_v49 = vor.u32 %v6973_v0, %v6969_v59  ;;  %v5814_v3 = vadd.f32 %v10898_v58, %v5068_v31  ;;  %v11498_v58 = vld [vmem:[#allocation54_spill] sm:$0xff]  ;;  %v6982_v19 = vshrl.u32 %v8528_v8, 16 }
 0x466   : > { %v6528_v11 = vpack.c.bf16 %v6501_v48, %v6500_v35  ;;  %v6334_v22 = vadd.f32 %v6237_v63, %v5812_v21  ;;  %v6964_v35 = vor.u32 %v6963_v38, %v6960_v15  ;;  %v6072_v21 = vrot.slane %v5913_v12, 5 }
 0x467   : > { %v6975_v42 = vrot.slane %v6974_v49, 4  ;;  %v6985_v4 = vshll.u32 %v8528_v8, 16  ;;  %v6991_v51 = vshll.u32 %v8529_v26, 16  ;;  %v6995_v23 = vshrl.u32 %v8529_v26, 16  ;;  %v10975_v26 = vpop.f32.mrf.mxu0 }
 0x468   : > { %6632 = vmatmul.bf16.gmra.mxu3 %v6528_v11  ;;  %v6434_v20 = vmul.f32 %v10731_v57, %v6334_v22  ;;  %v6965_v63 = vrot.slane %v6964_v35, 4  ;;  %v6073_v24 = vsel %vm9623_vm2, %v6071_v61, %v6072_v21  ;;  %v11499_v35 = vld [vmem:[#allocation22_spill] sm:$0xff]  ;;  %v11500_v61 = vld [vmem:[#allocation31_spill] sm:$0xff] }
 0x469   : > { %7358 = vmatmul.bf16.gmra.mxu0 %v7250_v41  ;;  %v6980_v44 = vsel %vm9631_vm5, %v6975_v42, %v6979_v50  ;;  %v6070_v41 = vsel %vm9623_vm2, %v8442_v60, %v6069_v54  ;;  %v6122_v45 = vunpack.c.l.b16 %v6073_v24  ;;  %v6984_v54 = vrot.slane %v6982_v19, 4  ;;  %v8533_v24 = vld [vmem:[%s9535_s21 + $0x98] sm:$0x1] }
 0x46a   : > { %v6470_v37 = vadd.f32 %v10750_v53, %v6434_v20  ;;  %v6970_v22 = vsel %vm9631_vm5, %v6965_v63, %v6969_v59  ;;  %v7226_v62 = vunpack.c.l.b16 %v6980_v44  ;;  %v6121_v20 = vunpack.c.l.b16 %v6070_v41  ;;  %v8532_v41 = vld [vmem:[%s9535_s21 + $0x94] sm:$0xf] }
 0x46b   : > { %v7225_v14 = vunpack.c.l.b16 %v6970_v22  ;;  %v6987_v15 = vrot.slane %v6985_v4, 5  ;;  %v6993_v38 = vrot.slane %v6991_v51, 5  ;;  %v4692_v21 = vadd.f32 %v11500_v61, %v10497_v56  ;;  %v11501_v56 = vld [vmem:[#allocation37_spill] sm:$0xff] }
 0x46c   : > { %v10930_v16 = vpop.f32.mrf.mxu1  ;;  %v6502_v11 = vmax.f32 %v6470_v37, 0.0  ;;  %v6138_v47 = vpack.c.b16 %v6122_v45, %v6121_v20  ;;  %v6997_v37 = vrot.slane %v6995_v23, 4  ;;  %v7025_v45 = vshll.u32 %v8533_v24, 16 }
 0x46d   : > { %v6239_v7 = vpop.f32.mrf.mxu2  ;;  %v7251_v6 = vpack.c.b16 %v7226_v62, %v7225_v14  ;;  %v8531_v14 = vld [vmem:[%s9535_s21 + $0x90] sm:$0xf] }
 0x46e   : > { %v6335_v36 = vadd.f32 %v6239_v7, %v5813_v34  ;;  %v5069_v34 = vadd.f32 %v11498_v58, %v4690_v43  ;;  %v6998_v46 = vor.u32 %v6997_v37, %v6993_v38  ;;  %v7006_v62 = vshrl.u32 %v8531_v14, 16 }
 0x46f   : > { %5764 = vmatmul.bf16.gmra.mxu1 %v5616_v39  ;;  %v8530_v39 = vld [vmem:[%s9535_s21 + $0x88] sm:$0x1]  ;;  %v7019_v58 = vshrl.u32 %v8532_v41, 16  ;;  %v7027_v23 = vrot.slane %v7025_v45, 5  ;;  %v11011_v45 = vpop.f32.mrf.mxu3 }
 0x470   : > { %v6435_v17 = vmul.f32 %v10731_v57, %v6335_v36  ;;  %v5815_v5 = vadd.f32 %v10914_v40, %v5069_v34  ;;  %v7001_v55 = vshll.u32 %v8530_v39, 16  ;;  %v6999_v60 = vrot.slane %v6998_v46, 4 }
 0x471   : > { %v7021_v39 = vrot.slane %v7019_v58, 4 }
 0x472   : > { %v6471_v48 = vadd.f32 %v10750_v53, %v6435_v17  ;;  %6281 = vmatmul.bf16.gmra.mxu2 %v6137_v9  ;;  %v6988_v17 = vor.u32 %v6987_v15, %v6984_v54  ;;  %v7003_v12 = vrot.slane %v7001_v55, 5 }
 0x474   : > { %v6503_v2 = vmax.f32 %v6471_v48, 0.0  ;;  %v5727_v18 = vpop.f32.mrf.mxu1  ;;  %v6989_v0 = vrot.slane %v6988_v17, 4  ;;  %v5070_v48 = vadd.f32 %v11499_v35, %v10481_v27  ;;  %v7004_v27 = vsel %vm9631_vm5, %v6999_v60, %v7003_v12 }
 0x475   : > { %v6242_v52 = vpop.f32.mrf.mxu2  ;;  %v7228_v43 = vunpack.c.l.b16 %v7004_v27 }
 0x476   : > { %v6529_v1 = vpack.c.bf16 %v6503_v2, %v6502_v11  ;;  %v6336_v25 = vadd.f32 %v6242_v52, %v5814_v3  ;;  %v6994_v28 = vsel %vm9631_vm5, %v6989_v0, %v6993_v38  ;;  %v5816_v31 = vadd.f32 %v10930_v16, %v5070_v48 }
 0x477   : > { %v7227_v42 = vunpack.c.l.b16 %v6994_v28  ;;  %v5071_v3 = vadd.f32 %v11501_v56, %v4692_v21  ;;  %v8535_v28 = vld [vmem:[%s9535_s21 + $0xa4] sm:$0xf] }
 0x478   : > { %6637 = vmatmul.bf16.gmra.mxu3 %v6529_v1  ;;  %v6436_v33 = vmul.f32 %v10731_v57, %v6336_v25  ;;  %v7009_v25 = vshll.u32 %v8531_v14, 16  ;;  %v11006_v14 = vld [vmem:[%s11355_s6] ss:$0 sm:$0xff] }
 0x479   : > { %7363 = vmatmul.bf16.gmra.mxu0 %v7251_v6  ;;  %v7252_v22 = vpack.c.b16 %v7228_v43, %v7227_v42  ;;  %v5817_v1 = vadd.f32 %v5727_v18, %v5071_v3  ;;  %v7015_v6 = vshll.u32 %v8532_v41, 16  ;;  %v7039_v43 = vshll.u32 %v8535_v28, 16 }
 0x47a   : > { %v6472_v40 = vadd.f32 %v10750_v53, %v6436_v33  ;;  %v7011_v33 = vrot.slane %v7009_v25, 5 }
 0x47b   : > { %v7017_v8 = vrot.slane %v7015_v6, 5 }
 0x47c   : > { %v10954_v36 = vpop.f32.mrf.mxu1  ;;  %v6504_v49 = vmax.f32 %v6472_v40, 0.0  ;;  %v11503_v40 = vld [vmem:[#allocation39_spill] sm:$0xff] }
 0x47d   : > { %v6244_v7 = vpop.f32.mrf.mxu2  ;;  %v7022_v51 = vor.u32 %v7021_v39, %v7017_v8  ;;  %v11018_v39 = vld [vmem:[%s11360_s11] ss:$0 sm:$0xff] }
 0x47e   : > { %v6337_v32 = vadd.f32 %v6244_v7, %v5815_v5  ;;  %v7008_v5 = vrot.slane %v7006_v62, 4 }
 0x47f   : > { %v7023_v38 = vrot.slane %v7022_v51, 4 }
 0x480   : > { %v6437_v59 = vmul.f32 %v10731_v57, %v6337_v32  ;;  %v7012_v19 = vor.u32 %v7011_v33, %v7008_v5  ;;  %v11506_v33 = vld [vmem:[#allocation40_spill] sm:$0xff] }
 0x482   : > { %v6473_v9 = vadd.f32 %v10750_v53, %v6437_v59  ;;  %6286 = vmatmul.bf16.gmra.mxu2 %v6138_v47  ;;  %v7013_v32 = vrot.slane %v7012_v19, 4  ;;  %v11502_v47 = vld [vmem:[#allocation23_spill] sm:$0xff]  ;;  %v11504_v59 = vld [vmem:[#allocation34_spill] sm:$0xff] }
 0x483   : > { %v5072_v55 = vadd.f32 %v11502_v47, %v10508_v29  ;;  %v4694_v37 = vadd.f32 %v11504_v59, %v11503_v40  ;;  %v7028_v29 = vsel %vm9631_vm5, %v7023_v38, %v7027_v23 }
 0x484   : > { %v6505_v50 = vmax.f32 %v6473_v9, 0.0  ;;  %v5732_v11 = vpop.f32.mrf.mxu1  ;;  %v7230_v0 = vunpack.c.l.b16 %v7028_v29 }
 0x485   : > { %v6247_v63 = vpop.f32.mrf.mxu2  ;;  %v5818_v9 = vadd.f32 %v10954_v36, %v5072_v55  ;;  %v10995_v36 = vld [vmem:[%s11354_s5] ss:$0 sm:$0xff] }
 0x486   : > { %v6530_v2 = vpack.c.bf16 %v6505_v50, %v6504_v49  ;;  %v6338_v52 = vadd.f32 %v6247_v63, %v5816_v31  ;;  %v11505_v50 = vld [vmem:[#allocation24_spill] sm:$0xff]  ;;  %v8534_v63 = vld [vmem:[%s9535_s21 + $0xa0] sm:$0xf] }
 0x487   : > { %v5073_v60 = vadd.f32 %v11505_v50, %v4694_v37  ;;  %v7030_v27 = vshrl.u32 %v8534_v63, 16  ;;  %v7033_v42 = vshll.u32 %v8534_v63, 16  ;;  %v8538_v50 = vld [vmem:[%s9535_s21 + $0xb4] sm:$0xf] }
 0x488   : > { %6642 = vmatmul.bf16.gmra.mxu3 %v6530_v2  ;;  %v6438_v44 = vmul.f32 %v10731_v57, %v6338_v52  ;;  %v8536_v2 = vld [vmem:[%s9535_s21 + $0xa8] sm:$0x1]  ;;  %v7043_v52 = vshrl.u32 %v8535_v28, 16  ;;  %v7063_v28 = vshll.u32 %v8538_v50, 16 }
 0x489   : > { %7368 = vmatmul.bf16.gmra.mxu0 %v7252_v22  ;;  %v5819_v61 = vadd.f32 %v5732_v11, %v5073_v60  ;;  %v7049_v3 = vshll.u32 %v8536_v2, 16  ;;  %v7032_v11 = vrot.slane %v7030_v27, 4 }
 0x48a   : > { %v6474_v18 = vadd.f32 %v10750_v53, %v6438_v44  ;;  %v7041_v44 = vrot.slane %v7039_v43, 5  ;;  %v7045_v62 = vrot.slane %v7043_v52, 4 }
 0x48c   : > { %v10973_v20 = vpop.f32.mrf.mxu1  ;;  %v6506_v54 = vmax.f32 %v6474_v18, 0.0  ;;  %v7046_v58 = vor.u32 %v7045_v62, %v7041_v44 }
 0x48d   : > { %v6249_v16 = vpop.f32.mrf.mxu2 }
 0x48e   : > { %v6339_v34 = vadd.f32 %v6249_v16, %v5817_v1  ;;  %v7035_v1 = vrot.slane %v7033_v42, 5  ;;  %v7047_v19 = vrot.slane %v7046_v58, 4 }
 0x490   : > { %v6439_v7 = vmul.f32 %v10731_v57, %v6339_v34  ;;  %v7018_v57 = vsel %vm9631_vm5, %v7013_v32, %v7017_v8  ;;  %v7036_v25 = vor.u32 %v7035_v1, %v7032_v11  ;;  %v7051_v34 = vrot.slane %v7049_v3, 5 }
 0x491   : > { %v7229_v12 = vunpack.c.l.b16 %v7018_v57  ;;  %v5074_v8 = vadd.f32 %v11506_v33, %v10534_v10  ;;  %v11508_v57 = vld [vmem:[#allocation38_spill] sm:$0xff]  ;;  %v11510_v33 = vld [vmem:[#allocation29_spill] sm:$0xff] }
 0x492   : > { %v6475_v4 = vadd.f32 %v10750_v53, %v6439_v7  ;;  %v7037_v5 = vrot.slane %v7036_v25, 4 }
 0x493   : > { %v7253_v49 = vpack.c.b16 %v7230_v0, %v7229_v12  ;;  %v5820_v47 = vadd.f32 %v10973_v20, %v5074_v8  ;;  %v11038_v20 = vld [vmem:[%s11357_s8] ss:$0 sm:$0xff] }
 0x494   : > { %v6507_v15 = vmax.f32 %v6475_v4, 0.0  ;;  %v10987_v53 = vpop.f32.mrf.mxu1  ;;  %v11507_v4 = vld [vmem:[#allocation30_spill] sm:$0xff]  ;;  %v7042_v32 = vsel %vm9631_vm5, %v7037_v5, %v7041_v44  ;;  %v11509_v5 = vld [vmem:[#allocation41_spill] sm:$0xff] }
 0x495   : > { %v6252_v17 = vpop.f32.mrf.mxu2  ;;  %v4696_v51 = vadd.f32 %v11507_v4, %v10547_v30  ;;  %v11033_v30 = vld [vmem:[%s11361_s12] ss:$0 sm:$0xff]  ;;  %v5076_v8 = vadd.f32 %v11510_v33, %v11509_v5 }
 0x496   : > { %v6531_v46 = vpack.c.bf16 %v6507_v15, %v6506_v54  ;;  %v6340_v35 = vadd.f32 %v6252_v17, %v5818_v9  ;;  %v7334_v48 = vpop.f32.mrf.mxu0  ;;  %v7052_v54 = vsel %vm9631_vm5, %v7047_v19, %v7051_v34  ;;  %v7231_v15 = vunpack.c.l.b16 %v7042_v32  ;;  %v11512_v32 = vld [vmem:[#allocation55_spill] sm:$0xff] }
 0x497   : > { %v7232_v38 = vunpack.c.l.b16 %v7052_v54  ;;  %v7418_v40 = vmul.f32 %v11018_v39, %v7334_v48  ;;  %v5075_v9 = vadd.f32 %v11508_v57, %v4696_v51 }
 0x498   : > { %6647 = vmatmul.bf16.gmra.mxu3 %v6531_v46  ;;  %v6440_v21 = vmul.f32 %v10995_v36, %v6340_v35  ;;  %v11044_v46 = vld [vmem:[%s11358_s9] ss:$0 sm:$0xff] }
 0x499   : > { %7373 = vmatmul.bf16.gmra.mxu0 %v7253_v49  ;;  %v7254_v17 = vpack.c.b16 %v7232_v38, %v7231_v15  ;;  %v5821_v12 = vadd.f32 %v10987_v53, %v5075_v9  ;;  %v7454_v0 = vadd.f32 %v11033_v30, %v7418_v40  ;;  %v8537_v49 = vld [vmem:[%s9535_s21 + $0xb0] sm:$0xf] }
 0x49a   : > { %v6476_v41 = vadd.f32 %v11006_v14, %v6440_v21  ;;  %v7054_v21 = vshrl.u32 %v8537_v49, 16  ;;  %v7057_v63 = vshll.u32 %v8537_v49, 16  ;;  %v11513_v49 = vld [vmem:[#allocation35_spill] sm:$0xff] }
 0x49c   : > { %v11001_v56 = vpop.f32.mrf.mxu1  ;;  %v6508_v18 = vmax.f32 %v6476_v41, 0.0  ;;  %v7056_v43 = vrot.slane %v7054_v21, 4  ;;  %v7059_v52 = vrot.slane %v7057_v63, 5 }
 0x49d   : > { %v6254_v31 = vpop.f32.mrf.mxu2 }
 0x49e   : > { %v6341_v22 = vadd.f32 %v6254_v31, %v5819_v61  ;;  %v7336_v24 = vpop.f32.mrf.mxu0  ;;  %v8539_v61 = vld [vmem:[%s9535_s21 + $0xb8] sm:$0x1]  ;;  %v7067_v31 = vshrl.u32 %v8538_v50, 16  ;;  %v7060_v62 = vor.u32 %v7059_v52, %v7056_v43 }
 0x49f   : > { %v7073_v42 = vshll.u32 %v8539_v61, 16 }
 0x4a0   : > { %v6441_v16 = vmul.f32 %v10995_v36, %v6341_v22  ;;  %v7065_v22 = vrot.slane %v7063_v28, 5  ;;  %v7069_v41 = vrot.slane %v7067_v31, 4  ;;  %v8540_v31 = vld [vmem:[%s9535_s21 + $0xc0] sm:$0xf] }
 0x4a1   : > { %v7075_v34 = vrot.slane %v7073_v42, 5  ;;  %v8542_v42 = vld [vmem:[%s9535_s21 + $0xc8] sm:$0x1]  ;;  %v7078_v43 = vshrl.u32 %v8540_v31, 16  ;;  %v7081_v52 = vshll.u32 %v8540_v31, 16 }
 0x4a2   : > { %v6477_v6 = vadd.f32 %v11006_v14, %v6441_v16  ;;  %v7419_v16 = vmul.f32 %v11018_v39, %v7336_v24  ;;  %v7070_v58 = vor.u32 %v7069_v41, %v7065_v22  ;;  %v7097_v41 = vshll.u32 %v8542_v42, 16 }
 0x4a4   : > { %v6509_v7 = vmax.f32 %v6477_v6, 0.0  ;;  %v11025_v55 = vpop.f32.mrf.mxu1  ;;  %v7071_v24 = vrot.slane %v7070_v58, 4  ;;  %v7455_v38 = vadd.f32 %v11033_v30, %v7419_v16  ;;  %v7083_v16 = vrot.slane %v7081_v52, 5 }
 0x4a5   : > { %v6257_v23 = vpop.f32.mrf.mxu2 }
 0x4a6   : > { %v6532_v10 = vpack.c.bf16 %v6509_v7, %v6508_v18  ;;  %v6342_v59 = vadd.f32 %v6257_v23, %v5820_v47  ;;  %v7339_v37 = vpop.f32.mrf.mxu0  ;;  %v7061_v7 = vrot.slane %v7060_v62, 4  ;;  %v11511_v23 = vld [vmem:[#allocation56_spill] sm:$0xff] }
 0x4a7   : > { %v4698_v47 = vadd.f32 %v11512_v32, %v11511_v23 }
 0x4a8   : > { %6652 = vmatmul.bf16.gmra.mxu3 %v6532_v10  ;;  %v6442_v35 = vmul.f32 %v10995_v36, %v6342_v59  ;;  %v5822_v10 = vadd.f32 %v11001_v56, %v5076_v8  ;;  %v7066_v15 = vsel %vm9631_vm5, %v7061_v7, %v7065_v22 }
 0x4a9   : > { %7378 = vmatmul.bf16.gmra.mxu0 %v7254_v17  ;;  %v7076_v17 = vsel %vm9631_vm5, %v7071_v24, %v7075_v34  ;;  %v7233_v57 = vunpack.c.l.b16 %v7066_v15  ;;  %v5077_v50 = vadd.f32 %v11513_v49, %v4698_v47  ;;  %v11515_v24 = vld [vmem:[#allocation42_spill] sm:$0xff] }
 0x4aa   : > { %v6478_v3 = vadd.f32 %v11006_v14, %v6442_v35  ;;  %v7234_v9 = vunpack.c.l.b16 %v7076_v17 }
 0x4ab   : > { %v6613_v29 = vpop.f32.mrf.mxu3  ;;  %v5823_v21 = vadd.f32 %v11025_v55, %v5077_v50  ;;  %v7080_v55 = vrot.slane %v7078_v43, 4 }
 0x4ac   : > { %v6697_v48 = vmul.f32 %v11038_v20, %v6613_v29  ;;  %v11055_v53 = vpop.f32.mrf.mxu1  ;;  %v6510_v19 = vmax.f32 %v6478_v3, 0.0 }
 0x4ad   : > { %v6259_v60 = vpop.f32.mrf.mxu2  ;;  %v7084_v8 = vor.u32 %v7083_v16, %v7080_v55 }
 0x4ae   : > { %v6733_v2 = vadd.f32 %v11044_v46, %v6697_v48  ;;  %v6343_v27 = vadd.f32 %v6259_v60, %v5821_v12  ;;  %v7341_v44 = vpop.f32.mrf.mxu0  ;;  %v7420_v12 = vmul.f32 %v11018_v39, %v7339_v37  ;;  %v7255_v48 = vpack.c.b16 %v7234_v9, %v7233_v57 }
 0x4af   : > { %v7421_v33 = vmul.f32 %v11018_v39, %v7341_v44  ;;  %v11516_v44 = vld [vmem:[#allocation58_spill] sm:$0xff] }
 0x4b0   : > { %v7486_v11 = vadd.f32 %v7454_v0, %v6733_v2  ;;  %v6443_v1 = vmul.f32 %v10995_v36, %v6343_v27  ;;  %v7456_v63 = vadd.f32 %v11033_v30, %v7420_v12  ;;  %v8541_v2 = vld [vmem:[%s9535_s21 + $0xc4] sm:$0xf] }
 0x4b1   : > { %v7087_v22 = vshll.u32 %v8541_v2, 16  ;;  %v7091_v3 = vshrl.u32 %v8541_v2, 16  ;;  %v7457_v12 = vadd.f32 %v11033_v30, %v7421_v33 }
 0x4b2   : > { %v7518_v25 = vmax.f32 %v7486_v11, 0.0  ;;  %v6479_v6 = vadd.f32 %v11006_v14, %v6443_v1 }
 0x4b3   : > { %v6615_v18 = vpop.f32.mrf.mxu3  ;;  %v7089_v62 = vrot.slane %v7087_v22, 5  ;;  %v7093_v5 = vrot.slane %v7091_v3, 4  ;;  %v8544_v3 = vld [vmem:[%s9535_s21 + $0xd4] sm:$0xf] }
 0x4b4   : > { %7550 = vst [vmem:[%s11063_s23] sm:$0xff] %v7518_v25  ;;  %v6511_v4 = vmax.f32 %v6479_v6, 0.0  ;;  %v6698_v51 = vmul.f32 %v11038_v20, %v6615_v18  ;;  %v11077_v35 = vpop.f32.mrf.mxu1 }
 0x4b5   : > { %v6262_v54 = vpop.f32.mrf.mxu2 }
 0x4b6   : > { %v6734_v40 = vadd.f32 %v11044_v46, %v6698_v51  ;;  %v6533_v59 = vpack.c.bf16 %v6511_v4, %v6510_v19  ;;  %v6344_v56 = vadd.f32 %v6262_v54, %v5822_v10  ;;  %v7344_v0 = vpop.f32.mrf.mxu0  ;;  %v7094_v19 = vor.u32 %v7093_v5, %v7089_v62  ;;  %v11514_v51 = vld [vmem:[#allocation44_spill] sm:$0xff] }
 0x4b7   : > { %v7099_v4 = vrot.slane %v7097_v41, 5  ;;  %v5078_v23 = vadd.f32 %v11515_v24, %v11514_v51  ;;  %v7085_v10 = vrot.slane %v7084_v8, 4  ;;  %v8545_v41 = vld [vmem:[%s9535_s21 + $0xd8] sm:$0x1] }
 0x4b8   : > { %v7487_v29 = vadd.f32 %v7455_v38, %v6734_v40  ;;  %6657 = vmatmul.bf16.gmra.mxu3 %v6533_v59  ;;  %v6444_v37 = vmul.f32 %v10995_v36, %v6344_v56  ;;  %v7095_v40 = vrot.slane %v7094_v19, 4  ;;  %v11517_v59 = vld [vmem:[#allocation43_spill] sm:$0xff] }
 0x4b9   : > { %7383 = vmatmul.bf16.gmra.mxu0 %v7255_v48  ;;  %v4700_v17 = vadd.f32 %v11517_v59, %v11516_v44  ;;  %v5824_v57 = vadd.f32 %v11055_v53, %v5078_v23  ;;  %v7422_v53 = vmul.f32 %v11018_v39, %v7344_v0  ;;  %v8543_v0 = vld [vmem:[%s9535_s21 + $0xd0] sm:$0xf] }
 0x4ba   : > { %v7519_v60 = vmax.f32 %v7487_v29, 0.0  ;;  %v6480_v25 = vadd.f32 %v11006_v14, %v6444_v37  ;;  %v7090_v29 = vsel %vm9631_vm5, %v7085_v10, %v7089_v62  ;;  %v7100_v49 = vsel %vm9631_vm5, %v7095_v40, %v7099_v4  ;;  %v11520_v40 = vld [vmem:[#allocation59_spill] sm:$0xff] }
 0x4bb   : > { %v6618_v61 = vpop.f32.mrf.mxu3  ;;  %v7235_v50 = vunpack.c.l.b16 %v7090_v29  ;;  %v7458_v43 = vadd.f32 %v11033_v30, %v7422_v53  ;;  %v7102_v55 = vshrl.u32 %v8543_v0, 16  ;;  %v7105_v16 = vshll.u32 %v8543_v0, 16 }
 0x4bc   : > { %7551 = vst [vmem:[%s11063_s23 + $0x8] sm:$0xff] %v7519_v60  ;;  %v6699_v28 = vmul.f32 %v11038_v20, %v6618_v61  ;;  %v11095_v32 = vpop.f32.mrf.mxu1  ;;  %v6512_v54 = vmax.f32 %v6480_v25, 0.0  ;;  %v7236_v60 = vunpack.c.l.b16 %v7100_v49  ;;  %v7111_v62 = vshll.u32 %v8544_v3, 16 }
 0x4bd   : > { %v6264_v27 = vpop.f32.mrf.mxu2  ;;  %v7115_v25 = vshrl.u32 %v8544_v3, 16  ;;  %v7104_v5 = vrot.slane %v7102_v55, 4  ;;  %v7107_v33 = vrot.slane %v7105_v16, 5 }
 0x4be   : > { %v6735_v11 = vadd.f32 %v11044_v46, %v6699_v28  ;;  %v6345_v1 = vadd.f32 %v6264_v27, %v5823_v21  ;;  %v7346_v34 = vpop.f32.mrf.mxu0  ;;  %v7256_v37 = vpack.c.b16 %v7236_v60, %v7235_v50  ;;  %v11518_v28 = vld [vmem:[#allocation57_spill] sm:$0xff]  ;;  %v7113_v8 = vrot.slane %v7111_v62, 5 }
 0x4bf   : > { %v5079_v31 = vadd.f32 %v11518_v28, %v4700_v17  ;;  %v7117_v51 = vrot.slane %v7115_v25, 4  ;;  %v7423_v24 = vmul.f32 %v11018_v39, %v7346_v34  ;;  %v7108_v23 = vor.u32 %v7107_v33, %v7104_v5  ;;  %v8546_v25 = vld [vmem:[%s9535_s21 + $0xe0] sm:$0xf] }
 0x4c0   : > { %v7488_v6 = vadd.f32 %v7456_v63, %v6735_v11  ;;  %v6445_v58 = vmul.f32 %v10995_v36, %v6345_v1  ;;  %v7129_v5 = vshll.u32 %v8546_v25, 16 }
 0x4c1   : > { %v5825_v42 = vadd.f32 %v11077_v35, %v5079_v31  ;;  %v7121_v35 = vshll.u32 %v8545_v41, 16  ;;  %v7109_v17 = vrot.slane %v7108_v23, 4 }
 0x4c2   : > { %v7520_v18 = vmax.f32 %v7488_v6, 0.0  ;;  %v6481_v7 = vadd.f32 %v11006_v14, %v6445_v58 }
 0x4c3   : > { %v6620_v47 = vpop.f32.mrf.mxu3  ;;  %v7114_v60 = vsel %vm9631_vm5, %v7109_v17, %v7113_v8 }
 0x4c4   : > { %7552 = vst [vmem:[%s11063_s23 + $0x10] sm:$0xff] %v7520_v18  ;;  %v6513_v15 = vmax.f32 %v6481_v7, 0.0  ;;  %v6700_v38 = vmul.f32 %v11038_v20, %v6620_v47  ;;  %v5752_v11 = vpop.f32.mrf.mxu1  ;;  %v7237_v31 = vunpack.c.l.b16 %v7114_v60 }
 0x4c5   : > { %v6267_v9 = vpop.f32.mrf.mxu2 }
 0x4c6   : > { %v6736_v56 = vadd.f32 %v11044_v46, %v6700_v38  ;;  %v6534_v48 = vpack.c.bf16 %v6513_v15, %v6512_v54  ;;  %v6346_v21 = vadd.f32 %v6267_v9, %v5824_v57  ;;  %v7349_v63 = vpop.f32.mrf.mxu0  ;;  %v7118_v54 = vor.u32 %v7117_v51, %v7113_v8  ;;  %v11519_v38 = vld [vmem:[#allocation45_spill] sm:$0xff] }
 0x4c7   : > { %v7123_v15 = vrot.slane %v7121_v35, 5  ;;  %v5080_v44 = vadd.f32 %v11520_v40, %v11519_v38  ;;  %v7126_v35 = vshrl.u32 %v8546_v25, 16  ;;  %v7131_v51 = vrot.slane %v7129_v5, 5 }
 0x4c8   : > { %v7489_v61 = vadd.f32 %v7457_v12, %v6736_v56  ;;  %6662 = vmatmul.bf16.gmra.mxu3 %v6534_v48  ;;  %v6446_v52 = vmul.f32 %v10995_v36, %v6346_v21  ;;  %v7119_v12 = vrot.slane %v7118_v54, 4  ;;  %v11521_v56 = vld [vmem:[#allocation46_spill] sm:$0xff]  ;;  %v11522_v48 = vld [vmem:[#allocation61_spill] sm:$0xff] }
 0x4c9   : > { %7388 = vmatmul.bf16.gmra.mxu0 %v7256_v37  ;;  %v4702_v34 = vadd.f32 %v11522_v48, %v11521_v56  ;;  %v5826_v49 = vadd.f32 %v11095_v32, %v5080_v44  ;;  %v7424_v32 = vmul.f32 %v11018_v39, %v7349_v63  ;;  %v8547_v63 = vld [vmem:[%s9535_s21 + $0xe4] sm:$0xf] }
 0x4ca   : > { %v7521_v2 = vmax.f32 %v7489_v61, 0.0  ;;  %v6482_v18 = vadd.f32 %v11006_v14, %v6446_v52  ;;  %v7459_v61 = vadd.f32 %v11033_v30, %v7423_v24  ;;  %v7124_v37 = vsel %vm9631_vm5, %v7119_v12, %v7123_v15  ;;  %v11525_v12 = vld [vmem:[#allocation62_spill] sm:$0xff] }
 0x4cb   : > { %v6623_v27 = vpop.f32.mrf.mxu3  ;;  %v7460_v55 = vadd.f32 %v11033_v30, %v7424_v32  ;;  %v7135_v33 = vshll.u32 %v8547_v63, 16  ;;  %v7139_v8 = vshrl.u32 %v8547_v63, 16 }
 0x4cc   : > { %7553 = vst [vmem:[%s11063_s23 + $0x18] sm:$0xff] %v7521_v2  ;;  %v6701_v22 = vmul.f32 %v11038_v20, %v6623_v27  ;;  %v6514_v57 = vmax.f32 %v6482_v18, 0.0  ;;  %v5755_v28 = vpop.f32.mrf.mxu1  ;;  %v7238_v2 = vunpack.c.l.b16 %v7124_v37 }
 0x4cd   : > { %v6269_v1 = vpop.f32.mrf.mxu2  ;;  %v7137_v24 = vrot.slane %v7135_v33, 5  ;;  %v7141_v15 = vrot.slane %v7139_v8, 4  ;;  %v8549_v33 = vld [vmem:[%s9535_s21 + $0xf0] sm:$0xf]  ;;  %v8550_v8 = vld [vmem:[%s9535_s21 + $0xf4] sm:$0xf] }
 0x4ce   : > { %v6737_v6 = vadd.f32 %v11044_v46, %v6701_v22  ;;  %v6347_v58 = vadd.f32 %v6269_v1, %v5825_v42  ;;  %v7351_v4 = vpop.f32.mrf.mxu0  ;;  %v7257_v52 = vpack.c.b16 %v7238_v2, %v7237_v31  ;;  %v11523_v22 = vld [vmem:[#allocation60_spill] sm:$0xff] }
 0x4cf   : > { %v5081_v0 = vadd.f32 %v11523_v22, %v4702_v34  ;;  %v7425_v40 = vmul.f32 %v11018_v39, %v7351_v4 }
 0x4d0   : > { %v7490_v7 = vadd.f32 %v7458_v43, %v6737_v6  ;;  %v6447_v19 = vmul.f32 %v10995_v36, %v6347_v58  ;;  %v8548_v58 = vld [vmem:[%s9535_s21 + $0xe8] sm:$0x1] }
 0x4d1   : > { %v5827_v41 = vadd.f32 %v5752_v11, %v5081_v0  ;;  %v7128_v11 = vrot.slane %v7126_v35, 4 }
 0x4d2   : > { %v7522_v47 = vmax.f32 %v7490_v7, 0.0  ;;  %v6483_v10 = vadd.f32 %v11006_v14, %v6447_v19  ;;  %v7145_v19 = vshll.u32 %v8548_v58, 16 }
 0x4d3   : > { %v6625_v59 = vpop.f32.mrf.mxu3  ;;  %v7132_v44 = vor.u32 %v7131_v51, %v7128_v11  ;;  %v7153_v11 = vshll.u32 %v8549_v33, 16  ;;  %v7159_v51 = vshll.u32 %v8550_v8, 16 }
 0x4d4   : > { %7554 = vst [vmem:[%s11063_s23 + $0x20] sm:$0xff] %v7522_v47  ;;  %v6515_v9 = vmax.f32 %v6483_v10, 0.0  ;;  %v6702_v29 = vmul.f32 %v11038_v20, %v6625_v59  ;;  %v5757_v38 = vpop.f32.mrf.mxu1 }
 0x4d5   : > { %v6272_v50 = vpop.f32.mrf.mxu2  ;;  %v7133_v34 = vrot.slane %v7132_v44, 4 }
 0x4d6   : > { %v6738_v53 = vadd.f32 %v11044_v46, %v6702_v29  ;;  %v6535_v21 = vpack.c.bf16 %v6515_v9, %v6514_v57  ;;  %v6348_v42 = vadd.f32 %v6272_v50, %v5826_v49  ;;  %v7354_v43 = vpop.f32.mrf.mxu0  ;;  %v7142_v57 = vor.u32 %v7141_v15, %v7137_v24  ;;  %v11524_v29 = vld [vmem:[#allocation47_spill] sm:$0xff] }
 0x4d7   : > { %v7147_v9 = vrot.slane %v7145_v19, 5  ;;  %v5082_v56 = vadd.f32 %v11525_v12, %v11524_v29  ;;  %v7138_v2 = vsel %vm9631_vm5, %v7133_v34, %v7137_v24  ;;  %v7150_v19 = vshrl.u32 %v8549_v33, 16 }
 0x4d8   : > { %v7491_v27 = vadd.f32 %v7459_v61, %v6738_v53  ;;  %6667 = vmatmul.bf16.gmra.mxu3 %v6535_v21  ;;  %v6448_v16 = vmul.f32 %v10995_v36, %v6348_v42  ;;  %v7143_v61 = vrot.slane %v7142_v57, 4  ;;  %v11526_v53 = vld [vmem:[#allocation65_spill] sm:$0xff]  ;;  %v11527_v21 = vld [vmem:[#allocation63_spill] sm:$0xff]  ;;  %v7239_v22 = vunpack.c.l.b16 %v7138_v2 }
 0x4d9   : > { %7393 = vmatmul.bf16.gmra.mxu0 %v7257_v52  ;;  %v4704_v4 = vadd.f32 %v11527_v21, %v11526_v53  ;;  %v5828_v37 = vadd.f32 %v5755_v28, %v5082_v56  ;;  %v7163_v24 = vshrl.u32 %v8550_v8, 16  ;;  %v7152_v15 = vrot.slane %v7150_v19, 4 }
 0x4da   : > { %v7523_v3 = vmax.f32 %v7491_v27, 0.0  ;;  %v6484_v23 = vadd.f32 %v11006_v14, %v6448_v16  ;;  %v7461_v27 = vadd.f32 %v11033_v30, %v7425_v40  ;;  %v7148_v52 = vsel %vm9631_vm5, %v7143_v61, %v7147_v9  ;;  %v11528_v16 = vld [vmem:[#allocation64_spill] sm:$0xff] }
 0x4db   : > { %v6628_v1 = vpop.f32.mrf.mxu3  ;;  %v7240_v0 = vunpack.c.l.b16 %v7148_v52  ;;  %v7161_v40 = vrot.slane %v7159_v51, 5  ;;  %v7165_v9 = vrot.slane %v7163_v24, 4  ;;  %v8552_v51 = vld [vmem:[%s9535_s21 + $0x100] sm:$0xf] }
 0x4dc   : > { %7555 = vst [vmem:[%s11063_s23 + $0x28] sm:$0xff] %v7523_v3  ;;  %v6703_v62 = vmul.f32 %v11038_v20, %v6628_v1  ;;  %v6516_v49 = vmax.f32 %v6484_v23, 0.0  ;;  %v7426_v1 = vmul.f32 %v11018_v39, %v7354_v43  ;;  %v5760_v63 = vpop.f32.mrf.mxu1 }
 0x4dd   : > { %v6274_v6 = vpop.f32.mrf.mxu2  ;;  %v7166_v34 = vor.u32 %v7165_v9, %v7161_v40 }
 0x4de   : > { %v6739_v18 = vadd.f32 %v11044_v46, %v6703_v62  ;;  %v6349_v7 = vadd.f32 %v6274_v6, %v5827_v41  ;;  %v7356_v54 = vpop.f32.mrf.mxu0  ;;  %v5083_v62 = vadd.f32 %v11528_v16, %v4704_v4  ;;  %v7462_v35 = vadd.f32 %v11033_v30, %v7426_v1 }
 0x4df   : > { %v7427_v29 = vmul.f32 %v11018_v39, %v7356_v54  ;;  %v7167_v2 = vrot.slane %v7166_v34, 4 }
 0x4e0   : > { %v7492_v47 = vadd.f32 %v7460_v55, %v6739_v18  ;;  %v6449_v10 = vmul.f32 %v10995_v36, %v6349_v7  ;;  %v7258_v55 = vpack.c.b16 %v7240_v0, %v7239_v22  ;;  %v5829_v58 = vadd.f32 %v5757_v38, %v5083_v62  ;;  %v8551_v7 = vld [vmem:[%s9535_s21 + $0xf8] sm:$0x1] }
 0x4e1   : > { %v7155_v38 = vrot.slane %v7153_v11, 5 }
 0x4e2   : > { %v7524_v59 = vmax.f32 %v7492_v47, 0.0  ;;  %v6485_v17 = vadd.f32 %v11006_v14, %v6449_v10  ;;  %v7169_v10 = vshll.u32 %v8551_v7, 16 }
 0x4e3   : > { %v6630_v48 = vpop.f32.mrf.mxu3  ;;  %v7156_v12 = vor.u32 %v7155_v38, %v7152_v15 }
 0x4e4   : > { %7556 = vst [vmem:[%s11063_s23 + $0x30] sm:$0xff] %v7524_v59  ;;  %v6517_v50 = vmax.f32 %v6485_v17, 0.0  ;;  %v6704_v60 = vmul.f32 %v11038_v20, %v6630_v48  ;;  %v5762_v52 = vpop.f32.mrf.mxu1 }
 0x4e5   : > { %v6277_v31 = vpop.f32.mrf.mxu2  ;;  %v7157_v21 = vrot.slane %v7156_v12, 4 }
 0x4e6   : > { %v6740_v32 = vadd.f32 %v11044_v46, %v6704_v60  ;;  %v6536_v42 = vpack.c.bf16 %v6517_v50, %v6516_v49  ;;  %v6350_v28 = vadd.f32 %v6277_v31, %v5828_v37  ;;  %v7359_v41 = vpop.f32.mrf.mxu0  ;;  %v7171_v49 = vrot.slane %v7169_v10, 5  ;;  %v11529_v50 = vld [vmem:[#allocation49_spill] sm:$0xff]  ;;  %v11530_v60 = vld [vmem:[#allocation66_spill] sm:$0xff] }
 0x4e7   : > { %v5084_v61 = vadd.f32 %v11530_v60, %v11529_v50  ;;  %v7162_v0 = vsel %vm9631_vm5, %v7157_v21, %v7161_v40  ;;  %v7177_v10 = vshll.u32 %v8552_v51, 16 }
 0x4e8   : > { %v7493_v3 = vadd.f32 %v7461_v27, %v6740_v32  ;;  %6672 = vmatmul.bf16.gmra.mxu3 %v6536_v42  ;;  %v6450_v5 = vmul.f32 %v10995_v36, %v6350_v28  ;;  %v11531_v27 = vld [vmem:[#allocation67_spill] sm:$0xff]  ;;  %v11532_v32 = vld [vmem:[#allocation48_spill] sm:$0xff]  ;;  %v7241_v16 = vunpack.c.l.b16 %v7162_v0  ;;  %v11535_v0 = vld [vmem:[#allocation69_spill] sm:$0xff] }
 0x4e9   : > { %7398 = vmatmul.bf16.gmra.mxu0 %v7258_v55  ;;  %v4706_v54 = vadd.f32 %v11532_v32, %v11531_v27  ;;  %v5830_v42 = vadd.f32 %v5760_v63, %v5084_v61  ;;  %v7172_v55 = vsel %vm9631_vm5, %v7167_v2, %v7171_v49  ;;  %v7428_v63 = vmul.f32 %v11018_v39, %v7359_v41  ;;  %v8553_v41 = vld [vmem:[%s9535_s21 + $0x104] sm:$0xf] }
 0x4ea   : > { %v7525_v25 = vmax.f32 %v7493_v3, 0.0  ;;  %v6486_v44 = vadd.f32 %v11006_v14, %v6450_v5  ;;  %v7463_v3 = vadd.f32 %v11033_v30, %v7427_v29  ;;  %v7242_v62 = vunpack.c.l.b16 %v7172_v55  ;;  %v11533_v5 = vld [vmem:[#allocation68_spill] sm:$0xff] }
 0x4eb   : > { %v6633_v6 = vpop.f32.mrf.mxu3  ;;  %v7464_v7 = vadd.f32 %v11033_v30, %v7428_v63  ;;  %v7183_v15 = vshll.u32 %v8553_v41, 16  ;;  %v7187_v38 = vshrl.u32 %v8553_v41, 16  ;;  %v7179_v29 = vrot.slane %v7177_v10, 5 }
 0x4ec   : > { %7557 = vst [vmem:[%s11063_s23 + $0x38] sm:$0xff] %v7525_v25  ;;  %v6705_v43 = vmul.f32 %v11038_v20, %v6633_v6  ;;  %v6518_v4 = vmax.f32 %v6486_v44, 0.0 }
 0x4ed   : > { %v6279_v18 = vpop.f32.mrf.mxu2  ;;  %v7185_v12 = vrot.slane %v7183_v15, 5 }
 0x4ee   : > { %v6741_v23 = vadd.f32 %v11044_v46, %v6705_v43  ;;  %v6351_v47 = vadd.f32 %v6279_v18, %v5829_v58  ;;  %v11174_v57 = vpop.f32.mrf.mxu0  ;;  %v5085_v43 = vadd.f32 %v11533_v5, %v4706_v54 }
 0x4f0   : > { %v7494_v59 = vadd.f32 %v7462_v35, %v6741_v23  ;;  %v6451_v17 = vmul.f32 %v10995_v36, %v6351_v47  ;;  %v7259_v35 = vpack.c.b16 %v7242_v62, %v7241_v16  ;;  %v5831_v18 = vadd.f32 %v5762_v52, %v5085_v43  ;;  %v8554_v23 = vld [vmem:[%s9535_s21 + $0x108] sm:$0x1]  ;;  %v11534_v52 = vld [vmem:[#allocation70_spill] sm:$0xff]  ;;  %s9260_s21 = sshra.s32 %s7598_s1, 4  ;;  %s9261_s21 = int_to_ptr.hbm [resolvable:$true] %s9260_s21 }
 0x4f1   : > { %v7174_v47 = vshrl.u32 %v8552_v51, 16  ;;  %s9262_s16 = scalar_lea.hbm %s9261_s21, 256  ;;  %p9267_p11 = scmp.lt.s32.totalorder %s9261_s21, %s11536_s18 }
 0x4f2   : > { %v7526_v56 = vmax.f32 %v7494_v59, 0.0  ;;  %v6487_v48 = vadd.f32 %v11006_v14, %v6451_v17  ;;  %v7193_v59 = vshll.u32 %v8554_v23, 16  ;;  %v5765_v17 = vpop.f32.mrf.mxu1  ;;  %p9263_p1 = scmp.ne.s32.totalorder %s9261_s21, %s9262_s16  ;;  %p9268_p9 = scmp.lt.s32.totalorder %s9266_s10, %s9262_s16 }
 0x4f3   : > { %v6635_v53 = vpop.f32.mrf.mxu3  ;;  %v7176_v9 = vrot.slane %v7174_v47, 4 }
 0x4f4   : > { %7558 = vst [vmem:[%s11063_s23 + $0x40] sm:$0xff] %v7526_v56  ;;  %v6519_v37 = vmax.f32 %v6487_v48, 0.0  ;;  %v6706_v31 = vmul.f32 %v11038_v20, %v6635_v53  ;;  %v7189_v56 = vrot.slane %v7187_v38, 4  ;;  %v7195_v53 = vrot.slane %v7193_v59, 5  ;;  %p9264_p4 = pnand %p9263_p1, %p9498_p3  ;;  %p9269_p2 = por %p9268_p9, %p9267_p11 }
 0x4f5   : > { %v6282_v22 = vpop.f32.mrf.mxu2  ;;  %v7180_v60 = vor.u32 %v7179_v29, %v7176_v9 }
 0x4f6   : > { %v6742_v1 = vadd.f32 %v11044_v46, %v6706_v31  ;;  %v6537_v28 = vpack.c.bf16 %v6519_v37, %v6518_v4  ;;  %v6352_v6 = vadd.f32 %v6282_v22, %v5830_v42  ;;  %v7364_v58 = vpop.f32.mrf.mxu0  ;;  %v7190_v61 = vor.u32 %v7189_v56, %v7185_v12  ;;  %p9265_p8 = pneg %p9264_p4 }
 0x4f7   : > { %v7429_v4 = vmul.f32 %v11018_v39, %v11174_v57  ;;  %v7181_v2 = vrot.slane %v7180_v60, 4  ;;  %v4708_v22 = vadd.f32 %v11011_v45, %v11534_v52  ;;  %v7430_v45 = vmul.f32 %v11018_v39, %v7364_v58 }
 0x4f8   : > { %v7495_v25 = vadd.f32 %v7463_v3, %v6742_v1  ;;  %6677 = vmatmul.bf16.gmra.mxu3 %v6537_v28  ;;  %v6452_v19 = vmul.f32 %v10995_v36, %v6352_v6  ;;  %v7191_v27 = vrot.slane %v7190_v61, 4  ;;  %v5832_v3 = vadd.f32 %v5765_v17, %v11535_v0  ;;  %p9270_p10 = pnand %p9269_p2, %p9265_p8 }
 0x4f9   : > { %7403 = vmatmul.bf16.gmra.mxu0 %v7259_v35  ;;  %v7186_v28 = vsel %vm9631_vm5, %v7181_v2, %v7185_v12  ;;  %v7465_v55 = vadd.f32 %v11033_v30, %v7429_v4 }
 0x4fa   : > { %v7527_v33 = vmax.f32 %v7495_v25, 0.0  ;;  %v6488_v48 = vadd.f32 %v11006_v14, %v6452_v19  ;;  %v7196_v57 = vsel %vm9631_vm5, %v7191_v27, %v7195_v53  ;;  %v7243_v25 = vunpack.c.l.b16 %v7186_v28  ;;  %v5767_v43 = vpop.f32.mrf.mxu1 }
 0x4fb   : > { %v6638_v8 = vpop.f32.mrf.mxu3  ;;  %v7244_v63 = vunpack.c.l.b16 %v7196_v57  ;;  %v7466_v19 = vadd.f32 %v11033_v30, %v7430_v45 }
 0x4fc   : > { %7559 = vst [vmem:[%s11063_s23 + $0x48] sm:$0xff] %v7527_v33  ;;  %v6707_v11 = vmul.f32 %v11038_v20, %v6638_v8  ;;  %v6520_v32 = vmax.f32 %v6488_v48, 0.0  ;;  %v5087_v8 = vadd.f32 %v10975_v26, %v4708_v22 }
 0x4fd   : > { %v6284_v24 = vpop.f32.mrf.mxu2  ;;  %v7260_v33 = vpack.c.b16 %v7244_v63, %v7243_v25 }
 0x4fe   : > { %v6743_v40 = vadd.f32 %v11044_v46, %v6707_v11  ;;  %v6353_v44 = vadd.f32 %v6284_v24, %v5831_v18  ;;  %v7366_v50 = vpop.f32.mrf.mxu0 }
 0x4ff   : > { %v7431_v38 = vmul.f32 %v11018_v39, %v7366_v50 }
 0x500   : > { %v7496_v34 = vadd.f32 %v7464_v7, %v6743_v40  ;;  %v6453_v49 = vmul.f32 %v10995_v36, %v6353_v44  ;;  %v5833_v7 = vadd.f32 %v5767_v43, %v5087_v8 }
 0x501   : > { %v7467_v29 = vadd.f32 %v11033_v30, %v7431_v38 }
 0x502   : > { %v7528_v21 = vmax.f32 %v7496_v34, 0.0  ;;  %v6489_v37 = vadd.f32 %v11006_v14, %v6453_v49 }
 0x503   : > { %v6640_v31 = vpop.f32.mrf.mxu3 }
 0x504   : > { %7560 = vst [vmem:[%s11063_s23 + $0x50] sm:$0xff] %v7528_v21  ;;  %v6521_v54 = vmax.f32 %v6489_v37, 0.0  ;;  %v6708_v42 = vmul.f32 %v11038_v20, %v6640_v31 }
 0x505   : > { %v6287_v1 = vpop.f32.mrf.mxu2 }
 0x506   : > { %v6744_v16 = vadd.f32 %v11044_v46, %v6708_v42  ;;  %v6538_v62 = vpack.c.bf16 %v6521_v54, %v6520_v32  ;;  %v6354_v35 = vadd.f32 %v6287_v1, %v5832_v3  ;;  %v7369_v5 = vpop.f32.mrf.mxu0 }
 0x507   : > { %v7432_v48 = vmul.f32 %v11018_v39, %v7369_v5 }
 0x508   : > { %v7497_v6 = vadd.f32 %v7465_v55, %v6744_v16  ;;  %6682 = vmatmul.bf16.gmra.mxu3 %v6538_v62  ;;  %v6454_v11 = vmul.f32 %v10995_v36, %v6354_v35 }
 0x509   : > { %7408 = vmatmul.bf16.gmra.mxu0 %v7260_v33 }
 0x50a   : > { %v7529_v13 = vmax.f32 %v7497_v6, 0.0  ;;  %v6490_v23 = vadd.f32 %v11006_v14, %v6454_v11 }
 0x50b   : > { %v6643_v18 = vpop.f32.mrf.mxu3 }
 0x50c   : > { %7561 = vst [vmem:[%s11063_s23 + $0x58] sm:$0xff] %v7529_v13  ;;  %v6709_v51 = vmul.f32 %v11038_v20, %v6643_v18  ;;  %v6522_v59 = vmax.f32 %v6490_v23, 0.0 }
 0x50d   : > { %v6289_v58 = vpop.f32.mrf.mxu2 }
 0x50e   : > { %v6745_v41 = vadd.f32 %v11044_v46, %v6709_v51  ;;  %v6355_v24 = vadd.f32 %v6289_v58, %v5833_v7  ;;  %v7371_v10 = vpop.f32.mrf.mxu0 }
 0x50f   : > { %v7433_v37 = vmul.f32 %v11018_v39, %v7371_v10 }
 0x510   : > { %v7498_v47 = vadd.f32 %v7466_v19, %v6745_v41  ;;  %v6455_v26 = vmul.f32 %v10995_v36, %v6355_v24 }
 0x511   : > { %v7469_v27 = vadd.f32 %v11033_v30, %v7433_v37 }
 0x512   : > { %v7530_v15 = vmax.f32 %v7498_v47, 0.0  ;;  %v6491_v40 = vadd.f32 %v11006_v14, %v6455_v26  ;;  %v7468_v14 = vadd.f32 %v11033_v30, %v7432_v48 }
 0x513   : > { %v6645_v44 = vpop.f32.mrf.mxu3 }
 0x514   : > { %7562 = vst [vmem:[%s11063_s23 + $0x60] sm:$0xff] %v7530_v15  ;;  %v6523_v17 = vmax.f32 %v6491_v40, 0.0  ;;  %v6710_v9 = vmul.f32 %v11038_v20, %v6645_v44 }
 0x516   : > { %v6746_v12 = vadd.f32 %v11044_v46, %v6710_v9  ;;  %v6539_v56 = vpack.c.bf16 %v6523_v17, %v6522_v59  ;;  %v7374_v34 = vpop.f32.mrf.mxu0 }
 0x517   : > { %v7434_v42 = vmul.f32 %v11018_v39, %v7374_v34 }
 0x518   : > { %v7499_v36 = vadd.f32 %v7467_v29, %v6746_v12  ;;  %6687 = vmatmul.bf16.gmra.mxu3 %v6539_v56 }
 0x519   : > { %v7470_v3 = vadd.f32 %v11033_v30, %v7434_v42 }
 0x51a   : > { %v7531_v49 = vmax.f32 %v7499_v36, 0.0 }
 0x51b   : > { %v6648_v50 = vpop.f32.mrf.mxu3 }
 0x51c   : > { %7563 = vst [vmem:[%s11063_s23 + $0x68] sm:$0xff] %v7531_v49  ;;  %v6711_v60 = vmul.f32 %v11038_v20, %v6648_v50 }
 0x51e   : > { %v6747_v61 = vadd.f32 %v11044_v46, %v6711_v60  ;;  %v7376_v21 = vpop.f32.mrf.mxu0 }
 0x51f   : > { %v7435_v62 = vmul.f32 %v11018_v39, %v7376_v21 }
 0x520   : > { %v7500_v53 = vadd.f32 %v7468_v14, %v6747_v61 }
 0x521   : > { %v7471_v6 = vadd.f32 %v11033_v30, %v7435_v62 }
 0x522   : > { %v7532_v4 = vmax.f32 %v7500_v53, 0.0 }
 0x523   : > { %v6650_v31 = vpop.f32.mrf.mxu3 }
 0x524   : > { %7564 = vst [vmem:[%s11063_s23 + $0x70] sm:$0xff] %v7532_v4  ;;  %v6712_v2 = vmul.f32 %v11038_v20, %v6650_v31 }
 0x526   : > { %v6748_v32 = vadd.f32 %v11044_v46, %v6712_v2  ;;  %v7379_v52 = vpop.f32.mrf.mxu0 }
 0x527   : > { %v7436_v5 = vmul.f32 %v11018_v39, %v7379_v52 }
 0x528   : > { %v7501_v54 = vadd.f32 %v7469_v27, %v6748_v32 }
 0x529   : > { %v7472_v13 = vadd.f32 %v11033_v30, %v7436_v5 }
 0x52a   : > { %v7533_v22 = vmax.f32 %v7501_v54, 0.0 }
 0x52b   : > { %v6653_v0 = vpop.f32.mrf.mxu3 }
 0x52c   : > { %7565 = vst [vmem:[%s11063_s23 + $0x78] sm:$0xff] %v7533_v22  ;;  %v6713_v1 = vmul.f32 %v11038_v20, %v6653_v0 }
 0x52e   : > { %v6749_v28 = vadd.f32 %v11044_v46, %v6713_v1  ;;  %v7381_v55 = vpop.f32.mrf.mxu0 }
 0x52f   : > { %v7437_v58 = vmul.f32 %v11018_v39, %v7381_v55 }
 0x530   : > { %v7502_v57 = vadd.f32 %v7470_v3, %v6749_v28 }
 0x531   : > { %v7473_v23 = vadd.f32 %v11033_v30, %v7437_v58 }
 0x532   : > { %v7534_v16 = vmax.f32 %v7502_v57, 0.0 }
 0x533   : > { %v6655_v25 = vpop.f32.mrf.mxu3 }
 0x534   : > { %7566 = vst [vmem:[%s11063_s23 + $0x80] sm:$0xff] %v7534_v16  ;;  %v6714_v63 = vmul.f32 %v11038_v20, %v6655_v25 }
 0x536   : > { %v6750_v45 = vadd.f32 %v11044_v46, %v6714_v63  ;;  %v7384_v43 = vpop.f32.mrf.mxu0 }
 0x537   : > { %v7438_v10 = vmul.f32 %v11018_v39, %v7384_v43 }
 0x538   : > { %v7503_v35 = vadd.f32 %v7471_v6, %v6750_v45 }
 0x539   : > { %v7474_v44 = vadd.f32 %v11033_v30, %v7438_v10  ;;  %v9093_v10 = vld [vmem:[%s11361_s12] ss:$0 sm:$0xff] }
 0x53a   : > { %v7535_v33 = vmax.f32 %v7503_v35, 0.0 }
 0x53b   : > { %v6658_v8 = vpop.f32.mrf.mxu3 }
 0x53c   : > { %7567 = vst [vmem:[%s11063_s23 + $0x88] sm:$0xff] %v7535_v33  ;;  %v6715_v18 = vmul.f32 %v11038_v20, %v6658_v8 }
 0x53e   : > { %v6751_v7 = vadd.f32 %v11044_v46, %v6715_v18  ;;  %v7386_v11 = vpop.f32.mrf.mxu0 }
 0x53f   : > { %v7439_v56 = vmul.f32 %v11018_v39, %v7386_v11 }
 0x540   : > { %v7504_v19 = vadd.f32 %v7472_v13, %v6751_v7  ;;  %v9092_v13 = vld [vmem:[%s11360_s11] ss:$0 sm:$0xff] }
 0x541   : > { %v7475_v34 = vadd.f32 %v11033_v30, %v7439_v56 }
 0x542   : > { %v7536_v51 = vmax.f32 %v7504_v19, 0.0 }
 0x543   : > { %v6660_v41 = vpop.f32.mrf.mxu3 }
 0x544   : > { %7568 = vst [vmem:[%s11063_s23 + $0x90] sm:$0xff] %v7536_v51  ;;  %v6716_v24 = vmul.f32 %v11038_v20, %v6660_v41 }
 0x546   : > { %v6752_v47 = vadd.f32 %v11044_v46, %v6716_v24  ;;  %v7389_v15 = vpop.f32.mrf.mxu0 }
 0x547   : > { %v7440_v14 = vmul.f32 %v11018_v39, %v7389_v15 }
 0x548   : > { %v7505_v26 = vadd.f32 %v7473_v23, %v6752_v47 }
 0x549   : > { %v7476_v21 = vadd.f32 %v11033_v30, %v7440_v14 }
 0x54a   : > { %v7537_v38 = vmax.f32 %v7505_v26, 0.0 }
 0x54b   : > { %v6663_v40 = vpop.f32.mrf.mxu3 }
 0x54c   : > { %7569 = vst [vmem:[%s11063_s23 + $0x98] sm:$0xff] %v7537_v38  ;;  %v6717_v59 = vmul.f32 %v11038_v20, %v6663_v40 }
 0x54e   : > { %v6753_v17 = vadd.f32 %v11044_v46, %v6717_v59  ;;  %v7391_v29 = vpop.f32.mrf.mxu0 }
 0x54f   : > { %v7441_v27 = vmul.f32 %v11018_v39, %v7391_v29  ;;  %v9094_v29 = vld [vmem:[%s11357_s8] ss:$0 sm:$0xff] }
 0x550   : > { %v7506_v9 = vadd.f32 %v7474_v44, %v6753_v17 }
 0x551   : > { %v7477_v52 = vadd.f32 %v11033_v30, %v7441_v27 }
 0x552   : > { %v7538_v12 = vmax.f32 %v7506_v9, 0.0 }
 0x553   : > { %v6665_v36 = vpop.f32.mrf.mxu3 }
 0x554   : > { %7570 = vst [vmem:[%s11063_s23 + $0xa0] sm:$0xff] %v7538_v12  ;;  %v6718_v48 = vmul.f32 %v11038_v20, %v6665_v36  ;;  %v9095_v12 = vld [vmem:[%s11358_s9] ss:$0 sm:$0xff] }
 0x556   : > { %v6754_v49 = vadd.f32 %v11044_v46, %v6718_v48  ;;  %v7394_v60 = vpop.f32.mrf.mxu0 }
 0x557   : > { %v7442_v3 = vmul.f32 %v11018_v39, %v7394_v60 }
 0x558   : > { %v7507_v50 = vadd.f32 %v7475_v34, %v6754_v49 }
 0x559   : > { %v7478_v57 = vadd.f32 %v11033_v30, %v7442_v3 }
 0x55a   : > { %v7539_v61 = vmax.f32 %v7507_v50, 0.0 }
 0x55b   : > { %v6668_v53 = vpop.f32.mrf.mxu3 }
 0x55c   : > { %7571 = vst [vmem:[%s11063_s23 + $0xa8] sm:$0xff] %v7539_v61  ;;  %v6719_v4 = vmul.f32 %v11038_v20, %v6668_v53 }
 0x55e   : > { %v6755_v37 = vadd.f32 %v11044_v46, %v6719_v4  ;;  %v7396_v54 = vpop.f32.mrf.mxu0 }
 0x55f   : > { %v7443_v6 = vmul.f32 %v11018_v39, %v7396_v54 }
 0x560   : > { %v7508_v31 = vadd.f32 %v7476_v21, %v6755_v37 }
 0x561   : > { %v7479_v5 = vadd.f32 %v11033_v30, %v7443_v6 }
 0x562   : > { %v7540_v2 = vmax.f32 %v7508_v31, 0.0 }
 0x563   : > { %v6670_v32 = vpop.f32.mrf.mxu3 }
 0x564   : > { %7572 = vst [vmem:[%s11063_s23 + $0xb0] sm:$0xff] %v7540_v2  ;;  %v6720_v42 = vmul.f32 %v11038_v20, %v6670_v32 }
 0x566   : > { %v6756_v22 = vadd.f32 %v11044_v46, %v6720_v42  ;;  %v7399_v16 = vpop.f32.mrf.mxu0 }
 0x567   : > { %v7444_v18 = vmul.f32 %v9092_v13, %v7399_v16 }
 0x568   : > { %v7509_v0 = vadd.f32 %v7477_v52, %v6756_v22 }
 0x569   : > { %v7480_v39 = vadd.f32 %v11033_v30, %v7444_v18 }
 0x56a   : > { %v7541_v1 = vmax.f32 %v7509_v0, 0.0 }
 0x56b   : > { %v6673_v28 = vpop.f32.mrf.mxu3 }
 0x56c   : > { %7573 = vst [vmem:[%s11063_s23 + $0xb8] sm:$0xff] %v7541_v1  ;;  %v6721_v55 = vmul.f32 %v11038_v20, %v6673_v28 }
 0x56e   : > { %v6757_v62 = vadd.f32 %v11044_v46, %v6721_v55  ;;  %v7401_v33 = vpop.f32.mrf.mxu0 }
 0x56f   : > { %v7445_v23 = vmul.f32 %v9092_v13, %v7401_v33 }
 0x570   : > { %v7510_v25 = vadd.f32 %v7478_v57, %v6757_v62 }
 0x571   : > { %v7481_v15 = vadd.f32 %v9093_v10, %v7445_v23 }
 0x572   : > { %v7542_v63 = vmax.f32 %v7510_v25, 0.0 }
 0x573   : > { %v6675_v45 = vpop.f32.mrf.mxu3 }
 0x574   : > { %7574 = vst [vmem:[%s11063_s23 + $0xc0] sm:$0xff] %v7542_v63  ;;  %v6722_v35 = vmul.f32 %v11038_v20, %v6675_v45 }
 0x576   : > { %v6758_v43 = vadd.f32 %v11044_v46, %v6722_v35  ;;  %v7404_v41 = vpop.f32.mrf.mxu0 }
 0x577   : > { %v7446_v40 = vmul.f32 %v9092_v13, %v7404_v41 }
 0x578   : > { %v7511_v8 = vadd.f32 %v7479_v5, %v6758_v43 }
 0x579   : > { %v7482_v9 = vadd.f32 %v9093_v10, %v7446_v40 }
 0x57a   : > { %v7543_v7 = vmax.f32 %v7511_v8, 0.0 }
 0x57b   : > { %v6678_v19 = vpop.f32.mrf.mxu3 }
 0x57c   : > { %7575 = vst [vmem:[%s11063_s23 + $0xc8] sm:$0xff] %v7543_v7  ;;  %v6723_v11 = vmul.f32 %v11038_v20, %v6678_v19 }
 0x57e   : > { %v6759_v51 = vadd.f32 %v11044_v46, %v6723_v11  ;;  %v7406_v17 = vpop.f32.mrf.mxu0 }
 0x57f   : > { %v7447_v48 = vmul.f32 %v9092_v13, %v7406_v17 }
 0x580   : > { %v7512_v58 = vadd.f32 %v7480_v39, %v6759_v51 }
 0x581   : > { %v7483_v14 = vadd.f32 %v9093_v10, %v7447_v48 }
 0x582   : > { %v7544_v24 = vmax.f32 %v7512_v58, 0.0 }
 0x583   : > { %v6680_v47 = vpop.f32.mrf.mxu3 }
 0x584   : > { %7576 = vst [vmem:[%s11063_s23 + $0xd0] sm:$0xff] %v7544_v24  ;;  %v6724_v26 = vmul.f32 %v11038_v20, %v6680_v47 }
 0x586   : > { %v6760_v30 = vadd.f32 %v11044_v46, %v6724_v26  ;;  %v7409_v50 = vpop.f32.mrf.mxu0 }
 0x587   : > { %v7448_v53 = vmul.f32 %v9092_v13, %v7409_v50 }
 0x588   : > { %v7513_v38 = vadd.f32 %v7481_v15, %v6760_v30 }
 0x589   : > { %v7484_v37 = vadd.f32 %v9093_v10, %v7448_v53 }
 0x58a   : > { %v7545_v44 = vmax.f32 %v7513_v38, 0.0 }
 0x58b   : > { %v6683_v59 = vpop.f32.mrf.mxu3 }
 0x58c   : > { %7577 = vst [vmem:[%s11063_s23 + $0xd8] sm:$0xff] %v7545_v44  ;;  %v6725_v20 = vmul.f32 %v9094_v29, %v6683_v59 }
 0x58e   : > { %v6761_v56 = vadd.f32 %v9095_v12, %v6725_v20  ;;  %v7411_v27 = vpop.f32.mrf.mxu0 }
 0x58f   : > { %v7449_v42 = vmul.f32 %v9092_v13, %v7411_v27 }
 0x590   : > { %v7514_v46 = vadd.f32 %v7482_v9, %v6761_v56 }
 0x591   : > { %v7485_v0 = vadd.f32 %v9093_v10, %v7449_v42 }
 0x592   : > { %v7546_v36 = vmax.f32 %v7514_v46, 0.0 }
 0x593   : > { %v6685_v34 = vpop.f32.mrf.mxu3 }
 0x594   : > { %7578 = vst [vmem:[%s11063_s23 + $0xe0] sm:$0xff] %v7546_v36  ;;  %v6726_v49 = vmul.f32 %v9094_v29, %v6685_v34 }
 0x596   : > { %v6762_v60 = vadd.f32 %v9095_v12, %v6726_v49 }
 0x598   : > { %v7515_v61 = vadd.f32 %v7483_v14, %v6762_v60 }
 0x59a   : > { %v7547_v21 = vmax.f32 %v7515_v61, 0.0 }
 0x59b   : > { %v6688_v4 = vpop.f32.mrf.mxu3 }
 0x59c   : > { %7579 = vst [vmem:[%s11063_s23 + $0xe8] sm:$0xff] %v7547_v21  ;;  %v6727_v31 = vmul.f32 %v9094_v29, %v6688_v4 }
 0x59e   : > { %v6763_v2 = vadd.f32 %v9095_v12, %v6727_v31 }
 0x5a0   : > { %v7516_v32 = vadd.f32 %v7484_v37, %v6763_v2 }
 0x5a2   : > { %v7548_v54 = vmax.f32 %v7516_v32, 0.0 }
 0x5a3   : > { %v6690_v52 = vpop.f32.mrf.mxu3 }
 0x5a4   : > { %7580 = vst [vmem:[%s11063_s23 + $0xf0] sm:$0xff] %v7548_v54  ;;  %v6728_v22 = vmul.f32 %v9094_v29, %v6690_v52 }
 0x5a6   : > { %v6764_v3 = vadd.f32 %v9095_v12, %v6728_v22 }
 0x5a8   : > { %v7517_v1 = vadd.f32 %v7485_v0, %v6764_v3 }
 0x5aa   : > { %v7549_v28 = vmax.f32 %v7517_v1, 0.0 }
 0x5ac   : > { %7581 = vst [vmem:[%s11063_s23 + $0xf8] sm:$0xff] %v7549_v28 }
 0x5ad   : > { %9273 = shalt.err (!%p9270_p10)
}
 0x5ae   : > { %s9330_s27 = smov 128   ;;  %s9331_s23 = smov 8  }
 0x5af   : > { %9005 = dma.vmem_to_hbm [thread:$0]  (%p9498_p3), %s7596_s15, 4096, %s7598_s1, %s7583_s29, %s9330_s27, %s9330_s27, %s9331_s23  }
 0x5b0 PF: > { %s11537_s19 = sld [smem:[#allocation18_spill]]  ;;  %p11539_p12 = scmp.ge.s32.totalorder %s9320_s28, 2 }
 0x5b2   : > { %p9025_p13 = pnand %p11539_p12, %p9437_p6 }
 0x5b4   : > { %p9026_p0 = pneg %p9025_p13 }
 0x5b6   : > { %s7612_s24 = sand.u32 1, %s11537_s19  }
 0x5b7   : > { %s7613_s25 = scalar_lea.sflag [#allocation6], %s7612_s24 }
 0x5b8   : > { %9303 = dma.done.wait (%p9026_p0), %s7613_s25, 4096  }
 0x5b9   : > { %9305 = vsyncadd (%p9026_p0), %s7613_s25, 4294963200  ;;  %s11540_s20 = sld [smem:[#allocation19_spill]]  ;;  %p28_p5 = scmp.ge.s32.totalorder %s9488_s30, 4  }
 0x5ba   : > { %s11541_s27 = sld [smem:[#allocation21_spill]]  ;;  %s11542_s25 = smov %s9312_s26 }
 0x5bb   : > { %s11544_s28 = smov %s9488_s30  ;;  %30 = sbr.rel (!%p28_p5) target bundleno = 13 (0xd), region = 144 }
 0x5bf   : > { %s11543_s26 = smov %s11540_s20 }
 0x5c0   :  { %7619 = vsyncpa [#allocation5], 1 }
 0x5c1   :  { %7621 = vsyncpa [#allocation5 + $0x1], 1 }
 0x5c2   :  { %7622 = vsyncpa [#allocation8], 1 }
 0x5c3   :  { %7623 = vsyncpa [#allocation11], 1 }
 0x5c4   :  { %7624 = vsyncpa [#allocation6], 1 }
 0x5c5   :  { %7626 = vsyncpa [#allocation6 + $0x1], 1 }

</bundles_post_ra>
